<compile_context>
chip_gen: v7x
topology: tpu7x:2x2x1
jax: 0.10.0
libtpu: 0.0.40
codegen_flags: <defaults>
</compile_context>

<pallas_src>
import numpy as np
import jax
import jax.numpy as jnp
from jax import lax
from jax.experimental import pallas as pl
from jax.experimental.pallas import tpu as pltpu

_HIGHEST = jax.lax.Precision.HIGHEST


# ----------------------------- fused Pallas kernel -------------------------

def _fused_net_kernel(x_ref, m1_ref, b1_ref, m2_ref, b2_ref,
                      wd1_ref, bd1_ref, wd2_ref, bd2_ref, o_ref):
    bt = x_ref.shape[0]
    x = x_ref[...]                                           # (BT, 28, 28)

    # ---- conv1 (5x5, Cin=1, Cout=4) as 5 banded matmuls over kh ----------
    # y1[b, oh, 4*ow + c1] = conv1_out[b, c1, oh, ow]
    y = None
    for kh in range(5):
        lhs = x[:, kh:kh + 24, :].reshape(bt * 24, 28)
        t = jnp.dot(lhs, m1_ref[kh], preferred_element_type=jnp.float32,
                    precision=_HIGHEST)
        y = t if y is None else y + t
    y1 = (y + b1_ref[...]).reshape(bt, 24, 96)

    # ---- maxpool1 2x2: shift-and-max, layout kept UNCOMPACTED --------------
    # valid pooled value at [b, 2*ph1, 8*pw1 + c1]; other positions = garbage
    # (finite) and are killed by zero rows in m2 / wd1.
    y1w = jnp.concatenate([y1[:, :, 4:], y1[:, :, :4]], axis=-1)   # lane +4
    pw = jnp.maximum(y1, y1w)
    pwh = jnp.concatenate([pw[:, 1:, :], pw[:, :1, :]], axis=1)    # row  +1
    p1 = jnp.maximum(pw, pwh)                                      # (BT,24,96)

    # ---- conv2 (5x5, Cin=4, Cout=8) over the uncompacted pool1 -------------
    # y2[b, 2*oh2, 8*ow2 + c2] = conv2_out[b, c2, oh2, ow2]
    y = None
    for kh in range(5):
        lhs = p1[:, 2 * kh:2 * kh + 16, :].reshape(bt * 16, 96)
        t = jnp.dot(lhs, m2_ref[kh], preferred_element_type=jnp.float32,
                    precision=_HIGHEST)
        y = t if y is None else y + t
    y2 = (y + b2_ref[...]).reshape(bt, 16, 64)

    # ---- maxpool2 2x2: shift-and-max, still uncompacted --------------------
    # valid pooled value at [b, 4*ph2, 16*pw2 + c2]
    y2w = jnp.concatenate([y2[:, :, 8:], y2[:, :, :8]], axis=-1)   # lane +8
    qw = jnp.maximum(y2, y2w)
    qwh = jnp.concatenate([qw[:, 2:, :], qw[:, :2, :]], axis=1)    # row  +2
    p2 = jnp.maximum(qw, qwh)                                      # (BT,16,64)

    # ---- flatten (uncompacted) -> dense1 (+ReLU) -> dense2 ------------------
    # wd1 is (1024, 64) with the pool2 layout + NCHW flatten permutation
    # folded in; dead positions have zero rows.
    flat = p2.reshape(bt, 1024)
    h = jnp.dot(flat, wd1_ref[...], preferred_element_type=jnp.float32,
                precision=_HIGHEST) + bd1_ref[...]
    h = jnp.maximum(h, 0.0)
    o_ref[...] = jnp.dot(h, wd2_ref[...], preferred_element_type=jnp.float32,
                         precision=_HIGHEST) + bd2_ref[...]


# ----------------------------- parameter preparation -----------------------

def prepare_params(p):
    """One-time (host-side) transform of PyTorch-layout params into the
    kernel's banded / uncompacted layouts.  Pure layout plumbing — done once,
    outside the hot path."""
    f32 = np.float32
    w1 = np.asarray(p["w_conv1"], dtype=f32)     # (4, 1, 5, 5)  torch OIHW
    b1 = np.asarray(p["b_conv1"], dtype=f32)     # (4,)
    w2 = np.asarray(p["w_conv2"], dtype=f32)     # (8, 4, 5, 5)
    b2 = np.asarray(p["b_conv2"], dtype=f32)     # (8,)
    wd1 = np.asarray(p["w_dense1"], dtype=f32)   # (64, 128) torch (out, in)
    bd1 = np.asarray(p["b_dense1"], dtype=f32)   # (64,)
    wd2 = np.asarray(p["w_dense2"], dtype=f32)   # (10, 64)
    bd2 = np.asarray(p["b_dense2"], dtype=f32)   # (10,)

    # conv1 banded weights: m1[kh, iw, 4*ow + c1] = W1[c1, 0, kh, iw - ow]
    m1 = np.zeros((5, 28, 96), f32)
    for kh in range(5):
        for ow in range(24):
            for c1 in range(4):
                for kw in range(5):
                    m1[kh, ow + kw, 4 * ow + c1] = w1[c1, 0, kh, kw]

    # conv2 banded weights over the UNCOMPACTED pool1 lane layout
    # (valid input lanes are 8*pw1 + c1; all other rows stay zero):
    # m2[kh, 8*pw1 + c1, 8*ow2 + c2] = W2[c2, c1, kh, pw1 - ow2]
    m2 = np.zeros((5, 96, 64), f32)
    for kh in range(5):
        for ow2 in range(8):
            for c2 in range(8):
                for c1 in range(4):
                    for kw in range(5):
                        m2[kh, 8 * (ow2 + kw) + c1, 8 * ow2 + c2] = \
                            w2[c2, c1, kh, kw]

    # dense1 over the UNCOMPACTED pool2 flatten: position 256*ph2+16*pw2+c2
    # holds pool2[c2, ph2, pw2]; torch flatten index is c2*16 + ph2*4 + pw2.
    wd1_full = np.zeros((1024, 64), f32)
    for ph2 in range(4):
        for pw2 in range(4):
            for c2 in range(8):
                wd1_full[256 * ph2 + 16 * pw2 + c2, :] = \
                    wd1[:, c2 * 16 + ph2 * 4 + pw2]

    return {
        "m1": jnp.asarray(m1),
        "b1": jnp.asarray(np.tile(b1, 24).reshape(1, 96)),   # col 4*ow+c1 -> b1[c1]
        "m2": jnp.asarray(m2),
        "b2": jnp.asarray(np.tile(b2, 8).reshape(1, 64)),    # col 8*ow2+c2 -> b2[c2]
        "wd1": jnp.asarray(wd1_full),
        "bd1": jnp.asarray(bd1.reshape(1, 64)),
        "wd2": jnp.asarray(wd2.T.copy()),                    # (64, 10)
        "bd2": jnp.asarray(bd2.reshape(1, 10)),
    }


# ----------------------------- forward wrapper -----------------------------

def net_forward(x_nchw, kp, batch_tile=32):
    """Fused forward pass matching the PyTorch Net.forward semantics."""
    n = x_nchw.shape[0]
    assert x_nchw.shape[1:] == (1, 28, 28), x_nchw.shape
    x = x_nchw.reshape(n, 28, 28).astype(jnp.float32)

    bt = n if n <= batch_tile else batch_tile
    npad = ((n + bt - 1) // bt) * bt
    if npad != n:
        x = jnp.pad(x, ((0, npad - n), (0, 0), (0, 0)))

    out = pl.pallas_call(
        _fused_net_kernel,
        out_shape=jax.ShapeDtypeStruct((npad, 10), jnp.float32),
        grid=(npad // bt,),
        in_specs=[
            pl.BlockSpec((bt, 28, 28), lambda i: (i, 0, 0)),   # input batch tile
            pl.BlockSpec((5, 28, 96), lambda i: (0, 0, 0)),    # conv1 banded weights
            pl.BlockSpec((1, 96), lambda i: (0, 0)),           # conv1 bias (tiled)
            pl.BlockSpec((5, 96, 64), lambda i: (0, 0, 0)),    # conv2 banded weights
            pl.BlockSpec((1, 64), lambda i: (0, 0)),           # conv2 bias (tiled)
            pl.BlockSpec((1024, 64), lambda i: (0, 0)),        # dense1 (folded layout)
            pl.BlockSpec((1, 64), lambda i: (0, 0)),
            pl.BlockSpec((64, 10), lambda i: (0, 0)),          # dense2
            pl.BlockSpec((1, 10), lambda i: (0, 0)),
        ],
        out_specs=pl.BlockSpec((bt, 10), lambda i: (i, 0)),
        compiler_params=pltpu.CompilerParams(
            dimension_semantics=("parallel",)),
    )(x, kp["m1"], kp["b1"], kp["m2"], kp["b2"],
      kp["wd1"], kp["bd1"], kp["wd2"], kp["bd2"])
    return out[:n]


# ----------------------------- params & reference --------------------------

def init_params(key):
    ks = jax.random.split(key, 8)

    def nrm(k, shape, scale):
        return (scale * jax.random.normal(k, shape)).astype(jnp.float32)

    return {
        "w_conv1": nrm(ks[0], (4, 1, 5, 5), 0.2),    # torch OIHW
        "b_conv1": nrm(ks[1], (4,), 0.1),
        "w_conv2": nrm(ks[2], (8, 4, 5, 5), 0.1),
        "b_conv2": nrm(ks[3], (8,), 0.1),
        "w_dense1": nrm(ks[4], (64, 128), 0.1),      # torch Linear (out, in)
        "b_dense1": nrm(ks[5], (64,), 0.1),
        "w_dense2": nrm(ks[6], (10, 64), 0.1),
        "b_dense2": nrm(ks[7], (10,), 0.1),
    }


def net_forward_ref(x_nchw, p):
    """Pure-JAX reference (mirrors the PyTorch module) for verification."""
    dn = ("NCHW", "OIHW", "NCHW")
    x = lax.conv_general_dilated(x_nchw, p["w_conv1"], (1, 1), "VALID",
                                 dimension_numbers=dn, precision=_HIGHEST)
    x = x + p["b_conv1"].reshape(1, -1, 1, 1)
    x = lax.reduce_window(x, -jnp.inf, lax.max, (1, 1, 2, 2), (1, 1, 2, 2), "VALID")
    x = lax.conv_general_dilated(x, p["w_conv2"], (1, 1), "VALID",
                                 dimension_numbers=dn, precision=_HIGHEST)
    x = x + p["b_conv2"].reshape(1, -1, 1, 1)
    x = lax.reduce_window(x, -jnp.inf, lax.max, (1, 1, 2, 2), (1, 1, 2, 2), "VALID")
    x = x.reshape(x.shape[0], -1)
    x = jnp.maximum(jnp.dot(x, p["w_dense1"].T, precision=_HIGHEST)
                    + p["b_dense1"], 0.0)
    x = jnp.dot(x, p["w_dense2"].T, precision=_HIGHEST) + p["b_dense2"]
    return x


# ----------------------------- main ----------------------------------------

if __name__ == "__main__":
    key = jax.random.PRNGKey(0)
    pkey, xkey = jax.random.split(key)
    params = init_params(pkey)
    kparams = prepare_params(params)   # one-time layout plumbing (outside hot path)

    # Input shape implied by the module: 28x28 single-channel (MNIST-like),
    # since flatten->128 forces ((H-4)/2 - 4)/2 == 4  =>  H == 28.
    x = jax.random.normal(xkey, (2, 1, 28, 28), dtype=jnp.float32)

    out = jax.jit(net_forward)(x, kparams)
    out = jax.block_until_ready(out)

    ref = net_forward_ref(x, params)
    assert out.shape == (2, 10), out.shape
    err = float(jnp.max(jnp.abs(out - ref)))
    assert jnp.allclose(out, ref, atol=2e-3, rtol=2e-3), err

    print("KERNEL_OK")
</pallas_src>

<mosaic_0001>
module attributes {stable_mosaic.version = 11 : i64} {
  func.func @_fused_net_kernel(%arg0: i32, %arg1: memref<2x28x28xf32, #tpu.memory_space<vmem>>, %arg2: memref<5x28x96xf32, #tpu.memory_space<vmem>>, %arg3: memref<1x96xf32, #tpu.memory_space<vmem>>, %arg4: memref<5x96x64xf32, #tpu.memory_space<vmem>>, %arg5: memref<1x64xf32, #tpu.memory_space<vmem>>, %arg6: memref<1024x64xf32, #tpu.memory_space<vmem>>, %arg7: memref<1x64xf32, #tpu.memory_space<vmem>>, %arg8: memref<64x10xf32, #tpu.memory_space<vmem>>, %arg9: memref<1x10xf32, #tpu.memory_space<vmem>>, %arg10: memref<2x10xf32, #tpu.memory_space<vmem>>) attributes {dimension_semantics = [#tpu.dimension_semantics<parallel>], iteration_bounds = array<i64: 1>, scalar_prefetch = 0 : i64, scratch_operands = 0 : i64, tpu.core_type = #tpu.core_type<tc>, window_params = [{transform_indices = @transform_0, window_bounds = array<i64: 2, 28, 28>}, {pipeline_mode = #tpu.pipeline_mode<synchronous>, transform_indices = @transform_1, window_bounds = array<i64: 5, 28, 96>}, {pipeline_mode = #tpu.pipeline_mode<synchronous>, transform_indices = @transform_2, window_bounds = array<i64: 1, 96>}, {pipeline_mode = #tpu.pipeline_mode<synchronous>, transform_indices = @transform_3, window_bounds = array<i64: 5, 96, 64>}, {pipeline_mode = #tpu.pipeline_mode<synchronous>, transform_indices = @transform_4, window_bounds = array<i64: 1, 64>}, {pipeline_mode = #tpu.pipeline_mode<synchronous>, transform_indices = @transform_5, window_bounds = array<i64: 1024, 64>}, {pipeline_mode = #tpu.pipeline_mode<synchronous>, transform_indices = @transform_6, window_bounds = array<i64: 1, 64>}, {pipeline_mode = #tpu.pipeline_mode<synchronous>, transform_indices = @transform_7, window_bounds = array<i64: 64, 10>}, {pipeline_mode = #tpu.pipeline_mode<synchronous>, transform_indices = @transform_8, window_bounds = array<i64: 1, 10>}, {transform_indices = @transform_9, window_bounds = array<i64: 2, 10>}]} {
    %c0 = arith.constant 0 : index
    %c0_0 = arith.constant 0 : index
    %c0_1 = arith.constant 0 : index
    %0 = vector.load %arg1[%c0, %c0_0, %c0_1] : memref<2x28x28xf32, #tpu.memory_space<vmem>>, vector<2x28x28xf32>
    %1 = vector.extract_strided_slice %0 {offsets = [0, 0, 0], sizes = [2, 24, 28], strides = [1, 1, 1]} : vector<2x28x28xf32> to vector<2x24x28xf32>
    %2 = vector.shape_cast %1 : vector<2x24x28xf32> to vector<48x28xf32>
    %c0_2 = arith.constant 0 : index
    %c0_3 = arith.constant 0 : index
    %c0_4 = arith.constant 0 : index
    %3 = vector.load %arg2[%c0_2, %c0_3, %c0_4] : memref<5x28x96xf32, #tpu.memory_space<vmem>>, vector<1x28x96xf32>
    %4 = vector.shape_cast %3 : vector<1x28x96xf32> to vector<28x96xf32>
    %cst = arith.constant dense<0.000000e+00> : vector<48x96xf32>
    %5 = tpu.matmul %2, %4, %cst {dimension_numbers = #tpu.dot_dimension_numbers<[1], [0], [0], [1], [0, 0, 1, 1], [], []>, precision = #tpu.contract_precision<fp32>} : vector<48x28xf32>, vector<28x96xf32>, vector<48x96xf32> -> vector<48x96xf32>
    %6 = vector.extract_strided_slice %0 {offsets = [0, 1, 0], sizes = [2, 24, 28], strides = [1, 1, 1]} : vector<2x28x28xf32> to vector<2x24x28xf32>
    %7 = vector.shape_cast %6 : vector<2x24x28xf32> to vector<48x28xf32>
    %c1 = arith.constant 1 : index
    %c0_5 = arith.constant 0 : index
    %c0_6 = arith.constant 0 : index
    %8 = vector.load %arg2[%c1, %c0_5, %c0_6] : memref<5x28x96xf32, #tpu.memory_space<vmem>>, vector<1x28x96xf32>
    %9 = vector.shape_cast %8 : vector<1x28x96xf32> to vector<28x96xf32>
    %cst_7 = arith.constant dense<0.000000e+00> : vector<48x96xf32>
    %10 = tpu.matmul %7, %9, %cst_7 {dimension_numbers = #tpu.dot_dimension_numbers<[1], [0], [0], [1], [0, 0, 1, 1], [], []>, precision = #tpu.contract_precision<fp32>} : vector<48x28xf32>, vector<28x96xf32>, vector<48x96xf32> -> vector<48x96xf32>
    %11 = arith.addf %5, %10 : vector<48x96xf32>
    %12 = vector.extract_strided_slice %0 {offsets = [0, 2, 0], sizes = [2, 24, 28], strides = [1, 1, 1]} : vector<2x28x28xf32> to vector<2x24x28xf32>
    %13 = vector.shape_cast %12 : vector<2x24x28xf32> to vector<48x28xf32>
    %c2 = arith.constant 2 : index
    %c0_8 = arith.constant 0 : index
    %c0_9 = arith.constant 0 : index
    %14 = vector.load %arg2[%c2, %c0_8, %c0_9] : memref<5x28x96xf32, #tpu.memory_space<vmem>>, vector<1x28x96xf32>
    %15 = vector.shape_cast %14 : vector<1x28x96xf32> to vector<28x96xf32>
    %cst_10 = arith.constant dense<0.000000e+00> : vector<48x96xf32>
    %16 = tpu.matmul %13, %15, %cst_10 {dimension_numbers = #tpu.dot_dimension_numbers<[1], [0], [0], [1], [0, 0, 1, 1], [], []>, precision = #tpu.contract_precision<fp32>} : vector<48x28xf32>, vector<28x96xf32>, vector<48x96xf32> -> vector<48x96xf32>
    %17 = arith.addf %11, %16 : vector<48x96xf32>
    %18 = vector.extract_strided_slice %0 {offsets = [0, 3, 0], sizes = [2, 24, 28], strides = [1, 1, 1]} : vector<2x28x28xf32> to vector<2x24x28xf32>
    %19 = vector.shape_cast %18 : vector<2x24x28xf32> to vector<48x28xf32>
    %c3 = arith.constant 3 : index
    %c0_11 = arith.constant 0 : index
    %c0_12 = arith.constant 0 : index
    %20 = vector.load %arg2[%c3, %c0_11, %c0_12] : memref<5x28x96xf32, #tpu.memory_space<vmem>>, vector<1x28x96xf32>
    %21 = vector.shape_cast %20 : vector<1x28x96xf32> to vector<28x96xf32>
    %cst_13 = arith.constant dense<0.000000e+00> : vector<48x96xf32>
    %22 = tpu.matmul %19, %21, %cst_13 {dimension_numbers = #tpu.dot_dimension_numbers<[1], [0], [0], [1], [0, 0, 1, 1], [], []>, precision = #tpu.contract_precision<fp32>} : vector<48x28xf32>, vector<28x96xf32>, vector<48x96xf32> -> vector<48x96xf32>
    %23 = arith.addf %17, %22 : vector<48x96xf32>
    %24 = vector.extract_strided_slice %0 {offsets = [0, 4, 0], sizes = [2, 24, 28], strides = [1, 1, 1]} : vector<2x28x28xf32> to vector<2x24x28xf32>
    %25 = vector.shape_cast %24 : vector<2x24x28xf32> to vector<48x28xf32>
    %c4 = arith.constant 4 : index
    %c0_14 = arith.constant 0 : index
    %c0_15 = arith.constant 0 : index
    %26 = vector.load %arg2[%c4, %c0_14, %c0_15] : memref<5x28x96xf32, #tpu.memory_space<vmem>>, vector<1x28x96xf32>
    %27 = vector.shape_cast %26 : vector<1x28x96xf32> to vector<28x96xf32>
    %cst_16 = arith.constant dense<0.000000e+00> : vector<48x96xf32>
    %28 = tpu.matmul %25, %27, %cst_16 {dimension_numbers = #tpu.dot_dimension_numbers<[1], [0], [0], [1], [0, 0, 1, 1], [], []>, precision = #tpu.contract_precision<fp32>} : vector<48x28xf32>, vector<28x96xf32>, vector<48x96xf32> -> vector<48x96xf32>
    %29 = arith.addf %23, %28 : vector<48x96xf32>
    %c0_17 = arith.constant 0 : index
    %c0_18 = arith.constant 0 : index
    %30 = vector.load %arg3[%c0_17, %c0_18] : memref<1x96xf32, #tpu.memory_space<vmem>>, vector<1x96xf32>
    %31 = vector.broadcast %30 : vector<1x96xf32> to vector<48x96xf32>
    %32 = arith.addf %29, %31 : vector<48x96xf32>
    %33 = vector.shape_cast %32 : vector<48x96xf32> to vector<2x24x96xf32>
    %34 = vector.extract_strided_slice %33 {offsets = [0, 0, 4], sizes = [2, 24, 92], strides = [1, 1, 1]} : vector<2x24x96xf32> to vector<2x24x92xf32>
    %35 = vector.extract_strided_slice %33 {offsets = [0, 0, 0], sizes = [2, 24, 4], strides = [1, 1, 1]} : vector<2x24x96xf32> to vector<2x24x4xf32>
    %36 = tpu.concatenate %34, %35 in 2 : vector<2x24x92xf32>, vector<2x24x4xf32> -> vector<2x24x96xf32>
    %37 = arith.maximumf %33, %36 : vector<2x24x96xf32>
    %38 = vector.extract_strided_slice %37 {offsets = [0, 1, 0], sizes = [2, 23, 96], strides = [1, 1, 1]} : vector<2x24x96xf32> to vector<2x23x96xf32>
    %39 = vector.extract_strided_slice %37 {offsets = [0, 0, 0], sizes = [2, 1, 96], strides = [1, 1, 1]} : vector<2x24x96xf32> to vector<2x1x96xf32>
    %40 = tpu.concatenate %38, %39 in 1 : vector<2x23x96xf32>, vector<2x1x96xf32> -> vector<2x24x96xf32>
    %41 = arith.maximumf %37, %40 : vector<2x24x96xf32>
    %42 = vector.extract_strided_slice %41 {offsets = [0, 0, 0], sizes = [2, 16, 96], strides = [1, 1, 1]} : vector<2x24x96xf32> to vector<2x16x96xf32>
    %43 = vector.shape_cast %42 : vector<2x16x96xf32> to vector<32x96xf32>
    %c0_19 = arith.constant 0 : index
    %c0_20 = arith.constant 0 : index
    %c0_21 = arith.constant 0 : index
    %44 = vector.load %arg4[%c0_19, %c0_20, %c0_21] : memref<5x96x64xf32, #tpu.memory_space<vmem>>, vector<1x96x64xf32>
    %45 = vector.shape_cast %44 : vector<1x96x64xf32> to vector<96x64xf32>
    %cst_22 = arith.constant dense<0.000000e+00> : vector<32x64xf32>
    %46 = tpu.matmul %43, %45, %cst_22 {dimension_numbers = #tpu.dot_dimension_numbers<[1], [0], [0], [1], [0, 0, 1, 1], [], []>, precision = #tpu.contract_precision<fp32>} : vector<32x96xf32>, vector<96x64xf32>, vector<32x64xf32> -> vector<32x64xf32>
    %47 = vector.extract_strided_slice %41 {offsets = [0, 2, 0], sizes = [2, 16, 96], strides = [1, 1, 1]} : vector<2x24x96xf32> to vector<2x16x96xf32>
    %48 = vector.shape_cast %47 : vector<2x16x96xf32> to vector<32x96xf32>
    %c1_23 = arith.constant 1 : index
    %c0_24 = arith.constant 0 : index
    %c0_25 = arith.constant 0 : index
    %49 = vector.load %arg4[%c1_23, %c0_24, %c0_25] : memref<5x96x64xf32, #tpu.memory_space<vmem>>, vector<1x96x64xf32>
    %50 = vector.shape_cast %49 : vector<1x96x64xf32> to vector<96x64xf32>
    %cst_26 = arith.constant dense<0.000000e+00> : vector<32x64xf32>
    %51 = tpu.matmul %48, %50, %cst_26 {dimension_numbers = #tpu.dot_dimension_numbers<[1], [0], [0], [1], [0, 0, 1, 1], [], []>, precision = #tpu.contract_precision<fp32>} : vector<32x96xf32>, vector<96x64xf32>, vector<32x64xf32> -> vector<32x64xf32>
    %52 = arith.addf %46, %51 : vector<32x64xf32>
    %53 = vector.extract_strided_slice %41 {offsets = [0, 4, 0], sizes = [2, 16, 96], strides = [1, 1, 1]} : vector<2x24x96xf32> to vector<2x16x96xf32>
    %54 = vector.shape_cast %53 : vector<2x16x96xf32> to vector<32x96xf32>
    %c2_27 = arith.constant 2 : index
    %c0_28 = arith.constant 0 : index
    %c0_29 = arith.constant 0 : index
    %55 = vector.load %arg4[%c2_27, %c0_28, %c0_29] : memref<5x96x64xf32, #tpu.memory_space<vmem>>, vector<1x96x64xf32>
    %56 = vector.shape_cast %55 : vector<1x96x64xf32> to vector<96x64xf32>
    %cst_30 = arith.constant dense<0.000000e+00> : vector<32x64xf32>
    %57 = tpu.matmul %54, %56, %cst_30 {dimension_numbers = #tpu.dot_dimension_numbers<[1], [0], [0], [1], [0, 0, 1, 1], [], []>, precision = #tpu.contract_precision<fp32>} : vector<32x96xf32>, vector<96x64xf32>, vector<32x64xf32> -> vector<32x64xf32>
    %58 = arith.addf %52, %57 : vector<32x64xf32>
    %59 = vector.extract_strided_slice %41 {offsets = [0, 6, 0], sizes = [2, 16, 96], strides = [1, 1, 1]} : vector<2x24x96xf32> to vector<2x16x96xf32>
    %60 = vector.shape_cast %59 : vector<2x16x96xf32> to vector<32x96xf32>
    %c3_31 = arith.constant 3 : index
    %c0_32 = arith.constant 0 : index
    %c0_33 = arith.constant 0 : index
    %61 = vector.load %arg4[%c3_31, %c0_32, %c0_33] : memref<5x96x64xf32, #tpu.memory_space<vmem>>, vector<1x96x64xf32>
    %62 = vector.shape_cast %61 : vector<1x96x64xf32> to vector<96x64xf32>
    %cst_34 = arith.constant dense<0.000000e+00> : vector<32x64xf32>
    %63 = tpu.matmul %60, %62, %cst_34 {dimension_numbers = #tpu.dot_dimension_numbers<[1], [0], [0], [1], [0, 0, 1, 1], [], []>, precision = #tpu.contract_precision<fp32>} : vector<32x96xf32>, vector<96x64xf32>, vector<32x64xf32> -> vector<32x64xf32>
    %64 = arith.addf %58, %63 : vector<32x64xf32>
    %65 = vector.extract_strided_slice %41 {offsets = [0, 8, 0], sizes = [2, 16, 96], strides = [1, 1, 1]} : vector<2x24x96xf32> to vector<2x16x96xf32>
    %66 = vector.shape_cast %65 : vector<2x16x96xf32> to vector<32x96xf32>
    %c4_35 = arith.constant 4 : index
    %c0_36 = arith.constant 0 : index
    %c0_37 = arith.constant 0 : index
    %67 = vector.load %arg4[%c4_35, %c0_36, %c0_37] : memref<5x96x64xf32, #tpu.memory_space<vmem>>, vector<1x96x64xf32>
    %68 = vector.shape_cast %67 : vector<1x96x64xf32> to vector<96x64xf32>
    %cst_38 = arith.constant dense<0.000000e+00> : vector<32x64xf32>
    %69 = tpu.matmul %66, %68, %cst_38 {dimension_numbers = #tpu.dot_dimension_numbers<[1], [0], [0], [1], [0, 0, 1, 1], [], []>, precision = #tpu.contract_precision<fp32>} : vector<32x96xf32>, vector<96x64xf32>, vector<32x64xf32> -> vector<32x64xf32>
    %70 = arith.addf %64, %69 : vector<32x64xf32>
    %c0_39 = arith.constant 0 : index
    %c0_40 = arith.constant 0 : index
    %71 = vector.load %arg5[%c0_39, %c0_40] : memref<1x64xf32, #tpu.memory_space<vmem>>, vector<1x64xf32>
    %72 = vector.broadcast %71 : vector<1x64xf32> to vector<32x64xf32>
    %73 = arith.addf %70, %72 : vector<32x64xf32>
    %74 = vector.shape_cast %73 : vector<32x64xf32> to vector<2x16x64xf32>
    %75 = vector.extract_strided_slice %74 {offsets = [0, 0, 8], sizes = [2, 16, 56], strides = [1, 1, 1]} : vector<2x16x64xf32> to vector<2x16x56xf32>
    %76 = vector.extract_strided_slice %74 {offsets = [0, 0, 0], sizes = [2, 16, 8], strides = [1, 1, 1]} : vector<2x16x64xf32> to vector<2x16x8xf32>
    %77 = tpu.concatenate %75, %76 in 2 : vector<2x16x56xf32>, vector<2x16x8xf32> -> vector<2x16x64xf32>
    %78 = arith.maximumf %74, %77 : vector<2x16x64xf32>
    %79 = vector.extract_strided_slice %78 {offsets = [0, 2, 0], sizes = [2, 14, 64], strides = [1, 1, 1]} : vector<2x16x64xf32> to vector<2x14x64xf32>
    %80 = vector.extract_strided_slice %78 {offsets = [0, 0, 0], sizes = [2, 2, 64], strides = [1, 1, 1]} : vector<2x16x64xf32> to vector<2x2x64xf32>
    %81 = tpu.concatenate %79, %80 in 1 : vector<2x14x64xf32>, vector<2x2x64xf32> -> vector<2x16x64xf32>
    %82 = arith.maximumf %78, %81 : vector<2x16x64xf32>
    %83 = vector.shape_cast %82 : vector<2x16x64xf32> to vector<2x1024xf32>
    %c0_41 = arith.constant 0 : index
    %c0_42 = arith.constant 0 : index
    %84 = vector.load %arg6[%c0_41, %c0_42] : memref<1024x64xf32, #tpu.memory_space<vmem>>, vector<1024x64xf32>
    %cst_43 = arith.constant dense<0.000000e+00> : vector<2x64xf32>
    %85 = tpu.matmul %83, %84, %cst_43 {dimension_numbers = #tpu.dot_dimension_numbers<[1], [0], [0], [1], [0, 0, 1, 1], [], []>, precision = #tpu.contract_precision<fp32>} : vector<2x1024xf32>, vector<1024x64xf32>, vector<2x64xf32> -> vector<2x64xf32>
    %c0_44 = arith.constant 0 : index
    %c0_45 = arith.constant 0 : index
    %86 = vector.load %arg7[%c0_44, %c0_45] : memref<1x64xf32, #tpu.memory_space<vmem>>, vector<1x64xf32>
    %87 = vector.broadcast %86 : vector<1x64xf32> to vector<2x64xf32>
    %88 = arith.addf %85, %87 : vector<2x64xf32>
    %cst_46 = arith.constant 0.000000e+00 : f32
    %89 = vector.broadcast %cst_46 : f32 to vector<2x64xf32>
    %90 = arith.maximumf %88, %89 : vector<2x64xf32>
    %c0_47 = arith.constant 0 : index
    %c0_48 = arith.constant 0 : index
    %91 = vector.load %arg8[%c0_47, %c0_48] : memref<64x10xf32, #tpu.memory_space<vmem>>, vector<64x10xf32>
    %cst_49 = arith.constant dense<0.000000e+00> : vector<2x10xf32>
    %92 = tpu.matmul %90, %91, %cst_49 {dimension_numbers = #tpu.dot_dimension_numbers<[1], [0], [0], [1], [0, 0, 1, 1], [], []>, precision = #tpu.contract_precision<fp32>} : vector<2x64xf32>, vector<64x10xf32>, vector<2x10xf32> -> vector<2x10xf32>
    %c0_50 = arith.constant 0 : index
    %c0_51 = arith.constant 0 : index
    %93 = vector.load %arg9[%c0_50, %c0_51] : memref<1x10xf32, #tpu.memory_space<vmem>>, vector<1x10xf32>
    %94 = vector.broadcast %93 : vector<1x10xf32> to vector<2x10xf32>
    %95 = arith.addf %92, %94 : vector<2x10xf32>
    %c0_52 = arith.constant 0 : index
    %c0_53 = arith.constant 0 : index
    %96 = vector.load %arg10[%c0_52, %c0_53] : memref<2x10xf32, #tpu.memory_space<vmem>>, vector<2x10xf32>
    tpu.vector_store %arg10[%c0_52, %c0_53], %95 {strides = array<i32>} : memref<2x10xf32, #tpu.memory_space<vmem>>, vector<2x10xf32>,
    return
  }
  func.func @transform_0(%arg0: i32) -> (i32, i32, i32) {
    %c0_i32 = arith.constant 0 : i32
    %c0_i32_0 = arith.constant 0 : i32
    %c0_i32_1 = arith.constant 0 : i32
    return %arg0, %c0_i32, %c0_i32_0 : i32, i32, i32
  }
  func.func @transform_1(%arg0: i32) -> (i32, i32, i32) {
    %c0_i32 = arith.constant 0 : i32
    %c0_i32_0 = arith.constant 0 : i32
    %c0_i32_1 = arith.constant 0 : i32
    %c0_i32_2 = arith.constant 0 : i32
    return %c0_i32, %c0_i32_0, %c0_i32_1 : i32, i32, i32
  }
  func.func @transform_2(%arg0: i32) -> (i32, i32) {
    %c0_i32 = arith.constant 0 : i32
    %c0_i32_0 = arith.constant 0 : i32
    %c0_i32_1 = arith.constant 0 : i32
    return %c0_i32, %c0_i32_0 : i32, i32
  }
  func.func @transform_3(%arg0: i32) -> (i32, i32, i32) {
    %c0_i32 = arith.constant 0 : i32
    %c0_i32_0 = arith.constant 0 : i32
    %c0_i32_1 = arith.constant 0 : i32
    %c0_i32_2 = arith.constant 0 : i32
    return %c0_i32, %c0_i32_0, %c0_i32_1 : i32, i32, i32
  }
  func.func @transform_4(%arg0: i32) -> (i32, i32) {
    %c0_i32 = arith.constant 0 : i32
    %c0_i32_0 = arith.constant 0 : i32
    %c0_i32_1 = arith.constant 0 : i32
    return %c0_i32, %c0_i32_0 : i32, i32
  }
  func.func @transform_5(%arg0: i32) -> (i32, i32) {
    %c0_i32 = arith.constant 0 : i32
    %c0_i32_0 = arith.constant 0 : i32
    %c0_i32_1 = arith.constant 0 : i32
    return %c0_i32, %c0_i32_0 : i32, i32
  }
  func.func @transform_6(%arg0: i32) -> (i32, i32) {
    %c0_i32 = arith.constant 0 : i32
    %c0_i32_0 = arith.constant 0 : i32
    %c0_i32_1 = arith.constant 0 : i32
    return %c0_i32, %c0_i32_0 : i32, i32
  }
  func.func @transform_7(%arg0: i32) -> (i32, i32) {
    %c0_i32 = arith.constant 0 : i32
    %c0_i32_0 = arith.constant 0 : i32
    %c0_i32_1 = arith.constant 0 : i32
    return %c0_i32, %c0_i32_0 : i32, i32
  }
  func.func @transform_8(%arg0: i32) -> (i32, i32) {
    %c0_i32 = arith.constant 0 : i32
    %c0_i32_0 = arith.constant 0 : i32
    %c0_i32_1 = arith.constant 0 : i32
    return %c0_i32, %c0_i32_0 : i32, i32
  }
  func.func @transform_9(%arg0: i32) -> (i32, i32) {
    %c0_i32 = arith.constant 0 : i32
    %c0_i32_0 = arith.constant 0 : i32
    return %arg0, %c0_i32 : i32, i32
  }
}

</mosaic_0001>

<bundles_post_ra>
// kernel: net_forward.1
= control target key start
LH: loop header
LB: loop body
LE: loop exit
PB: predicated region body
PF: predicated region fallthrough
CT: control target
= control target key end

     0   :  { %vm86_vm0 = vcmask 1043456   ;;  %vm53_vm1 = vcmask 1046528   ;;  %vm73_vm2 = vcmask 228352   ;;  %s22704_s0 = inlined_call_operand.vmem [shape: f32[2,28,28], index: 0, kind: input, shape index: {}]   ;;  %s22705_s1 = inlined_call_operand.vmem [shape: f32[5,28,96], index: 1, kind: input, shape index: {}]   ;;  %s22706_s2 = inlined_call_operand.vmem [shape: f32[1,96], index: 2, kind: input, shape index: {}]   ;;  %s22707_s3 = inlined_call_operand.vmem [shape: f32[5,96,64], index: 3, kind: input, shape index: {}]   ;;  %s22708_s4 = inlined_call_operand.vmem [shape: f32[1,64], index: 4, kind: input, shape index: {}]   ;;  %s22709_s5 = inlined_call_operand.vmem [shape: f32[1024,64], index: 5, kind: input, shape index: {}]   ;;  %s22710_s6 = inlined_call_operand.vmem [shape: f32[1,64], index: 6, kind: input, shape index: {}]   ;;  %s22711_s7 = inlined_call_operand.vmem [shape: f32[64,10], index: 7, kind: input, shape index: {}]   ;;  %s22712_s8 = inlined_call_operand.vmem [shape: f32[1,10], index: 8, kind: input, shape index: {}]   ;;  %s22713_s9 = inlined_call_operand.hbm [shape: f32[2,10], index: 9, kind: output, shape index: {}]  }
   0x1   :  { %v11965_v0 = vld [vmem:[%s22705_s1 + $0x20] sm:$0xff]  ;;  %v11966_v1 = vld [vmem:[%s22705_s1 + $0x28] sm:$0xff]  ;;  %v11967_v2 = vld [vmem:[%s22705_s1 + $0x30] sm:$0xff] }
   0x2   :  { %v91_v3 = vand.u32 4294901760, %v11965_v0  ;;  %v94_v4 = vand.u32 4294901760, %v11966_v1  ;;  %v11968_v5 = vld [vmem:[%s22705_s1 + $0x38] sm:$0xf]  ;;  %v97_v6 = vand.u32 4294901760, %v11967_v2  ;;  %v17451_v7 = vld [vmem:[%s22704_s0] sm:$0xff] }
   0x3   :  { %v88_v8 = vsel %vm86_vm0, %v11968_v5, 0  ;;  %v17457_v9 = vld [vmem:[%s22704_s0 + $0x8] sm:$0xff]  ;;  %v54_v10 = vrot.slane %v17451_v7, 1  ;;  %v17463_v11 = vld [vmem:[%s22704_s0 + $0x10] sm:$0xff]  ;;  %v17468_v12 = vld [vmem:[%s22704_s0 + $0x18] sm:$0xf] }
   0x4   :  { %v17470_v13 = vpack.c.bf16 %v94_v4, %v91_v3  ;;  %v100_v14 = vand.u32 4294901760, %v88_v8  ;;  %v55_v15 = vrot.slane %v17457_v9, 1  ;;  %v17473_v16 = vsub.f32 %v11965_v0, %v91_v3  ;;  %v17478_v17 = vld [vmem:[%s22704_s0 + $0x20] sm:$0xff]  ;;  %v17483_v18 = vld [vmem:[%s22704_s0 + $0x28] sm:$0xff] }
   0x5   :  { %v17485_v19 = vsub.f32 %v11966_v1, %v94_v4  ;;  %v57_v20 = vrot.slane %v17463_v11, 1  ;;  %v59_v21 = vrot.slane %v17468_v12, 1  ;;  %v61_v22 = vrot.slane %v17478_v17, 1 }
   0x6   :  { %15232 = vmatprep.subr.bf16.mxu0 %v17470_v13  ;;  %v17491_v23 = vpack.c.bf16 %v100_v14, %v97_v6  ;;  %v56_v24 = vsel %vm53_vm1, %v54_v10, %v55_v15  ;;  %v222_v25 = vand.u32 4294901760, %v17473_v16  ;;  %v62_v26 = vrot.slane %v17483_v18, 1 }
   0x7   :  { %15234 = vmatpush3.bf16.msra.mxu0 %v17470_v13  ;;  %v74_v27 = vsel %vm73_vm2, %v56_v24, 0  ;;  %v229_v28 = vand.u32 4294901760, %v17485_v19  ;;  %v58_v29 = vsel %vm53_vm1, %v55_v15, %v57_v20  ;;  %v60_v30 = vsel %vm53_vm1, %v57_v20, %v59_v21 }
   0x8   :  { %14 = vsyncpa [#allocation3], 0  ;;  %15236 = vmatprep.subr.bf16.mxu0 %v17491_v23  ;;  %v17502_v31 = vand.u32 4294901760, %v74_v27  ;;  %v223_v32 = vsub.f32 %v17473_v16, %v222_v25  ;;  %v76_v33 = vsel %vm73_vm2, %v58_v29, 0  ;;  %v78_v34 = vsel %vm73_vm2, %v60_v30, 0  ;;  %v17520_v39 = vld [vmem:[%s22704_s0 + $0x30] sm:$0xff] }
   0x9   :  { %v230_v35 = vsub.f32 %v17485_v19, %v229_v28  ;;  %v17512_v36 = vand.u32 4294901760, %v76_v33  ;;  %v17514_v37 = vand.u32 4294901760, %v78_v34  ;;  %v63_v38 = vsel %vm53_vm1, %v61_v22, %v62_v26  ;;  %v17558_v60 = vld [vmem:[%s22704_s0 + $0x38] sm:$0xf]  ;;  %s17376_s30 = smov 92   ;;  %s17377_s21 = smov 120  }
   0xa   :  { %v17523_v40 = vsub.f32 %v74_v27, %v17502_v31  ;;  %v224_v41 = vand.u32 4294901760, %v223_v32  ;;  %v80_v42 = vsel %vm73_vm2, %v63_v38, 0  ;;  %v17526_v43 = vsub.f32 %v11967_v2, %v97_v6  ;;  %s17378_s22 = smov 56   ;;  %s17382_s16 = smov 64  }
   0xb   :  { %15238 = vmatpush3.bf16.msra.mxu0 %v17491_v23  ;;  %v231_v44 = vand.u32 4294901760, %v230_v35  ;;  %v17530_v45 = vsub.f32 %v76_v33, %v17512_v36  ;;  %v17533_v46 = vsub.f32 %v78_v34, %v17514_v37  ;;  %v17535_v47 = vand.u32 4294901760, %v80_v42  ;;  %s17385_s14 = smov [#allocation2]  }
   0xc   :  { %v161_v48 = vand.u32 4294901760, %v17523_v40  ;;  %v236_v49 = vand.u32 4294901760, %v17526_v43  ;;  %v17539_v50 = vsub.f32 %v88_v8, %v100_v14  ;;  %v64_v51 = vrot.slane %v17520_v39, 1  ;;  %s11957_s15 = sshll.u32 %s17385_s14, 4  ;;  %s11958_s15 = int_to_ptr.vmem [resolvable:$true] %s11957_s15 }
   0xd   :  { %v15239_v52 = vpack.c.bf16 %v231_v44, %v224_v41  ;;  %v171_v53 = vand.u32 4294901760, %v17530_v45  ;;  %v181_v54 = vand.u32 4294901760, %v17533_v46  ;;  %v17545_v55 = vsub.f32 %v80_v42, %v17535_v47  ;;  %s17351_s17 = scalar_lea.vmem %s11958_s15, 32  ;;  %p17356_p1 = scmp.lt.s32.totalorder %s11958_s15, %s11958_s15 }
   0xe   :  { %v162_v56 = vsub.f32 %v17523_v40, %v161_v48  ;;  %v237_v57 = vsub.f32 %v17526_v43, %v236_v49  ;;  %v243_v58 = vand.u32 4294901760, %v17539_v50  ;;  %v65_v59 = vsel %vm53_vm1, %v62_v26, %v64_v51  ;;  %p17352_p0 = scmp.ne.s32.totalorder %s11958_s15, %s17351_s17  ;;  %p17357_p2 = scmp.lt.s32.totalorder %s17351_s17, %s17351_s17 }
   0xf   :  { %15240 = vmatprep.subr.bf16.mxu0 %v15239_v52  ;;  %v172_v61 = vsub.f32 %v17530_v45, %v171_v53  ;;  %v182_v62 = vsub.f32 %v17533_v46, %v181_v54  ;;  %v191_v63 = vand.u32 4294901760, %v17545_v55  ;;  %v82_v0 = vsel %vm73_vm2, %v65_v59, 0 }
  0x10   :  { %v163_v1 = vand.u32 4294901760, %v162_v56  ;;  %v238_v2 = vand.u32 4294901760, %v237_v57  ;;  %v244_v3 = vsub.f32 %v17539_v50, %v243_v58  ;;  %v17571_v4 = vand.u32 4294901760, %v82_v0  ;;  %p17358_p3 = por %p17357_p2, %p17356_p1 }
  0x11   :  { %v173_v5 = vand.u32 4294901760, %v172_v61  ;;  %v183_v6 = vand.u32 4294901760, %v182_v62  ;;  %v192_v8 = vsub.f32 %v17545_v55, %v191_v63  ;;  %v66_v10 = vrot.slane %v17558_v60, 1 }
  0x12   :  { %13715 = vmatprep.mubr.f32.mxu0 %v163_v1  ;;  %v245_v14 = vand.u32 4294901760, %v244_v3  ;;  %v200_v15 = vsub.f32 %v82_v0, %v17571_v4  ;;  %v15247_v29 = vpack.c.bf16 %v17485_v19, %v17473_v16  ;;  %v15251_v41 = vpack.c.bf16 %v17539_v50, %v17526_v43  ;;  %v41_v16 = vld [vmem:[%s22705_s1] sm:$0xff]  ;;  %v42_v19 = vld [vmem:[%s22705_s1 + $0x8] sm:$0xff]  ;;  %v44_v43 = vld [vmem:[%s22705_s1 + $0x18] sm:$0xf]  ;;  %p17359_p4 = pnand %p17358_p3, %p17352_p0 }
  0x13   :  { %13716 = vmatmul.mubr.f32.vlgmr.msra.gmra.mrb[0].mxu0 %v173_v5  ;;  %v193_v20 = vand.u32 4294901760, %v192_v8  ;;  %v67_v21 = vsel %vm53_vm1, %v64_v51, %v66_v10  ;;  %v15263_v42 = vpack.c.bf16 %v229_v28, %v222_v25  ;;  %v15267_v44 = vpack.c.bf16 %v243_v58, %v236_v49 }
  0x14   :  { %15242 = vmatpush3.bf16.msra.mxu0 %v15239_v52  ;;  %13718 = vmatprep.mubr.f32.mxu0 %v183_v6  ;;  %v15243_v22 = vpack.c.bf16 %v245_v14, %v238_v2  ;;  %v201_v24 = vand.u32 4294901760, %v200_v15  ;;  %v84_v26 = vsel %vm73_vm2, %v67_v21, 0  ;;  %v806_v25 = vand.u32 4294901760, %v41_v16 }
  0x15   :  { %v17578_v27 = vand.u32 4294901760, %v84_v26  ;;  %v809_v28 = vand.u32 4294901760, %v42_v19  ;;  %v803_v49 = vsel %vm86_vm0, %v44_v43, 0  ;;  %v792_v52 = vsel %vm73_vm2, %v17457_v9, 0 }
  0x16   :  { %15244 = vmatprep.subr.bf16.mxu0 %v15243_v22  ;;  %v202_v30 = vsub.f32 %v200_v15, %v201_v24  ;;  %v815_v56 = vand.u32 4294901760, %v803_v49  ;;  %v17649_v57 = vand.u32 4294901760, %v792_v52  ;;  %v796_v62 = vsel %vm73_vm2, %v17478_v17, 0 }
  0x17   :  { %13719 = vmatmul.mubr.f32.gmra.mrb[2].mxu0 %v193_v20  ;;  %v210_v32 = vsub.f32 %v84_v26, %v17578_v27  ;;  %v798_v1 = vsel %vm73_vm2, %v17483_v18, 0  ;;  %v17679_v5 = vand.u32 4294901760, %v796_v62  ;;  %v800_v14 = vsel %vm73_vm2, %v17520_v39, 0 }
  0x18   :  { %15246 = vmatpush3.bf16.msra.mxu0 %v15243_v22  ;;  %v203_v33 = vand.u32 4294901760, %v202_v30  ;;  %v17669_v0 = vsub.f32 %v803_v49, %v815_v56  ;;  %v17677_v3 = vsub.f32 %v792_v52, %v17649_v57  ;;  %v17686_v10 = vand.u32 4294901760, %v798_v1 }
  0x19   :  { %v211_v34 = vand.u32 4294901760, %v210_v32  ;;  %15248 = vmatprep.subr.bf16.mxu0 %v15247_v29  ;;  %v17697_v26 = vand.u32 4294901760, %v800_v14  ;;  %vm1505_vm3 = vcmask 1045504   ;;  %vm2246_vm4 = vcmask 1044480  }
  0x1a   :  { %13721 = vmatprep.mubr.f32.mxu0 %v203_v33  ;;  %v958_v22 = vand.u32 4294901760, %v17669_v0  ;;  %vm3782_vm5 = vcmask 752640   ;;  %vm3868_vm6 = vcmask 785408   ;;  %vm6074_vm7 = vcmask 1041408  }
  0x1b   :  { %v212_v35 = vsub.f32 %v210_v32, %v211_v34  ;;  %vm7606_vm8 = vcmask 457728   ;;  %vm7801_vm9 = vcmask 523264   ;;  %vm17384_vm10 = vmmov 0  }
  0x1c   :  { %vm11949_vm11 = vcmask 74752  }
  0x1d   :  { %v213_v38 = vand.u32 4294901760, %v212_v35 }
  0x1f   :  { %13722 = vmatmul.mubr.f32.gmra.mrb[4].mxu0 %v213_v38  ;;  %v17721_v38 = vsub.f32 %v800_v14, %v17697_v26 }
  0x20   :  { %13732 = vmatprep.mubr.f32.mxu0 %v17502_v31 }
  0x23   :  { %13733 = vmatmul.mubr.f32.vlgmr.msra.gmra.mrb[0].mxu0 %v17512_v36 }
  0x24   :  { %15250 = vmatpush3.bf16.msra.mxu0 %v15247_v29  ;;  %13735 = vmatprep.mubr.f32.mxu0 %v17514_v37 }
  0x25   :  { %15252 = vmatprep.subr.bf16.mxu0 %v15251_v41 }
  0x27   :  { %13736 = vmatmul.mubr.f32.gmra.mrb[2].mxu0 %v17535_v47 }
  0x28   :  { %15254 = vmatpush3.bf16.msra.mxu0 %v15251_v41  ;;  %13738 = vmatprep.mubr.f32.mxu0 %v17571_v4 }
  0x29   :  { %15256 = vmatprep.subr.bf16.mxu0 %v17470_v13 }
  0x2b   :  { %13739 = vmatmul.mubr.f32.gmra.mrb[4].mxu0 %v17578_v27 }
  0x2c   :  { %13749 = vmatprep.mubr.f32.mxu0 %v17523_v40  ;;  %v17621_v40 = vsub.f32 %v41_v16, %v806_v25 }
  0x2e   :  { %v937_v51 = vand.u32 4294901760, %v17621_v40 }
  0x2f   :  { %13750 = vmatmul.mubr.f32.vlgmr.msra.gmra.mrb[0].mxu0 %v17530_v45  ;;  %v790_v45 = vsel %vm73_vm2, %v17451_v7, 0 }
  0x30   :  { %15258 = vmatpush3.bf16.msra.mxu0 %v17470_v13  ;;  %13752 = vmatprep.mubr.f32.mxu0 %v17533_v46  ;;  %v17628_v46 = vsub.f32 %v42_v19, %v809_v28  ;;  %v17637_v50 = vand.u32 4294901760, %v790_v45  ;;  %v938_v59 = vsub.f32 %v17621_v40, %v937_v51 }
  0x31   :  { %15260 = vmatprep.subr.bf16.mxu0 %v17491_v23 }
  0x32   :  { %v17654_v58 = vsub.f32 %v790_v45, %v17637_v50 }
  0x33   :  { %13753 = vmatmul.mubr.f32.gmra.mrb[2].mxu0 %v17545_v55 }
  0x34   :  { %15262 = vmatpush3.bf16.msra.mxu0 %v17491_v23  ;;  %13755 = vmatprep.mubr.f32.mxu0 %v200_v15  ;;  %v876_v6 = vand.u32 4294901760, %v17654_v58  ;;  %v939_v15 = vand.u32 4294901760, %v938_v59 }
  0x35   :  { %15264 = vmatprep.subr.bf16.mxu0 %v15263_v42 }
  0x36   :  { %v877_v29 = vsub.f32 %v17654_v58, %v876_v6 }
  0x37   :  { %13756 = vmatmul.mubr.f32.gmra.mrb[4].mxu0 %v210_v32  ;;  %v17706_v32 = vsub.f32 %v798_v1, %v17686_v10 }
  0x38   :  { %13766 = vmatprep.mubr.f32.mxu0 %v161_v48  ;;  %v43_v48 = vld [vmem:[%s22705_s1 + $0x10] sm:$0xff]  ;;  %v878_v41 = vand.u32 4294901760, %v877_v29 }
  0x39   :  { %v812_v55 = vand.u32 4294901760, %v43_v48 }
  0x3b   :  { %13767 = vmatmul.mubr.f32.vlgmr.msra.gmra.mrb[0].mxu0 %v171_v53  ;;  %v17643_v53 = vpack.c.bf16 %v809_v28, %v806_v25  ;;  %v17674_v2 = vpack.c.bf16 %v815_v56, %v812_v55  ;;  %v926_v28 = vand.u32 4294901760, %v17721_v38 }
  0x3c   :  { %15266 = vmatpush3.bf16.msra.mxu0 %v15263_v42  ;;  %13769 = vmatprep.mubr.f32.mxu0 %v181_v54  ;;  %v794_v54 = vsel %vm73_vm2, %v17463_v11, 0 }
  0x3d   :  { %15268 = vmatprep.subr.bf16.mxu0 %v15267_v44  ;;  %v17659_v61 = vand.u32 4294901760, %v794_v54  ;;  %v927_v49 = vsub.f32 %v17721_v38, %v926_v28 }
  0x3f   :  { %13770 = vmatmul.mubr.f32.gmra.mrb[2].mxu0 %v191_v63  ;;  %v17667_v63 = vsub.f32 %v43_v48, %v812_v55  ;;  %v17684_v8 = vsub.f32 %v794_v54, %v17659_v61  ;;  %v928_v54 = vand.u32 4294901760, %v927_v49 }
  0x40   :  { %15270 = vmatpush3.bf16.msra.mxu0 %v15267_v44  ;;  %13772 = vmatprep.mubr.f32.mxu0 %v201_v24  ;;  %v17695_v24 = vsub.f32 %v796_v62, %v17679_v5  ;;  %v1509_v62 = vrot.slane %v17463_v11, 2 }
  0x41   :  { %15272 = vmatprep.subr.bf16.mxu0 %v17470_v13  ;;  %v951_v21 = vand.u32 4294901760, %v17667_v63  ;;  %v896_v30 = vand.u32 4294901760, %v17684_v8  ;;  %v15299_v55 = vpack.c.bf16 %v17669_v0, %v17667_v63 }
  0x42   :  { %v906_v35 = vand.u32 4294901760, %v17695_v24 }
  0x43   :  { %13773 = vmatmul.mubr.f32.gmra.mrb[4].mxu0 %v211_v34  ;;  %v952_v33 = vsub.f32 %v17667_v63, %v951_v21  ;;  %v897_v42 = vsub.f32 %v17684_v8, %v896_v30 }
  0x44   :  { %13783 = vmatprep.mubr.f32.mxu0 %v17502_v31  ;;  %v907_v25 = vsub.f32 %v17695_v24, %v906_v35 }
  0x45   :  { %v953_v44 = vand.u32 4294901760, %v952_v33  ;;  %v898_v43 = vand.u32 4294901760, %v897_v42 }
  0x46   :  { %v908_v48 = vand.u32 4294901760, %v907_v25 }
  0x47   :  { %13784 = vmatmul.mubr.f32.vlgmr.msra.gmra.mrb[0].mxu0 %v17512_v36 }
  0x48   :  { %15274 = vmatpush3.bf16.msra.mxu0 %v17470_v13  ;;  %13786 = vmatprep.mubr.f32.mxu0 %v17514_v37  ;;  %v944_v13 = vand.u32 4294901760, %v17628_v46 }
  0x49   :  { %15276 = vmatprep.subr.bf16.mxu0 %v17491_v23 }
  0x4a   :  { %v15311_v56 = vpack.c.bf16 %v944_v13, %v937_v51  ;;  %v1506_v51 = vrot.slane %v17451_v7, 2 }
  0x4b   :  { %13787 = vmatmul.mubr.f32.gmra.mrb[2].mxu0 %v17535_v47 }
  0x4c   :  { %15278 = vmatpush3.bf16.msra.mxu0 %v17491_v23  ;;  %13789 = vmatprep.mubr.f32.mxu0 %v17571_v4  ;;  %v945_v23 = vsub.f32 %v17628_v46, %v944_v13  ;;  %v1507_v13 = vrot.slane %v17457_v9, 2 }
  0x4d   :  { %15280 = vmatprep.subr.bf16.mxu0 %v17643_v53 }
  0x4e   :  { %v946_v20 = vand.u32 4294901760, %v945_v23  ;;  %v1508_v63 = vsel %vm1505_vm3, %v1506_v51, %v1507_v13  ;;  %v1510_v14 = vsel %vm1505_vm3, %v1507_v13, %v1509_v62 }
  0x4f   :  { %13790 = vmatmul.mubr.f32.gmra.mrb[4].mxu0 %v17578_v27 }
  0x50   :  { %13800 = vmatprep.mubr.f32.mxu0 %v17502_v31  ;;  %v886_v31 = vand.u32 4294901760, %v17677_v3 }
  0x52   :  { %v887_v34 = vsub.f32 %v17677_v3, %v886_v31 }
  0x53   :  { %13801 = vmatmul.mubr.f32.vlgmr.msra.gmra.mrb[0].mxu0 %v17512_v36  ;;  %v15287_v36 = vpack.c.bf16 %v946_v20, %v939_v15  ;;  %v1513_v15 = vrot.slane %v17478_v17, 2  ;;  %v1514_v20 = vrot.slane %v17483_v18, 2 }
  0x54   :  { %15282 = vmatpush3.bf16.msra.mxu0 %v17643_v53  ;;  %13803 = vmatprep.mubr.f32.mxu0 %v17514_v37  ;;  %v959_v37 = vsub.f32 %v17669_v0, %v958_v22  ;;  %v888_v19 = vand.u32 4294901760, %v887_v34  ;;  %v1511_v0 = vrot.slane %v17468_v12, 2  ;;  %v1518_v34 = vrot.slane %v17558_v60, 2 }
  0x55   :  { %15284 = vmatprep.subr.bf16.mxu0 %v17674_v2 }
  0x56   :  { %v960_v16 = vand.u32 4294901760, %v959_v37  ;;  %v1515_v37 = vsel %vm1505_vm3, %v1513_v15, %v1514_v20 }
  0x57   :  { %13804 = vmatmul.mubr.f32.gmra.mrb[2].mxu0 %v17535_v47  ;;  %v916_v47 = vand.u32 4294901760, %v17706_v32  ;;  %v1531_v25 = vsel %vm73_vm2, %v1515_v37, 0 }
  0x58   :  { %15286 = vmatpush3.bf16.msra.mxu0 %v17674_v2  ;;  %13806 = vmatprep.mubr.f32.mxu0 %v17571_v4  ;;  %v15291_v45 = vpack.c.bf16 %v960_v16, %v953_v44  ;;  %v17843_v49 = vand.u32 4294901760, %v1531_v25 }
  0x59   :  { %15288 = vmatprep.subr.bf16.mxu0 %v15287_v36  ;;  %v917_v4 = vsub.f32 %v17706_v32, %v916_v47 }
  0x5b   :  { %13807 = vmatmul.mubr.f32.gmra.mrb[4].mxu0 %v17578_v27  ;;  %v918_v52 = vand.u32 4294901760, %v917_v4  ;;  %v15295_v27 = vpack.c.bf16 %v17628_v46, %v17621_v40  ;;  %v15315_v40 = vpack.c.bf16 %v958_v22, %v951_v21  ;;  %v11969_v46 = vld [vmem:[%s22705_s1 + $0x40] sm:$0xff]  ;;  %v1512_v21 = vsel %vm1505_vm3, %v1509_v62, %v1511_v0 }
  0x5c   :  { %13817 = vmatprep.mubr.f32.mxu0 %v878_v41  ;;  %v1541_v59 = vand.u32 4294901760, %v11969_v46  ;;  %v1516_v22 = vrot.slane %v17520_v39, 2 }
  0x5e   :  { %v17780_v1 = vsub.f32 %v11969_v46, %v1541_v59  ;;  %v1519_v4 = vsel %vm1505_vm3, %v1516_v22, %v1518_v34 }
  0x5f   :  { %13818 = vmatmul.mubr.f32.vlgmr.msra.gmra.mrb[0].mxu0 %v888_v19 }
  0x60   :  { %15290 = vmatpush3.bf16.msra.mxu0 %v15287_v36  ;;  %13820 = vmatprep.mubr.f32.mxu0 %v898_v43  ;;  %v1527_v36 = vsel %vm73_vm2, %v1510_v14, 0 }
  0x61   :  { %15292 = vmatprep.subr.bf16.mxu0 %v15291_v45 }
  0x63   :  { %13821 = vmatmul.mubr.f32.gmra.mrb[2].mxu0 %v908_v48 }
  0x64   :  { %15294 = vmatpush3.bf16.msra.mxu0 %v15291_v45  ;;  %13823 = vmatprep.mubr.f32.mxu0 %v918_v52 }
  0x65   :  { %15296 = vmatprep.subr.bf16.mxu0 %v15295_v27 }
  0x67   :  { %13824 = vmatmul.mubr.f32.gmra.mrb[4].mxu0 %v928_v54 }
  0x68   :  { %13834 = vmatprep.mubr.f32.mxu0 %v17637_v50 }
  0x6b   :  { %13835 = vmatmul.mubr.f32.vlgmr.msra.gmra.mrb[0].mxu0 %v17649_v57 }
  0x6c   :  { %15298 = vmatpush3.bf16.msra.mxu0 %v15295_v27  ;;  %13837 = vmatprep.mubr.f32.mxu0 %v17659_v61 }
  0x6d   :  { %15300 = vmatprep.subr.bf16.mxu0 %v15299_v55 }
  0x6f   :  { %13838 = vmatmul.mubr.f32.gmra.mrb[2].mxu0 %v17679_v5 }
  0x70   :  { %15302 = vmatpush3.bf16.msra.mxu0 %v15299_v55  ;;  %13840 = vmatprep.mubr.f32.mxu0 %v17686_v10  ;;  %v1535_v55 = vsel %vm73_vm2, %v1519_v4, 0 }
  0x71   :  { %15304 = vmatprep.subr.bf16.mxu0 %v17643_v53 }
  0x73   :  { %13841 = vmatmul.mubr.f32.gmra.mrb[4].mxu0 %v17697_v26 }
  0x74   :  { %13851 = vmatprep.mubr.f32.mxu0 %v17654_v58  ;;  %v11970_v58 = vld [vmem:[%s22705_s1 + $0x48] sm:$0xff] }
  0x75   :  { %v1544_v23 = vand.u32 4294901760, %v11970_v58 }
  0x77   :  { %13852 = vmatmul.mubr.f32.vlgmr.msra.gmra.mrb[0].mxu0 %v17677_v3  ;;  %v17783_v3 = vsub.f32 %v11970_v58, %v1544_v23  ;;  %v17807_v33 = vpack.c.bf16 %v1544_v23, %v1541_v59  ;;  %v17860_v58 = vand.u32 4294901760, %v1535_v55 }
  0x78   :  { %15306 = vmatpush3.bf16.msra.mxu0 %v17643_v53  ;;  %13854 = vmatprep.mubr.f32.mxu0 %v17684_v8  ;;  %v1525_v8 = vsel %vm73_vm2, %v1508_v63, 0 }
  0x79   :  { %15308 = vmatprep.subr.bf16.mxu0 %v17674_v2 }
  0x7b   :  { %13855 = vmatmul.mubr.f32.gmra.mrb[2].mxu0 %v17695_v24  ;;  %v11971_v24 = vld [vmem:[%s22705_s1 + $0x50] sm:$0xff] }
  0x7c   :  { %15310 = vmatpush3.bf16.msra.mxu0 %v17674_v2  ;;  %13857 = vmatprep.mubr.f32.mxu0 %v17706_v32  ;;  %v1679_v32 = vand.u32 4294901760, %v17783_v3 }
  0x7d   :  { %15312 = vmatprep.subr.bf16.mxu0 %v15311_v56 }
  0x7e   :  { %v1680_v16 = vsub.f32 %v17783_v3, %v1679_v32 }
  0x7f   :  { %13858 = vmatmul.mubr.f32.gmra.mrb[4].mxu0 %v17721_v38  ;;  %v1547_v38 = vand.u32 4294901760, %v11971_v24 }
  0x80   :  { %13868 = vmatprep.mubr.f32.mxu0 %v876_v6  ;;  %v11972_v6 = vld [vmem:[%s22705_s1 + $0x58] sm:$0xf] }
  0x81   :  { %v1538_v29 = vsel %vm86_vm0, %v11972_v6, 0 }
  0x82   :  { %v1550_v41 = vand.u32 4294901760, %v1538_v29 }
  0x83   :  { %13869 = vmatmul.mubr.f32.vlgmr.msra.gmra.mrb[0].mxu0 %v886_v31  ;;  %v1672_v31 = vand.u32 4294901760, %v17780_v1 }
  0x84   :  { %15314 = vmatpush3.bf16.msra.mxu0 %v15311_v56  ;;  %13871 = vmatprep.mubr.f32.mxu0 %v896_v30  ;;  %v17802_v30 = vand.u32 4294901760, %v1525_v8  ;;  %v17833_v43 = vsub.f32 %v1538_v29, %v1550_v41  ;;  %v17838_v45 = vpack.c.bf16 %v1550_v41, %v1547_v38 }
  0x85   :  { %15316 = vmatprep.subr.bf16.mxu0 %v15315_v40  ;;  %v1673_v42 = vsub.f32 %v17780_v1, %v1672_v31 }
  0x86   :  { %v17822_v44 = vsub.f32 %v1525_v8, %v17802_v30  ;;  %v1693_v51 = vand.u32 4294901760, %v17833_v43  ;;  %v17884_v8 = vsub.f32 %v1535_v55, %v17860_v58  ;;  %v2257_v55 = vrot.slane %v17520_v39, 3 }
  0x87   :  { %13872 = vmatmul.mubr.f32.gmra.mrb[2].mxu0 %v906_v35  ;;  %v1517_v35 = vsel %vm1505_vm3, %v1514_v20, %v1516_v22  ;;  %v1674_v56 = vand.u32 4294901760, %v1673_v42  ;;  %v15359_v42 = vpack.c.bf16 %v1679_v32, %v1672_v31  ;;  %v2248_v31 = vrot.slane %v17457_v9, 3  ;;  %v11973_v32 = vld [vmem:[%s22705_s1 + $0x60] sm:$0xff] }
  0x88   :  { %15318 = vmatpush3.bf16.msra.mxu0 %v15315_v40  ;;  %13874 = vmatprep.mubr.f32.mxu0 %v916_v47  ;;  %v17817_v47 = vand.u32 4294901760, %v1527_v36  ;;  %v1611_v52 = vand.u32 4294901760, %v17822_v44  ;;  %v1681_v40 = vand.u32 4294901760, %v1680_v16  ;;  %v1661_v29 = vand.u32 4294901760, %v17884_v8 }
  0x89   :  { %15320 = vmatprep.subr.bf16.mxu0 %v17643_v53  ;;  %v2250_v16 = vrot.slane %v17463_v11, 3  ;;  %v2252_v9 = vrot.slane %v17468_v12, 3  ;;  %v11976_v11 = vld [vmem:[%s22705_s1 + $0x78] sm:$0xf] }
  0x8a   :  { %v17841_v48 = vsub.f32 %v1527_v36, %v17817_v47  ;;  %v1612_v59 = vsub.f32 %v17822_v44, %v1611_v52  ;;  %v1662_v34 = vsub.f32 %v17884_v8, %v1661_v29 }
  0x8b   :  { %13875 = vmatmul.mubr.f32.gmra.mrb[4].mxu0 %v926_v28  ;;  %v17831_v28 = vsub.f32 %v11971_v24, %v1547_v38  ;;  %v2251_v4 = vsel %vm2246_vm4, %v2248_v31, %v2250_v16  ;;  %v2253_v12 = vsel %vm2246_vm4, %v2250_v16, %v2252_v9 }
  0x8c   :  { %13885 = vmatprep.mubr.f32.mxu0 %v17637_v50  ;;  %v1621_v13 = vand.u32 4294901760, %v17841_v48  ;;  %v1613_v14 = vand.u32 4294901760, %v1612_v59  ;;  %v1663_v38 = vand.u32 4294901760, %v1662_v34  ;;  %v2268_v39 = vsel %vm73_vm2, %v2251_v4, 0 }
  0x8d   :  { %v1686_v46 = vand.u32 4294901760, %v17831_v28  ;;  %v15347_v41 = vpack.c.bf16 %v17833_v43, %v17831_v28  ;;  %v2259_v59 = vrot.slane %v17558_v60, 3 }
  0x8e   :  { %v1622_v0 = vsub.f32 %v17841_v48, %v1621_v13 }
  0x8f   :  { %13886 = vmatmul.mubr.f32.vlgmr.msra.gmra.mrb[0].mxu0 %v17649_v57  ;;  %v1687_v63 = vsub.f32 %v17831_v28, %v1686_v46 }
  0x90   :  { %15322 = vmatpush3.bf16.msra.mxu0 %v17643_v53  ;;  %13888 = vmatprep.mubr.f32.mxu0 %v17659_v61  ;;  %v1529_v53 = vsel %vm73_vm2, %v1512_v21, 0  ;;  %v1623_v22 = vand.u32 4294901760, %v1622_v0 }
  0x91   :  { %15324 = vmatprep.subr.bf16.mxu0 %v17674_v2  ;;  %v17827_v19 = vand.u32 4294901760, %v1529_v53  ;;  %v1688_v20 = vand.u32 4294901760, %v1687_v63  ;;  %v17980_v63 = vand.u32 4294901760, %v2268_v39 }
  0x93   :  { %13889 = vmatmul.mubr.f32.gmra.mrb[2].mxu0 %v17679_v5  ;;  %v17848_v27 = vsub.f32 %v1529_v53, %v17827_v19 }
  0x94   :  { %15326 = vmatpush3.bf16.msra.mxu0 %v17674_v2  ;;  %13891 = vmatprep.mubr.f32.mxu0 %v17686_v10  ;;  %v1533_v2 = vsel %vm73_vm2, %v1517_v35, 0 }
  0x95   :  { %15328 = vmatprep.subr.bf16.mxu0 %v17807_v33  ;;  %v17850_v54 = vand.u32 4294901760, %v1533_v2  ;;  %v1631_v62 = vand.u32 4294901760, %v17848_v27 }
  0x97   :  { %13892 = vmatmul.mubr.f32.gmra.mrb[4].mxu0 %v17697_v26  ;;  %v17869_v23 = vsub.f32 %v1533_v2, %v17850_v54  ;;  %v1632_v15 = vsub.f32 %v17848_v27, %v1631_v62 }
  0x98   :  { %13902 = vmatprep.mubr.f32.mxu0 %v17637_v50  ;;  %v17858_v50 = vsub.f32 %v1531_v25, %v17843_v49  ;;  %v2282_v25 = vand.u32 4294901760, %v11973_v32 }
  0x99   :  { %v1633_v36 = vand.u32 4294901760, %v1632_v15  ;;  %v2260_v15 = vsel %vm2246_vm4, %v2257_v55, %v2259_v59 }
  0x9a   :  { %v1641_v6 = vand.u32 4294901760, %v17858_v50  ;;  %v17945_v2 = vsub.f32 %v11973_v32, %v2282_v25 }
  0x9b   :  { %13903 = vmatmul.mubr.f32.vlgmr.msra.gmra.mrb[0].mxu0 %v17649_v57  ;;  %v15335_v57 = vpack.c.bf16 %v1681_v40, %v1674_v56 }
  0x9c   :  { %15330 = vmatpush3.bf16.msra.mxu0 %v17807_v33  ;;  %13905 = vmatprep.mubr.f32.mxu0 %v17659_v61  ;;  %v1694_v61 = vsub.f32 %v17833_v43, %v1693_v51  ;;  %v1642_v24 = vsub.f32 %v17858_v50, %v1641_v6 }
  0x9d   :  { %15332 = vmatprep.subr.bf16.mxu0 %v17838_v45 }
  0x9e   :  { %v1695_v21 = vand.u32 4294901760, %v1694_v61  ;;  %v1643_v37 = vand.u32 4294901760, %v1642_v24 }
  0x9f   :  { %13906 = vmatmul.mubr.f32.gmra.mrb[2].mxu0 %v17679_v5  ;;  %v1651_v5 = vand.u32 4294901760, %v17869_v23 }
  0xa0   :  { %15334 = vmatpush3.bf16.msra.mxu0 %v17838_v45  ;;  %13908 = vmatprep.mubr.f32.mxu0 %v17686_v10  ;;  %v15339_v53 = vpack.c.bf16 %v1695_v21, %v1688_v20  ;;  %v18003_v20 = vsub.f32 %v2268_v39, %v17980_v63  ;;  %v17344_v39 = vld [vmem:[%s22704_s0 + $0x8] sm:$0xff] }
  0xa1   :  { %15336 = vmatprep.subr.bf16.mxu0 %v15335_v57  ;;  %v1652_v10 = vsub.f32 %v17869_v23, %v1651_v5 }
  0xa3   :  { %13909 = vmatmul.mubr.f32.gmra.mrb[4].mxu0 %v17697_v26  ;;  %v1653_v35 = vand.u32 4294901760, %v1652_v10  ;;  %v15343_v26 = vpack.c.bf16 %v17783_v3, %v17780_v1  ;;  %v15363_v1 = vpack.c.bf16 %v1693_v51, %v1686_v46  ;;  %v2247_v3 = vrot.slane %v17451_v7, 3 }
  0xa4   :  { %13919 = vmatprep.mubr.f32.mxu0 %v1613_v14  ;;  %v2279_v46 = vsel %vm86_vm0, %v11976_v11, 0  ;;  %v2270_v51 = vsel %vm73_vm2, %v2253_v12, 0 }
  0xa5   :  { %v2249_v7 = vsel %vm2246_vm4, %v2247_v3, %v2248_v31  ;;  %v17987_v0 = vand.u32 4294901760, %v2270_v51 }
  0xa6   :  { %v2266_v43 = vsel %vm73_vm2, %v2249_v7, 0 }
  0xa7   :  { %13920 = vmatmul.mubr.f32.vlgmr.msra.gmra.mrb[0].mxu0 %v1623_v22  ;;  %v17960_v40 = vand.u32 4294901760, %v2266_v43  ;;  %v18011_v24 = vsub.f32 %v2270_v51, %v17987_v0  ;;  %v2988_v51 = vrot.slane %v17344_v39, 4 }
  0xa8   :  { %15338 = vmatpush3.bf16.msra.mxu0 %v15335_v57  ;;  %13922 = vmatprep.mubr.f32.mxu0 %v1633_v36  ;;  %v2276_v36 = vsel %vm73_vm2, %v2260_v15, 0 }
  0xa9   :  { %15340 = vmatprep.subr.bf16.mxu0 %v15339_v53  ;;  %v17978_v57 = vsub.f32 %v2266_v43, %v17960_v40 }
  0xab   :  { %13923 = vmatmul.mubr.f32.gmra.mrb[2].mxu0 %v1643_v37 }
  0xac   :  { %15342 = vmatpush3.bf16.msra.mxu0 %v15339_v53  ;;  %13925 = vmatprep.mubr.f32.mxu0 %v1653_v35  ;;  %v2362_v35 = vand.u32 4294901760, %v18003_v20 }
  0xad   :  { %15344 = vmatprep.subr.bf16.mxu0 %v15343_v26 }
  0xae   :  { %v2363_v3 = vsub.f32 %v18003_v20, %v2362_v35 }
  0xaf   :  { %13926 = vmatmul.mubr.f32.gmra.mrb[4].mxu0 %v1663_v38 }
  0xb0   :  { %13936 = vmatprep.mubr.f32.mxu0 %v17802_v30 }
  0xb3   :  { %13937 = vmatmul.mubr.f32.vlgmr.msra.gmra.mrb[0].mxu0 %v17817_v47 }
  0xb4   :  { %15346 = vmatpush3.bf16.msra.mxu0 %v15343_v26  ;;  %13939 = vmatprep.mubr.f32.mxu0 %v17827_v19  ;;  %v18023_v26 = vand.u32 4294901760, %v2276_v36 }
  0xb5   :  { %15348 = vmatprep.subr.bf16.mxu0 %v15347_v41 }
  0xb6   :  { %v18047_v32 = vsub.f32 %v2276_v36, %v18023_v26  ;;  %v17348_v36 = vld [vmem:[%s22704_s0 + $0x28] sm:$0xff] }
  0xb7   :  { %13940 = vmatmul.mubr.f32.gmra.mrb[2].mxu0 %v17843_v49 }
  0xb8   :  { %15350 = vmatpush3.bf16.msra.mxu0 %v15347_v41  ;;  %13942 = vmatprep.mubr.f32.mxu0 %v17850_v54  ;;  %v2372_v41 = vand.u32 4294901760, %v18011_v24  ;;  %v2402_v43 = vand.u32 4294901760, %v18047_v32 }
  0xb9   :  { %15352 = vmatprep.subr.bf16.mxu0 %v17807_v33 }
  0xba   :  { %v2373_v16 = vsub.f32 %v18011_v24, %v2372_v41  ;;  %v2403_v12 = vsub.f32 %v18047_v32, %v2402_v43 }
  0xbb   :  { %13943 = vmatmul.mubr.f32.gmra.mrb[4].mxu0 %v17860_v58 }
  0xbc   :  { %13953 = vmatprep.mubr.f32.mxu0 %v17822_v44  ;;  %v11974_v44 = vld [vmem:[%s22705_s1 + $0x68] sm:$0xff] }
  0xbd   :  { %v2285_v28 = vand.u32 4294901760, %v11974_v44 }
  0xbf   :  { %13954 = vmatmul.mubr.f32.vlgmr.msra.gmra.mrb[0].mxu0 %v17841_v48  ;;  %v2254_v48 = vrot.slane %v17478_v17, 3  ;;  %v17958_v56 = vpack.c.bf16 %v2285_v28, %v2282_v25  ;;  %v11975_v17 = vld [vmem:[%s22705_s1 + $0x70] sm:$0xff]  ;;  %v2364_v25 = vand.u32 4294901760, %v2363_v3  ;;  %v17350_v3 = vld [vmem:[%s22704_s0 + $0x38] sm:$0xf] }
  0xc0   :  { %15354 = vmatpush3.bf16.msra.mxu0 %v17807_v33  ;;  %13956 = vmatprep.mubr.f32.mxu0 %v17848_v27  ;;  %v2255_v27 = vrot.slane %v17483_v18, 3  ;;  %v2413_v18 = vand.u32 4294901760, %v17945_v2 }
  0xc1   :  { %15356 = vmatprep.subr.bf16.mxu0 %v17838_v45 }
  0xc2   :  { %v2414_v61 = vsub.f32 %v17945_v2, %v2413_v18 }
  0xc3   :  { %13957 = vmatmul.mubr.f32.gmra.mrb[2].mxu0 %v17858_v50  ;;  %v2258_v50 = vsel %vm2246_vm4, %v2255_v27, %v2257_v55  ;;  %v2404_v55 = vand.u32 4294901760, %v2403_v12 }
  0xc4   :  { %15358 = vmatpush3.bf16.msra.mxu0 %v17838_v45  ;;  %13959 = vmatprep.mubr.f32.mxu0 %v17869_v23  ;;  %v2291_v23 = vand.u32 4294901760, %v2279_v46  ;;  %v2415_v10 = vand.u32 4294901760, %v2414_v61 }
  0xc5   :  { %15360 = vmatprep.subr.bf16.mxu0 %v15359_v42 }
  0xc7   :  { %13960 = vmatmul.mubr.f32.gmra.mrb[4].mxu0 %v17884_v8 }
  0xc8   :  { %13970 = vmatprep.mubr.f32.mxu0 %v1611_v52  ;;  %v17952_v52 = vsub.f32 %v11974_v44, %v2285_v28 }
  0xcb   :  { %13971 = vmatmul.mubr.f32.vlgmr.msra.gmra.mrb[0].mxu0 %v1621_v13  ;;  %v2420_v13 = vand.u32 4294901760, %v17952_v52 }
  0xcc   :  { %15362 = vmatpush3.bf16.msra.mxu0 %v15359_v42  ;;  %13973 = vmatprep.mubr.f32.mxu0 %v1631_v62  ;;  %v2288_v62 = vand.u32 4294901760, %v11975_v17 }
  0xcd   :  { %15364 = vmatprep.subr.bf16.mxu0 %v15363_v1  ;;  %v2421_v8 = vsub.f32 %v17952_v52, %v2420_v13 }
  0xce   :  { %v17995_v14 = vsub.f32 %v11975_v17, %v2288_v62  ;;  %v18008_v22 = vpack.c.bf16 %v2291_v23, %v2288_v62 }
  0xcf   :  { %13974 = vmatmul.mubr.f32.gmra.mrb[2].mxu0 %v1641_v6  ;;  %v2274_v6 = vsel %vm73_vm2, %v2258_v50, 0  ;;  %v2422_v53 = vand.u32 4294901760, %v2421_v8  ;;  %v17345_v50 = vld [vmem:[%s22704_s0 + $0x10] sm:$0xff] }
  0xd0   :  { %15366 = vmatpush3.bf16.msra.mxu0 %v15363_v1  ;;  %13976 = vmatprep.mubr.f32.mxu0 %v1651_v5  ;;  %v2352_v5 = vand.u32 4294901760, %v17978_v57  ;;  %v2427_v37 = vand.u32 4294901760, %v17995_v14  ;;  %v2990_v59 = vrot.slane %v17345_v50, 4 }
  0xd1   :  { %15368 = vmatprep.subr.bf16.mxu0 %v17807_v33 }
  0xd2   :  { %v2353_v38 = vsub.f32 %v17978_v57, %v2352_v5  ;;  %v2428_v1 = vsub.f32 %v17995_v14, %v2427_v37 }
  0xd3   :  { %13977 = vmatmul.mubr.f32.gmra.mrb[4].mxu0 %v1661_v29  ;;  %v18013_v29 = vand.u32 4294901760, %v2274_v6 }
  0xd4   :  { %13987 = vmatprep.mubr.f32.mxu0 %v17802_v30  ;;  %v2354_v44 = vand.u32 4294901760, %v2353_v38  ;;  %v2429_v7 = vand.u32 4294901760, %v2428_v1 }
  0xd5   :  { %v18032_v42 = vsub.f32 %v2274_v6, %v18013_v29 }
  0xd7   :  { %13988 = vmatmul.mubr.f32.vlgmr.msra.gmra.mrb[0].mxu0 %v17817_v47 }
  0xd8   :  { %15370 = vmatpush3.bf16.msra.mxu0 %v17807_v33  ;;  %13990 = vmatprep.mubr.f32.mxu0 %v17827_v19  ;;  %v2256_v33 = vsel %vm2246_vm4, %v2254_v48, %v2255_v27 }
  0xd9   :  { %15372 = vmatprep.subr.bf16.mxu0 %v17838_v45  ;;  %v2272_v60 = vsel %vm73_vm2, %v2256_v33, 0  ;;  %v11978_v33 = vld [vmem:[%s22705_s1 + $0x88] sm:$0xff] }
  0xda   :  { %v18005_v21 = vand.u32 4294901760, %v2272_v60 }
  0xdb   :  { %13991 = vmatmul.mubr.f32.gmra.mrb[2].mxu0 %v17843_v49 }
  0xdc   :  { %15374 = vmatpush3.bf16.msra.mxu0 %v17838_v45  ;;  %13993 = vmatprep.mubr.f32.mxu0 %v17850_v54  ;;  %v17997_v45 = vsub.f32 %v2279_v46, %v2291_v23  ;;  %v15407_v46 = vpack.c.bf16 %v2420_v13, %v2413_v18  ;;  %v11977_v13 = vld [vmem:[%s22705_s1 + $0x80] sm:$0xff]  ;;  %v17346_v23 = vld [vmem:[%s22704_s0 + $0x18] sm:$0xf] }
  0xdd   :  { %15376 = vmatprep.subr.bf16.mxu0 %v17958_v56  ;;  %v3022_v61 = vand.u32 4294901760, %v11977_v13 }
  0xde   :  { %v2434_v34 = vand.u32 4294901760, %v17997_v45  ;;  %v15395_v17 = vpack.c.bf16 %v17997_v45, %v17995_v14  ;;  %v2991_v14 = vsel %vm86_vm0, %v2988_v51, %v2990_v59 }
  0xdf   :  { %13994 = vmatmul.mubr.f32.gmra.mrb[4].mxu0 %v17860_v58  ;;  %v18120_v8 = vsub.f32 %v11977_v13, %v3022_v61 }
  0xe0   :  { %14004 = vmatprep.mubr.f32.mxu0 %v17802_v30  ;;  %v18021_v30 = vsub.f32 %v2272_v60, %v18005_v21  ;;  %v3025_v60 = vand.u32 4294901760, %v11978_v33 }
  0xe2   :  { %v2382_v31 = vand.u32 4294901760, %v18021_v30 }
  0xe3   :  { %14005 = vmatmul.mubr.f32.vlgmr.msra.gmra.mrb[0].mxu0 %v17817_v47  ;;  %v15383_v47 = vpack.c.bf16 %v2422_v53, %v2415_v10  ;;  %v2995_v10 = vrot.slane %v17348_v36, 4  ;;  %v17349_v53 = vld [vmem:[%s22704_s0 + $0x30] sm:$0xff] }
  0xe4   :  { %15378 = vmatpush3.bf16.msra.mxu0 %v17958_v56  ;;  %14007 = vmatprep.mubr.f32.mxu0 %v17827_v19  ;;  %v2435_v19 = vsub.f32 %v17997_v45, %v2434_v34  ;;  %v2383_v28 = vsub.f32 %v18021_v30, %v2382_v31  ;;  %v17347_v45 = vld [vmem:[%s22704_s0 + $0x20] sm:$0xff] }
  0xe5   :  { %15380 = vmatprep.subr.bf16.mxu0 %v18008_v22  ;;  %v2994_v15 = vrot.slane %v17347_v45, 4 }
  0xe6   :  { %v2436_v9 = vand.u32 4294901760, %v2435_v19  ;;  %v2384_v11 = vand.u32 4294901760, %v2383_v28 }
  0xe7   :  { %14008 = vmatmul.mubr.f32.gmra.mrb[2].mxu0 %v17843_v49  ;;  %v2392_v49 = vand.u32 4294901760, %v18032_v42 }
  0xe8   :  { %15382 = vmatpush3.bf16.msra.mxu0 %v18008_v22  ;;  %14010 = vmatprep.mubr.f32.mxu0 %v17850_v54  ;;  %v2374_v54 = vand.u32 4294901760, %v2373_v16  ;;  %v15387_v48 = vpack.c.bf16 %v2436_v9, %v2429_v7 }
  0xe9   :  { %15384 = vmatprep.subr.bf16.mxu0 %v15383_v47  ;;  %v2393_v4 = vsub.f32 %v18032_v42, %v2392_v49 }
  0xeb   :  { %14011 = vmatmul.mubr.f32.gmra.mrb[4].mxu0 %v17860_v58  ;;  %v2394_v27 = vand.u32 4294901760, %v2393_v4  ;;  %v15391_v58 = vpack.c.bf16 %v17952_v52, %v17945_v2  ;;  %v15411_v2 = vpack.c.bf16 %v2434_v34, %v2427_v37  ;;  %v17343_v52 = vld [vmem:[%s22704_s0] sm:$0xff]  ;;  %v2997_v37 = vrot.slane %v17349_v53, 4 }
  0xec   :  { %14021 = vmatprep.mubr.f32.mxu0 %v2354_v44  ;;  %v2987_v18 = vrot.slane %v17343_v52, 4  ;;  %v18139_v34 = vpack.c.bf16 %v3025_v60, %v3022_v61 }
  0xed   :  { %v2998_v19 = vsel %vm86_vm0, %v2995_v10, %v2997_v37 }
  0xee   :  { %v2989_v62 = vsel %vm86_vm0, %v2987_v18, %v2988_v51  ;;  %v3014_v28 = vsel %vm73_vm2, %v2998_v19, 0  ;;  %v11981_v19 = vld [vmem:[%s22706_s2] ss:$0 sm:$0xff]  ;;  %s17375_s2 = smov 124  }
  0xef   :  { %14022 = vmatmul.mubr.f32.vlgmr.msra.gmra.mrb[0].mxu0 %v2364_v25  ;;  %v3006_v6 = vsel %vm73_vm2, %v2989_v62, 0 }
  0xf0   :  { %15386 = vmatpush3.bf16.msra.mxu0 %v15383_v47  ;;  %14024 = vmatprep.mubr.f32.mxu0 %v2374_v54 }
  0xf1   :  { %15388 = vmatprep.subr.bf16.mxu0 %v15387_v48 }
  0xf3   :  { %14025 = vmatmul.mubr.f32.gmra.mrb[2].mxu0 %v2384_v11 }
  0xf4   :  { %15390 = vmatpush3.bf16.msra.mxu0 %v15387_v48  ;;  %14027 = vmatprep.mubr.f32.mxu0 %v2394_v27 }
  0xf5   :  { %15392 = vmatprep.subr.bf16.mxu0 %v15391_v58 }
  0xf7   :  { %14028 = vmatmul.mubr.f32.gmra.mrb[4].mxu0 %v2404_v55  ;;  %v18196_v55 = vand.u32 4294901760, %v3014_v28 }
  0xf8   :  { %14038 = vmatprep.mubr.f32.mxu0 %v17960_v40 }
  0xf9   :  { %v18215_v50 = vsub.f32 %v3014_v28, %v18196_v55 }
  0xfb   :  { %14039 = vmatmul.mubr.f32.vlgmr.msra.gmra.mrb[0].mxu0 %v17980_v63 }
  0xfc   :  { %15394 = vmatpush3.bf16.msra.mxu0 %v15391_v58  ;;  %14041 = vmatprep.mubr.f32.mxu0 %v17987_v0 }
  0xfd   :  { %15396 = vmatprep.subr.bf16.mxu0 %v15395_v17 }
  0xff   :  { %14042 = vmatmul.mubr.f32.gmra.mrb[2].mxu0 %v18005_v21 }
 0x100   :  { %15398 = vmatpush3.bf16.msra.mxu0 %v15395_v17  ;;  %14044 = vmatprep.mubr.f32.mxu0 %v18013_v29 }
 0x101   :  { %15400 = vmatprep.subr.bf16.mxu0 %v17958_v56 }
 0x103   :  { %14045 = vmatmul.mubr.f32.gmra.mrb[4].mxu0 %v18023_v26 }
 0x104   :  { %14055 = vmatprep.mubr.f32.mxu0 %v17978_v57  ;;  %v2992_v57 = vrot.slane %v17346_v23, 4 }
 0x107   :  { %14056 = vmatmul.mubr.f32.vlgmr.msra.gmra.mrb[0].mxu0 %v18003_v20  ;;  %v18129_v20 = vsub.f32 %v11978_v33, %v3025_v60 }
 0x108   :  { %15402 = vmatpush3.bf16.msra.mxu0 %v17958_v56  ;;  %14058 = vmatprep.mubr.f32.mxu0 %v18011_v24  ;;  %v2993_v24 = vsel %vm86_vm0, %v2990_v59, %v2992_v57 }
 0x109   :  { %15404 = vmatprep.subr.bf16.mxu0 %v18008_v22  ;;  %v3010_v47 = vsel %vm73_vm2, %v2993_v24, 0  ;;  %v3160_v1 = vand.u32 4294901760, %v18129_v20 }
 0x10a   :  { %v18170_v9 = vand.u32 4294901760, %v3010_v47 }
 0x10b   :  { %14059 = vmatmul.mubr.f32.gmra.mrb[2].mxu0 %v18021_v30  ;;  %v11979_v30 = vld [vmem:[%s22705_s1 + $0x90] sm:$0xff] }
 0x10c   :  { %15406 = vmatpush3.bf16.msra.mxu0 %v18008_v22  ;;  %14061 = vmatprep.mubr.f32.mxu0 %v18032_v42  ;;  %v3008_v42 = vsel %vm73_vm2, %v2991_v14, 0  ;;  %v18194_v58 = vsub.f32 %v3010_v47, %v18170_v9 }
 0x10d   :  { %15408 = vmatprep.subr.bf16.mxu0 %v15407_v46 }
 0x10e   :  { %v3112_v33 = vand.u32 4294901760, %v18194_v58 }
 0x10f   :  { %14062 = vmatmul.mubr.f32.gmra.mrb[4].mxu0 %v18047_v32  ;;  %v3028_v32 = vand.u32 4294901760, %v11979_v30 }
 0x110   :  { %14072 = vmatprep.mubr.f32.mxu0 %v2352_v5  ;;  %v11980_v5 = vld [vmem:[%s22705_s1 + $0x98] sm:$0xf]  ;;  %v3113_v60 = vsub.f32 %v18194_v58, %v3112_v33 }
 0x111   :  { %v3019_v38 = vsel %vm86_vm0, %v11980_v5, 0  ;;  %v18178_v54 = vsub.f32 %v11979_v30, %v3028_v32 }
 0x112   :  { %v3031_v44 = vand.u32 4294901760, %v3019_v38  ;;  %v3114_v24 = vand.u32 4294901760, %v3113_v60 }
 0x113   :  { %14073 = vmatmul.mubr.f32.vlgmr.msra.gmra.mrb[0].mxu0 %v2362_v35  ;;  %v18141_v35 = vand.u32 4294901760, %v3006_v6  ;;  %v3167_v52 = vand.u32 4294901760, %v18178_v54 }
 0x114   :  { %15410 = vmatpush3.bf16.msra.mxu0 %v15407_v46  ;;  %14075 = vmatprep.mubr.f32.mxu0 %v2372_v41  ;;  %v3153_v41 = vand.u32 4294901760, %v18120_v8  ;;  %v18191_v27 = vpack.c.bf16 %v3031_v44, %v3028_v32 }
 0x115   :  { %15412 = vmatprep.subr.bf16.mxu0 %v15411_v2  ;;  %v18161_v16 = vsub.f32 %v3006_v6, %v18141_v35  ;;  %v3168_v59 = vsub.f32 %v18178_v54, %v3167_v52 }
 0x116   :  { %v3154_v7 = vsub.f32 %v18120_v8, %v3153_v41 }
 0x117   :  { %14076 = vmatmul.mubr.f32.gmra.mrb[2].mxu0 %v2382_v31  ;;  %v2999_v31 = vrot.slane %v17350_v3, 4  ;;  %v3092_v48 = vand.u32 4294901760, %v18161_v16  ;;  %v3169_v6 = vand.u32 4294901760, %v3168_v59 }
 0x118   :  { %15414 = vmatpush3.bf16.msra.mxu0 %v15411_v2  ;;  %14078 = vmatprep.mubr.f32.mxu0 %v2392_v49  ;;  %v18163_v49 = vand.u32 4294901760, %v3008_v42  ;;  %v3155_v46 = vand.u32 4294901760, %v3154_v7  ;;  %v18319_v7 = vld [vmem:[%s22707_s3 + $0x80] sm:$0xff] }
 0x119   :  { %15416 = vmatprep.subr.bf16.mxu0 %v17958_v56  ;;  %v3000_v4 = vsel %vm86_vm0, %v2997_v37, %v2999_v31  ;;  %v3093_v13 = vsub.f32 %v18161_v16, %v3092_v48  ;;  %v3890_v28 = vand.u32 4294901760, %v18319_v7 }
 0x11a   :  { %v18186_v11 = vsub.f32 %v3008_v42, %v18163_v49  ;;  %v3016_v17 = vsel %vm73_vm2, %v3000_v4, 0  ;;  %v15455_v42 = vpack.c.bf16 %v3160_v1, %v3153_v41 }
 0x11b   :  { %14079 = vmatmul.mubr.f32.gmra.mrb[4].mxu0 %v2402_v43  ;;  %v3161_v43 = vsub.f32 %v18129_v20, %v3160_v1  ;;  %v18206_v51 = vand.u32 4294901760, %v3016_v17  ;;  %v3094_v61 = vand.u32 4294901760, %v3093_v13  ;;  %v11984_v1 = vld [vmem:[%s22707_s3 + $0x70] sm:$0xff] }
 0x11c   :  { %14089 = vmatprep.mubr.f32.mxu0 %v17960_v40  ;;  %v3102_v39 = vand.u32 4294901760, %v18186_v11  ;;  %v3884_v3 = vand.u32 4294901760, %v11984_v1 }
 0x11d   :  { %v3162_v2 = vand.u32 4294901760, %v3161_v43  ;;  %v18230_v57 = vsub.f32 %v3016_v17, %v18206_v51 }
 0x11e   :  { %v3103_v62 = vsub.f32 %v18186_v11, %v3102_v39 }
 0x11f   :  { %14090 = vmatmul.mubr.f32.vlgmr.msra.gmra.mrb[0].mxu0 %v17980_v63  ;;  %v3142_v5 = vand.u32 4294901760, %v18230_v57 }
 0x120   :  { %15418 = vmatpush3.bf16.msra.mxu0 %v17958_v56  ;;  %14092 = vmatprep.mubr.f32.mxu0 %v17987_v0  ;;  %v2996_v56 = vsel %vm86_vm0, %v2994_v15, %v2995_v10  ;;  %v3104_v45 = vand.u32 4294901760, %v3103_v62 }
 0x121   :  { %15420 = vmatprep.subr.bf16.mxu0 %v18008_v22  ;;  %v3012_v25 = vsel %vm73_vm2, %v2996_v56, 0  ;;  %v3143_v53 = vsub.f32 %v18230_v57, %v3142_v5  ;;  %v11985_v56 = vld [vmem:[%s22707_s3 + $0x78] sm:$0xff] }
 0x122   :  { %v18188_v12 = vand.u32 4294901760, %v3012_v25  ;;  %v3887_v31 = vand.u32 4294901760, %v11985_v56 }
 0x123   :  { %14093 = vmatmul.mubr.f32.gmra.mrb[2].mxu0 %v18005_v21  ;;  %v3144_v30 = vand.u32 4294901760, %v3143_v53 }
 0x124   :  { %15422 = vmatpush3.bf16.msra.mxu0 %v18008_v22  ;;  %14095 = vmatprep.mubr.f32.mxu0 %v18013_v29  ;;  %v18180_v22 = vsub.f32 %v3019_v38, %v3031_v44  ;;  %v18312_v44 = vpack.c.bf16 %v3887_v31, %v3884_v3 }
 0x125   :  { %15424 = vmatprep.subr.bf16.mxu0 %v18139_v34 }
 0x126   :  { %v3174_v18 = vand.u32 4294901760, %v18180_v22  ;;  %v15443_v38 = vpack.c.bf16 %v18180_v22, %v18178_v54 }
 0x127   :  { %14096 = vmatmul.mubr.f32.gmra.mrb[4].mxu0 %v18023_v26 }
 0x128   :  { %14106 = vmatprep.mubr.f32.mxu0 %v17960_v40  ;;  %v18204_v40 = vsub.f32 %v3012_v25, %v18188_v12 }
 0x12a   :  { %v3122_v23 = vand.u32 4294901760, %v18204_v40 }
 0x12b   :  { %14107 = vmatmul.mubr.f32.vlgmr.msra.gmra.mrb[0].mxu0 %v17980_v63  ;;  %v15431_v63 = vpack.c.bf16 %v3162_v2, %v3155_v46  ;;  %v11990_v2 = vld [vmem:[%s22707_s3 + $0xa0] sm:$0xff] }
 0x12c   :  { %15426 = vmatpush3.bf16.msra.mxu0 %v18139_v34  ;;  %14109 = vmatprep.mubr.f32.mxu0 %v17987_v0  ;;  %v3175_v0 = vsub.f32 %v18180_v22, %v3174_v18  ;;  %v3123_v15 = vsub.f32 %v18204_v40, %v3122_v23 }
 0x12d   :  { %15428 = vmatprep.subr.bf16.mxu0 %v18191_v27 }
 0x12e   :  { %v3176_v14 = vand.u32 4294901760, %v3175_v0  ;;  %v3124_v10 = vand.u32 4294901760, %v3123_v15 }
 0x12f   :  { %14110 = vmatmul.mubr.f32.gmra.mrb[2].mxu0 %v18005_v21  ;;  %v3132_v21 = vand.u32 4294901760, %v18215_v50 }
 0x130   :  { %15430 = vmatpush3.bf16.msra.mxu0 %v18191_v27  ;;  %14112 = vmatprep.mubr.f32.mxu0 %v18013_v29  ;;  %v15435_v36 = vpack.c.bf16 %v3176_v14, %v3169_v6  ;;  %v18404_v6 = vsub.f32 %v11984_v1, %v3884_v3  ;;  %v18406_v14 = vsub.f32 %v11985_v56, %v3887_v31 }
 0x131   :  { %15432 = vmatprep.subr.bf16.mxu0 %v15431_v63  ;;  %v3133_v29 = vsub.f32 %v18215_v50, %v3132_v21 }
 0x133   :  { %14113 = vmatmul.mubr.f32.gmra.mrb[4].mxu0 %v18023_v26  ;;  %v3134_v37 = vand.u32 4294901760, %v3133_v29  ;;  %v15439_v26 = vpack.c.bf16 %v18129_v20, %v18120_v8  ;;  %v15459_v8 = vpack.c.bf16 %v3174_v18, %v3167_v52  ;;  %v11982_v20 = vld [vmem:[%s22707_s3 + $0x60] sm:$0xff]  ;;  %v11991_v52 = vld [vmem:[%s22707_s3 + $0xa8] sm:$0xff]  ;;  %v3902_v18 = vand.u32 4294901760, %v11990_v2 }
 0x134   :  { %14123 = vmatprep.mubr.f32.mxu0 %v3094_v61  ;;  %v3878_v41 = vand.u32 4294901760, %v11982_v20  ;;  %v22723_v29 = vand.u32 4294901760, %v18406_v14 }
 0x136   :  { %v4019_v53 = vsub.f32 %v18406_v14, %v22723_v29 }
 0x137   :  { %14124 = vmatmul.mubr.f32.vlgmr.msra.gmra.mrb[0].mxu0 %v3104_v45 }
 0x138   :  { %15434 = vmatpush3.bf16.msra.mxu0 %v15431_v63  ;;  %14126 = vmatprep.mubr.f32.mxu0 %v3114_v24  ;;  %v11993_v63 = vld [vmem:[%s22707_s3 + $0xb8] sm:$0xff]  ;;  %v22726_v24 = vand.u32 4294901760, %v18404_v6 }
 0x139   :  { %15436 = vmatprep.subr.bf16.mxu0 %v15435_v36  ;;  %v3911_v0 = vand.u32 4294901760, %v11993_v63 }
 0x13b   :  { %14127 = vmatmul.mubr.f32.gmra.mrb[2].mxu0 %v3124_v10  ;;  %v4012_v10 = vsub.f32 %v18404_v6, %v22726_v24 }
 0x13c   :  { %15438 = vmatpush3.bf16.msra.mxu0 %v15435_v36  ;;  %14129 = vmatprep.mubr.f32.mxu0 %v3134_v37  ;;  %v18427_v37 = vsub.f32 %v18319_v7, %v3890_v28  ;;  %v18460_v7 = vsub.f32 %v11990_v2, %v3902_v18 }
 0x13d   :  { %15440 = vmatprep.subr.bf16.mxu0 %v15439_v26 }
 0x13f   :  { %14130 = vmatmul.mubr.f32.gmra.mrb[4].mxu0 %v3144_v30  ;;  %v4013_v30 = vand.u32 4294901760, %v4012_v10 }
 0x140   :  { %14140 = vmatprep.mubr.f32.mxu0 %v18141_v35 }
 0x143   :  { %14141 = vmatmul.mubr.f32.vlgmr.msra.gmra.mrb[0].mxu0 %v18163_v49 }
 0x144   :  { %15442 = vmatpush3.bf16.msra.mxu0 %v15439_v26  ;;  %14143 = vmatprep.mubr.f32.mxu0 %v18170_v9 }
 0x145   :  { %15444 = vmatprep.subr.bf16.mxu0 %v15443_v38 }
 0x147   :  { %14144 = vmatmul.mubr.f32.gmra.mrb[2].mxu0 %v18188_v12 }
 0x148   :  { %15446 = vmatpush3.bf16.msra.mxu0 %v15443_v38  ;;  %14146 = vmatprep.mubr.f32.mxu0 %v18196_v55  ;;  %v4020_v38 = vand.u32 4294901760, %v4019_v53 }
 0x149   :  { %15448 = vmatprep.subr.bf16.mxu0 %v18139_v34 }
 0x14b   :  { %14147 = vmatmul.mubr.f32.gmra.mrb[4].mxu0 %v18206_v51 }
 0x14c   :  { %14157 = vmatprep.mubr.f32.mxu0 %v18161_v16 }
 0x14f   :  { %14158 = vmatmul.mubr.f32.vlgmr.msra.gmra.mrb[0].mxu0 %v18186_v11  ;;  %v18346_v11 = vld [vmem:[%s22707_s3 + $0x98] sm:$0xff] }
 0x150   :  { %15450 = vmatpush3.bf16.msra.mxu0 %v18139_v34  ;;  %14160 = vmatprep.mubr.f32.mxu0 %v18194_v58  ;;  %v3899_v58 = vand.u32 4294901760, %v18346_v11 }
 0x151   :  { %15452 = vmatprep.subr.bf16.mxu0 %v18191_v27 }
 0x152   :  { %v18451_v1 = vsub.f32 %v18346_v11, %v3899_v58 }
 0x153   :  { %14161 = vmatmul.mubr.f32.gmra.mrb[2].mxu0 %v18204_v40 }
 0x154   :  { %15454 = vmatpush3.bf16.msra.mxu0 %v18191_v27  ;;  %14163 = vmatprep.mubr.f32.mxu0 %v18215_v50  ;;  %v11992_v50 = vld [vmem:[%s22707_s3 + $0xb0] sm:$0xff]  ;;  %v22718_v31 = vand.u32 4294901760, %v18451_v1 }
 0x155   :  { %15456 = vmatprep.subr.bf16.mxu0 %v15455_v42  ;;  %v3908_v59 = vand.u32 4294901760, %v11992_v50 }
 0x157   :  { %14164 = vmatmul.mubr.f32.gmra.mrb[4].mxu0 %v18230_v57  ;;  %v18394_v57 = vpack.c.bf16 %v3911_v0, %v3908_v59 }
 0x158   :  { %14174 = vmatprep.mubr.f32.mxu0 %v3092_v48  ;;  %v18341_v48 = vld [vmem:[%s22707_s3 + $0x90] sm:$0xff] }
 0x15b   :  { %14175 = vmatmul.mubr.f32.vlgmr.msra.gmra.mrb[0].mxu0 %v3102_v39  ;;  %v3905_v39 = vand.u32 4294901760, %v11991_v52 }
 0x15c   :  { %15458 = vmatpush3.bf16.msra.mxu0 %v15455_v42  ;;  %14177 = vmatprep.mubr.f32.mxu0 %v3112_v33  ;;  %v22721_v42 = vand.u32 4294901760, %v18427_v37 }
 0x15d   :  { %15460 = vmatprep.subr.bf16.mxu0 %v15459_v8  ;;  %v18372_v40 = vpack.c.bf16 %v3905_v39, %v3902_v18 }
 0x15f   :  { %14178 = vmatmul.mubr.f32.gmra.mrb[2].mxu0 %v3122_v23 }
 0x160   :  { %15462 = vmatpush3.bf16.msra.mxu0 %v15459_v8  ;;  %14180 = vmatprep.mubr.f32.mxu0 %v3132_v21 }
 0x161   :  { %15464 = vmatprep.subr.bf16.mxu0 %v18139_v34 }
 0x163   :  { %14181 = vmatmul.mubr.f32.gmra.mrb[4].mxu0 %v3142_v5 }
 0x164   :  { %14191 = vmatprep.mubr.f32.mxu0 %v18141_v35 }
 0x167   :  { %14192 = vmatmul.mubr.f32.vlgmr.msra.gmra.mrb[0].mxu0 %v18163_v49 }
 0x168   :  { %15466 = vmatpush3.bf16.msra.mxu0 %v18139_v34  ;;  %14194 = vmatprep.mubr.f32.mxu0 %v18170_v9  ;;  %v11983_v34 = vld [vmem:[%s22707_s3 + $0x68] sm:$0xff] }
 0x169   :  { %15468 = vmatprep.subr.bf16.mxu0 %v18191_v27 }
 0x16b   :  { %14195 = vmatmul.mubr.f32.gmra.mrb[2].mxu0 %v18188_v12 }
 0x16c   :  { %15470 = vmatpush3.bf16.msra.mxu0 %v18191_v27  ;;  %14197 = vmatprep.mubr.f32.mxu0 %v18196_v55  ;;  %v3896_v27 = vand.u32 4294901760, %v18341_v48 }
 0x16e   :  { %v18358_v17 = vpack.c.bf16 %v3899_v58, %v3896_v27  ;;  %v18475_v58 = vsub.f32 %v11992_v50, %v3908_v59 }
 0x16f   :  { %14198 = vmatmul.mubr.f32.gmra.mrb[4].mxu0 %v18206_v51 }
 0x170   :  { %14208 = vmatprep.mubr.f32.mxu0 %v18141_v35  ;;  %v3881_v35 = vand.u32 4294901760, %v11983_v34  ;;  %v22715_v18 = vand.u32 4294901760, %v18475_v58 }
 0x172   :  { %v18299_v47 = vpack.c.bf16 %v3881_v35, %v3878_v41  ;;  %v18376_v13 = vsub.f32 %v11983_v34, %v3881_v35  ;;  %v4026_v34 = vsub.f32 %v18427_v37, %v22721_v42  ;;  %v18448_v35 = vsub.f32 %v18341_v48, %v3896_v27 }
 0x173   :  { %14209 = vmatmul.mubr.f32.vlgmr.msra.gmra.mrb[0].mxu0 %v18163_v49 }
 0x174   :  { %14211 = vmatprep.mubr.f32.mxu0 %v18170_v9  ;;  %15472 = vmatprep.subr.bf16.mxu1 %v18299_v47  ;;  %v18324_v9 = vld [vmem:[%s22707_s3 + $0x88] sm:$0xff]  ;;  %v4004_v23 = vand.u32 4294901760, %v18376_v13  ;;  %v4027_v56 = vand.u32 4294901760, %v4026_v34  ;;  %v22719_v3 = vand.u32 4294901760, %v18448_v35  ;;  %v18507_v53 = vpack.c.bf16 %v18451_v1, %v18448_v35 }
 0x175   :  { %15474 = vmatpush3.bf16.msra.mxu1 %v18299_v47  ;;  %v3893_v43 = vand.u32 4294901760, %v18324_v9 }
 0x176   :  { %15476 = vmatprep.subr.bf16.mxu1 %v18312_v44  ;;  %v4005_v60 = vsub.f32 %v18376_v13, %v4004_v23 }
 0x177   :  { %14212 = vmatmul.mubr.f32.gmra.mrb[2].mxu0 %v18188_v12  ;;  %v18336_v22 = vpack.c.bf16 %v3893_v43, %v3890_v28  ;;  %v18430_v26 = vsub.f32 %v18324_v9, %v3893_v43  ;;  %v18462_v9 = vsub.f32 %v11991_v52, %v3905_v39  ;;  %v4047_v28 = vsub.f32 %v18451_v1, %v22718_v31 }
 0x178   :  { %14214 = vmatprep.mubr.f32.mxu0 %v18196_v55  ;;  %v4006_v5 = vand.u32 4294901760, %v4005_v60  ;;  %v4068_v60 = vsub.f32 %v18475_v58, %v22715_v18 }
 0x179   :  { %15478 = vmatpush3.bf16.msra.mxu1 %v18312_v44  ;;  %v22720_v8 = vand.u32 4294901760, %v18430_v26  ;;  %v4048_v48 = vand.u32 4294901760, %v4047_v28  ;;  %v18503_v10 = vpack.c.bf16 %v18430_v26, %v18427_v37 }
 0x17a   :  { %15480 = vmatprep.subr.bf16.mxu1 %v18336_v22 }
 0x17b   :  { %14215 = vmatmul.mubr.f32.gmra.mrb[4].mxu0 %v18206_v51  ;;  %v18374_v51 = vsub.f32 %v11982_v20, %v3878_v41  ;;  %v18439_v20 = vpack.c.bf16 %v4020_v38, %v4013_v30  ;;  %v4033_v41 = vsub.f32 %v18430_v26, %v22720_v8  ;;  %v18511_v30 = vpack.c.bf16 %v18462_v9, %v18460_v7 }
 0x17d   :  { %15482 = vmatpush3.bf16.msra.mxu1 %v18336_v22  ;;  %v3997_v62 = vand.u32 4294901760, %v18374_v51 }
 0x17e   :  { %15484 = vmatprep.subr.bf16.mxu1 %v18358_v17 }
 0x17f   :  { %v3998_v61 = vsub.f32 %v18374_v51, %v3997_v62 }
 0x181   :  { %15486 = vmatpush3.bf16.msra.mxu1 %v18358_v17  ;;  %v3999_v15 = vand.u32 4294901760, %v3998_v61 }
 0x182   :  { %15488 = vmatprep.subr.bf16.mxu1 %v18372_v40 }
 0x183   :  { %v18418_v36 = vpack.c.bf16 %v4006_v5, %v3999_v15  ;;  %v18495_v15 = vpack.c.bf16 %v18376_v13, %v18374_v51  ;;  %v18499_v5 = vpack.c.bf16 %v18406_v14, %v18404_v6  ;;  %v23210_v51 = vand.u32 4294901760, %v18427_v37 }
 0x184   :  { %v23211_v13 = vand.u32 4294901760, %v18430_v26  ;;  %v23216_v37 = vand.u32 4294901760, %v18462_v9 }
 0x185   :  { %15490 = vmatpush3.bf16.msra.mxu1 %v18372_v40 }
 0x186   :  { %15492 = vmatprep.subr.bf16.mxu1 %v18394_v57 }
 0x189   :  { %15494 = vmatpush3.bf16.msra.mxu1 %v18394_v57 }
 0x18a   :  { %15496 = vmatprep.subr.bf16.mxu1 %v18418_v36 }
 0x246   :  { %v14210_v32 = vpop.f32.mrb[0].mxu0 }
 0x247   :  { %v18314_v16 = vadd.f32 %v14210_v32, %v11981_v19  ;;  %v3687_v49 = vpop.f32.mrb[1].mxu0 }
 0x248   :  { %v18326_v25 = vadd.f32 %v11981_v19, %v3687_v49  ;;  %v4040_v49 = vsub.f32 %v18448_v35, %v22719_v3 }
 0x249   :  { %3748 = vrot.lane.b32.xlu0 %v18314_v16, %s17375_s2 }
 0x24a   :  { %3764 = vrot.lane.b32.xlu1 %v18326_v25, %s17376_s30  ;;  %v14213_v54 = vpop.f32.mrb[2].mxu0  ;;  %v4041_v43 = vand.u32 4294901760, %v4040_v49 }
 0x24b   :  { %v3699_v4 = vpop.f32.mrb[3].mxu0  ;;  %v18378_v33 = vadd.f32 %v14213_v54, %v11981_v19  ;;  %v22717_v54 = vand.u32 4294901760, %v18460_v7 }
 0x24c   :  { %v18348_v12 = vadd.f32 %v11981_v19, %v3699_v4  ;;  %v22716_v4 = vand.u32 4294901760, %v18462_v9 }
 0x24d   :  { %3746 = vrot.lane.b32.xlu0 %v18326_v25, %s17375_s2  ;;  %v4054_v11 = vsub.f32 %v18460_v7, %v22717_v54 }
 0x24e   :  { %3750 = vrot.lane.b32.xlu1 %v18348_v12, %s17375_s2  ;;  %v14216_v55 = vpop.f32.mrb[4].mxu0  ;;  %v4061_v27 = vsub.f32 %v18462_v9, %v22716_v4  ;;  %v3830_v9 = vld [vmem:[%s22707_s3 + $0x18] sm:$0xff] }
 0x24f   :  { %v3711_v46 = vpop.f32.mrb[5].mxu0  ;;  %v18402_v21 = vadd.f32 %v14216_v55, %v11981_v19  ;;  %v18477_v55 = vsub.f32 %v11993_v63, %v3911_v0  ;;  %v4055_v2 = vand.u32 4294901760, %v4054_v11  ;;  %v4069_v63 = vand.u32 4294901760, %v4068_v60 }
 0x250   :  { %v18408_v45 = vadd.f32 %v11981_v19, %v3711_v46  ;;  %v4034_v19 = vand.u32 4294901760, %v4033_v41  ;;  %v18479_v46 = vpack.c.bf16 %v4048_v48, %v4041_v43  ;;  %v4062_v52 = vand.u32 4294901760, %v4061_v27 }
 0x251   :  { %3766 = vrot.lane.b32.xlu0 %v18314_v16, %s17376_s30  ;;  %v22714_v39 = vand.u32 4294901760, %v18477_v55  ;;  %v18515_v38 = vpack.c.bf16 %v18477_v55, %v18475_v58 }
 0x252   :  { %3768 = vrot.lane.b32.xlu1 %v18348_v12, %s17376_s30  ;;  %v18455_v32 = vpack.c.bf16 %v4034_v19, %v4027_v56  ;;  %v18483_v61 = vpack.c.bf16 %v4062_v52, %v4055_v2 }
 0x253   :  { %v4075_v50 = vsub.f32 %v18477_v55, %v22714_v39 }
 0x255   :  { %3752 = vrot.lane.b32.xlu0 %v18378_v33, %s17375_s2  ;;  %v4076_v59 = vand.u32 4294901760, %v4075_v50 }
 0x256   :  { %3770 = vrot.lane.b32.xlu1 %v18378_v33, %s17376_s30 }
 0x257   :  { %v18491_v0 = vpack.c.bf16 %v4076_v59, %v4069_v63 }
 0x259   :  { %3756 = vrot.lane.b32.xlu0 %v18402_v21, %s17375_s2 }
 0x25a   :  { %3754 = vrot.lane.b32.xlu1 %v18408_v45, %s17375_s2 }
 0x25d   :  { %3772 = vrot.lane.b32.xlu0 %v18408_v45, %s17376_s30 }
 0x25e   :  { %3774 = vrot.lane.b32.xlu1 %v18402_v21, %s17376_s30 }
 0x2bb   :  { %v3749_v34 = vpop.permute.xlu0 %3748 }
 0x2bc   :  { %v3765_v41 = vpop.permute.xlu1 %3764 }
 0x2bf   :  { %v3747_v56 = vpop.permute.xlu0 %3746 }
 0x2c0   :  { %v3783_v19 = vsel %vm3782_vm5, %v3747_v56, %v3765_v41  ;;  %v3751_v49 = vpop.permute.xlu1 %3750 }
 0x2c1   :  { %v3789_v28 = vmax.f32 %v18326_v25, %v3783_v19 }
 0x2c3   :  { %v3767_v43 = vpop.permute.xlu0 %3766  ;;  %v3801_v60 = vrot.slane %v3789_v28, 1 }
 0x2c4   :  { %v3784_v48 = vsel %vm3782_vm5, %v3749_v34, %v3767_v43  ;;  %v3769_v11 = vpop.permute.xlu1 %3768 }
 0x2c5   :  { %v3790_v27 = vmax.f32 %v18314_v16, %v3784_v48  ;;  %v3785_v2 = vsel %vm3782_vm5, %v3751_v49, %v3769_v11 }
 0x2c6   :  { %v3791_v52 = vmax.f32 %v18348_v12, %v3785_v2 }
 0x2c7   :  { %v3802_v50 = vrot.slane %v3790_v27, 1  ;;  %v3753_v63 = vpop.permute.xlu0 %3752 }
 0x2c8   :  { %v3804_v59 = vrot.slane %v3791_v52, 1  ;;  %v3771_v39 = vpop.permute.xlu1 %3770 }
 0x2c9   :  { %v3803_v41 = vsel %vm53_vm1, %v3801_v60, %v3802_v50  ;;  %v3786_v12 = vsel %vm3782_vm5, %v3753_v63, %v3771_v39 }
 0x2ca   :  { %v18524_v56 = vmax.f32 %v3789_v28, %v3803_v41  ;;  %v3805_v25 = vsel %vm53_vm1, %v3802_v50, %v3804_v59  ;;  %v3819_v34 = vsel %vm53_vm1, %v3804_v59, %v3801_v60  ;;  %v3792_v39 = vmax.f32 %v18378_v33, %v3786_v12 }
 0x2cb   :  { %v18528_v19 = vmax.f32 %v3790_v27, %v3805_v25  ;;  %v18530_v16 = vmax.f32 %v3791_v52, %v3819_v34  ;;  %v3757_v49 = vpop.permute.xlu0 %3756 }
 0x2cc   :  { %v3755_v43 = vpop.permute.xlu1 %3754  ;;  %v3845_v48 = vrot.slane %v18524_v56, 2  ;;  %v18536_v11 = vsel %vm3868_vm6, %v18524_v56, 0  ;;  %v5321_v50 = vrot.slane %v18524_v56, 4 }
 0x2cd   :  { %v3848_v28 = vrot.slane %v18530_v16, 2  ;;  %v18541_v2 = vsel %vm3868_vm6, %v18528_v19, 0  ;;  %v18545_v27 = vsel %vm3868_vm6, %v18530_v16, 0  ;;  %v3846_v52 = vrot.slane %v18528_v19, 2 }
 0x2ce   :  { %v5322_v34 = vrot.slane %v18528_v19, 4  ;;  %v6078_v29 = vrot.slane %v18530_v16, 6 }
 0x2cf   :  { %v3773_v60 = vpop.permute.xlu0 %3772  ;;  %v3847_v41 = vsel %vm1505_vm3, %v3845_v48, %v3846_v52  ;;  %v3849_v25 = vsel %vm1505_vm3, %v3846_v52, %v3848_v28 }
 0x2d0   :  { %v3787_v63 = vsel %vm3782_vm5, %v3755_v43, %v3773_v60  ;;  %v3775_v59 = vpop.permute.xlu1 %3774  ;;  %v3869_v54 = vsel %vm3868_vm6, %v3847_v41, 0  ;;  %v3871_v31 = vsel %vm3868_vm6, %v3849_v25, 0  ;;  %v3806_v43 = vrot.slane %v3792_v39, 1 }
 0x2d1   :  { %v3793_v18 = vmax.f32 %v18408_v45, %v3787_v63  ;;  %v3788_v4 = vsel %vm3782_vm5, %v3757_v49, %v3775_v59  ;;  %v18558_v12 = vand.u32 4294901760, %v3869_v54  ;;  %v18561_v3 = vand.u32 4294901760, %v3871_v31 }
 0x2d2   :  { %v3794_v33 = vmax.f32 %v18402_v21, %v3788_v4  ;;  %v5323_v45 = vsel %vm86_vm0, %v5321_v50, %v5322_v34 }
 0x2d3   :  { %v3807_v60 = vrot.slane %v3793_v18, 1  ;;  %v18564_v28 = vsub.f32 %v3869_v54, %v18558_v12  ;;  %v18569_v52 = vsub.f32 %v3871_v31, %v18561_v3 }
 0x2d4   :  { %v3809_v48 = vrot.slane %v3794_v33, 1 }
 0x2d5   :  { %v3808_v49 = vsel %vm53_vm1, %v3806_v43, %v3807_v60  ;;  %v3956_v59 = vand.u32 4294901760, %v18564_v28  ;;  %v22722_v54 = vand.u32 4294901760, %v18569_v52 }
 0x2d6   :  { %v18571_v21 = vmax.f32 %v3792_v39, %v3808_v49  ;;  %v3810_v4 = vsel %vm53_vm1, %v3807_v60, %v3809_v48  ;;  %v3820_v63 = vsel %vm53_vm1, %v3809_v48, %v3806_v43 }
 0x2d7   :  { %v18576_v41 = vmax.f32 %v3793_v18, %v3810_v4  ;;  %v18578_v25 = vmax.f32 %v3794_v33, %v3820_v63  ;;  %v3957_v50 = vsub.f32 %v18564_v28, %v3956_v59  ;;  %v3967_v43 = vsub.f32 %v18569_v52, %v22722_v54 }
 0x2d8   :  { %v3850_v31 = vrot.slane %v18571_v21, 2  ;;  %v5324_v33 = vrot.slane %v18530_v16, 4  ;;  %v18595_v63 = vsel %vm3868_vm6, %v18571_v21, 0 }
 0x2d9   :  { %v3853_v39 = vrot.slane %v18578_v25, 2  ;;  %v3958_v60 = vand.u32 4294901760, %v3957_v50  ;;  %v3851_v18 = vrot.slane %v18576_v41, 2  ;;  %v3968_v48 = vand.u32 4294901760, %v3967_v43 }
 0x2db   :  { %14241 = vmatprep.mubr.f32.mxu1 %v3958_v60  ;;  %v3852_v49 = vsel %vm1505_vm3, %v3850_v31, %v3851_v18  ;;  %v3854_v4 = vsel %vm1505_vm3, %v3851_v18, %v3853_v39  ;;  %v18606_v31 = vsel %vm3868_vm6, %v18576_v41, 0  ;;  %v18609_v39 = vsel %vm3868_vm6, %v5323_v45, 0 }
 0x2dc   :  { %14242 = vmatmul.mubr.f32.vlgmr.msra.gmra.mrb[0].mxu1 %v3968_v48  ;;  %v3873_v8 = vsel %vm3868_vm6, %v3852_v49, 0  ;;  %v3875_v42 = vsel %vm3868_vm6, %v3854_v4, 0  ;;  %v6076_v4 = vrot.slane %v18528_v19, 6 }
 0x2dd   :  { %15498 = vmatpush3.bf16.msra.mxu1 %v18418_v36  ;;  %v18600_v50 = vand.u32 4294901760, %v3873_v8  ;;  %v18602_v43 = vand.u32 4294901760, %v3875_v42  ;;  %v5325_v36 = vsel %vm86_vm0, %v5322_v34, %v5324_v33  ;;  %v5329_v34 = vrot.slane %v18578_v25, 4 }
 0x2de   :  { %15500 = vmatprep.subr.bf16.mxu1 %v18439_v20  ;;  %v18620_v48 = vsel %vm3868_vm6, %v5325_v36, 0  ;;  %v5326_v33 = vrot.slane %v18571_v21, 4 }
 0x2df   :  { %v18613_v60 = vsub.f32 %v3873_v8, %v18600_v50  ;;  %v18616_v18 = vsub.f32 %v3875_v42, %v18602_v43 }
 0x2e1   :  { %15502 = vmatpush3.bf16.msra.mxu1 %v18439_v20  ;;  %v22724_v49 = vand.u32 4294901760, %v18613_v60  ;;  %v22725_v45 = vand.u32 4294901760, %v18616_v18  ;;  %v6075_v20 = vrot.slane %v18524_v56, 6 }
 0x2e2   :  { %15504 = vmatprep.subr.bf16.mxu1 %v18455_v32 }
 0x2e3   :  { %v3977_v8 = vsub.f32 %v18613_v60, %v22724_v49  ;;  %v3987_v42 = vsub.f32 %v18616_v18, %v22725_v45  ;;  %v5327_v49 = vrot.slane %v18576_v41, 4  ;;  %v6077_v56 = vsel %vm6074_vm7, %v6075_v20, %v6076_v4  ;;  %v3833_v20 = vld [vmem:[%s22707_s3 + $0x30] sm:$0xff] }
 0x2e4   :  { %v18653_v16 = vsel %vm3868_vm6, %v6077_v56, 0 }
 0x2e5   :  { %15506 = vmatpush3.bf16.msra.mxu1 %v18455_v32  ;;  %v3978_v36 = vand.u32 4294901760, %v3977_v8  ;;  %v3988_v54 = vand.u32 4294901760, %v3987_v42  ;;  %v5328_v45 = vsel %vm86_vm0, %v5326_v33, %v5327_v49  ;;  %v5330_v24 = vsel %vm86_vm0, %v5327_v49, %v5329_v34  ;;  %v3832_v8 = vld [vmem:[%s22707_s3 + $0x28] sm:$0xff] }
 0x2e6   :  { %15508 = vmatprep.subr.bf16.mxu1 %v18479_v46  ;;  %v18646_v32 = vsel %vm3868_vm6, %v5328_v45, 0  ;;  %v18650_v19 = vsel %vm3868_vm6, %v5330_v24, 0  ;;  %v6080_v24 = vrot.slane %v18571_v21, 6  ;;  %v3831_v45 = vld [vmem:[%s22707_s3 + $0x20] sm:$0xff] }
 0x2e7   :  { %14244 = vmatprep.mubr.f32.mxu1 %v3978_v36  ;;  %v4622_v36 = vand.u32 4294901760, %v3833_v20 }
 0x2e8   :  { %14245 = vmatmul.mubr.f32.gmra.mrb[2].mxu1 %v3988_v54  ;;  %v6079_v54 = vsel %vm6074_vm7, %v6076_v4, %v6078_v29  ;;  %v6081_v29 = vrot.slane %v18576_v41, 6  ;;  %v18684_v41 = vsel %vm3868_vm6, %v18578_v25, 0  ;;  %v3834_v4 = vld [vmem:[%s22707_s3 + $0x38] sm:$0xff] }
 0x2e9   :  { %15510 = vmatpush3.bf16.msra.mxu1 %v18479_v46  ;;  %14271 = vmatprep.mubr.f32.mxu1 %v18558_v12  ;;  %v18657_v49 = vsel %vm3868_vm6, %v6079_v54, 0  ;;  %v6083_v46 = vrot.slane %v18578_v25, 6  ;;  %v23217_v25 = vand.u32 4294901760, %v18475_v58  ;;  %v4625_v56 = vand.u32 4294901760, %v3834_v4  ;;  %v3835_v54 = vld [vmem:[%s22707_s3 + $0x40] sm:$0xff] }
 0x2ea   :  { %15512 = vmatprep.subr.bf16.mxu1 %v18483_v61 }
 0x2ed   :  { %15514 = vmatpush3.bf16.msra.mxu1 %v18483_v61  ;;  %v6082_v61 = vsel %vm6074_vm7, %v6080_v24, %v6081_v29 }
 0x2ee   :  { %15516 = vmatprep.subr.bf16.mxu1 %v18491_v0 }
 0x2f1   :  { %15518 = vmatpush3.bf16.msra.mxu1 %v18491_v0  ;;  %v6084_v0 = vsel %vm6074_vm7, %v6081_v29, %v6083_v46  ;;  %v3836_v46 = vld [vmem:[%s22707_s3 + $0x48] sm:$0xff]  ;;  %v18814_v29 = vand.u32 4294901760, %v18541_v2 }
 0x2f2   :  { %15520 = vmatprep.subr.bf16.mxu1 %v18495_v15  ;;  %v18680_v21 = vsel %vm3868_vm6, %v6084_v0, 0 }
 0x2f4   :  { %14272 = vmatmul.mubr.f32.vlgmr.msra.gmra.mrb[0].mxu1 %v18561_v3 }
 0x2f5   :  { %14274 = vmatprep.mubr.f32.mxu1 %v18600_v50  ;;  %15522 = vmatpush3.bf16.msra.mxu1 %v18495_v15  ;;  %v18677_v15 = vsel %vm3868_vm6, %v6082_v61, 0 }
 0x2f6   :  { %15524 = vmatprep.subr.bf16.mxu1 %v18499_v5 }
 0x2f8   :  { %14275 = vmatmul.mubr.f32.gmra.mrb[2].mxu1 %v18602_v43 }
 0x2f9   :  { %15526 = vmatpush3.bf16.msra.mxu1 %v18499_v5  ;;  %14301 = vmatprep.mubr.f32.mxu1 %v18564_v28  ;;  %v15567_v5 = vpack.c.bf16 %v4004_v23, %v3997_v62  ;;  %v23209_v28 = vand.u32 4294901760, %v18613_v60  ;;  %v15575_v62 = vpack.c.bf16 %v23211_v13, %v23210_v51  ;;  %v23212_v23 = vand.u32 4294901760, %v18616_v18 }
 0x2fa   :  { %15528 = vmatprep.subr.bf16.mxu1 %v18503_v10  ;;  %v18834_v51 = vand.u32 4294901760, %v18595_v63  ;;  %v18838_v13 = vsub.f32 %v18541_v2, %v18814_v29 }
 0x2fd   :  { %15530 = vmatpush3.bf16.msra.mxu1 %v18503_v10  ;;  %v23206_v10 = vand.u32 4294901760, %v18404_v6  ;;  %v23213_v6 = vand.u32 4294901760, %v18448_v35  ;;  %v3827_v35 = vld [vmem:[%s22707_s3] sm:$0xff] }
 0x2fe   :  { %15532 = vmatprep.subr.bf16.mxu1 %v18507_v53 }
 0x301   :  { %15534 = vmatpush3.bf16.msra.mxu1 %v18507_v53  ;;  %v23207_v53 = vand.u32 4294901760, %v18406_v14  ;;  %v23214_v14 = vand.u32 4294901760, %v18451_v1  ;;  %v18759_v1 = vand.u32 4294901760, %v18536_v11 }
 0x302   :  { %15536 = vmatprep.subr.bf16.mxu1 %v18511_v30 }
 0x303   :  { %v18771_v58 = vsub.f32 %v18536_v11, %v18759_v1  ;;  %v4616_v11 = vand.u32 4294901760, %v3831_v45 }
 0x305   :  { %15538 = vmatpush3.bf16.msra.mxu1 %v18511_v30  ;;  %v15571_v30 = vpack.c.bf16 %v23207_v53, %v23206_v10  ;;  %v4682_v42 = vand.u32 4294901760, %v18771_v58  ;;  %v4631_v10 = vand.u32 4294901760, %v3836_v46  ;;  %v18823_v53 = vpack.c.bf16 %v4625_v56, %v4622_v36 }
 0x306   :  { %15540 = vmatprep.subr.bf16.mxu1 %v18515_v38 }
 0x307   :  { %v4683_v33 = vsub.f32 %v18771_v58, %v4682_v42 }
 0x309   :  { %15542 = vmatpush3.bf16.msra.mxu1 %v18515_v38  ;;  %v23208_v38 = vand.u32 4294901760, %v18569_v52 }
 0x30a   :  { %15544 = vmatprep.subr.bf16.mxu1 %v18299_v47 }
 0x30c   :  { %14302 = vmatmul.mubr.f32.vlgmr.msra.gmra.mrb[0].mxu1 %v18569_v52  ;;  %v15579_v52 = vpack.c.bf16 %v23214_v14, %v23213_v6 }
 0x30d   :  { %14304 = vmatprep.mubr.f32.mxu1 %v18613_v60  ;;  %15546 = vmatpush3.bf16.msra.mxu1 %v18299_v47  ;;  %v23218_v60 = vand.u32 4294901760, %v18477_v55 }
 0x30e   :  { %15548 = vmatprep.subr.bf16.mxu1 %v18312_v44 }
 0x310   :  { %14305 = vmatmul.mubr.f32.gmra.mrb[2].mxu1 %v18616_v18  ;;  %v15587_v18 = vpack.c.bf16 %v23218_v60, %v23217_v25  ;;  %v18861_v60 = vsub.f32 %v18595_v63, %v18834_v51 }
 0x311   :  { %15550 = vmatpush3.bf16.msra.mxu1 %v18312_v44  ;;  %14331 = vmatprep.mubr.f32.mxu1 %v3956_v59  ;;  %v23215_v59 = vand.u32 4294901760, %v18460_v7 }
 0x312   :  { %15552 = vmatprep.subr.bf16.mxu1 %v18336_v22 }
 0x313   :  { %v15583_v26 = vpack.c.bf16 %v23216_v37, %v23215_v59 }
 0x315   :  { %15554 = vmatpush3.bf16.msra.mxu1 %v18336_v22 }
 0x316   :  { %15556 = vmatprep.subr.bf16.mxu1 %v18358_v17 }
 0x319   :  { %15558 = vmatpush3.bf16.msra.mxu1 %v18358_v17 }
 0x31a   :  { %15560 = vmatprep.subr.bf16.mxu1 %v18372_v40 }
 0x31d   :  { %15562 = vmatpush3.bf16.msra.mxu1 %v18372_v40 }
 0x31e   :  { %15564 = vmatprep.subr.bf16.mxu1 %v18394_v57 }
 0x321   :  { %15566 = vmatpush3.bf16.msra.mxu1 %v18394_v57 }
 0x322   :  { %15568 = vmatprep.subr.bf16.mxu1 %v15567_v5 }
 0x324   :  { %14332 = vmatmul.mubr.f32.vlgmr.msra.gmra.mrb[0].mxu1 %v23208_v38 }
 0x325   :  { %14334 = vmatprep.mubr.f32.mxu1 %v23209_v28  ;;  %15570 = vmatpush3.bf16.msra.mxu1 %v15567_v5  ;;  %v4628_v5 = vand.u32 4294901760, %v3835_v54  ;;  %v3838_v28 = vld [vmem:[%s22707_s3 + $0x58] sm:$0xff] }
 0x326   :  { %15572 = vmatprep.subr.bf16.mxu1 %v15571_v30  ;;  %v4637_v2 = vand.u32 4294901760, %v3838_v28 }
 0x327   :  { %v18846_v14 = vpack.c.bf16 %v4631_v10, %v4628_v5 }
 0x328   :  { %14335 = vmatmul.mubr.f32.gmra.mrb[2].mxu1 %v23212_v23 }
 0x329   :  { %15574 = vmatpush3.bf16.msra.mxu1 %v15571_v30  ;;  %14361 = vmatprep.mubr.f32.mxu1 %v18558_v12 }
 0x32a   :  { %15576 = vmatprep.subr.bf16.mxu1 %v15575_v62 }
 0x32d   :  { %15578 = vmatpush3.bf16.msra.mxu1 %v15575_v62  ;;  %v18841_v62 = vand.u32 4294901760, %v18606_v31 }
 0x32e   :  { %15580 = vmatprep.subr.bf16.mxu1 %v15579_v52 }
 0x331   :  { %15582 = vmatpush3.bf16.msra.mxu1 %v15579_v52  ;;  %v18848_v52 = vsub.f32 %v3831_v45, %v4616_v11  ;;  %v4702_v45 = vand.u32 4294901760, %v18861_v60 }
 0x332   :  { %15584 = vmatprep.subr.bf16.mxu1 %v15583_v26 }
 0x333   :  { %v22728_v63 = vand.u32 4294901760, %v18848_v52 }
 0x335   :  { %15586 = vmatpush3.bf16.msra.mxu1 %v15583_v26 }
 0x336   :  { %15588 = vmatprep.subr.bf16.mxu1 %v15587_v18 }
 0x339   :  { %15590 = vmatpush3.bf16.msra.mxu1 %v15587_v18  ;;  %v18864_v18 = vand.u32 4294901760, %v18838_v13 }
 0x33a   :  { %15592 = vmatprep.subr.bf16.mxu1 %v18299_v47 }
 0x33c   :  { %14362 = vmatmul.mubr.f32.vlgmr.msra.gmra.mrb[0].mxu1 %v18561_v3 }
 0x33d   :  { %14364 = vmatprep.mubr.f32.mxu1 %v18600_v50  ;;  %15594 = vmatpush3.bf16.msra.mxu1 %v18299_v47  ;;  %v3828_v47 = vld [vmem:[%s22707_s3 + $0x8] sm:$0xff] }
 0x33e   :  { %15596 = vmatprep.subr.bf16.mxu1 %v18312_v44  ;;  %v4607_v7 = vand.u32 4294901760, %v3828_v47 }
 0x340   :  { %14365 = vmatmul.mubr.f32.gmra.mrb[2].mxu1 %v18602_v43 }
 0x341   :  { %15598 = vmatpush3.bf16.msra.mxu1 %v18312_v44  ;;  %14391 = vmatprep.mubr.f32.mxu1 %v18558_v12  ;;  %v4604_v44 = vand.u32 4294901760, %v3827_v35  ;;  %v4613_v12 = vand.u32 4294901760, %v3830_v9 }
 0x342   :  { %15600 = vmatprep.subr.bf16.mxu1 %v18336_v22 }
 0x343   :  { %v18809_v24 = vsub.f32 %v3827_v35, %v4604_v44  ;;  %v18819_v0 = vsub.f32 %v3830_v9, %v4613_v12  ;;  %v18868_v35 = vsub.f32 %v18606_v31, %v18841_v62  ;;  %v18881_v9 = vsub.f32 %v3834_v4, %v4625_v56 }
 0x345   :  { %15602 = vmatpush3.bf16.msra.mxu1 %v18336_v22  ;;  %v3829_v22 = vld [vmem:[%s22707_s3 + $0x10] sm:$0xff]  ;;  %v4723_v30 = vand.u32 4294901760, %v18809_v24  ;;  %v22729_v6 = vand.u32 4294901760, %v18819_v0  ;;  %v22731_v56 = vand.u32 4294901760, %v18881_v9 }
 0x346   :  { %15604 = vmatprep.subr.bf16.mxu1 %v18358_v17  ;;  %v4610_v55 = vand.u32 4294901760, %v3829_v22 }
 0x347   :  { %v4724_v26 = vsub.f32 %v18809_v24, %v4723_v30 }
 0x348   :  { %v18786_v34 = vpack.c.bf16 %v4613_v12, %v4610_v55  ;;  %v18817_v61 = vsub.f32 %v3829_v22, %v4610_v55  ;;  %v18879_v22 = vsub.f32 %v3833_v20, %v4622_v36  ;;  %v4752_v20 = vsub.f32 %v18848_v52, %v22728_v63 }
 0x349   :  { %15606 = vmatpush3.bf16.msra.mxu1 %v18358_v17  ;;  %v18775_v17 = vpack.c.bf16 %v4607_v7, %v4604_v44  ;;  %v4745_v44 = vsub.f32 %v18819_v0, %v22729_v6  ;;  %v4725_v55 = vand.u32 4294901760, %v4724_v26  ;;  %v18902_v26 = vsub.f32 %v3835_v54, %v4628_v5 }
 0x34a   :  { %15608 = vmatprep.subr.bf16.mxu1 %v18372_v40  ;;  %v22730_v23 = vand.u32 4294901760, %v18817_v61  ;;  %v4765_v36 = vand.u32 4294901760, %v18879_v22  ;;  %v4753_v6 = vand.u32 4294901760, %v4752_v20 }
 0x34b   :  { %v4779_v5 = vand.u32 4294901760, %v18902_v26 }
 0x34c   :  { %v4766_v54 = vsub.f32 %v18879_v22, %v4765_v36 }
 0x34d   :  { %15610 = vmatpush3.bf16.msra.mxu1 %v18372_v40  ;;  %v4619_v40 = vand.u32 4294901760, %v3832_v8 }
 0x34e   :  { %15612 = vmatprep.subr.bf16.mxu1 %v18394_v57  ;;  %v4767_v20 = vand.u32 4294901760, %v4766_v54 }
 0x34f   :  { %v18850_v59 = vsub.f32 %v3832_v8, %v4619_v40  ;;  %v4693_v8 = vsub.f32 %v18838_v13, %v18864_v18 }
 0x351   :  { %15614 = vmatpush3.bf16.msra.mxu1 %v18394_v57  ;;  %v18800_v57 = vpack.c.bf16 %v4619_v40, %v4616_v11  ;;  %v18890_v11 = vand.u32 4294901760, %v18868_v35 }
 0x352   :  { %15616 = vmatprep.subr.bf16.mxu1 %v18775_v17 }
 0x354   :  { %14392 = vmatmul.mubr.f32.vlgmr.msra.gmra.mrb[0].mxu1 %v18561_v3  ;;  %v18811_v3 = vsub.f32 %v3828_v47, %v4607_v7  ;;  %v4738_v47 = vsub.f32 %v18817_v61, %v22730_v23  ;;  %v22727_v7 = vand.u32 4294901760, %v18850_v59 }
 0x355   :  { %14394 = vmatprep.mubr.f32.mxu1 %v18600_v50  ;;  %15618 = vmatpush3.bf16.msra.mxu1 %v18775_v17  ;;  %v4684_v50 = vand.u32 4294901760, %v4683_v33  ;;  %v4746_v33 = vand.u32 4294901760, %v4745_v44  ;;  %v18909_v44 = vand.u32 4294901760, %v4693_v8 }
 0x356   :  { %15620 = vmatprep.subr.bf16.mxu1 %v18786_v34  ;;  %v4730_v38 = vand.u32 4294901760, %v18811_v3  ;;  %v4739_v40 = vand.u32 4294901760, %v4738_v47  ;;  %v4759_v4 = vsub.f32 %v18850_v59, %v22727_v7  ;;  %v4703_v47 = vsub.f32 %v18861_v60, %v4702_v45 }
 0x357   :  { %v4713_v7 = vsub.f32 %v18868_v35, %v18890_v11 }
 0x358   :  { %14395 = vmatmul.mubr.f32.gmra.mrb[2].mxu1 %v18602_v43  ;;  %v3837_v43 = vld [vmem:[%s22707_s3 + $0x50] sm:$0xff]  ;;  %v4731_v25 = vsub.f32 %v18811_v3, %v4730_v38  ;;  %v15643_v63 = vpack.c.bf16 %v4746_v33, %v4739_v40  ;;  %v4760_v23 = vand.u32 4294901760, %v4759_v4  ;;  %v4704_v8 = vand.u32 4294901760, %v4703_v47 }
 0x359   :  { %15622 = vmatpush3.bf16.msra.mxu1 %v18786_v34  ;;  %14421 = vmatprep.mubr.f32.mxu1 %v4684_v50  ;;  %v4634_v37 = vand.u32 4294901760, %v3837_v43  ;;  %v18927_v40 = vand.u32 4294901760, %v4713_v7 }
 0x35a   :  { %15624 = vmatprep.subr.bf16.mxu1 %v18800_v57  ;;  %v4732_v12 = vand.u32 4294901760, %v4731_v25  ;;  %v18904_v25 = vsub.f32 %v3836_v46, %v4631_v10  ;;  %v4773_v46 = vsub.f32 %v18881_v9, %v22731_v56  ;;  %v15647_v33 = vpack.c.bf16 %v4760_v23, %v4753_v6 }
 0x35b   :  { %v18884_v31 = vpack.c.bf16 %v4637_v2, %v4634_v37  ;;  %v4780_v56 = vsub.f32 %v18902_v26, %v4779_v5 }
 0x35c   :  { %v15639_v50 = vpack.c.bf16 %v4732_v12, %v4725_v55  ;;  %v4786_v10 = vand.u32 4294901760, %v18904_v25  ;;  %v18922_v55 = vsub.f32 %v3837_v43, %v4634_v37  ;;  %v18924_v12 = vsub.f32 %v3838_v28, %v4637_v2 }
 0x35d   :  { %15626 = vmatpush3.bf16.msra.mxu1 %v18800_v57  ;;  %v4774_v4 = vand.u32 4294901760, %v4773_v46  ;;  %v4781_v6 = vand.u32 4294901760, %v4780_v56  ;;  %v15663_v56 = vpack.c.bf16 %v18811_v3, %v18809_v24  ;;  %v23221_v24 = vand.u32 4294901760, %v18848_v52 }
 0x35e   :  { %15628 = vmatprep.subr.bf16.mxu1 %v18823_v53  ;;  %v4787_v43 = vsub.f32 %v18904_v25, %v4786_v10  ;;  %v4793_v28 = vand.u32 4294901760, %v18922_v55  ;;  %v4800_v37 = vand.u32 4294901760, %v18924_v12  ;;  %v23222_v3 = vand.u32 4294901760, %v18850_v59 }
 0x35f   :  { %v15651_v23 = vpack.c.bf16 %v4774_v4, %v4767_v20  ;;  %v15675_v20 = vpack.c.bf16 %v18881_v9, %v18879_v22  ;;  %v15679_v4 = vpack.c.bf16 %v18904_v25, %v18902_v26  ;;  %v11997_v22 = vld [vmem:[%s22707_s3 + $0xd8] sm:$0xff]  ;;  %v11998_v26 = vld [vmem:[%s22707_s3 + $0xe0] sm:$0xff]  ;;  %v11999_v25 = vld [vmem:[%s22707_s3 + $0xe8] sm:$0xff] }
 0x360   :  { %v4788_v2 = vand.u32 4294901760, %v4787_v43  ;;  %v4794_v7 = vsub.f32 %v18922_v55, %v4793_v28  ;;  %v15683_v43 = vpack.c.bf16 %v18924_v12, %v18922_v55 }
 0x361   :  { %15630 = vmatpush3.bf16.msra.mxu1 %v18823_v53 }
 0x362   :  { %15632 = vmatprep.subr.bf16.mxu1 %v18846_v14  ;;  %v15655_v47 = vpack.c.bf16 %v4788_v2, %v4781_v6  ;;  %v4795_v54 = vand.u32 4294901760, %v4794_v7  ;;  %v12002_v7 = vld [vmem:[%s22707_s3 + $0x100] sm:$0xff] }
 0x365   :  { %15634 = vmatpush3.bf16.msra.mxu1 %v18846_v14 }
 0x366   :  { %15636 = vmatprep.subr.bf16.mxu1 %v18884_v31 }
 0x369   :  { %15638 = vmatpush3.bf16.msra.mxu1 %v18884_v31 }
 0x36a   :  { %15640 = vmatprep.subr.bf16.mxu1 %v15639_v50 }
 0x36c   :  { %14422 = vmatmul.mubr.f32.vlgmr.msra.gmra.mrb[0].mxu1 %v18909_v44 }
 0x36d   :  { %14424 = vmatprep.mubr.f32.mxu1 %v4704_v8  ;;  %15642 = vmatpush3.bf16.msra.mxu1 %v15639_v50  ;;  %v4801_v50 = vsub.f32 %v18924_v12, %v4800_v37  ;;  %v15667_v8 = vpack.c.bf16 %v18819_v0, %v18817_v61  ;;  %v12000_v12 = vld [vmem:[%s22707_s3 + $0xf0] sm:$0xff] }
 0x36e   :  { %15644 = vmatprep.subr.bf16.mxu1 %v15643_v63 }
 0x36f   :  { %v4802_v46 = vand.u32 4294901760, %v4801_v50  ;;  %v12003_v50 = vld [vmem:[%s22707_s3 + $0x108] sm:$0xff] }
 0x370   :  { %14425 = vmatmul.mubr.f32.gmra.mrb[2].mxu1 %v18927_v40 }
 0x371   :  { %15646 = vmatpush3.bf16.msra.mxu1 %v15643_v63  ;;  %14451 = vmatprep.mubr.f32.mxu1 %v18759_v1  ;;  %v15659_v63 = vpack.c.bf16 %v4802_v46, %v4795_v54  ;;  %v19081_v46 = vand.u32 4294901760, %v18620_v48 }
 0x372   :  { %15648 = vmatprep.subr.bf16.mxu1 %v15647_v33 }
 0x375   :  { %15650 = vmatpush3.bf16.msra.mxu1 %v15647_v33  ;;  %v15671_v33 = vpack.c.bf16 %v18850_v59, %v18848_v52  ;;  %v15731_v52 = vpack.c.bf16 %v4800_v37, %v4793_v28  ;;  %v11994_v59 = vld [vmem:[%s22707_s3 + $0xc0] sm:$0xff]  ;;  %v12001_v28 = vld [vmem:[%s22707_s3 + $0xf8] sm:$0xff]  ;;  %v5371_v37 = vand.u32 4294901760, %v12000_v12 }
 0x376   :  { %15652 = vmatprep.subr.bf16.mxu1 %v15651_v23  ;;  %v5374_v2 = vand.u32 4294901760, %v12001_v28 }
 0x379   :  { %15654 = vmatpush3.bf16.msra.mxu1 %v15651_v23  ;;  %v23220_v23 = vand.u32 4294901760, %v18819_v0 }
 0x37a   :  { %15656 = vmatprep.subr.bf16.mxu1 %v15655_v47 }
 0x37d   :  { %15658 = vmatpush3.bf16.msra.mxu1 %v15655_v47 }
 0x37e   :  { %15660 = vmatprep.subr.bf16.mxu1 %v15659_v63 }
 0x381   :  { %15662 = vmatpush3.bf16.msra.mxu1 %v15659_v63  ;;  %v5377_v63 = vand.u32 4294901760, %v12002_v7 }
 0x382   :  { %15664 = vmatprep.subr.bf16.mxu1 %v15663_v56 }
 0x384   :  { %14452 = vmatmul.mubr.f32.vlgmr.msra.gmra.mrb[0].mxu1 %v18814_v29 }
 0x385   :  { %14454 = vmatprep.mubr.f32.mxu1 %v18834_v51  ;;  %15666 = vmatpush3.bf16.msra.mxu1 %v15663_v56  ;;  %v5380_v56 = vand.u32 4294901760, %v12003_v50 }
 0x386   :  { %15668 = vmatprep.subr.bf16.mxu1 %v15667_v8 }
 0x388   :  { %14455 = vmatmul.mubr.f32.gmra.mrb[2].mxu1 %v18841_v62 }
 0x389   :  { %15670 = vmatpush3.bf16.msra.mxu1 %v15667_v8  ;;  %14481 = vmatprep.mubr.f32.mxu1 %v18771_v58  ;;  %v15711_v58 = vpack.c.bf16 %v4730_v38, %v4723_v30  ;;  %v15719_v30 = vpack.c.bf16 %v23222_v3, %v23221_v24  ;;  %v15727_v38 = vpack.c.bf16 %v4786_v10, %v4779_v5  ;;  %v19107_v24 = vand.u32 4294901760, %v18650_v19 }
 0x38a   :  { %15672 = vmatprep.subr.bf16.mxu1 %v15671_v33 }
 0x38d   :  { %15674 = vmatpush3.bf16.msra.mxu1 %v15671_v33 }
 0x38e   :  { %15676 = vmatprep.subr.bf16.mxu1 %v15675_v20 }
 0x391   :  { %15678 = vmatpush3.bf16.msra.mxu1 %v15675_v20  ;;  %v19089_v20 = vpack.c.bf16 %v5374_v2, %v5371_v37 }
 0x392   :  { %15680 = vmatprep.subr.bf16.mxu1 %v15679_v4 }
 0x395   :  { %15682 = vmatpush3.bf16.msra.mxu1 %v15679_v4 }
 0x396   :  { %15684 = vmatprep.subr.bf16.mxu1 %v15683_v43 }
 0x399   :  { %15686 = vmatpush3.bf16.msra.mxu1 %v15683_v43 }
 0x39a   :  { %15688 = vmatprep.subr.bf16.mxu1 %v18775_v17 }
 0x39c   :  { %14482 = vmatmul.mubr.f32.vlgmr.msra.gmra.mrb[0].mxu1 %v18838_v13 }
 0x39d   :  { %14484 = vmatprep.mubr.f32.mxu1 %v18861_v60  ;;  %15690 = vmatpush3.bf16.msra.mxu1 %v18775_v17  ;;  %v19025_v60 = vand.u32 4294901760, %v18609_v39 }
 0x39e   :  { %15692 = vmatprep.subr.bf16.mxu1 %v18786_v34 }
 0x3a0   :  { %14485 = vmatmul.mubr.f32.gmra.mrb[2].mxu1 %v18868_v35 }
 0x3a1   :  { %15694 = vmatpush3.bf16.msra.mxu1 %v18786_v34  ;;  %14511 = vmatprep.mubr.f32.mxu1 %v4682_v42  ;;  %v23219_v42 = vand.u32 4294901760, %v18817_v61  ;;  %v23223_v61 = vand.u32 4294901760, %v18881_v9  ;;  %v19037_v9 = vsub.f32 %v18609_v39, %v19025_v60  ;;  %v5365_v39 = vand.u32 4294901760, %v11998_v26 }
 0x3a2   :  { %15696 = vmatprep.subr.bf16.mxu1 %v18800_v57 }
 0x3a3   :  { %v15715_v6 = vpack.c.bf16 %v23220_v23, %v23219_v42  ;;  %v15723_v0 = vpack.c.bf16 %v23223_v61, %v4765_v36  ;;  %v5362_v36 = vand.u32 4294901760, %v11997_v22  ;;  %v22739_v5 = vand.u32 4294901760, %v19037_v9  ;;  %v12005_v42 = vld [vmem:[%s22707_s3 + $0x118] sm:$0xff] }
 0x3a4   :  { %v19100_v23 = vand.u32 4294901760, %v18646_v32  ;;  %v19109_v3 = vsub.f32 %v11998_v26, %v5365_v39  ;;  %v19114_v61 = vpack.c.bf16 %v5380_v56, %v5377_v63  ;;  %v19143_v26 = vsub.f32 %v12000_v12, %v5371_v37 }
 0x3a5   :  { %15698 = vmatpush3.bf16.msra.mxu1 %v18800_v57  ;;  %v5432_v55 = vsub.f32 %v19037_v9, %v22739_v5  ;;  %v19086_v33 = vsub.f32 %v11997_v22, %v5362_v36 }
 0x3a6   :  { %15700 = vmatprep.subr.bf16.mxu1 %v18823_v53  ;;  %v22736_v22 = vand.u32 4294901760, %v19109_v3 }
 0x3a8   :  { %v5501_v12 = vsub.f32 %v19109_v3, %v22736_v22 }
 0x3a9   :  { %15702 = vmatpush3.bf16.msra.mxu1 %v18823_v53 }
 0x3aa   :  { %15704 = vmatprep.subr.bf16.mxu1 %v18846_v14 }
 0x3ad   :  { %15706 = vmatpush3.bf16.msra.mxu1 %v18846_v14 }
 0x3ae   :  { %15708 = vmatprep.subr.bf16.mxu1 %v18884_v31 }
 0x3b1   :  { %15710 = vmatpush3.bf16.msra.mxu1 %v18884_v31 }
 0x3b2   :  { %15712 = vmatprep.subr.bf16.mxu1 %v15711_v58 }
 0x3b4   :  { %14512 = vmatmul.mubr.f32.vlgmr.msra.gmra.mrb[0].mxu1 %v18864_v18 }
 0x3b5   :  { %14514 = vmatprep.mubr.f32.mxu1 %v4702_v45  ;;  %15714 = vmatpush3.bf16.msra.mxu1 %v15711_v58  ;;  %v12004_v58 = vld [vmem:[%s22707_s3 + $0x110] sm:$0xff] }
 0x3b6   :  { %15716 = vmatprep.subr.bf16.mxu1 %v15715_v6 }
 0x3b8   :  { %14515 = vmatmul.mubr.f32.gmra.mrb[2].mxu1 %v18890_v11 }
 0x3b9   :  { %15718 = vmatpush3.bf16.msra.mxu1 %v15715_v6  ;;  %14541 = vmatprep.mubr.f32.mxu1 %v18759_v1  ;;  %v19104_v6 = vsub.f32 %v18620_v48, %v19081_v46  ;;  %v5386_v48 = vand.u32 4294901760, %v12005_v42 }
 0x3ba   :  { %15720 = vmatprep.subr.bf16.mxu1 %v15719_v30 }
 0x3bd   :  { %15722 = vmatpush3.bf16.msra.mxu1 %v15719_v30 }
 0x3be   :  { %15724 = vmatprep.subr.bf16.mxu1 %v15723_v0 }
 0x3c1   :  { %15726 = vmatpush3.bf16.msra.mxu1 %v15723_v0 }
 0x3c2   :  { %15728 = vmatprep.subr.bf16.mxu1 %v15727_v38 }
 0x3c5   :  { %15730 = vmatpush3.bf16.msra.mxu1 %v15727_v38  ;;  %v22734_v38 = vand.u32 4294901760, %v19086_v33 }
 0x3c6   :  { %15732 = vmatprep.subr.bf16.mxu1 %v15731_v52 }
 0x3c9   :  { %15734 = vmatpush3.bf16.msra.mxu1 %v15731_v52  ;;  %v5383_v52 = vand.u32 4294901760, %v12004_v58 }
 0x3ca   :  { %15736 = vmatprep.subr.bf16.mxu1 %v18775_v17 }
 0x3cc   :  { %14542 = vmatmul.mubr.f32.vlgmr.msra.gmra.mrb[0].mxu1 %v18814_v29 }
 0x3cd   :  { %14544 = vmatprep.mubr.f32.mxu1 %v18834_v51  ;;  %15738 = vmatpush3.bf16.msra.mxu1 %v18775_v17  ;;  %v11995_v17 = vld [vmem:[%s22707_s3 + $0xc8] sm:$0xff] }
 0x3ce   :  { %15740 = vmatprep.subr.bf16.mxu1 %v18786_v34 }
 0x3d0   :  { %14545 = vmatmul.mubr.f32.gmra.mrb[2].mxu1 %v18841_v62 }
 0x3d1   :  { %15742 = vmatpush3.bf16.msra.mxu1 %v18786_v34  ;;  %14571 = vmatprep.mubr.f32.mxu1 %v18759_v1  ;;  %v5353_v1 = vand.u32 4294901760, %v11994_v59  ;;  %v5356_v34 = vand.u32 4294901760, %v11995_v17 }
 0x3d2   :  { %15744 = vmatprep.subr.bf16.mxu1 %v18800_v57 }
 0x3d3   :  { %v19075_v47 = vsub.f32 %v11994_v59, %v5353_v1  ;;  %v19077_v54 = vsub.f32 %v11995_v17, %v5356_v34 }
 0x3d5   :  { %15746 = vmatpush3.bf16.msra.mxu1 %v18800_v57  ;;  %v11996_v57 = vld [vmem:[%s22707_s3 + $0xd0] sm:$0xff]  ;;  %v22738_v4 = vand.u32 4294901760, %v19075_v47  ;;  %v22735_v43 = vand.u32 4294901760, %v19077_v54 }
 0x3d6   :  { %15748 = vmatprep.subr.bf16.mxu1 %v18823_v53  ;;  %v5359_v45 = vand.u32 4294901760, %v11996_v57 }
 0x3d7   :  { %v5473_v59 = vsub.f32 %v19075_v47, %v22738_v4  ;;  %v5480_v17 = vsub.f32 %v19077_v54, %v22735_v43  ;;  %v19167_v43 = vsub.f32 %v12003_v50, %v5380_v56 }
 0x3d8   :  { %v19052_v10 = vpack.c.bf16 %v5362_v36, %v5359_v45  ;;  %v19084_v8 = vsub.f32 %v11996_v57, %v5359_v45  ;;  %v19132_v57 = vsub.f32 %v18650_v19, %v19107_v24  ;;  %v19148_v19 = vpack.c.bf16 %v5386_v48, %v5383_v52 }
 0x3d9   :  { %15750 = vmatpush3.bf16.msra.mxu1 %v18823_v53  ;;  %v19041_v53 = vpack.c.bf16 %v5356_v34, %v5353_v1  ;;  %v19127_v1 = vsub.f32 %v18646_v32, %v19100_v23  ;;  %v22733_v34 = vand.u32 4294901760, %v19104_v6  ;;  %v5494_v32 = vsub.f32 %v19086_v33, %v22734_v38 }
 0x3da   :  { %15752 = vmatprep.subr.bf16.mxu1 %v18846_v14  ;;  %v22732_v0 = vand.u32 4294901760, %v19084_v8  ;;  %v19165_v38 = vsub.f32 %v12002_v7, %v5377_v63  ;;  %v5535_v56 = vand.u32 4294901760, %v19167_v43 }
 0x3dc   :  { %v5487_v36 = vsub.f32 %v19084_v8, %v22732_v0  ;;  %v5461_v0 = vand.u32 4294901760, %v19132_v57  ;;  %v5528_v63 = vand.u32 4294901760, %v19165_v38 }
 0x3dd   :  { %15754 = vmatpush3.bf16.msra.mxu1 %v18846_v14  ;;  %v5368_v14 = vand.u32 4294901760, %v11999_v25 }
 0x3de   :  { %15756 = vmatprep.subr.bf16.mxu1 %v18884_v31  ;;  %v5488_v37 = vand.u32 4294901760, %v5487_v36  ;;  %v5462_v36 = vsub.f32 %v19132_v57, %v5461_v0 }
 0x3df   :  { %v19111_v30 = vsub.f32 %v11999_v25, %v5368_v14  ;;  %v19145_v25 = vsub.f32 %v12001_v28, %v5374_v2  ;;  %v5495_v2 = vand.u32 4294901760, %v5494_v32  ;;  %v5502_v32 = vand.u32 4294901760, %v5501_v12 }
 0x3e0   :  { %v5463_v12 = vand.u32 4294901760, %v5462_v36 }
 0x3e1   :  { %15758 = vmatpush3.bf16.msra.mxu1 %v18884_v31  ;;  %v19066_v31 = vpack.c.bf16 %v5368_v14, %v5365_v39  ;;  %v22737_v45 = vand.u32 4294901760, %v19111_v30  ;;  %v5474_v39 = vand.u32 4294901760, %v5473_v59  ;;  %v5481_v14 = vand.u32 4294901760, %v5480_v17 }
 0x3e2   :  { %15760 = vmatprep.subr.bf16.mxu1 %v19041_v53  ;;  %v5514_v59 = vand.u32 4294901760, %v19143_v26  ;;  %v22740_v17 = vand.u32 4294901760, %v19145_v25  ;;  %v15787_v4 = vpack.c.bf16 %v5495_v2, %v5488_v37 }
 0x3e3   :  { %v5508_v28 = vsub.f32 %v19111_v30, %v22737_v45 }
 0x3e4   :  { %14572 = vmatmul.mubr.f32.vlgmr.msra.gmra.mrb[0].mxu1 %v18814_v29  ;;  %v5515_v7 = vsub.f32 %v19143_v26, %v5514_v59  ;;  %v5522_v50 = vsub.f32 %v19145_v25, %v22740_v17  ;;  %v5529_v17 = vsub.f32 %v19165_v38, %v5528_v63 }
 0x3e5   :  { %14574 = vmatprep.mubr.f32.mxu1 %v18834_v51  ;;  %15762 = vmatpush3.bf16.msra.mxu1 %v19041_v53  ;;  %v5433_v51 = vand.u32 4294901760, %v5432_v55  ;;  %v5451_v55 = vand.u32 4294901760, %v19127_v1  ;;  %v5509_v5 = vand.u32 4294901760, %v5508_v28 }
 0x3e6   :  { %15764 = vmatprep.subr.bf16.mxu1 %v19052_v10  ;;  %v5516_v37 = vand.u32 4294901760, %v5515_v7  ;;  %v5523_v2 = vand.u32 4294901760, %v5522_v50  ;;  %v15811_v50 = vpack.c.bf16 %v19086_v33, %v19084_v8 }
 0x3e7   :  { %v5452_v22 = vsub.f32 %v19127_v1, %v5451_v55  ;;  %v15791_v28 = vpack.c.bf16 %v5509_v5, %v5502_v32 }
 0x3e8   :  { %14575 = vmatmul.mubr.f32.gmra.mrb[2].mxu1 %v18841_v62  ;;  %v15795_v5 = vpack.c.bf16 %v5523_v2, %v5516_v37  ;;  %v23224_v2 = vand.u32 4294901760, %v19037_v9 }
 0x3e9   :  { %15766 = vmatpush3.bf16.msra.mxu1 %v19052_v10  ;;  %14601 = vmatprep.mubr.f32.mxu1 %v5433_v51  ;;  %v5442_v51 = vsub.f32 %v19104_v6, %v22733_v34  ;;  %v15783_v34 = vpack.c.bf16 %v5481_v14, %v5474_v39  ;;  %v19184_v39 = vsub.f32 %v12004_v58, %v5383_v52 }
 0x3ea   :  { %15768 = vmatprep.subr.bf16.mxu1 %v19066_v31  ;;  %v19186_v14 = vsub.f32 %v12005_v42, %v5386_v48  ;;  %v5536_v58 = vsub.f32 %v19167_v43, %v5535_v56  ;;  %v5530_v48 = vand.u32 4294901760, %v5529_v17  ;;  %v15807_v17 = vpack.c.bf16 %v19077_v54, %v19075_v47 }
 0x3eb   :  { %v5443_v45 = vand.u32 4294901760, %v5442_v51  ;;  %v5453_v51 = vand.u32 4294901760, %v5452_v22  ;;  %v5542_v42 = vand.u32 4294901760, %v19184_v39 }
 0x3ec   :  { %v5549_v52 = vand.u32 4294901760, %v19186_v14  ;;  %v15827_v37 = vpack.c.bf16 %v19186_v14, %v19184_v39 }
 0x3ed   :  { %15770 = vmatpush3.bf16.msra.mxu1 %v19066_v31  ;;  %v5543_v22 = vsub.f32 %v19184_v39, %v5542_v42  ;;  %v12013_v39 = vld [vmem:[%s22707_s3 + $0x158] sm:$0xff] }
 0x3ee   :  { %15772 = vmatprep.subr.bf16.mxu1 %v19089_v20 }
 0x3ef   :  { %v5544_v32 = vand.u32 4294901760, %v5543_v22 }
 0x3f1   :  { %15774 = vmatpush3.bf16.msra.mxu1 %v19089_v20 }
 0x3f2   :  { %15776 = vmatprep.subr.bf16.mxu1 %v19114_v61 }
 0x3f5   :  { %15778 = vmatpush3.bf16.msra.mxu1 %v19114_v61 }
 0x3f6   :  { %15780 = vmatprep.subr.bf16.mxu1 %v19148_v19 }
 0x3f9   :  { %15782 = vmatpush3.bf16.msra.mxu1 %v19148_v19 }
 0x3fa   :  { %15784 = vmatprep.subr.bf16.mxu1 %v15783_v34 }
 0x3fc   :  { %14602 = vmatmul.mubr.f32.vlgmr.msra.gmra.mrb[0].mxu1 %v5443_v45  ;;  %v5550_v45 = vsub.f32 %v19186_v14, %v5549_v52 }
 0x3fd   :  { %14604 = vmatprep.mubr.f32.mxu1 %v5453_v51  ;;  %15786 = vmatpush3.bf16.msra.mxu1 %v15783_v34  ;;  %v5537_v34 = vand.u32 4294901760, %v5536_v58  ;;  %v15815_v51 = vpack.c.bf16 %v19111_v30, %v19109_v3  ;;  %v23225_v58 = vand.u32 4294901760, %v19075_v47  ;;  %v23230_v47 = vand.u32 4294901760, %v19109_v3 }
 0x3fe   :  { %15788 = vmatprep.subr.bf16.mxu1 %v15787_v4  ;;  %v5551_v7 = vand.u32 4294901760, %v5550_v45  ;;  %v23229_v45 = vand.u32 4294901760, %v19104_v6  ;;  %v15875_v3 = vpack.c.bf16 %v5549_v52, %v5542_v42  ;;  %v6128_v42 = vand.u32 4294901760, %v12013_v39  ;;  %v12014_v52 = vld [vmem:[%s22707_s3 + $0x160] sm:$0xff] }
 0x3ff   :  { %v15799_v36 = vpack.c.bf16 %v5537_v34, %v5530_v48  ;;  %v23227_v48 = vand.u32 4294901760, %v19084_v8  ;;  %v23228_v34 = vand.u32 4294901760, %v19086_v33  ;;  %v23232_v8 = vand.u32 4294901760, %v19145_v25 }
 0x400   :  { %14605 = vmatmul.mubr.f32.gmra.mrb[2].mxu1 %v5463_v12  ;;  %v15819_v12 = vpack.c.bf16 %v19145_v25, %v19143_v26  ;;  %v12010_v26 = vld [vmem:[%s22707_s3 + $0x140] sm:$0xff]  ;;  %v12011_v25 = vld [vmem:[%s22707_s3 + $0x148] sm:$0xff] }
 0x401   :  { %15790 = vmatpush3.bf16.msra.mxu1 %v15787_v4  ;;  %14631 = vmatprep.mubr.f32.mxu1 %v19025_v60  ;;  %v15803_v4 = vpack.c.bf16 %v5551_v7, %v5544_v32  ;;  %v15859_v22 = vpack.c.bf16 %v23228_v34, %v23227_v48  ;;  %v15867_v33 = vpack.c.bf16 %v23232_v8, %v5514_v59  ;;  %v12015_v32 = vld [vmem:[%s22707_s3 + $0x168] sm:$0xff]  ;;  %v19367_v48 = vand.u32 4294901760, %v18680_v21 }
 0x402   :  { %15792 = vmatprep.subr.bf16.mxu1 %v15791_v28 }
 0x405   :  { %15794 = vmatpush3.bf16.msra.mxu1 %v15791_v28  ;;  %v15823_v28 = vpack.c.bf16 %v19167_v43, %v19165_v38  ;;  %v12006_v43 = vld [vmem:[%s22707_s3 + $0x120] sm:$0xff] }
 0x406   :  { %15796 = vmatprep.subr.bf16.mxu1 %v15795_v5 }
 0x409   :  { %15798 = vmatpush3.bf16.msra.mxu1 %v15795_v5  ;;  %v23226_v5 = vand.u32 4294901760, %v19077_v54  ;;  %v23231_v54 = vand.u32 4294901760, %v19111_v30  ;;  %v19285_v30 = vand.u32 4294901760, %v18653_v16 }
 0x40a   :  { %15800 = vmatprep.subr.bf16.mxu1 %v15799_v36 }
 0x40b   :  { %v19297_v38 = vsub.f32 %v18653_v16, %v19285_v30  ;;  %v6119_v16 = vand.u32 4294901760, %v12010_v26 }
 0x40d   :  { %15802 = vmatpush3.bf16.msra.mxu1 %v15799_v36  ;;  %v15863_v36 = vpack.c.bf16 %v23231_v54, %v23230_v47  ;;  %v19369_v34 = vsub.f32 %v12010_v26, %v6119_v16 }
 0x40e   :  { %15804 = vmatprep.subr.bf16.mxu1 %v15803_v4 }
 0x411   :  { %15806 = vmatpush3.bf16.msra.mxu1 %v15803_v4  ;;  %v19341_v4 = vand.u32 4294901760, %v18657_v49 }
 0x412   :  { %15808 = vmatprep.subr.bf16.mxu1 %v15807_v17 }
 0x414   :  { %14632 = vmatmul.mubr.f32.vlgmr.msra.gmra.mrb[0].mxu1 %v19081_v46 }
 0x415   :  { %14634 = vmatprep.mubr.f32.mxu1 %v19100_v23  ;;  %15810 = vmatpush3.bf16.msra.mxu1 %v15807_v17  ;;  %v6131_v17 = vand.u32 4294901760, %v12014_v52 }
 0x416   :  { %15812 = vmatprep.subr.bf16.mxu1 %v15811_v50 }
 0x418   :  { %14635 = vmatmul.mubr.f32.gmra.mrb[2].mxu1 %v19107_v24 }
 0x419   :  { %15814 = vmatpush3.bf16.msra.mxu1 %v15811_v50  ;;  %14661 = vmatprep.mubr.f32.mxu1 %v19037_v9  ;;  %v15855_v9 = vpack.c.bf16 %v23226_v5, %v23225_v58  ;;  %v6134_v50 = vand.u32 4294901760, %v12015_v32  ;;  %v12017_v58 = vld [vmem:[%s22707_s3 + $0x178] sm:$0xff]  ;;  %v19360_v5 = vand.u32 4294901760, %v18677_v15 }
 0x41a   :  { %15816 = vmatprep.subr.bf16.mxu1 %v15815_v51 }
 0x41d   :  { %15818 = vmatpush3.bf16.msra.mxu1 %v15815_v51 }
 0x41e   :  { %15820 = vmatprep.subr.bf16.mxu1 %v15819_v12 }
 0x421   :  { %15822 = vmatpush3.bf16.msra.mxu1 %v15819_v12 }
 0x422   :  { %15824 = vmatprep.subr.bf16.mxu1 %v15823_v28 }
 0x425   :  { %15826 = vmatpush3.bf16.msra.mxu1 %v15823_v28 }
 0x426   :  { %15828 = vmatprep.subr.bf16.mxu1 %v15827_v37 }
 0x429   :  { %15830 = vmatpush3.bf16.msra.mxu1 %v15827_v37 }
 0x42a   :  { %15832 = vmatprep.subr.bf16.mxu1 %v19041_v53 }
 0x42c   :  { %14662 = vmatmul.mubr.f32.vlgmr.msra.gmra.mrb[0].mxu1 %v19104_v6  ;;  %v15871_v6 = vpack.c.bf16 %v5535_v56, %v5528_v63  ;;  %v12012_v56 = vld [vmem:[%s22707_s3 + $0x150] sm:$0xff] }
 0x42d   :  { %14664 = vmatprep.mubr.f32.mxu1 %v19127_v1  ;;  %15834 = vmatpush3.bf16.msra.mxu1 %v19041_v53  ;;  %v6125_v14 = vand.u32 4294901760, %v12012_v56 }
 0x42e   :  { %15836 = vmatprep.subr.bf16.mxu1 %v19052_v10 }
 0x42f   :  { %v19349_v28 = vpack.c.bf16 %v6128_v42, %v6125_v14 }
 0x430   :  { %14665 = vmatmul.mubr.f32.gmra.mrb[2].mxu1 %v19132_v57 }
 0x431   :  { %15838 = vmatpush3.bf16.msra.mxu1 %v19052_v10  ;;  %14691 = vmatprep.mubr.f32.mxu1 %v23224_v2  ;;  %v12016_v2 = vld [vmem:[%s22707_s3 + $0x170] sm:$0xff] }
 0x432   :  { %15840 = vmatprep.subr.bf16.mxu1 %v19066_v31 }
 0x435   :  { %15842 = vmatpush3.bf16.msra.mxu1 %v19066_v31 }
 0x436   :  { %15844 = vmatprep.subr.bf16.mxu1 %v19089_v20 }
 0x439   :  { %15846 = vmatpush3.bf16.msra.mxu1 %v19089_v20 }
 0x43a   :  { %15848 = vmatprep.subr.bf16.mxu1 %v19114_v61 }
 0x43d   :  { %15850 = vmatpush3.bf16.msra.mxu1 %v19114_v61 }
 0x43e   :  { %15852 = vmatprep.subr.bf16.mxu1 %v19148_v19 }
 0x441   :  { %15854 = vmatpush3.bf16.msra.mxu1 %v19148_v19 }
 0x442   :  { %15856 = vmatprep.subr.bf16.mxu1 %v15855_v9 }
 0x444   :  { %14692 = vmatmul.mubr.f32.vlgmr.msra.gmra.mrb[0].mxu1 %v23229_v45  ;;  %v19374_v45 = vpack.c.bf16 %v6134_v50, %v6131_v17 }
 0x445   :  { %14694 = vmatprep.mubr.f32.mxu1 %v5451_v55  ;;  %15858 = vmatpush3.bf16.msra.mxu1 %v15855_v9  ;;  %v6185_v55 = vand.u32 4294901760, %v19297_v38  ;;  %v19364_v9 = vsub.f32 %v18657_v49, %v19341_v4  ;;  %v6140_v49 = vand.u32 4294901760, %v12017_v58 }
 0x446   :  { %15860 = vmatprep.subr.bf16.mxu1 %v15859_v22 }
 0x447   :  { %v6186_v63 = vsub.f32 %v19297_v38, %v6185_v55 }
 0x448   :  { %14695 = vmatmul.mubr.f32.gmra.mrb[2].mxu1 %v5461_v0  ;;  %v12009_v0 = vld [vmem:[%s22707_s3 + $0x138] sm:$0xff] }
 0x449   :  { %15862 = vmatpush3.bf16.msra.mxu1 %v15859_v22  ;;  %14721 = vmatprep.mubr.f32.mxu1 %v19025_v60  ;;  %v6116_v57 = vand.u32 4294901760, %v12009_v0 }
 0x44a   :  { %15864 = vmatprep.subr.bf16.mxu1 %v15863_v36 }
 0x44b   :  { %v19346_v12 = vsub.f32 %v12009_v0, %v6116_v57  ;;  %v19405_v0 = vsub.f32 %v12013_v39, %v6128_v42 }
 0x44d   :  { %15866 = vmatpush3.bf16.msra.mxu1 %v15863_v36  ;;  %v22744_v54 = vand.u32 4294901760, %v19346_v12  ;;  %v6137_v36 = vand.u32 4294901760, %v12016_v2  ;;  %v22745_v42 = vand.u32 4294901760, %v19405_v0 }
 0x44e   :  { %15868 = vmatprep.subr.bf16.mxu1 %v15867_v33 }
 0x451   :  { %15870 = vmatpush3.bf16.msra.mxu1 %v15867_v33 }
 0x452   :  { %15872 = vmatprep.subr.bf16.mxu1 %v15871_v6 }
 0x455   :  { %15874 = vmatpush3.bf16.msra.mxu1 %v15871_v6  ;;  %v19387_v6 = vsub.f32 %v18677_v15, %v19360_v5  ;;  %v6248_v15 = vsub.f32 %v19346_v12, %v22744_v54 }
 0x456   :  { %15876 = vmatprep.subr.bf16.mxu1 %v15875_v3 }
 0x457   :  { %v6205_v26 = vand.u32 4294901760, %v19387_v6  ;;  %v6249_v39 = vand.u32 4294901760, %v6248_v15 }
 0x459   :  { %15878 = vmatpush3.bf16.msra.mxu1 %v15875_v3  ;;  %v22743_v3 = vand.u32 4294901760, %v19364_v9 }
 0x45a   :  { %15880 = vmatprep.subr.bf16.mxu1 %v19041_v53 }
 0x45c   :  { %14722 = vmatmul.mubr.f32.vlgmr.msra.gmra.mrb[0].mxu1 %v19081_v46 }
 0x45d   :  { %14724 = vmatprep.mubr.f32.mxu1 %v19100_v23  ;;  %15882 = vmatpush3.bf16.msra.mxu1 %v19041_v53  ;;  %v12007_v53 = vld [vmem:[%s22707_s3 + $0x128] sm:$0xff] }
 0x45e   :  { %15884 = vmatprep.subr.bf16.mxu1 %v19052_v10 }
 0x460   :  { %14725 = vmatmul.mubr.f32.gmra.mrb[2].mxu1 %v19107_v24 }
 0x461   :  { %15886 = vmatpush3.bf16.msra.mxu1 %v19052_v10  ;;  %14751 = vmatprep.mubr.f32.mxu1 %v19025_v60  ;;  %v6107_v60 = vand.u32 4294901760, %v12006_v43  ;;  %v6110_v10 = vand.u32 4294901760, %v12007_v53 }
 0x462   :  { %15888 = vmatprep.subr.bf16.mxu1 %v19066_v31 }
 0x463   :  { %v19335_v7 = vsub.f32 %v12006_v43, %v6107_v60  ;;  %v19392_v43 = vsub.f32 %v18680_v21, %v19367_v48  ;;  %v19408_v21 = vpack.c.bf16 %v6140_v49, %v6137_v36 }
 0x465   :  { %15890 = vmatpush3.bf16.msra.mxu1 %v19066_v31  ;;  %v12008_v31 = vld [vmem:[%s22707_s3 + $0x130] sm:$0xff]  ;;  %v6226_v37 = vand.u32 4294901760, %v19335_v7 }
 0x466   :  { %15892 = vmatprep.subr.bf16.mxu1 %v19089_v20  ;;  %v6113_v1 = vand.u32 4294901760, %v12008_v31 }
 0x467   :  { %v6227_v8 = vsub.f32 %v19335_v7, %v6226_v37 }
 0x468   :  { %v19312_v59 = vpack.c.bf16 %v6116_v57, %v6113_v1  ;;  %v19344_v51 = vsub.f32 %v12008_v31, %v6113_v1  ;;  %v19403_v31 = vsub.f32 %v12012_v56, %v6125_v14 }
 0x469   :  { %15894 = vmatpush3.bf16.msra.mxu1 %v19089_v20  ;;  %v19301_v20 = vpack.c.bf16 %v6110_v10, %v6107_v60  ;;  %v6228_v1 = vand.u32 4294901760, %v6227_v8  ;;  %v19425_v8 = vsub.f32 %v12014_v52, %v6131_v17 }
 0x46a   :  { %15896 = vmatprep.subr.bf16.mxu1 %v19114_v61  ;;  %v6240_v47 = vand.u32 4294901760, %v19344_v51  ;;  %v6268_v14 = vand.u32 4294901760, %v19403_v31 }
 0x46b   :  { %v6282_v17 = vand.u32 4294901760, %v19425_v8 }
 0x46c   :  { %v6269_v52 = vsub.f32 %v19403_v31, %v6268_v14 }
 0x46d   :  { %15898 = vmatpush3.bf16.msra.mxu1 %v19114_v61  ;;  %v6122_v61 = vand.u32 4294901760, %v12011_v25 }
 0x46e   :  { %15900 = vmatprep.subr.bf16.mxu1 %v19148_v19 }
 0x46f   :  { %v19371_v22 = vsub.f32 %v12011_v25, %v6122_v61  ;;  %v6196_v25 = vsub.f32 %v19364_v9, %v22743_v3 }
 0x471   :  { %15902 = vmatpush3.bf16.msra.mxu1 %v19148_v19  ;;  %v19326_v19 = vpack.c.bf16 %v6122_v61, %v6119_v16  ;;  %v22742_v60 = vand.u32 4294901760, %v19371_v22  ;;  %v6215_v16 = vand.u32 4294901760, %v19392_v43 }
 0x472   :  { %15904 = vmatprep.subr.bf16.mxu1 %v19301_v20 }
 0x474   :  { %14752 = vmatmul.mubr.f32.vlgmr.msra.gmra.mrb[0].mxu1 %v19081_v46  ;;  %v19337_v46 = vsub.f32 %v12007_v53, %v6110_v10  ;;  %v22741_v53 = vand.u32 4294901760, %v19369_v34  ;;  %v6241_v10 = vsub.f32 %v19344_v51, %v6240_v47 }
 0x475   :  { %14754 = vmatprep.mubr.f32.mxu1 %v19100_v23  ;;  %15906 = vmatpush3.bf16.msra.mxu1 %v19301_v20  ;;  %v6187_v23 = vand.u32 4294901760, %v6186_v63  ;;  %v6262_v63 = vsub.f32 %v19371_v22, %v22742_v60  ;;  %v6197_v60 = vand.u32 4294901760, %v6196_v25 }
 0x476   :  { %15908 = vmatprep.subr.bf16.mxu1 %v19312_v59  ;;  %v6255_v61 = vsub.f32 %v19369_v34, %v22741_v53  ;;  %v6242_v56 = vand.u32 4294901760, %v6241_v10  ;;  %v6206_v53 = vsub.f32 %v19387_v6, %v6205_v26  ;;  %v6216_v10 = vsub.f32 %v19392_v43, %v6215_v16 }
 0x477   :  { %v6263_v54 = vand.u32 4294901760, %v6262_v63 }
 0x478   :  { %14755 = vmatmul.mubr.f32.gmra.mrb[2].mxu1 %v19107_v24  ;;  %v6233_v24 = vand.u32 4294901760, %v19337_v46  ;;  %v6256_v15 = vand.u32 4294901760, %v6255_v61  ;;  %v15931_v3 = vpack.c.bf16 %v6249_v39, %v6242_v56  ;;  %v6207_v25 = vand.u32 4294901760, %v6206_v53 }
 0x479   :  { %15910 = vmatpush3.bf16.msra.mxu1 %v19312_v59  ;;  %14781 = vmatprep.mubr.f32.mxu1 %v6187_v23  ;;  %v6217_v61 = vand.u32 4294901760, %v6216_v10  ;;  %v6270_v56 = vand.u32 4294901760, %v6269_v52 }
 0x47a   :  { %15912 = vmatprep.subr.bf16.mxu1 %v19326_v19  ;;  %v6234_v33 = vsub.f32 %v19337_v46, %v6233_v24  ;;  %v15935_v63 = vpack.c.bf16 %v6263_v54, %v6256_v15 }
 0x47c   :  { %v6235_v57 = vand.u32 4294901760, %v6234_v33  ;;  %v19427_v33 = vsub.f32 %v12015_v32, %v6134_v50  ;;  %v6276_v32 = vsub.f32 %v19405_v0, %v22745_v42  ;;  %v6283_v42 = vsub.f32 %v19425_v8, %v6282_v17 }
 0x47d   :  { %15914 = vmatpush3.bf16.msra.mxu1 %v19326_v19 }
 0x47e   :  { %15916 = vmatprep.subr.bf16.mxu1 %v19349_v28  ;;  %v15927_v23 = vpack.c.bf16 %v6235_v57, %v6228_v1  ;;  %v6289_v50 = vand.u32 4294901760, %v19427_v33  ;;  %v19444_v1 = vsub.f32 %v12016_v2, %v6137_v36  ;;  %v19446_v57 = vsub.f32 %v12017_v58, %v6140_v49 }
 0x47f   :  { %v6277_v39 = vand.u32 4294901760, %v6276_v32  ;;  %v6284_v49 = vand.u32 4294901760, %v6283_v42  ;;  %v15951_v42 = vpack.c.bf16 %v19337_v46, %v19335_v7  ;;  %v15955_v32 = vpack.c.bf16 %v19346_v12, %v19344_v51 }
 0x480   :  { %v6290_v2 = vsub.f32 %v19427_v33, %v6289_v50  ;;  %v6296_v58 = vand.u32 4294901760, %v19444_v1  ;;  %v6303_v36 = vand.u32 4294901760, %v19446_v57  ;;  %v23235_v7 = vand.u32 4294901760, %v19369_v34 }
 0x481   :  { %15918 = vmatpush3.bf16.msra.mxu1 %v19349_v28  ;;  %v15939_v54 = vpack.c.bf16 %v6277_v39, %v6270_v56  ;;  %v15971_v56 = vpack.c.bf16 %v19446_v57, %v19444_v1  ;;  %v23236_v46 = vand.u32 4294901760, %v19371_v22  ;;  %v23237_v51 = vand.u32 4294901760, %v19405_v0 }
 0x482   :  { %15920 = vmatprep.subr.bf16.mxu1 %v19374_v45  ;;  %v6291_v53 = vand.u32 4294901760, %v6290_v2  ;;  %v23234_v2 = vand.u32 4294901760, %v19364_v9 }
 0x484   :  { %v15943_v10 = vpack.c.bf16 %v6291_v53, %v6284_v49 }
 0x485   :  { %15922 = vmatpush3.bf16.msra.mxu1 %v19374_v45 }
 0x486   :  { %15924 = vmatprep.subr.bf16.mxu1 %v19408_v21 }
 0x489   :  { %15926 = vmatpush3.bf16.msra.mxu1 %v19408_v21 }
 0x48a   :  { %15928 = vmatprep.subr.bf16.mxu1 %v15927_v23 }
 0x48c   :  { %14782 = vmatmul.mubr.f32.vlgmr.msra.gmra.mrb[0].mxu1 %v6197_v60  ;;  %v6297_v60 = vsub.f32 %v19444_v1, %v6296_v58 }
 0x48d   :  { %14784 = vmatprep.mubr.f32.mxu1 %v6207_v25  ;;  %15930 = vmatpush3.bf16.msra.mxu1 %v15927_v23  ;;  %v6304_v23 = vsub.f32 %v19446_v57, %v6303_v36  ;;  %v15959_v25 = vpack.c.bf16 %v19371_v22, %v19369_v34  ;;  %v12018_v34 = vld [vmem:[%s22707_s3 + $0x180] sm:$0xff]  ;;  %v12021_v22 = vld [vmem:[%s22707_s3 + $0x198] sm:$0xff] }
 0x48e   :  { %15932 = vmatprep.subr.bf16.mxu1 %v15931_v3  ;;  %v6298_v15 = vand.u32 4294901760, %v6297_v60 }
 0x48f   :  { %v6305_v52 = vand.u32 4294901760, %v6304_v23 }
 0x490   :  { %14785 = vmatmul.mubr.f32.gmra.mrb[2].mxu1 %v6217_v61  ;;  %v15963_v61 = vpack.c.bf16 %v19405_v0, %v19403_v31  ;;  %v12023_v31 = vld [vmem:[%s22707_s3 + $0x1a8] sm:$0xff] }
 0x491   :  { %15934 = vmatpush3.bf16.msra.mxu1 %v15931_v3  ;;  %14811 = vmatprep.mubr.f32.mxu1 %v19285_v30  ;;  %v15947_v3 = vpack.c.bf16 %v6305_v52, %v6298_v15 }
 0x492   :  { %15936 = vmatprep.subr.bf16.mxu1 %v15935_v63 }
 0x495   :  { %15938 = vmatpush3.bf16.msra.mxu1 %v15935_v63  ;;  %v15967_v63 = vpack.c.bf16 %v19427_v33, %v19425_v8 }
 0x496   :  { %15940 = vmatprep.subr.bf16.mxu1 %v15939_v54 }
 0x499   :  { %15942 = vmatpush3.bf16.msra.mxu1 %v15939_v54 }
 0x49a   :  { %15944 = vmatprep.subr.bf16.mxu1 %v15943_v10 }
 0x49d   :  { %15946 = vmatpush3.bf16.msra.mxu1 %v15943_v10  ;;  %v19614_v10 = vand.u32 4294901760, %v18684_v41 }
 0x49e   :  { %15948 = vmatprep.subr.bf16.mxu1 %v15947_v3 }
 0x4a1   :  { %15950 = vmatpush3.bf16.msra.mxu1 %v15947_v3 }
 0x4a2   :  { %15952 = vmatprep.subr.bf16.mxu1 %v15951_v42 }
 0x4a4   :  { %14812 = vmatmul.mubr.f32.vlgmr.msra.gmra.mrb[0].mxu1 %v19341_v4 }
 0x4a5   :  { %14814 = vmatprep.mubr.f32.mxu1 %v19360_v5  ;;  %15954 = vmatpush3.bf16.msra.mxu1 %v15951_v42 }
 0x4a6   :  { %15956 = vmatprep.subr.bf16.mxu1 %v15955_v32 }
 0x4a8   :  { %14815 = vmatmul.mubr.f32.gmra.mrb[2].mxu1 %v19367_v48 }
 0x4a9   :  { %15958 = vmatpush3.bf16.msra.mxu1 %v15955_v32  ;;  %14841 = vmatprep.mubr.f32.mxu1 %v19297_v38  ;;  %v15999_v38 = vpack.c.bf16 %v6233_v24, %v6226_v37  ;;  %v16007_v37 = vpack.c.bf16 %v23236_v46, %v23235_v7  ;;  %v16015_v24 = vpack.c.bf16 %v6289_v50, %v6282_v17  ;;  %v12026_v17 = vld [vmem:[%s22707_s3 + $0x1c0] sm:$0xff]  ;;  %v12027_v50 = vld [vmem:[%s22707_s3 + $0x1c8] sm:$0xff] }
 0x4aa   :  { %15960 = vmatprep.subr.bf16.mxu1 %v15959_v25  ;;  %v6870_v57 = vand.u32 4294901760, %v12026_v17 }
 0x4ad   :  { %15962 = vmatpush3.bf16.msra.mxu1 %v15959_v25 }
 0x4ae   :  { %15964 = vmatprep.subr.bf16.mxu1 %v15963_v61 }
 0x4b1   :  { %15966 = vmatpush3.bf16.msra.mxu1 %v15963_v61 }
 0x4b2   :  { %15968 = vmatprep.subr.bf16.mxu1 %v15967_v63 }
 0x4b5   :  { %15970 = vmatpush3.bf16.msra.mxu1 %v15967_v63 }
 0x4b6   :  { %15972 = vmatprep.subr.bf16.mxu1 %v15971_v56 }
 0x4b9   :  { %15974 = vmatpush3.bf16.msra.mxu1 %v15971_v56 }
 0x4ba   :  { %15976 = vmatprep.subr.bf16.mxu1 %v19301_v20 }
 0x4bc   :  { %14842 = vmatmul.mubr.f32.vlgmr.msra.gmra.mrb[0].mxu1 %v19364_v9  ;;  %v16019_v9 = vpack.c.bf16 %v6303_v36, %v6296_v58  ;;  %v6873_v58 = vand.u32 4294901760, %v12027_v50 }
 0x4bd   :  { %14844 = vmatprep.mubr.f32.mxu1 %v19387_v6  ;;  %15978 = vmatpush3.bf16.msra.mxu1 %v19301_v20 }
 0x4be   :  { %15980 = vmatprep.subr.bf16.mxu1 %v19312_v59  ;;  %v19621_v3 = vpack.c.bf16 %v6873_v58, %v6870_v57 }
 0x4c0   :  { %14845 = vmatmul.mubr.f32.gmra.mrb[2].mxu1 %v19392_v43  ;;  %v12022_v43 = vld [vmem:[%s22707_s3 + $0x1a0] sm:$0xff] }
 0x4c1   :  { %15982 = vmatpush3.bf16.msra.mxu1 %v19312_v59  ;;  %14871 = vmatprep.mubr.f32.mxu1 %v6185_v55  ;;  %v23233_v55 = vand.u32 4294901760, %v19346_v12  ;;  %v16011_v12 = vpack.c.bf16 %v23237_v51, %v6268_v14  ;;  %v6858_v0 = vand.u32 4294901760, %v12022_v43  ;;  %v12025_v14 = vld [vmem:[%s22707_s3 + $0x1b8] sm:$0xff] }
 0x4c2   :  { %15984 = vmatprep.subr.bf16.mxu1 %v19326_v19  ;;  %v6867_v33 = vand.u32 4294901760, %v12025_v14 }
 0x4c3   :  { %v16003_v39 = vpack.c.bf16 %v23233_v55, %v6240_v47  ;;  %v19616_v15 = vsub.f32 %v12022_v43, %v6858_v0  ;;  %v19669_v43 = vsub.f32 %v12027_v50, %v6873_v58 }
 0x4c5   :  { %15986 = vmatpush3.bf16.msra.mxu1 %v19326_v19  ;;  %v6993_v55 = vand.u32 4294901760, %v19616_v15  ;;  %v7028_v50 = vand.u32 4294901760, %v19669_v43 }
 0x4c6   :  { %15988 = vmatprep.subr.bf16.mxu1 %v19349_v28 }
 0x4c9   :  { %15990 = vmatpush3.bf16.msra.mxu1 %v19349_v28 }
 0x4ca   :  { %15992 = vmatprep.subr.bf16.mxu1 %v19374_v45 }
 0x4cd   :  { %15994 = vmatpush3.bf16.msra.mxu1 %v19374_v45 }
 0x4ce   :  { %15996 = vmatprep.subr.bf16.mxu1 %v19408_v21 }
 0x4d1   :  { %15998 = vmatpush3.bf16.msra.mxu1 %v19408_v21 }
 0x4d2   :  { %16000 = vmatprep.subr.bf16.mxu1 %v15999_v38 }
 0x4d4   :  { %14872 = vmatmul.mubr.f32.vlgmr.msra.gmra.mrb[0].mxu1 %v23234_v2 }
 0x4d5   :  { %14874 = vmatprep.mubr.f32.mxu1 %v6205_v26  ;;  %16002 = vmatpush3.bf16.msra.mxu1 %v15999_v38  ;;  %v6861_v26 = vand.u32 4294901760, %v12023_v31  ;;  %v19635_v38 = vsub.f32 %v18684_v41, %v19614_v10 }
 0x4d6   :  { %16004 = vmatprep.subr.bf16.mxu1 %v16003_v39 }
 0x4d7   :  { %v19618_v52 = vsub.f32 %v12023_v31, %v6861_v26 }
 0x4d8   :  { %14875 = vmatmul.mubr.f32.gmra.mrb[2].mxu1 %v6215_v16  ;;  %v12024_v16 = vld [vmem:[%s22707_s3 + $0x1b0] sm:$0xff] }
 0x4d9   :  { %16006 = vmatpush3.bf16.msra.mxu1 %v16003_v39  ;;  %14901 = vmatprep.mubr.f32.mxu1 %v19285_v30  ;;  %v6864_v8 = vand.u32 4294901760, %v12024_v16  ;;  %v7000_v39 = vand.u32 4294901760, %v19618_v52 }
 0x4da   :  { %16008 = vmatprep.subr.bf16.mxu1 %v16007_v37 }
 0x4db   :  { %v19599_v49 = vpack.c.bf16 %v6867_v33, %v6864_v8  ;;  %v19646_v46 = vsub.f32 %v12024_v16, %v6864_v8 }
 0x4dd   :  { %16010 = vmatpush3.bf16.msra.mxu1 %v16007_v37  ;;  %v19648_v37 = vsub.f32 %v12025_v14, %v6867_v33 }
 0x4de   :  { %16012 = vmatprep.subr.bf16.mxu1 %v16011_v12 }
 0x4e1   :  { %16014 = vmatpush3.bf16.msra.mxu1 %v16011_v12 }
 0x4e2   :  { %16016 = vmatprep.subr.bf16.mxu1 %v16015_v24 }
 0x4e5   :  { %16018 = vmatpush3.bf16.msra.mxu1 %v16015_v24 }
 0x4e6   :  { %16020 = vmatprep.subr.bf16.mxu1 %v16019_v9 }
 0x4e9   :  { %16022 = vmatpush3.bf16.msra.mxu1 %v16019_v9  ;;  %v6954_v9 = vand.u32 4294901760, %v19635_v38 }
 0x4ea   :  { %16024 = vmatprep.subr.bf16.mxu1 %v19301_v20 }
 0x4ec   :  { %14902 = vmatmul.mubr.f32.vlgmr.msra.gmra.mrb[0].mxu1 %v19341_v4 }
 0x4ed   :  { %14904 = vmatprep.mubr.f32.mxu1 %v19360_v5  ;;  %16026 = vmatpush3.bf16.msra.mxu1 %v19301_v20  ;;  %v12019_v20 = vld [vmem:[%s22707_s3 + $0x188] sm:$0xff] }
 0x4ee   :  { %16028 = vmatprep.subr.bf16.mxu1 %v19312_v59 }
 0x4f0   :  { %14905 = vmatmul.mubr.f32.gmra.mrb[2].mxu1 %v19367_v48 }
 0x4f1   :  { %16030 = vmatpush3.bf16.msra.mxu1 %v19312_v59  ;;  %14931 = vmatprep.mubr.f32.mxu1 %v19285_v30  ;;  %v6846_v59 = vand.u32 4294901760, %v12018_v34  ;;  %v6849_v30 = vand.u32 4294901760, %v12019_v20 }
 0x4f2   :  { %16032 = vmatprep.subr.bf16.mxu1 %v19326_v19 }
 0x4f3   :  { %v19554_v47 = vpack.c.bf16 %v6849_v30, %v6846_v59  ;;  %v19584_v1 = vsub.f32 %v12018_v34, %v6846_v59  ;;  %v6994_v34 = vsub.f32 %v19616_v15, %v6993_v55 }
 0x4f5   :  { %16034 = vmatpush3.bf16.msra.mxu1 %v19326_v19  ;;  %v12020_v19 = vld [vmem:[%s22707_s3 + $0x190] sm:$0xff]  ;;  %v6965_v53 = vand.u32 4294901760, %v19584_v1 }
 0x4f6   :  { %16036 = vmatprep.subr.bf16.mxu1 %v19349_v28  ;;  %v6852_v6 = vand.u32 4294901760, %v12020_v19 }
 0x4f7   :  { %v6966_v61 = vsub.f32 %v19584_v1, %v6965_v53 }
 0x4f8   :  { %v19594_v36 = vsub.f32 %v12020_v19, %v6852_v6  ;;  %v7007_v19 = vand.u32 4294901760, %v19646_v46 }
 0x4f9   :  { %16038 = vmatpush3.bf16.msra.mxu1 %v19349_v28  ;;  %v6855_v28 = vand.u32 4294901760, %v12021_v22  ;;  %v6967_v51 = vand.u32 4294901760, %v6966_v61 }
 0x4fa   :  { %16040 = vmatprep.subr.bf16.mxu1 %v19374_v45  ;;  %v6979_v42 = vand.u32 4294901760, %v19594_v36  ;;  %v7008_v8 = vsub.f32 %v19646_v46, %v7007_v19 }
 0x4fb   :  { %v19596_v54 = vsub.f32 %v12021_v22, %v6855_v28  ;;  %v7014_v22 = vand.u32 4294901760, %v19648_v37 }
 0x4fc   :  { %v6980_v2 = vsub.f32 %v19594_v36, %v6979_v42 }
 0x4fd   :  { %16042 = vmatpush3.bf16.msra.mxu1 %v19374_v45  ;;  %v19564_v45 = vpack.c.bf16 %v6855_v28, %v6852_v6  ;;  %v6986_v32 = vand.u32 4294901760, %v19596_v54  ;;  %v19667_v28 = vsub.f32 %v12026_v17, %v6870_v57  ;;  %v7015_v33 = vsub.f32 %v19648_v37, %v7014_v22 }
 0x4fe   :  { %16044 = vmatprep.subr.bf16.mxu1 %v19408_v21  ;;  %v6981_v59 = vand.u32 4294901760, %v6980_v2  ;;  %v7009_v2 = vand.u32 4294901760, %v7008_v8 }
 0x4ff   :  { %v6987_v7 = vsub.f32 %v19596_v54, %v6986_v32  ;;  %v7021_v17 = vand.u32 4294901760, %v19667_v28 }
 0x501   :  { %16046 = vmatpush3.bf16.msra.mxu1 %v19408_v21  ;;  %v19575_v21 = vpack.c.bf16 %v6861_v26, %v6858_v0  ;;  %v6955_v0 = vsub.f32 %v19635_v38, %v6954_v9  ;;  %v6995_v26 = vand.u32 4294901760, %v6994_v34 }
 0x502   :  { %16048 = vmatprep.subr.bf16.mxu1 %v19554_v47 }
 0x503   :  { %v6956_v61 = vand.u32 4294901760, %v6955_v0  ;;  %v16099_v0 = vpack.c.bf16 %v19596_v54, %v19594_v36 }
 0x504   :  { %14932 = vmatmul.mubr.f32.vlgmr.msra.gmra.mrb[0].mxu1 %v19341_v4  ;;  %v19586_v4 = vsub.f32 %v12019_v20, %v6849_v30  ;;  %v7001_v20 = vsub.f32 %v19618_v52, %v7000_v39  ;;  %v6988_v30 = vand.u32 4294901760, %v6987_v7  ;;  %v7016_v7 = vand.u32 4294901760, %v7015_v33  ;;  %v7813_v33 = vld [vmem:[%s22709_s5 + $0x18] sm:$0xff] }
 0x505   :  { %14934 = vmatprep.mubr.f32.mxu1 %v19360_v5  ;;  %16050 = vmatpush3.bf16.msra.mxu1 %v19554_v47  ;;  %v19589_v5 = vand.u32 4294901760, %v18545_v27 }
 0x506   :  { %16052 = vmatprep.subr.bf16.mxu1 %v19564_v45  ;;  %v6972_v60 = vand.u32 4294901760, %v19586_v4  ;;  %v16075_v16 = vpack.c.bf16 %v6988_v30, %v6981_v59  ;;  %v7002_v14 = vand.u32 4294901760, %v7001_v20 }
 0x507   :  { %v19611_v23 = vsub.f32 %v18545_v27, %v19589_v5 }
 0x508   :  { %14935 = vmatmul.mubr.f32.gmra.mrb[2].mxu1 %v19367_v48  ;;  %v12028_v48 = vld [vmem:[%s22707_s3 + $0x1d0] sm:$0xff]  ;;  %v6973_v63 = vsub.f32 %v19586_v4, %v6972_v60 }
 0x509   :  { %16054 = vmatpush3.bf16.msra.mxu1 %v19564_v45  ;;  %14961 = vmatprep.mubr.f32.mxu1 %v18909_v44  ;;  %v12029_v44 = vld [vmem:[%s22707_s3 + $0x1d8] sm:$0xff]  ;;  %v6876_v25 = vand.u32 4294901760, %v12028_v48  ;;  %v6934_v56 = vand.u32 4294901760, %v19611_v23 }
 0x50a   :  { %16056 = vmatprep.subr.bf16.mxu1 %v19575_v21  ;;  %v6879_v27 = vand.u32 4294901760, %v12029_v44  ;;  %v6974_v12 = vand.u32 4294901760, %v6973_v63  ;;  %v16079_v63 = vpack.c.bf16 %v7002_v14, %v6995_v26  ;;  %v16103_v26 = vpack.c.bf16 %v19618_v52, %v19616_v15  ;;  %v7811_v52 = vld [vmem:[%s22709_s5 + $0x8] sm:$0xff] }
 0x50b   :  { %v6935_v24 = vsub.f32 %v19611_v23, %v6934_v56  ;;  %v19683_v57 = vsub.f32 %v12028_v48, %v6876_v25  ;;  %v7029_v48 = vsub.f32 %v19669_v43, %v7028_v50  ;;  %v16111_v14 = vpack.c.bf16 %v19669_v43, %v19667_v28  ;;  %v7812_v43 = vld [vmem:[%s22709_s5 + $0x10] sm:$0xff] }
 0x50c   :  { %v19651_v41 = vpack.c.bf16 %v6879_v27, %v6876_v25  ;;  %v16071_v6 = vpack.c.bf16 %v6974_v12, %v6967_v51  ;;  %v19685_v58 = vsub.f32 %v12029_v44, %v6879_v27  ;;  %v7022_v51 = vsub.f32 %v19667_v28, %v7021_v17  ;;  %v7829_v28 = vld [vmem:[%s22709_s5 + $0x98] sm:$0xff] }
 0x50d   :  { %16058 = vmatpush3.bf16.msra.mxu1 %v19575_v21  ;;  %v6936_v31 = vand.u32 4294901760, %v6935_v24  ;;  %v7035_v44 = vand.u32 4294901760, %v19683_v57  ;;  %v7030_v12 = vand.u32 4294901760, %v7029_v48 }
 0x50e   :  { %16060 = vmatprep.subr.bf16.mxu1 %v19599_v49  ;;  %v7042_v25 = vand.u32 4294901760, %v19685_v58  ;;  %v7023_v27 = vand.u32 4294901760, %v7022_v51  ;;  %v16115_v8 = vpack.c.bf16 %v19685_v58, %v19683_v57  ;;  %v8003_v51 = vand.u32 4294901760, %v7829_v28 }
 0x50f   :  { %v7036_v24 = vsub.f32 %v19683_v57, %v7035_v44 }
 0x510   :  { %v7043_v34 = vsub.f32 %v19685_v58, %v7042_v25  ;;  %v16087_v20 = vpack.c.bf16 %v7030_v12, %v7023_v27  ;;  %v19891_v12 = vld [vmem:[%s22709_s5 + $0x210] sm:$0xff] }
 0x511   :  { %16062 = vmatpush3.bf16.msra.mxu1 %v19599_v49  ;;  %v7037_v59 = vand.u32 4294901760, %v7036_v24  ;;  %23248 = vst [vmem:[#allocation15_spill] sm:$0xff] %v19891_v12  ;;  %v19896_v24 = vld [vmem:[%s22709_s5 + $0x218] sm:$0xff] }
 0x512   :  { %16064 = vmatprep.subr.bf16.mxu1 %v19621_v3  ;;  %v7044_v30 = vand.u32 4294901760, %v7043_v34  ;;  %23249 = vst [vmem:[#allocation16_spill] sm:$0xff] %v19896_v24 }
 0x515   :  { %16066 = vmatpush3.bf16.msra.mxu1 %v19621_v3 }
 0x516   :  { %16068 = vmatprep.subr.bf16.mxu1 %v19651_v41 }
 0x519   :  { %16070 = vmatpush3.bf16.msra.mxu1 %v19651_v41 }
 0x51a   :  { %16072 = vmatprep.subr.bf16.mxu1 %v16071_v6 }
 0x51c   :  { %14962 = vmatmul.mubr.f32.vlgmr.msra.gmra.mrb[0].mxu1 %v6936_v31  ;;  %v16095_v31 = vpack.c.bf16 %v19586_v4, %v19584_v1  ;;  %v16155_v1 = vpack.c.bf16 %v7014_v22, %v7007_v19  ;;  %v16163_v4 = vpack.c.bf16 %v7042_v25, %v7035_v44  ;;  %v7952_v44 = vand.u32 4294901760, %v7812_v43 }
 0x51d   :  { %14964 = vmatprep.mubr.f32.mxu1 %v18927_v40  ;;  %16074 = vmatpush3.bf16.msra.mxu1 %v16071_v6  ;;  %v16083_v40 = vpack.c.bf16 %v7016_v7, %v7009_v2  ;;  %v16091_v6 = vpack.c.bf16 %v7044_v30, %v7037_v59  ;;  %v7955_v25 = vand.u32 4294901760, %v7813_v33 }
 0x51e   :  { %16076 = vmatprep.subr.bf16.mxu1 %v16075_v16 }
 0x520   :  { %14965 = vmatmul.mubr.f32.gmra.mrb[2].mxu1 %v6956_v61  ;;  %v19874_v61 = vld [vmem:[%s22709_s5 + $0x290] sm:$0xff] }
 0x521   :  { %16078 = vmatpush3.bf16.msra.mxu1 %v16075_v16  ;;  %14991 = vmatprep.mubr.f32.mxu1 %v18814_v29  ;;  %v16107_v16 = vpack.c.bf16 %v19648_v37, %v19646_v46  ;;  %v19835_v46 = vld [vmem:[%s22709_s5 + $0x208] sm:$0xff]  ;;  %v7828_v37 = vld [vmem:[%s22709_s5 + $0x90] sm:$0xff]  ;;  %23246 = vst [vmem:[#allocation13_spill] sm:$0xff] %v19874_v61  ;;  %v22750_v27 = vand.u32 4294901760, %v19874_v61 }
 0x522   :  { %16080 = vmatprep.subr.bf16.mxu1 %v16079_v63  ;;  %23241 = vst [vmem:[#allocation8_spill] sm:$0xff] %v19835_v46  ;;  %v22753_v2 = vand.u32 4294901760, %v19835_v46  ;;  %v8000_v7 = vand.u32 4294901760, %v7828_v37 }
 0x524   :  { %v19908_v59 = vpack.c.bf16 %v8003_v51, %v8000_v7  ;;  %v19910_v30 = vsub.f32 %v7828_v37, %v8000_v7  ;;  %v7816_v7 = vld [vmem:[%s22709_s5 + $0x30] sm:$0xff] }
 0x525   :  { %16082 = vmatpush3.bf16.msra.mxu1 %v16079_v63 }
 0x526   :  { %16084 = vmatprep.subr.bf16.mxu1 %v16083_v40  ;;  %23252 = vst [vmem:[#allocation19_spill] sm:$0xff] %v19908_v59 }
 0x529   :  { %16086 = vmatpush3.bf16.msra.mxu1 %v16083_v40  ;;  %v19885_v40 = vld [vmem:[%s22709_s5 + $0x298] sm:$0xff] }
 0x52a   :  { %16088 = vmatprep.subr.bf16.mxu1 %v16087_v20  ;;  %23247 = vst [vmem:[#allocation14_spill] sm:$0xff] %v19885_v40 }
 0x52d   :  { %16090 = vmatpush3.bf16.msra.mxu1 %v16087_v20  ;;  %v19906_v20 = vsub.f32 %v19835_v46, %v22753_v2 }
 0x52e   :  { %16092 = vmatprep.subr.bf16.mxu1 %v16091_v6 }
 0x52f   :  { %23251 = vst [vmem:[#allocation18_spill] sm:$0xff] %v19906_v20 }
 0x531   :  { %16094 = vmatpush3.bf16.msra.mxu1 %v16091_v6  ;;  %v7830_v6 = vld [vmem:[%s22709_s5 + $0xa0] sm:$0xff] }
 0x532   :  { %16096 = vmatprep.subr.bf16.mxu1 %v16095_v31 }
 0x534   :  { %14992 = vmatmul.mubr.f32.vlgmr.msra.gmra.mrb[0].mxu1 %v19589_v5 }
 0x535   :  { %14994 = vmatprep.mubr.f32.mxu1 %v18841_v62  ;;  %16098 = vmatpush3.bf16.msra.mxu1 %v16095_v31  ;;  %v7831_v31 = vld [vmem:[%s22709_s5 + $0xa8] sm:$0xff] }
 0x536   :  { %16100 = vmatprep.subr.bf16.mxu1 %v16099_v0 }
 0x538   :  { %14995 = vmatmul.mubr.f32.gmra.mrb[2].mxu1 %v19614_v10 }
 0x539   :  { %16102 = vmatpush3.bf16.msra.mxu1 %v16099_v0  ;;  %15021 = vmatprep.mubr.f32.mxu1 %v18838_v13  ;;  %v16143_v13 = vpack.c.bf16 %v6972_v60, %v6965_v53  ;;  %v7826_v53 = vld [vmem:[%s22709_s5 + $0x80] sm:$0xff]  ;;  %v7827_v60 = vld [vmem:[%s22709_s5 + $0x88] sm:$0xff] }
 0x53a   :  { %16104 = vmatprep.subr.bf16.mxu1 %v16103_v26  ;;  %v7997_v15 = vand.u32 4294901760, %v7827_v60  ;;  %v7814_v0 = vld [vmem:[%s22709_s5 + $0x20] sm:$0xff] }
 0x53c   :  { %v19844_v19 = vsub.f32 %v7827_v60, %v7997_v15 }
 0x53d   :  { %16106 = vmatpush3.bf16.msra.mxu1 %v16103_v26  ;;  %v19921_v26 = vsub.f32 %v7829_v28, %v8003_v51 }
 0x53e   :  { %16108 = vmatprep.subr.bf16.mxu1 %v16107_v16 }
 0x541   :  { %16110 = vmatpush3.bf16.msra.mxu1 %v16107_v16  ;;  %v19923_v16 = vpack.c.bf16 %v7955_v25, %v7952_v44 }
 0x542   :  { %16112 = vmatprep.subr.bf16.mxu1 %v16111_v14 }
 0x543   :  { %23253 = vst [vmem:[#allocation20_spill] sm:$0xff] %v19923_v16 }
 0x545   :  { %16114 = vmatpush3.bf16.msra.mxu1 %v16111_v14  ;;  %v19925_v14 = vsub.f32 %v7812_v43, %v7952_v44  ;;  %v7832_v43 = vld [vmem:[%s22709_s5 + $0xb0] sm:$0xff] }
 0x546   :  { %16116 = vmatprep.subr.bf16.mxu1 %v16115_v8 }
 0x549   :  { %16118 = vmatpush3.bf16.msra.mxu1 %v16115_v8  ;;  %v19927_v8 = vsub.f32 %v7813_v33, %v7955_v25  ;;  %v7833_v33 = vld [vmem:[%s22709_s5 + $0xb8] sm:$0xff] }
 0x54a   :  { %16120 = vmatprep.subr.bf16.mxu1 %v19554_v47 }
 0x54c   :  { %15022 = vmatmul.mubr.f32.vlgmr.msra.gmra.mrb[0].mxu1 %v19611_v23  ;;  %v7810_v23 = vld [vmem:[%s22709_s5] sm:$0xff] }
 0x54d   :  { %15024 = vmatprep.mubr.f32.mxu1 %v18868_v35  ;;  %16122 = vmatpush3.bf16.msra.mxu1 %v19554_v47  ;;  %v16151_v35 = vpack.c.bf16 %v7000_v39, %v6993_v55  ;;  %v19830_v39 = vld [vmem:[%s22709_s5 + $0x200] sm:$0xff] }
 0x54e   :  { %16124 = vmatprep.subr.bf16.mxu1 %v19564_v45  ;;  %23240 = vst [vmem:[#allocation7_spill] sm:$0xff] %v19830_v39  ;;  %v22754_v63 = vand.u32 4294901760, %v19830_v39 }
 0x550   :  { %15025 = vmatmul.mubr.f32.gmra.mrb[2].mxu1 %v19635_v38  ;;  %v19901_v34 = vsub.f32 %v19830_v39, %v22754_v63  ;;  %v7836_v39 = vld [vmem:[%s22709_s5 + $0xd0] sm:$0xff] }
 0x551   :  { %16126 = vmatpush3.bf16.msra.mxu1 %v19564_v45  ;;  %15051 = vmatprep.mubr.f32.mxu1 %v18864_v18  ;;  %v16147_v18 = vpack.c.bf16 %v6986_v32, %v6979_v42  ;;  %v19818_v42 = vld [vmem:[%s22709_s5 + $0x280] sm:$0xff]  ;;  %v19823_v32 = vld [vmem:[%s22709_s5 + $0x288] sm:$0xff] }
 0x552   :  { %16128 = vmatprep.subr.bf16.mxu1 %v19575_v21  ;;  %23238 = vst [vmem:[#allocation5_spill] sm:$0xff] %v19818_v42  ;;  %23239 = vst [vmem:[#allocation6_spill] sm:$0xff] %v19823_v32  ;;  %v22756_v38 = vand.u32 4294901760, %v19818_v42  ;;  %v22755_v55 = vand.u32 4294901760, %v19823_v32 }
 0x553   :  { %23250 = vst [vmem:[#allocation17_spill] sm:$0xff] %v19901_v34 }
 0x554   :  { %v19864_v57 = vsub.f32 %v19818_v42, %v22756_v38  ;;  %v19869_v58 = vsub.f32 %v19823_v32, %v22755_v55  ;;  %v7834_v38 = vld [vmem:[%s22709_s5 + $0xc0] sm:$0xff] }
 0x555   :  { %16130 = vmatpush3.bf16.msra.mxu1 %v19575_v21 }
 0x556   :  { %16132 = vmatprep.subr.bf16.mxu1 %v19599_v49  ;;  %23244 = vst [vmem:[#allocation11_spill] sm:$0xff] %v19864_v57  ;;  %23245 = vst [vmem:[#allocation12_spill] sm:$0xff] %v19869_v58  ;;  %v16639_v48 = vpack.c.bf16 %v19869_v58, %v19864_v57 }
 0x559   :  { %16134 = vmatpush3.bf16.msra.mxu1 %v19599_v49 }
 0x55a   :  { %16136 = vmatprep.subr.bf16.mxu1 %v19621_v3 }
 0x55d   :  { %16138 = vmatpush3.bf16.msra.mxu1 %v19621_v3 }
 0x55e   :  { %16140 = vmatprep.subr.bf16.mxu1 %v19651_v41 }
 0x561   :  { %16142 = vmatpush3.bf16.msra.mxu1 %v19651_v41 }
 0x562   :  { %16144 = vmatprep.subr.bf16.mxu1 %v16143_v13 }
 0x564   :  { %15052 = vmatmul.mubr.f32.vlgmr.msra.gmra.mrb[0].mxu1 %v6934_v56  ;;  %v7949_v56 = vand.u32 4294901760, %v7811_v52 }
 0x565   :  { %15054 = vmatprep.mubr.f32.mxu1 %v18890_v11  ;;  %16146 = vmatpush3.bf16.msra.mxu1 %v16143_v13  ;;  %v16159_v11 = vpack.c.bf16 %v7028_v50, %v7021_v17  ;;  %v7815_v13 = vld [vmem:[%s22709_s5 + $0x28] sm:$0xff] }
 0x566   :  { %16148 = vmatprep.subr.bf16.mxu1 %v16147_v18  ;;  %v19859_v50 = vsub.f32 %v7811_v52, %v7949_v56  ;;  %v7961_v60 = vand.u32 4294901760, %v7815_v13  ;;  %v19973_v52 = vld [vmem:[%s22709_s5 + $0x228] sm:$0xff] }
 0x567   :  { %23260 = vst [vmem:[#allocation27_spill] sm:$0xff] %v19973_v52 }
 0x568   :  { %15055 = vmatmul.mubr.f32.gmra.mrb[2].mxu1 %v6954_v9  ;;  %v20001_v25 = vsub.f32 %v7815_v13, %v7961_v60 }
 0x569   :  { %16150 = vmatpush3.bf16.msra.mxu1 %v16147_v18  ;;  %15081 = vmatprep.mubr.f32.mxu1 %v18814_v29  ;;  %v19935_v18 = vld [vmem:[%s22709_s5 + $0x2a0] sm:$0xff] }
 0x56a   :  { %16152 = vmatprep.subr.bf16.mxu1 %v16151_v35  ;;  %23254 = vst [vmem:[#allocation21_spill] sm:$0xff] %v19935_v18 }
 0x56d   :  { %16154 = vmatpush3.bf16.msra.mxu1 %v16151_v35  ;;  %v16641_v35 = vpack.c.bf16 %v19906_v20, %v19901_v34 }
 0x56e   :  { %16156 = vmatprep.subr.bf16.mxu1 %v16155_v1 }
 0x571   :  { %16158 = vmatpush3.bf16.msra.mxu1 %v16155_v1  ;;  %v22749_v1 = vand.u32 4294901760, %v19885_v40 }
 0x572   :  { %16160 = vmatprep.subr.bf16.mxu1 %v16159_v11 }
 0x575   :  { %16162 = vmatpush3.bf16.msra.mxu1 %v16159_v11  ;;  %v19944_v11 = vsub.f32 %v19874_v61, %v22750_v27  ;;  %v7835_v27 = vld [vmem:[%s22709_s5 + $0xc8] sm:$0xff] }
 0x576   :  { %16164 = vmatprep.subr.bf16.mxu1 %v16163_v4 }
 0x577   :  { %23255 = vst [vmem:[#allocation22_spill] sm:$0xff] %v19944_v11 }
 0x579   :  { %16166 = vmatpush3.bf16.msra.mxu1 %v16163_v4  ;;  %v22747_v4 = vand.u32 4294901760, %v19891_v12 }
 0x57a   :  { %16168 = vmatprep.subr.bf16.mxu1 %v19554_v47 }
 0x57c   :  { %15082 = vmatmul.mubr.f32.vlgmr.msra.gmra.mrb[0].mxu1 %v19589_v5 }
 0x57d   :  { %15084 = vmatprep.mubr.f32.mxu1 %v18841_v62  ;;  %16170 = vmatpush3.bf16.msra.mxu1 %v19554_v47 }
 0x57e   :  { %16172 = vmatprep.subr.bf16.mxu1 %v19564_v45 }
 0x580   :  { %15085 = vmatmul.mubr.f32.gmra.mrb[2].mxu1 %v19614_v10 }
 0x581   :  { %16174 = vmatpush3.bf16.msra.mxu1 %v19564_v45  ;;  %15111 = vmatprep.mubr.f32.mxu1 %v18814_v29  ;;  %v12030_v29 = vld [vmem:[%s22708_s4] ss:$0 sm:$0xff] }
 0x582   :  { %16176 = vmatprep.subr.bf16.mxu1 %v19575_v21 }
 0x585   :  { %16178 = vmatpush3.bf16.msra.mxu1 %v19575_v21 }
 0x586   :  { %16180 = vmatprep.subr.bf16.mxu1 %v19599_v49 }
 0x589   :  { %16182 = vmatpush3.bf16.msra.mxu1 %v19599_v49 }
 0x58a   :  { %16184 = vmatprep.subr.bf16.mxu1 %v19621_v3 }
 0x58d   :  { %16186 = vmatpush3.bf16.msra.mxu1 %v19621_v3  ;;  %v7946_v3 = vand.u32 4294901760, %v7810_v23 }
 0x58e   :  { %16188 = vmatprep.subr.bf16.mxu1 %v19651_v41 }
 0x58f   :  { %v19846_v22 = vsub.f32 %v7810_v23, %v7946_v3  ;;  %v19857_v17 = vpack.c.bf16 %v7949_v56, %v7946_v3  ;;  %v19962_v23 = vld [vmem:[%s22709_s5 + $0x2a8] sm:$0xff] }
 0x590   :  { %23258 = vst [vmem:[#allocation25_spill] sm:$0xff] %v19962_v23 }
 0x591   :  { %16190 = vmatpush3.bf16.msra.mxu1 %v19651_v41  ;;  %23243 = vst [vmem:[#allocation10_spill] sm:$0xff] %v19857_v17 }
 0x592   :  { %16640 = vmatprep.subr.bf16.mxu1 %v16639_v48 }
 0x594   :  { %15112 = vmatmul.mubr.f32.vlgmr.msra.gmra.mrb[0].mxu1 %v19589_v5 }
 0x595   :  { %15114 = vmatprep.mubr.f32.mxu1 %v18841_v62  ;;  %16642 = vmatpush3.bf16.msra.mxu1 %v16641_v35 }
 0x598   :  { %15115 = vmatmul.mubr.f32.gmra.mrb[2].mxu1 %v19614_v10  ;;  %v7994_v10 = vand.u32 4294901760, %v7826_v53 }
 0x59a   :  { %v19840_v41 = vpack.c.bf16 %v7997_v15, %v7994_v10  ;;  %v19842_v9 = vsub.f32 %v7826_v53, %v7994_v10  ;;  %v19957_v53 = vsub.f32 %v19891_v12, %v22747_v4  ;;  %v22748_v10 = vand.u32 4294901760, %v19935_v18  ;;  %v19968_v15 = vld [vmem:[%s22709_s5 + $0x220] sm:$0xff] }
 0x59b   :  { %23259 = vst [vmem:[#allocation26_spill] sm:$0xff] %v19968_v15  ;;  %v22752_v13 = vand.u32 4294901760, %v19968_v15  ;;  %v8021_v12 = vand.u32 4294901760, %v7835_v27 }
 0x59c   :  { %23242 = vst [vmem:[#allocation9_spill] sm:$0xff] %v19840_v41  ;;  %16192 = vmatprep.subr.bf16.mxu0 %v19840_v41  ;;  %23257 = vst [vmem:[#allocation24_spill] sm:$0xff] %v19957_v53 }
 0x59d   :  { %16194 = vmatpush3.bf16.msra.mxu0 %v19857_v17  ;;  %v20127_v46 = vsub.f32 %v7835_v27, %v8021_v12 }
 0x59e   :  { %16196 = vmatprep.subr.bf16.mxu0 %v19908_v59 }
 0x59f   :  { %23288 = vst [vmem:[#allocation53_spill] sm:$0xff] %v20127_v46 }
 0x5a1   :  { %16198 = vmatpush3.bf16.msra.mxu0 %v19923_v16 }
 0x667   :  { %v15113_v47 = vpop.f32.mrb[0].mxu1 }
 0x668   :  { %v19787_v45 = vadd.f32 %v15113_v47, %v12030_v29  ;;  %v7541_v21 = vpop.f32.mrb[1].mxu1  ;;  %v8006_v47 = vand.u32 4294901760, %v7830_v6 }
 0x669   :  { %v19789_v36 = vadd.f32 %v12030_v29, %v7541_v21  ;;  %v8009_v21 = vand.u32 4294901760, %v7831_v31 }
 0x66a   :  { %7584 = vrot.lane.b32.xlu1 %v19787_v45, %s17377_s21  ;;  %v19982_v37 = vsub.f32 %v7830_v6, %v8006_v47  ;;  %v7817_v6 = vld [vmem:[%s22709_s5 + $0x38] sm:$0xff] }
 0x66b   :  { %7582 = vrot.lane.b32.xlu0 %v19789_v36, %s17377_s21  ;;  %v15116_v5 = vpop.f32.mrb[2].mxu1  ;;  %v19980_v56 = vpack.c.bf16 %v8009_v21, %v8006_v47  ;;  %v19984_v28 = vsub.f32 %v7831_v31, %v8009_v21  ;;  %v20009_v31 = vld [vmem:[%s22709_s5 + $0x2b0] sm:$0xff]  ;;  %v22751_v47 = vand.u32 4294901760, %v19962_v23  ;;  %v22758_v21 = vand.u32 4294901760, %v19973_v52 }
 0x66c   :  { %v7553_v54 = vpop.f32.mrb[3].mxu1  ;;  %v19795_v62 = vadd.f32 %v15116_v5, %v12030_v29  ;;  %v7958_v5 = vand.u32 4294901760, %v7814_v0  ;;  %23264 = vst [vmem:[#allocation31_spill] sm:$0xff] %v20009_v31 }
 0x66d   :  { %v19797_v49 = vadd.f32 %v12030_v29, %v7553_v54  ;;  %v22746_v29 = vand.u32 4294901760, %v19896_v24  ;;  %v19952_v54 = vsub.f32 %v19885_v40, %v22749_v1  ;;  %23262 = vst [vmem:[#allocation29_spill] sm:$0xff] %v19980_v56  ;;  %16200 = vmatprep.subr.bf16.mxu0 %v19980_v56  ;;  %v20026_v4 = vsub.f32 %v19962_v23, %v22751_v47  ;;  %v20047_v47 = vld [vmem:[%s22709_s5 + $0x238] sm:$0xff] }
 0x66e   :  { %7596 = vrot.lane.b32.xlu1 %v19787_v45, %s17378_s22  ;;  %v19997_v48 = vpack.c.bf16 %v7961_v60, %v7958_v5  ;;  %v19999_v44 = vsub.f32 %v7814_v0, %v7958_v5  ;;  %v20018_v0 = vsub.f32 %v19935_v18, %v22748_v10  ;;  %v8012_v5 = vand.u32 4294901760, %v7832_v43  ;;  %23270 = vst [vmem:[#allocation37_spill] sm:$0xff] %v20047_v47 }
 0x66f   :  { %7594 = vrot.lane.b32.xlu0 %v19789_v36, %s17378_s22  ;;  %23256 = vst [vmem:[#allocation23_spill] sm:$0xff] %v19952_v54  ;;  %v19978_v3 = vsub.f32 %v19896_v24, %v22746_v29  ;;  %v16643_v51 = vpack.c.bf16 %v19952_v54, %v19944_v11  ;;  %v8015_v60 = vand.u32 4294901760, %v7833_v33  ;;  %v7964_v29 = vand.u32 4294901760, %v7816_v7  ;;  %23266 = vst [vmem:[#allocation33_spill] sm:$0xff] %v20026_v4 }
 0x670   :  { %23263 = vst [vmem:[#allocation30_spill] sm:$0xff] %v19997_v48  ;;  %23265 = vst [vmem:[#allocation32_spill] sm:$0xff] %v20018_v0  ;;  %16202 = vmatpush3.bf16.msra.mxu0 %v19997_v48  ;;  %v20031_v10 = vsub.f32 %v19968_v15, %v22752_v13  ;;  %v7967_v1 = vand.u32 4294901760, %v7817_v6  ;;  %v20052_v13 = vsub.f32 %v19973_v52, %v22758_v21  ;;  %v7818_v15 = vld [vmem:[%s22709_s5 + $0x40] sm:$0xff]  ;;  %v8018_v24 = vand.u32 4294901760, %v7834_v38 }
 0x671   :  { %23261 = vst [vmem:[#allocation28_spill] sm:$0xff] %v19978_v3  ;;  %v16645_v35 = vpack.c.bf16 %v19978_v3, %v19957_v53  ;;  %16644 = vmatprep.subr.bf16.mxu1 %v16643_v51  ;;  %v20036_v51 = vld [vmem:[%s22709_s5 + $0x2b8] sm:$0xff]  ;;  %v20054_v2 = vpack.c.bf16 %v8015_v60, %v8012_v5  ;;  %v20056_v63 = vsub.f32 %v7832_v43, %v8012_v5  ;;  %v7819_v5 = vld [vmem:[%s22709_s5 + $0x48] sm:$0xff]  ;;  %v7970_v40 = vand.u32 4294901760, %v7818_v15 }
 0x672   :  { %7588 = vrot.lane.b32.xlu1 %v19795_v62, %s17377_s21  ;;  %23267 = vst [vmem:[#allocation34_spill] sm:$0xff] %v20031_v10  ;;  %23268 = vst [vmem:[#allocation35_spill] sm:$0xff] %v20036_v51  ;;  %v20058_v55 = vsub.f32 %v7833_v33, %v8015_v60  ;;  %v16647_v21 = vpack.c.bf16 %v20026_v4, %v20018_v0  ;;  %v20071_v52 = vpack.c.bf16 %v7967_v1, %v7964_v29  ;;  %v20083_v60 = vld [vmem:[%s22709_s5 + $0x2c0] sm:$0xff]  ;;  %v17379_v56 = vmov 1983009808   ;;  %v7825_v4 = vld [vmem:[%s22709_s5 + $0x78] sm:$0xff] }
 0x673   :  { %7586 = vrot.lane.b32.xlu0 %v19797_v49, %s17377_s21  ;;  %16646 = vmatpush3.bf16.msra.mxu1 %v16645_v35  ;;  %v20042_v35 = vld [vmem:[%s22709_s5 + $0x230] sm:$0xff]  ;;  %23271 = vst [vmem:[#allocation38_spill] sm:$0xff] %v20052_v13  ;;  %23272 = vst [vmem:[#allocation39_spill] sm:$0xff] %v20054_v2  ;;  %v20073_v43 = vsub.f32 %v7816_v7, %v7964_v29  ;;  %v20075_v33 = vsub.f32 %v7817_v6, %v7967_v1  ;;  %v22767_v18 = vand.u32 4294901760, %v20036_v51  ;;  %v20132_v6 = vld [vmem:[%s22709_s5 + $0x248] sm:$0xff] }
 0x674   :  { %23269 = vst [vmem:[#allocation36_spill] sm:$0xff] %v20042_v35  ;;  %23273 = vst [vmem:[#allocation40_spill] sm:$0xff] %v20058_v55  ;;  %v16649_v23 = vpack.c.bf16 %v20052_v13, %v20031_v10  ;;  %16204 = vmatprep.subr.bf16.mxu0 %v20054_v2  ;;  %v23278_v29 = vand.u32 4294901760, %v20009_v31  ;;  %v22769_v7 = vand.u32 4294901760, %v20042_v35  ;;  %16648 = vmatprep.subr.bf16.mxu1 %v16647_v21  ;;  %v20110_v21 = vld [vmem:[%s22709_s5 + $0x2c8] sm:$0xff]  ;;  %v23293_v42 = vand.u32 4294901760, %v20083_v60 }
 0x675   :  { %23274 = vst [vmem:[#allocation41_spill] sm:$0xff] %v20071_v52  ;;  %23275 = vst [vmem:[#allocation42_spill] sm:$0xff] %v20073_v43  ;;  %16206 = vmatpush3.bf16.msra.mxu0 %v20071_v52  ;;  %v20100_v61 = vsub.f32 %v20036_v51, %v22767_v18  ;;  %v23284_v18 = vand.u32 4294901760, %v20047_v47  ;;  %v20144_v27 = vsub.f32 %v7818_v15, %v7970_v40  ;;  %v22783_v32 = vand.u32 4294901760, %v20110_v21  ;;  %v20334_v10 = vld [vmem:[%s22709_s5 + $0x268] sm:$0xff]  ;;  %v20359_v0 = vld [vmem:[%s22709_s5 + $0x2f0] sm:$0xff] }
 0x676   :  { %7600 = vrot.lane.b32.xlu1 %v19795_v62, %s17378_s22  ;;  %23276 = vst [vmem:[#allocation43_spill] sm:$0xff] %v20075_v33  ;;  %23277 = vst [vmem:[#allocation44_spill] sm:$0xff] %v20083_v60  ;;  %v20092_v1 = vsub.f32 %v20009_v31, %v23278_v29  ;;  %v20105_v29 = vsub.f32 %v20042_v35, %v22769_v7  ;;  %v7973_v31 = vand.u32 4294901760, %v7819_v5  ;;  %v8024_v15 = vand.u32 4294901760, %v7836_v39 }
 0x677   :  { %7598 = vrot.lane.b32.xlu0 %v19797_v49, %s17378_s22  ;;  %16650 = vmatpush3.bf16.msra.mxu1 %v16649_v23  ;;  %23280 = vst [vmem:[#allocation46_spill] sm:$0xff] %v20100_v61  ;;  %23282 = vst [vmem:[#allocation48_spill] sm:$0xff] %v20110_v21  ;;  %v20116_v23 = vld [vmem:[%s22709_s5 + $0x240] sm:$0xff]  ;;  %v20121_v51 = vsub.f32 %v20047_v47, %v23284_v18  ;;  %v20123_v7 = vpack.c.bf16 %v8021_v12, %v8018_v24  ;;  %v7837_v18 = vld [vmem:[%s22709_s5 + $0xd8] sm:$0xff]  ;;  %v7639_v16 = vunpack.c.l.s4 %v17379_v56 }
 0x678   :  { %23279 = vst [vmem:[#allocation45_spill] sm:$0xff] %v20092_v1  ;;  %23281 = vst [vmem:[#allocation47_spill] sm:$0xff] %v20105_v29  ;;  %v20125_v35 = vsub.f32 %v7834_v38, %v8018_v24  ;;  %v16651_v47 = vpack.c.bf16 %v20100_v61, %v20092_v1  ;;  %v20142_v38 = vpack.c.bf16 %v7973_v31, %v7970_v40  ;;  %v22785_v2 = vand.u32 4294901760, %v20116_v23 }
 0x679   :  { %23283 = vst [vmem:[#allocation49_spill] sm:$0xff] %v20116_v23  ;;  %23285 = vst [vmem:[#allocation50_spill] sm:$0xff] %v20121_v51  ;;  %v20146_v12 = vsub.f32 %v7819_v5, %v7973_v31  ;;  %v16653_v24 = vpack.c.bf16 %v20121_v51, %v20105_v29  ;;  %16208 = vmatprep.subr.bf16.mxu0 %v20123_v7  ;;  %v20155_v52 = vsub.f32 %v20083_v60, %v23293_v42 }
 0x67a   :  { %23286 = vst [vmem:[#allocation51_spill] sm:$0xff] %v20123_v7  ;;  %23287 = vst [vmem:[#allocation52_spill] sm:$0xff] %v20125_v35  ;;  %16652 = vmatprep.subr.bf16.mxu1 %v16651_v47  ;;  %16210 = vmatpush3.bf16.msra.mxu0 %v20142_v38  ;;  %v22787_v40 = vand.u32 4294901760, %v20132_v6  ;;  %v8027_v31 = vand.u32 4294901760, %v7837_v18  ;;  %v20163_v5 = vsub.f32 %v20110_v21, %v22783_v32  ;;  %v7640_v41 = vunpack.c.0.s8 %v7639_v16 }
 0x67b   :  { %23289 = vst [vmem:[#allocation54_spill] sm:$0xff] %v20132_v6  ;;  %23290 = vst [vmem:[#allocation55_spill] sm:$0xff] %v20142_v38  ;;  %16654 = vmatpush3.bf16.msra.mxu1 %v16653_v24  ;;  %v20168_v42 = vsub.f32 %v20116_v23, %v22785_v2  ;;  %v20177_v38 = vsub.f32 %v7836_v39, %v8024_v15 }
 0x67c   :  { %23291 = vst [vmem:[#allocation56_spill] sm:$0xff] %v20144_v27  ;;  %23292 = vst [vmem:[#allocation57_spill] sm:$0xff] %v20146_v12  ;;  %v20173_v47 = vsub.f32 %v20132_v6, %v22787_v40  ;;  %v20175_v60 = vpack.c.bf16 %v8027_v31, %v8024_v15  ;;  %v20179_v24 = vsub.f32 %v7837_v18, %v8027_v31 }
 0x67d   :  { %23294 = vst [vmem:[#allocation58_spill] sm:$0xff] %v20155_v52  ;;  %23295 = vst [vmem:[#allocation59_spill] sm:$0xff] %v20163_v5  ;;  %v16655_v32 = vpack.c.bf16 %v20163_v5, %v20155_v52 }
 0x67e   :  { %23296 = vst [vmem:[#allocation60_spill] sm:$0xff] %v20168_v42  ;;  %23297 = vst [vmem:[#allocation61_spill] sm:$0xff] %v20173_v47  ;;  %v16657_v21 = vpack.c.bf16 %v20173_v47, %v20168_v42  ;;  %16212 = vmatprep.subr.bf16.mxu0 %v20175_v60 }
 0x67f   :  { %23298 = vst [vmem:[#allocation62_spill] sm:$0xff] %v20175_v60  ;;  %23299 = vst [vmem:[#allocation63_spill] sm:$0xff] %v20177_v38  ;;  %16656 = vmatprep.subr.bf16.mxu1 %v16655_v32  ;;  %v7641_v60 = vlaneseq }
 0x680   :  { %23300 = vst [vmem:[#allocation64_spill] sm:$0xff] %v20179_v24  ;;  %16658 = vmatpush3.bf16.msra.mxu1 %v16657_v21  ;;  %23323 = vst [vmem:[#allocation84_spill] sm:$0xff] %v20334_v10 }
 0x681   :  { %v7642_v47 = vshrl.u32 %v7641_v60, 7  ;;  %v22820_v60 = vmov 0.0   ;;  %23328 = vst [vmem:[#allocation89_spill] sm:$0xff] %v20359_v0 }
 0x683   :  { %v7643_v5 = vsub.s32 %v7640_v41, %v7642_v47 }
 0x6dc   :  { %v7585_v2 = vpop.permute.xlu1 %7584 }
 0x6dd   :  { %v7583_v23 = vpop.permute.xlu0 %7582 }
 0x6e0   :  { %v7597_v40 = vpop.permute.xlu1 %7596 }
 0x6e1   :  { %v7608_v6 = vsel %vm7606_vm8, %v7585_v2, %v7597_v40  ;;  %v7595_v39 = vpop.permute.xlu0 %7594 }
 0x6e2   :  { %v7612_v18 = vmax.f32 %v19787_v45, %v7608_v6  ;;  %v7607_v15 = vsel %vm7606_vm8, %v7583_v23, %v7595_v39  ;;  %v17380_v45 = vmov 1934713408  }
 0x6e3   :  { %v7611_v31 = vmax.f32 %v19789_v36, %v7607_v15  ;;  %v7670_v6 = vunpack.c.l.s4 %v17380_v45 }
 0x6e4   :  { %v7620_v7 = vrot.slane %v7612_v18, 2  ;;  %v7589_v48 = vpop.permute.xlu1 %7588 }
 0x6e5   :  { %v7619_v32 = vrot.slane %v7611_v31, 2  ;;  %v7587_v21 = vpop.permute.xlu0 %7586  ;;  %v7671_v16 = vunpack.c.0.s8 %v7670_v6 }
 0x6e7   :  { %v7621_v59 = vsel %vm1505_vm3, %v7619_v32, %v7620_v7  ;;  %v7631_v23 = vsel %vm1505_vm3, %v7620_v7, %v7619_v32 }
 0x6e8   :  { %v7601_v17 = vpop.permute.xlu1 %7600  ;;  %v7633_v56 = vmax.f32 %v7611_v31, %v7621_v59  ;;  %v7634_v52 = vmax.f32 %v7612_v18, %v7631_v23 }
 0x6e9   :  { %v7610_v2 = vsel %vm7606_vm8, %v7589_v48, %v7601_v17  ;;  %v7599_v40 = vpop.permute.xlu0 %7598 }
 0x6ea   :  { %v7614_v36 = vmax.f32 %v19795_v62, %v7610_v2  ;;  %v7609_v39 = vsel %vm7606_vm8, %v7587_v21, %v7599_v40  ;;  %v7637_v17 = vcombine.high %v7633_v56, %v22820_v60  ;;  %v7644_v62 = vrot.slane %v7633_v56, %v7643_v5 }
 0x6eb   :  { %v7613_v15 = vmax.f32 %v19797_v49, %v7609_v39  ;;  %v7674_v2 = vsub.s32 %v7671_v16, %v7642_v47  ;;  %v7710_v21 = vrot.slane %v7634_v52, %v7643_v5  ;;  %v7703_v59 = vcombine.high %v7634_v52, %v22820_v60 }
 0x6ec   :  { %v7623_v42 = vrot.slane %v7614_v36, 2  ;;  %v7651_v40 = vrot.slane %v7637_v17, %v7643_v5  ;;  %v7820_v17 = vld [vmem:[%s22709_s5 + $0x50] sm:$0xff] }
 0x6ed   :  { %v7622_v51 = vrot.slane %v7613_v15, 2 }
 0x6ef   :  { %v7624_v48 = vsel %vm1505_vm3, %v7622_v51, %v7623_v42  ;;  %v7632_v45 = vsel %vm1505_vm3, %v7623_v42, %v7622_v51  ;;  %v7717_v51 = vrot.slane %v7703_v59, %v7643_v5 }
 0x6f0   :  { %v7635_v7 = vmax.f32 %v7613_v15, %v7624_v48  ;;  %v7636_v32 = vmax.f32 %v7614_v36, %v7632_v45 }
 0x6f2   :  { %v7652_v49 = vcombine.high %v7635_v7, %v22820_v60  ;;  %v7659_v41 = vrot.slane %v7635_v7, %v7643_v5  ;;  %v7725_v18 = vrot.slane %v7636_v32, %v7643_v5  ;;  %v7718_v31 = vcombine.high %v7636_v32, %v22820_v60 }
 0x6f4   :  { %v7666_v6 = vrot.slane %v7652_v49, %v7643_v5  ;;  %v7668_v23 = vcombine.high %v7644_v62, %v7659_v41  ;;  %v7667_v39 = vcombine.low %v7644_v62, %v7659_v41  ;;  %v7734_v29 = vcombine.high %v7710_v21, %v7725_v18  ;;  %v20227_v62 = vld [vmem:[%s22709_s5 + $0x2d0] sm:$0xff] }
 0x6f5   :  { %v7733_v61 = vcombine.low %v7710_v21, %v7725_v18  ;;  %v7732_v42 = vrot.slane %v7718_v31, %v7643_v5  ;;  %v7821_v5 = vld [vmem:[%s22709_s5 + $0x58] sm:$0xff]  ;;  %23303 = vst [vmem:[#allocation67_spill] sm:$0xff] %v20227_v62  ;;  %v20245_v31 = vld [vmem:[%s22709_s5 + $0x250] sm:$0xff] }
 0x6f6   :  { %v20202_v36 = vrot.slane %v7668_v23, %v7674_v2  ;;  %v20204_v47 = vrot.slane %v7667_v39, %v7674_v2  ;;  %v7684_v56 = vcombine.high %v7651_v40, %v7666_v6  ;;  %v7683_v52 = vcombine.low %v7651_v40, %v7666_v6  ;;  %v20232_v21 = vld [vmem:[%s22709_s5 + $0x2d8] sm:$0xff]  ;;  %23307 = vst [vmem:[#allocation71_spill] sm:$0xff] %v20245_v31 }
 0x6f7   :  { %v20206_v15 = vrot.slane %v7734_v29, %v7674_v2  ;;  %v20208_v16 = vrot.slane %v7733_v61, %v7674_v2  ;;  %v7750_v48 = vcombine.high %v7717_v51, %v7732_v42  ;;  %v7749_v45 = vcombine.low %v7717_v51, %v7732_v42  ;;  %23304 = vst [vmem:[#allocation68_spill] sm:$0xff] %v20232_v21  ;;  %v7838_v51 = vld [vmem:[%s22709_s5 + $0xe0] sm:$0xff] }
 0x6f8   :  { %v7700_v7 = vcombine.high %v20202_v36, %v22820_v60  ;;  %v7699_v32 = vcombine.high %v20204_v47, %v22820_v60  ;;  %v20220_v29 = vrot.slane %v7684_v56, %v7674_v2  ;;  %v20222_v61 = vrot.slane %v7683_v52, %v7674_v2  ;;  %v20290_v52 = vld [vmem:[%s22709_s5 + $0x2e0] sm:$0xff] }
 0x6f9   :  { %v7766_v59 = vcombine.high %v20206_v15, %v22820_v60  ;;  %v7765_v49 = vcombine.high %v20208_v16, %v22820_v60  ;;  %v20238_v41 = vrot.slane %v7750_v48, %v7674_v2  ;;  %v20240_v18 = vrot.slane %v7749_v45, %v7674_v2  ;;  %v20256_v2 = vld [vmem:[%s22709_s5 + $0x258] sm:$0xff]  ;;  %v7839_v45 = vld [vmem:[%s22709_s5 + $0xe8] sm:$0xff]  ;;  %23312 = vst [vmem:[#allocation76_spill] sm:$0xff] %v20290_v52 }
 0x6fa   :  { %23301 = vst [vmem:[#allocation65_spill] sm:$0xff] %v20220_v29  ;;  %23302 = vst [vmem:[#allocation66_spill] sm:$0xff] %v20222_v61  ;;  %7774 = vrot.lane.b32.xlu0 %v7700_v7, %s17382_s16  ;;  %7770 = vrot.lane.b32.xlu1 %v7699_v32, %s17382_s16  ;;  %v7702_v40 = vcombine.high %v20220_v29, %v22820_v60  ;;  %v7701_v6 = vcombine.high %v20222_v61, %v22820_v60  ;;  %v7976_v23 = vand.u32 4294901760, %v7820_v17  ;;  %v7822_v7 = vld [vmem:[%s22709_s5 + $0x60] sm:$0xff]  ;;  %v7823_v32 = vld [vmem:[%s22709_s5 + $0x68] sm:$0xff] }
 0x6fb   :  { %23305 = vst [vmem:[#allocation69_spill] sm:$0xff] %v20238_v41  ;;  %23306 = vst [vmem:[#allocation70_spill] sm:$0xff] %v20240_v18  ;;  %v7979_v39 = vand.u32 4294901760, %v7821_v5  ;;  %v20263_v42 = vcombine.high %v20238_v41, %v22820_v60  ;;  %v20267_v56 = vcombine.high %v20240_v18, %v22820_v60  ;;  %v22830_v48 = vand.u32 4294901760, %v20245_v31 }
 0x6fc   :  { %23308 = vst [vmem:[#allocation72_spill] sm:$0xff] %v20256_v2  ;;  %v20282_v60 = vsub.f32 %v7820_v17, %v7976_v23  ;;  %v23313_v18 = vand.u32 4294901760, %v20227_v62  ;;  %v23315_v1 = vand.u32 4294901760, %v20232_v21  ;;  %v20318_v17 = vld [vmem:[%s22709_s5 + $0x260] sm:$0xff] }
 0x6fd   :  { %v20280_v61 = vpack.c.bf16 %v7979_v39, %v7976_v23  ;;  %v20284_v29 = vsub.f32 %v7821_v5, %v7979_v39  ;;  %v8030_v5 = vand.u32 4294901760, %v7838_v51  ;;  %v20308_v23 = vsub.f32 %v20245_v31, %v22830_v48  ;;  %23319 = vst [vmem:[#allocation81_spill] sm:$0xff] %v20318_v17 }
 0x6fe   :  { %23310 = vst [vmem:[#allocation74_spill] sm:$0xff] %v20282_v60  ;;  %v20295_v41 = vsub.f32 %v20227_v62, %v23313_v18  ;;  %v20300_v13 = vsub.f32 %v20232_v21, %v23315_v1  ;;  %7782 = vrot.lane.b32.xlu0 %v7702_v40, %s17382_s16  ;;  %7778 = vrot.lane.b32.xlu1 %v7701_v6, %s17382_s16  ;;  %v8033_v39 = vand.u32 4294901760, %v7839_v45  ;;  %v7982_v18 = vand.u32 4294901760, %v7822_v7  ;;  %v20313_v1 = vld [vmem:[%s22709_s5 + $0x2e8] sm:$0xff] }
 0x6ff   :  { %23309 = vst [vmem:[#allocation73_spill] sm:$0xff] %v20280_v61  ;;  %23311 = vst [vmem:[#allocation75_spill] sm:$0xff] %v20284_v29  ;;  %v7985_v62 = vand.u32 4294901760, %v7823_v32  ;;  %16214 = vmatpush3.bf16.msra.mxu0 %v20280_v61  ;;  %v23320_v6 = vand.u32 4294901760, %v20256_v2  ;;  %v20328_v31 = vsub.f32 %v7838_v51, %v8030_v5  ;;  %v7840_v61 = vld [vmem:[%s22709_s5 + $0xf0] sm:$0xff]  ;;  %v22857_v3 = vand.u32 4294901760, %v20318_v17 }
 0x700   :  { %23314 = vst [vmem:[#allocation77_spill] sm:$0xff] %v20295_v41  ;;  %23316 = vst [vmem:[#allocation78_spill] sm:$0xff] %v20300_v13  ;;  %v16659_v40 = vpack.c.bf16 %v20300_v13, %v20295_v41  ;;  %v7841_v13 = vld [vmem:[%s22709_s5 + $0xf8] sm:$0xff]  ;;  %v20342_v41 = vpack.c.bf16 %v8033_v39, %v8030_v5  ;;  %v20348_v21 = vsub.f32 %v7822_v7, %v7982_v18  ;;  %v22852_v7 = vand.u32 4294901760, %v20313_v1 }
 0x701   :  { %23317 = vst [vmem:[#allocation79_spill] sm:$0xff] %v20308_v23  ;;  %23318 = vst [vmem:[#allocation80_spill] sm:$0xff] %v20313_v1  ;;  %v20326_v48 = vsub.f32 %v20256_v2, %v23320_v6  ;;  %v20344_v6 = vsub.f32 %v7839_v45, %v8033_v39  ;;  %v20346_v51 = vpack.c.bf16 %v7985_v62, %v7982_v18  ;;  %v7824_v2 = vld [vmem:[%s22709_s5 + $0x70] sm:$0xff]  ;;  %v23330_v39 = vand.u32 4294901760, %v20290_v52 }
 0x702   :  { %23322 = vst [vmem:[#allocation83_spill] sm:$0xff] %v20328_v31  ;;  %23324 = vst [vmem:[#allocation85_spill] sm:$0xff] %v20342_v41  ;;  %16660 = vmatprep.subr.bf16.mxu1 %v16659_v40  ;;  %v20363_v5 = vsub.f32 %v7823_v32, %v7985_v62  ;;  %7790 = vrot.lane.b32.xlu0 %v7766_v59, %s17382_s16  ;;  %v22859_v40 = vand.u32 4294901760, %v20334_v10  ;;  %v8036_v53 = vand.u32 4294901760, %v7840_v61  ;;  %v8039_v54 = vand.u32 4294901760, %v7841_v13  ;;  %v20384_v59 = vld [vmem:[%s22709_s5 + $0x2f8] sm:$0xff] }
 0x703   :  { %23321 = vst [vmem:[#allocation82_spill] sm:$0xff] %v20326_v48  ;;  %23325 = vst [vmem:[#allocation86_spill] sm:$0xff] %v20344_v6  ;;  %v16661_v45 = vpack.c.bf16 %v20326_v48, %v20308_v23  ;;  %v20369_v18 = vsub.f32 %v20290_v52, %v23330_v39  ;;  %7786 = vrot.lane.b32.xlu1 %v7765_v49, %s17382_s16  ;;  %16216 = vmatprep.subr.bf16.mxu0 %v20342_v41  ;;  %v7988_v32 = vand.u32 4294901760, %v7824_v2  ;;  %v20405_v49 = vld [vmem:[%s22709_s5 + $0x270] sm:$0xff] }
 0x704   :  { %23326 = vst [vmem:[#allocation87_spill] sm:$0xff] %v20346_v51  ;;  %23327 = vst [vmem:[#allocation88_spill] sm:$0xff] %v20348_v21  ;;  %v20379_v62 = vsub.f32 %v20313_v1, %v22852_v7  ;;  %v7991_v39 = vand.u32 4294901760, %v7825_v4  ;;  %16218 = vmatpush3.bf16.msra.mxu0 %v20346_v51  ;;  %v20396_v7 = vsub.f32 %v20334_v10, %v22859_v40  ;;  %v20410_v51 = vld [vmem:[%s22709_s5 + $0x278] sm:$0xff]  ;;  %v22863_v41 = vand.u32 4294901760, %v20384_v59 }
 0x705   :  { %23329 = vst [vmem:[#allocation90_spill] sm:$0xff] %v20363_v5  ;;  %23331 = vst [vmem:[#allocation91_spill] sm:$0xff] %v20369_v18  ;;  %16662 = vmatpush3.bf16.msra.mxu1 %v16661_v45  ;;  %v20391_v45 = vsub.f32 %v20318_v17, %v22857_v3  ;;  %v20398_v1 = vpack.c.bf16 %v8039_v54, %v8036_v53  ;;  %v20400_v52 = vsub.f32 %v7840_v61, %v8036_v53 }
 0x706   :  { %23332 = vst [vmem:[#allocation92_spill] sm:$0xff] %v20379_v62  ;;  %23333 = vst [vmem:[#allocation93_spill] sm:$0xff] %v20384_v59  ;;  %v16663_v3 = vpack.c.bf16 %v20379_v62, %v20369_v18  ;;  %v20414_v17 = vsub.f32 %v7841_v13, %v8039_v54  ;;  %v20416_v40 = vpack.c.bf16 %v7991_v39, %v7988_v32  ;;  %7798 = vrot.lane.b32.xlu0 %v20263_v42, %s17382_s16 }
 0x707   :  { %23334 = vst [vmem:[#allocation94_spill] sm:$0xff] %v20391_v45  ;;  %23335 = vst [vmem:[#allocation95_spill] sm:$0xff] %v20396_v7  ;;  %v20418_v10 = vsub.f32 %v7824_v2, %v7988_v32  ;;  %7794 = vrot.lane.b32.xlu1 %v20267_v56, %s17382_s16  ;;  %v16665_v53 = vpack.c.bf16 %v20396_v7, %v20391_v45  ;;  %v20426_v61 = vsub.f32 %v7825_v4, %v7991_v39 }
 0x708   :  { %23336 = vst [vmem:[#allocation96_spill] sm:$0xff] %v20398_v1  ;;  %23337 = vst [vmem:[#allocation97_spill] sm:$0xff] %v20400_v52  ;;  %v23344_v54 = vand.u32 4294901760, %v20359_v0  ;;  %16664 = vmatprep.subr.bf16.mxu1 %v16663_v3  ;;  %16220 = vmatprep.subr.bf16.mxu0 %v20398_v1  ;;  %v22865_v2 = vand.u32 4294901760, %v20405_v49  ;;  %v22867_v42 = vand.u32 4294901760, %v20410_v51  ;;  %v20443_v4 = vsub.f32 %v20384_v59, %v22863_v41 }
 0x709   :  { %23338 = vst [vmem:[#allocation98_spill] sm:$0xff] %v20405_v49  ;;  %23339 = vst [vmem:[#allocation99_spill] sm:$0xff] %v20410_v51  ;;  %16666 = vmatpush3.bf16.msra.mxu1 %v16665_v53  ;;  %16222 = vmatpush3.bf16.msra.mxu0 %v20416_v40  ;;  %v23349_v32 = vand.u32 4294901760, %v19842_v9  ;;  %v23350_v3 = vand.u32 4294901760, %v19844_v19  ;;  %v23351_v59 = vand.u32 4294901760, %v19846_v22  ;;  %v22892_v7 = vand.u32 4294901760, %v19910_v30 }
 0x70a   :  { %23340 = vst [vmem:[#allocation100_spill] sm:$0xff] %v20414_v17  ;;  %23341 = vst [vmem:[#allocation101_spill] sm:$0xff] %v20416_v40  ;;  %v20432_v13 = vsub.f32 %v20359_v0, %v23344_v54  ;;  %v20451_v56 = vsub.f32 %v20405_v49, %v22865_v2  ;;  %v20456_v53 = vsub.f32 %v20410_v51, %v22867_v42  ;;  %v23352_v49 = vand.u32 4294901760, %v19859_v50 }
 0x70b   :  { %23342 = vst [vmem:[#allocation102_spill] sm:$0xff] %v20418_v10  ;;  %23343 = vst [vmem:[#allocation103_spill] sm:$0xff] %v20426_v61  ;;  %v8173_v41 = vsub.f32 %v19842_v9, %v23349_v32  ;;  %v8180_v39 = vsub.f32 %v19844_v19, %v23350_v3  ;;  %v8061_v2 = vsub.f32 %v19846_v22, %v23351_v59  ;;  %v22884_v51 = vand.u32 4294901760, %v19869_v58 }
 0x70c   :  { %23345 = vst [vmem:[#allocation104_spill] sm:$0xff] %v20432_v13  ;;  %23346 = vst [vmem:[#allocation105_spill] sm:$0xff] %v20443_v4  ;;  %v16667_v54 = vpack.c.bf16 %v20443_v4, %v20432_v13  ;;  %v8068_v42 = vsub.f32 %v19859_v50, %v23352_v49  ;;  %v16669_v32 = vpack.c.bf16 %v20456_v53, %v20451_v56  ;;  %v23353_v4 = vand.u32 4294901760, %v19864_v57 }
 0x70d   :  { %23347 = vst [vmem:[#allocation106_spill] sm:$0xff] %v20451_v56  ;;  %23348 = vst [vmem:[#allocation107_spill] sm:$0xff] %v20456_v53  ;;  %v8174_v0 = vand.u32 4294901760, %v8173_v41  ;;  %v8181_v40 = vand.u32 4294901760, %v8180_v39  ;;  %v8062_v3 = vand.u32 4294901760, %v8061_v2  ;;  %v22886_v49 = vand.u32 4294901760, %v19921_v26 }
 0x70e   :  { %16668 = vmatprep.subr.bf16.mxu1 %v16667_v54  ;;  %v8069_v1 = vand.u32 4294901760, %v8068_v42  ;;  %v16703_v13 = vpack.c.bf16 %v22884_v51, %v23353_v4  ;;  %v22885_v45 = vand.u32 4294901760, %v19925_v14  ;;  %v22887_v41 = vand.u32 4294901760, %v19927_v8 }
 0x70f   :  { %16670 = vmatpush3.bf16.msra.mxu1 %v16669_v32  ;;  %v16223_v59 = vpack.c.bf16 %v8181_v40, %v8174_v0  ;;  %v8187_v2 = vsub.f32 %v19910_v30, %v22892_v7  ;;  %v8194_v0 = vsub.f32 %v19921_v26, %v22886_v49  ;;  %v22890_v51 = vand.u32 4294901760, %v19999_v44 }
 0x710   :  { %v20482_v62 = vpack.c.bf16 %v8069_v1, %v8062_v3  ;;  %16704 = vmatprep.subr.bf16.mxu1 %v16703_v13  ;;  %v8075_v40 = vsub.f32 %v19925_v14, %v22885_v45  ;;  %v8082_v1 = vsub.f32 %v19927_v8, %v22887_v41  ;;  %v22888_v13 = vand.u32 4294901760, %v19982_v37 }
 0x711   :  { %16224 = vmatprep.subr.bf16.mxu0 %v16223_v59  ;;  %v8188_v42 = vand.u32 4294901760, %v8187_v2  ;;  %v8195_v4 = vand.u32 4294901760, %v8194_v0  ;;  %v22889_v3 = vand.u32 4294901760, %v19984_v28  ;;  %v22891_v45 = vand.u32 4294901760, %v20001_v25 }
 0x712   :  { %v8076_v39 = vand.u32 4294901760, %v8075_v40  ;;  %v8083_v54 = vand.u32 4294901760, %v8082_v1  ;;  %v8201_v32 = vsub.f32 %v19982_v37, %v22888_v13  ;;  %v8089_v0 = vsub.f32 %v19999_v44, %v22890_v51 }
 0x713   :  { %v20502_v59 = vpack.c.bf16 %v8195_v4, %v8188_v42  ;;  %v8208_v2 = vsub.f32 %v19984_v28, %v22889_v3  ;;  %v8096_v40 = vsub.f32 %v20001_v25, %v22891_v45  ;;  %v22893_v42 = vand.u32 4294901760, %v20056_v63 }
 0x714   :  { %v20506_v49 = vpack.c.bf16 %v8083_v54, %v8076_v39  ;;  %v8202_v41 = vand.u32 4294901760, %v8201_v32  ;;  %v22896_v4 = vand.u32 4294901760, %v20058_v55  ;;  %v8090_v39 = vand.u32 4294901760, %v8089_v0 }
 0x715   :  { %v8209_v1 = vand.u32 4294901760, %v8208_v2  ;;  %v8097_v54 = vand.u32 4294901760, %v8096_v40  ;;  %v22900_v32 = vand.u32 4294901760, %v20073_v43  ;;  %v8215_v3 = vsub.f32 %v20056_v63, %v22893_v42 }
 0x716   :  { %v8222_v51 = vsub.f32 %v20058_v55, %v22896_v4  ;;  %v22899_v2 = vand.u32 4294901760, %v20075_v33  ;;  %v22901_v42 = vand.u32 4294901760, %v20125_v35  ;;  %v22907_v57 = vand.u32 4294901760, %v20127_v46 }
 0x717   :  { %v20520_v13 = vpack.c.bf16 %v8209_v1, %v8202_v41  ;;  %v20529_v45 = vpack.c.bf16 %v8097_v54, %v8090_v39  ;;  %v8103_v0 = vsub.f32 %v20073_v43, %v22900_v32  ;;  %v8216_v40 = vand.u32 4294901760, %v8215_v3 }
 0x718   :  { %v8223_v7 = vand.u32 4294901760, %v8222_v51  ;;  %v8110_v41 = vsub.f32 %v20075_v33, %v22899_v2  ;;  %v22906_v39 = vand.u32 4294901760, %v20144_v27  ;;  %v8229_v54 = vsub.f32 %v20125_v35, %v22901_v42 }
 0x719   :  { %v8104_v1 = vand.u32 4294901760, %v8103_v0  ;;  %v22908_v51 = vand.u32 4294901760, %v20146_v12  ;;  %v8236_v0 = vsub.f32 %v20127_v46, %v22907_v57  ;;  %v22909_v42 = vand.u32 4294901760, %v20177_v38 }
 0x71a   :  { %v20538_v58 = vpack.c.bf16 %v8223_v7, %v8216_v40  ;;  %v8111_v4 = vand.u32 4294901760, %v8110_v41  ;;  %v8117_v7 = vsub.f32 %v20144_v27, %v22906_v39  ;;  %v8230_v40 = vand.u32 4294901760, %v8229_v54 }
 0x71b   :  { %v8124_v41 = vsub.f32 %v20146_v12, %v22908_v51  ;;  %v8237_v2 = vand.u32 4294901760, %v8236_v0  ;;  %v8243_v39 = vsub.f32 %v20177_v38, %v22909_v42  ;;  %v22914_v54 = vand.u32 4294901760, %v20284_v29 }
 0x71c   :  { %v20546_v3 = vpack.c.bf16 %v8111_v4, %v8104_v1  ;;  %v8118_v32 = vand.u32 4294901760, %v8117_v7  ;;  %v22913_v4 = vand.u32 4294901760, %v20179_v24  ;;  %v22912_v1 = vand.u32 4294901760, %v20282_v60 }
 0x71d   :  { %v8125_v53 = vand.u32 4294901760, %v8124_v41  ;;  %v20560_v56 = vpack.c.bf16 %v8237_v2, %v8230_v40  ;;  %v8244_v41 = vand.u32 4294901760, %v8243_v39  ;;  %v8138_v2 = vsub.f32 %v20284_v29, %v22914_v54 }
 0x71e   :  { %v8250_v0 = vsub.f32 %v20179_v24, %v22913_v4  ;;  %v8131_v7 = vsub.f32 %v20282_v60, %v22912_v1  ;;  %v22915_v42 = vand.u32 4294901760, %v20328_v31  ;;  %v22918_v39 = vand.u32 4294901760, %v20363_v5 }
 0x71f   :  { %v20566_v57 = vpack.c.bf16 %v8125_v53, %v8118_v32  ;;  %v8139_v18 = vand.u32 4294901760, %v8138_v2  ;;  %v22917_v53 = vand.u32 4294901760, %v20344_v6  ;;  %v22916_v32 = vand.u32 4294901760, %v20348_v21 }
 0x720   :  { %v8251_v40 = vand.u32 4294901760, %v8250_v0  ;;  %v8132_v51 = vand.u32 4294901760, %v8131_v7  ;;  %v8257_v1 = vsub.f32 %v20328_v31, %v22915_v42  ;;  %v22919_v42 = vand.u32 4294901760, %v20400_v52 }
 0x721   :  { %23354 = vst [vmem:[#allocation108_spill] sm:$0xff] %v20566_v57  ;;  %v8264_v0 = vsub.f32 %v20344_v6, %v22917_v53  ;;  %v8145_v7 = vsub.f32 %v20348_v21, %v22916_v32 }
 0x722   :  { %v20580_v57 = vpack.c.bf16 %v8251_v40, %v8244_v41  ;;  %v20586_v4 = vpack.c.bf16 %v8139_v18, %v8132_v51  ;;  %v8258_v2 = vand.u32 4294901760, %v8257_v1  ;;  %v8152_v41 = vsub.f32 %v20363_v5, %v22918_v39 }
 0x723   :  { %v8265_v40 = vand.u32 4294901760, %v8264_v0  ;;  %v8146_v54 = vand.u32 4294901760, %v8145_v7  ;;  %v22920_v18 = vand.u32 4294901760, %v20414_v17  ;;  %v22921_v51 = vand.u32 4294901760, %v20418_v10 }
 0x724   :  { %23355 = vst [vmem:[#allocation109_spill] sm:$0xff] %v20580_v57  ;;  %23356 = vst [vmem:[#allocation110_spill] sm:$0xff] %v20586_v4  ;;  %v8153_v57 = vand.u32 4294901760, %v8152_v41  ;;  %v8271_v32 = vsub.f32 %v20400_v52, %v22919_v42  ;;  %v22922_v1 = vand.u32 4294901760, %v20426_v61  ;;  %v23364_v52 = vld [vmem:[#allocation23_spill] sm:$0xff] }
 0x725   :  { %v20600_v4 = vpack.c.bf16 %v8265_v40, %v8258_v2  ;;  %v8278_v0 = vsub.f32 %v20414_v17, %v22920_v18  ;;  %v8159_v7 = vsub.f32 %v20418_v10, %v22921_v51  ;;  %v22941_v17 = vand.u32 4294901760, %v23364_v52  ;;  %v23369_v10 = vld [vmem:[#allocation28_spill] sm:$0xff]  ;;  %v23375_v52 = vld [vmem:[#allocation45_spill] sm:$0xff] }
 0x726   :  { %v20606_v53 = vpack.c.bf16 %v8153_v57, %v8146_v54  ;;  %v8272_v41 = vand.u32 4294901760, %v8271_v32  ;;  %v8166_v2 = vsub.f32 %v20426_v61, %v22922_v1  ;;  %v22946_v21 = vand.u32 4294901760, %v23369_v10 }
 0x727   :  { %v8279_v40 = vand.u32 4294901760, %v8278_v0  ;;  %v8160_v39 = vand.u32 4294901760, %v8159_v7 }
 0x728   :  { %23357 = vst [vmem:[#allocation111_spill] sm:$0xff] %v20606_v53  ;;  %v8167_v57 = vand.u32 4294901760, %v8166_v2 }
 0x729   :  { %v20621_v53 = vpack.c.bf16 %v8279_v40, %v8272_v41 }
 0x72a   :  { %v20623_v18 = vpack.c.bf16 %v8167_v57, %v8160_v39 }
 0x76c   :  { %v7775_v40 = vpop.permute.xlu0 %7774  ;;  %v7771_v0 = vpop.permute.xlu1 %7770 }
 0x76d   :  { %v7803_v57 = vsel %vm7801_vm9, %v20202_v36, %v7775_v40  ;;  %v7802_v1 = vsel %vm7801_vm9, %v20204_v47, %v7771_v0 }
 0x76e   :  { %v20657_v51 = vand.u32 4294901760, %v7803_v57  ;;  %v20659_v7 = vand.u32 4294901760, %v7802_v1 }
 0x770   :  { %23358 = vst [vmem:[#allocation112_spill] sm:$0xff] %v20659_v7  ;;  %v20662_v2 = vsub.f32 %v7803_v57, %v20657_v51  ;;  %v20665_v41 = vsub.f32 %v7802_v1, %v20659_v7  ;;  %v20667_v39 = vpop.permute.xlu0 %7782  ;;  %v20669_v32 = vpop.permute.xlu1 %7778 }
 0x771   :  { %23360 = vst [vmem:[#allocation114_spill] sm:$0xff] %v20667_v39  ;;  %23361 = vst [vmem:[#allocation115_spill] sm:$0xff] %v20669_v32  ;;  %v22942_v39 = vand.u32 4294901760, %v19906_v20  ;;  %v23429_v20 = vld [vmem:[#allocation70_spill] sm:$0xff] }
 0x772   :  { %23359 = vst [vmem:[#allocation113_spill] sm:$0xff] %v20665_v41  ;;  %v22927_v54 = vand.u32 4294901760, %v20665_v41  ;;  %v22934_v36 = vand.u32 4294901760, %v20662_v2 }
 0x774   :  { %v8050_v47 = vsub.f32 %v20665_v41, %v22927_v54  ;;  %v7791_v0 = vpop.permute.xlu0 %7790  ;;  %v8044_v57 = vsub.f32 %v20662_v2, %v22934_v36 }
 0x775   :  { %v7787_v40 = vpop.permute.xlu1 %7786  ;;  %v7807_v42 = vsel %vm7801_vm9, %v20206_v15, %v7791_v0 }
 0x776   :  { %v7806_v32 = vsel %vm7801_vm9, %v20208_v16, %v7787_v40  ;;  %v8051_v61 = vand.u32 4294901760, %v8050_v47  ;;  %v20686_v54 = vand.u32 4294901760, %v7807_v42  ;;  %v8045_v36 = vand.u32 4294901760, %v8044_v57  ;;  %v23368_v47 = vld [vmem:[#allocation24_spill] sm:$0xff] }
 0x777   :  { %v20688_v41 = vand.u32 4294901760, %v7806_v32  ;;  %v23367_v16 = vand.u32 4294901760, %v19901_v34  ;;  %v22947_v40 = vand.u32 4294901760, %v23368_v47  ;;  %v23370_v57 = vand.u32 4294901760, %v19944_v11 }
 0x778   :  { %23362 = vst [vmem:[#allocation116_spill] sm:$0xff] %v20686_v54  ;;  %v20692_v1 = vsub.f32 %v7807_v42, %v20686_v54  ;;  %8046 = vmatprep.mubr.f32.mxu0 %v8045_v36  ;;  %v23372_v36 = vld [vmem:[#allocation33_spill] sm:$0xff] }
 0x779   :  { %23363 = vst [vmem:[#allocation117_spill] sm:$0xff] %v20688_v41  ;;  %v20695_v15 = vsub.f32 %v7806_v32, %v20688_v41  ;;  %v16705_v0 = vpack.c.bf16 %v22942_v39, %v23367_v16  ;;  %8052 = vmatmul.mubr.f32.vlgmr.msra.gmra.mrb[6].mxu0 %v8051_v61  ;;  %v16707_v42 = vpack.c.bf16 %v22941_v17, %v23370_v57  ;;  %v23371_v32 = vld [vmem:[#allocation32_spill] sm:$0xff]  ;;  %v22951_v31 = vand.u32 4294901760, %v23372_v36  ;;  %v23373_v16 = vld [vmem:[#allocation34_spill] sm:$0xff]  ;;  %v23380_v36 = vld [vmem:[#allocation59_spill] sm:$0xff] }
 0x77a   :  { %23365 = vst [vmem:[#allocation118_spill] sm:$0xff] %v20692_v1  ;;  %10143 = vmatprep.mubr.f32.mxu1 %v20692_v1  ;;  %v22952_v5 = vand.u32 4294901760, %v23371_v32  ;;  %16226 = vmatpush3.bf16.msra.mxu0 %v20482_v62  ;;  %v16709_v61 = vpack.c.bf16 %v22946_v21, %v22947_v40  ;;  %v22955_v57 = vand.u32 4294901760, %v23373_v16  ;;  %v23374_v17 = vld [vmem:[#allocation38_spill] sm:$0xff] }
 0x77b   :  { %23366 = vst [vmem:[#allocation119_spill] sm:$0xff] %v20695_v15  ;;  %8282 = vmatprep.mubr.f32.mxu0 %v20657_v51  ;;  %10146 = vmatmul.mubr.f32.vlgmr.msra.gmra.mrb[4].mxu1 %v20695_v15  ;;  %v22954_v39 = vand.u32 4294901760, %v23374_v17 }
 0x77c   :  { %16228 = vmatprep.subr.bf16.mxu0 %v20502_v59  ;;  %16706 = vmatpush3.bf16.msra.mxu1 %v16705_v0  ;;  %v16711_v62 = vpack.c.bf16 %v22951_v31, %v22952_v5  ;;  %v22959_v59 = vand.u32 4294901760, %v23375_v52  ;;  %v23376_v0 = vld [vmem:[#allocation46_spill] sm:$0xff]  ;;  %v23382_v52 = vld [vmem:[#allocation61_spill] sm:$0xff] }
 0x77d   :  { %10420 = vmatprep.mubr.f32.mxu1 %v20686_v54  ;;  %16708 = vmatprep.subr.bf16.mxu1 %v16707_v42  ;;  %v22958_v11 = vand.u32 4294901760, %v23376_v0  ;;  %v16713_v21 = vpack.c.bf16 %v22954_v39, %v22955_v57  ;;  %v23377_v42 = vld [vmem:[#allocation47_spill] sm:$0xff]  ;;  %v23378_v54 = vld [vmem:[#allocation50_spill] sm:$0xff]  ;;  %v23381_v39 = vld [vmem:[#allocation60_spill] sm:$0xff]  ;;  %v22967_v0 = vand.u32 4294901760, %v23382_v52 }
 0x77e   :  { %16230 = vmatpush3.bf16.msra.mxu0 %v20506_v49  ;;  %v22965_v40 = vand.u32 4294901760, %v23377_v42  ;;  %v22962_v32 = vand.u32 4294901760, %v23378_v54  ;;  %v23379_v5 = vld [vmem:[#allocation58_spill] sm:$0xff]  ;;  %v22968_v57 = vand.u32 4294901760, %v23381_v39  ;;  %v23390_v52 = vld [vmem:[#allocation109_spill] sm:$0xff] }
 0x77f   :  { %16232 = vmatprep.subr.bf16.mxu0 %v20520_v13  ;;  %v16715_v31 = vpack.c.bf16 %v22958_v11, %v22959_v59  ;;  %v22964_v49 = vand.u32 4294901760, %v23379_v5  ;;  %v22963_v13 = vand.u32 4294901760, %v23380_v36  ;;  %v23394_v39 = vld [vmem:[#allocation105_spill] sm:$0xff]  ;;  %v23422_v5 = vpack.c.bf16 %v20001_v25, %v19999_v44 }
 0x780   :  { %16710 = vmatpush3.bf16.msra.mxu1 %v16709_v61  ;;  %v7799_v61 = vpop.permute.xlu0 %7798 }
 0x781   :  { %16712 = vmatprep.subr.bf16.mxu1 %v16711_v62  ;;  %v16717_v62 = vpack.c.bf16 %v22962_v32, %v22965_v40  ;;  %v16719_v11 = vpack.c.bf16 %v22963_v13, %v22964_v49  ;;  %v22979_v32 = vand.u32 4294901760, %v20308_v23  ;;  %v22976_v13 = vand.u32 4294901760, %v20326_v48  ;;  %v23386_v49 = vld [vmem:[#allocation91_spill] sm:$0xff]  ;;  %v23389_v40 = vld [vmem:[#allocation108_spill] sm:$0xff]  ;;  %v23396_v23 = vld [vmem:[#allocation110_spill] sm:$0xff] }
 0x782   :  { %16234 = vmatpush3.bf16.msra.mxu0 %v20529_v45  ;;  %v23383_v45 = vld [vmem:[#allocation77_spill] sm:$0xff]  ;;  %v23415_v48 = vpack.c.bf16 %v19927_v8, %v19925_v14 }
 0x783   :  { %16236 = vmatprep.subr.bf16.mxu0 %v20538_v58  ;;  %v22971_v59 = vand.u32 4294901760, %v23383_v45  ;;  %v23384_v58 = vld [vmem:[#allocation78_spill] sm:$0xff]  ;;  %v23393_v45 = vld [vmem:[#allocation104_spill] sm:$0xff] }
 0x784   :  { %16714 = vmatpush3.bf16.msra.mxu1 %v16713_v21  ;;  %v22970_v17 = vand.u32 4294901760, %v23384_v58  ;;  %v23385_v21 = vld [vmem:[#allocation69_spill] sm:$0xff]  ;;  %v23392_v58 = vld [vmem:[#allocation95_spill] sm:$0xff] }
 0x785   :  { %16716 = vmatprep.subr.bf16.mxu1 %v16715_v31  ;;  %v7809_v54 = vsel %vm7801_vm9, %v23385_v21, %v7799_v61  ;;  %v16721_v31 = vpack.c.bf16 %v22967_v0, %v22968_v57  ;;  %v22978_v61 = vand.u32 4294901760, %v23386_v49  ;;  %v23387_v21 = vld [vmem:[#allocation92_spill] sm:$0xff]  ;;  %v23391_v0 = vld [vmem:[#allocation94_spill] sm:$0xff] }
 0x786   :  { %16238 = vmatpush3.bf16.msra.mxu0 %v20546_v3  ;;  %v16723_v3 = vpack.c.bf16 %v22970_v17, %v22971_v59  ;;  %v22983_v57 = vand.u32 4294901760, %v23391_v0  ;;  %v22982_v17 = vand.u32 4294901760, %v23392_v58  ;;  %v23408_v58 = vpack.c.bf16 %v19859_v50, %v19846_v22  ;;  %v20918_v0 = vld [vmem:[%s22709_s5 + $0x3b8] sm:$0xff] }
 0x787   :  { %16240 = vmatprep.subr.bf16.mxu0 %v20560_v56  ;;  %v22977_v56 = vand.u32 4294901760, %v23387_v21  ;;  %v23420_v16 = vand.u32 4294901760, %v20918_v0 }
 0x788   :  { %16718 = vmatpush3.bf16.msra.mxu1 %v16717_v62  ;;  %v20771_v62 = vand.u32 4294901760, %v7809_v54 }
 0x789   :  { %16720 = vmatprep.subr.bf16.mxu1 %v16719_v11  ;;  %v16725_v11 = vpack.c.bf16 %v22976_v13, %v22979_v32  ;;  %v16727_v59 = vpack.c.bf16 %v22977_v56, %v22978_v61  ;;  %v20794_v13 = vld [vmem:[%s22709_s5 + $0x380] sm:$0xff]  ;;  %v23397_v56 = vld [vmem:[#allocation106_spill] sm:$0xff]  ;;  %v23398_v61 = vld [vmem:[#allocation107_spill] sm:$0xff] }
 0x78a   :  { %23388 = vst [vmem:[#allocation69_spill] sm:$0xff] %v20771_v62  ;;  %16242 = vmatpush3.bf16.msra.mxu0 %v23389_v40  ;;  %v22985_v40 = vand.u32 4294901760, %v23393_v45  ;;  %v22989_v32 = vand.u32 4294901760, %v23398_v61  ;;  %v22991_v49 = vand.u32 4294901760, %v20794_v13 }
 0x78b   :  { %16244 = vmatprep.subr.bf16.mxu0 %v23390_v52  ;;  %v22984_v52 = vand.u32 4294901760, %v23394_v39 }
 0x78c   :  { %16722 = vmatpush3.bf16.msra.mxu1 %v16721_v31  ;;  %v20788_v31 = vsub.f32 %v7809_v54, %v20771_v62  ;;  %v16729_v54 = vpack.c.bf16 %v22982_v17, %v22983_v57  ;;  %v20822_v17 = vld [vmem:[%s22709_s5 + $0x308] sm:$0xff] }
 0x78d   :  { %16724 = vmatprep.subr.bf16.mxu1 %v16723_v3  ;;  %v20799_v3 = vld [vmem:[%s22709_s5 + $0x388] sm:$0xff]  ;;  %v16731_v21 = vpack.c.bf16 %v22984_v52, %v22985_v40  ;;  %v20829_v52 = vld [vmem:[%s22709_s5 + $0x390] sm:$0xff]  ;;  %v20834_v40 = vld [vmem:[%s22709_s5 + $0x398] sm:$0xff] }
 0x78e   :  { %23395 = vst [vmem:[#allocation108_spill] sm:$0xff] %v20788_v31  ;;  %16246 = vmatpush3.bf16.msra.mxu0 %v23396_v23  ;;  %v22990_v23 = vand.u32 4294901760, %v23397_v56  ;;  %v23400_v39 = vand.u32 4294901760, %v20799_v3  ;;  %v23405_v61 = vand.u32 4294901760, %v20829_v52  ;;  %v23406_v56 = vand.u32 4294901760, %v20834_v40 }
 0x78f   :  { %16248 = vmatprep.subr.bf16.mxu0 %v20600_v4  ;;  %v22995_v4 = vand.u32 4294901760, %v20822_v17 }
 0x790   :  { %16726 = vmatpush3.bf16.msra.mxu1 %v16725_v11  ;;  %v20817_v11 = vld [vmem:[%s22709_s5 + $0x300] sm:$0xff]  ;;  %v20847_v45 = vpack.c.bf16 %v23400_v39, %v22991_v49  ;;  %v20873_v49 = vld [vmem:[%s22709_s5 + $0x3a8] sm:$0xff] }
 0x791   :  { %16728 = vmatprep.subr.bf16.mxu1 %v16727_v59  ;;  %v23399_v59 = vld [vmem:[#allocation111_spill] sm:$0xff]  ;;  %v22996_v57 = vand.u32 4294901760, %v20817_v11  ;;  %v23413_v36 = vand.u32 4294901760, %v20873_v49 }
 0x792   :  { %16250 = vmatpush3.bf16.msra.mxu0 %v23399_v59  ;;  %v16733_v59 = vpack.c.bf16 %v22989_v32, %v22990_v23  ;;  %23401 = vst [vmem:[#allocation109_spill] sm:$0xff] %v20847_v45  ;;  %v20859_v32 = vld [vmem:[%s22709_s5 + $0x318] sm:$0xff]  ;;  %v20868_v23 = vld [vmem:[%s22709_s5 + $0x3a0] sm:$0xff] }
 0x793   :  { %16252 = vmatprep.subr.bf16.mxu0 %v20621_v53  ;;  %v23403_v53 = vpack.c.bf16 %v19844_v19, %v19842_v9 }
 0x794   :  { %16730 = vmatpush3.bf16.msra.mxu1 %v16729_v54  ;;  %v20854_v54 = vld [vmem:[%s22709_s5 + $0x310] sm:$0xff] }
 0x795   :  { %16732 = vmatprep.subr.bf16.mxu1 %v16731_v21  ;;  %v23402_v21 = vand.u32 4294901760, %v20788_v31 }
 0x796   :  { %16254 = vmatpush3.bf16.msra.mxu0 %v20623_v18  ;;  %v20882_v18 = vpack.c.bf16 %v22995_v4, %v22996_v57  ;;  %v20899_v4 = vld [vmem:[%s22709_s5 + $0x320] sm:$0xff]  ;;  %v20904_v57 = vld [vmem:[%s22709_s5 + $0x328] sm:$0xff] }
 0x797   :  { %v10630_v39 = vsub.f32 %v20788_v31, %v23402_v21  ;;  %16256 = vmatprep.subr.bf16.mxu0 %v23403_v53  ;;  %v23006_v21 = vand.u32 4294901760, %v20854_v54  ;;  %v20892_v53 = vpack.c.bf16 %v23406_v56, %v23405_v61  ;;  %v20913_v56 = vld [vmem:[%s22709_s5 + $0x3b0] sm:$0xff] }
 0x798   :  { %16734 = vmatpush3.bf16.msra.mxu1 %v16733_v59  ;;  %23404 = vst [vmem:[#allocation110_spill] sm:$0xff] %v20882_v18  ;;  %v23409_v59 = vpack.c.bf16 %v19921_v26, %v19910_v30  ;;  %v23419_v42 = vand.u32 4294901760, %v20913_v56 }
 0x799   :  { %8284 = vmatmul.mubr.f32.vlgmr.msra.gmra.mrb[8].mxu0 %v20659_v7  ;;  %16768 = vmatprep.subr.bf16.mxu1 %v20847_v45  ;;  %23407 = vst [vmem:[#allocation111_spill] sm:$0xff] %v20892_v53  ;;  %v10631_v61 = vand.u32 4294901760, %v10630_v39  ;;  %v23015_v45 = vand.u32 4294901760, %v20899_v4  ;;  %v23439_v7 = vpack.c.bf16 %v20146_v12, %v20144_v27  ;;  %v23447_v12 = vpack.c.bf16 %v20284_v29, %v20282_v60 }
 0x79a   :  { %16258 = vmatpush3.bf16.msra.mxu0 %v23408_v58  ;;  %8419 = vmatprep.mubr.f32.mxu0 %v20662_v2  ;;  %v23410_v58 = vand.u32 4294901760, %v20859_v32  ;;  %v20982_v10 = vpack.c.bf16 %v23420_v16, %v23419_v42  ;;  %v21002_v16 = vld [vmem:[%s22709_s5 + $0x3d0] sm:$0xff]  ;;  %v21007_v42 = vld [vmem:[%s22709_s5 + $0x3d8] sm:$0xff]  ;;  %v23465_v60 = vand.u32 4294901760, %v20817_v11 }
 0x79b   :  { %10422 = vmatmul.mubr.f32.vlgmr.msra.gmra.mrb[6].mxu1 %v20688_v41  ;;  %16260 = vmatprep.subr.bf16.mxu0 %v23409_v59  ;;  %v23412_v41 = vand.u32 4294901760, %v20868_v23 }
 0x79c   :  { %16770 = vmatpush3.bf16.msra.mxu1 %v20882_v18  ;;  %10632 = vmatprep.mubr.f32.mxu1 %v10631_v61  ;;  %v20929_v39 = vpack.c.bf16 %v23410_v58, %v23006_v21  ;;  %v20945_v58 = vld [vmem:[%s22709_s5 + $0x330] sm:$0xff]  ;;  %v20950_v21 = vld [vmem:[%s22709_s5 + $0x338] sm:$0xff]  ;;  %v23416_v18 = vpack.c.bf16 %v19984_v28, %v19982_v37  ;;  %23421 = vst [vmem:[#allocation123_spill] sm:$0xff] %v20982_v10 }
 0x79d   :  { %16772 = vmatprep.subr.bf16.mxu1 %v20892_v53  ;;  %v20938_v59 = vpack.c.bf16 %v23413_v36, %v23412_v41  ;;  %v20958_v41 = vld [vmem:[%s22709_s5 + $0x3c0] sm:$0xff]  ;;  %v20963_v36 = vld [vmem:[%s22709_s5 + $0x3c8] sm:$0xff]  ;;  %v23029_v53 = vand.u32 4294901760, %v20945_v58 }
 0x79e   :  { %23411 = vst [vmem:[#allocation120_spill] sm:$0xff] %v20929_v39  ;;  %16262 = vmatpush3.bf16.msra.mxu0 %v23415_v48  ;;  %v23417_v48 = vand.u32 4294901760, %v20904_v57  ;;  %v23426_v34 = vand.u32 4294901760, %v20958_v41  ;;  %v23427_v15 = vand.u32 4294901760, %v20963_v36 }
 0x79f   :  { %23414 = vst [vmem:[#allocation121_spill] sm:$0xff] %v20938_v59  ;;  %16264 = vmatprep.subr.bf16.mxu0 %v23416_v18  ;;  %v23423_v18 = vpack.c.bf16 %v20058_v55, %v20056_v63  ;;  %v23460_v55 = vld [vmem:[#allocation88_spill] sm:$0xff] }
 0x7a0   :  { %16774 = vmatpush3.bf16.msra.mxu1 %v20929_v39  ;;  %v20973_v61 = vpack.c.bf16 %v23417_v48, %v23015_v45  ;;  %v20989_v48 = vld [vmem:[%s22709_s5 + $0x340] sm:$0xff]  ;;  %v20994_v45 = vld [vmem:[%s22709_s5 + $0x348] sm:$0xff]  ;;  %v7795_v39 = vpop.permute.xlu1 %7794  ;;  %v21026_v1 = vpack.c.bf16 %v23427_v15, %v23426_v34  ;;  %v23430_v34 = vpack.c.bf16 %v20075_v33, %v20073_v43  ;;  %v23436_v43 = vand.u32 4294901760, %v21002_v16 }
 0x7a1   :  { %16776 = vmatprep.subr.bf16.mxu1 %v20938_v59  ;;  %v7808_v47 = vsel %vm7801_vm9, %v23429_v20, %v7795_v39  ;;  %v21048_v15 = vld [vmem:[%s22709_s5 + $0x3e0] sm:$0xff]  ;;  %v23432_v20 = vand.u32 4294901760, %v20989_v48  ;;  %v23433_v39 = vand.u32 4294901760, %v20994_v45 }
 0x7a2   :  { %23418 = vst [vmem:[#allocation122_spill] sm:$0xff] %v20973_v61  ;;  %16266 = vmatpush3.bf16.msra.mxu0 %v23422_v5  ;;  %v23424_v5 = vand.u32 4294901760, %v20950_v21  ;;  %23428 = vst [vmem:[#allocation125_spill] sm:$0xff] %v21026_v1  ;;  %v21067_v33 = vand.u32 4294901760, %v7808_v47 }
 0x7a3   :  { %16268 = vmatprep.subr.bf16.mxu0 %v23423_v18  ;;  %v23431_v18 = vpack.c.bf16 %v20127_v46, %v20125_v35  ;;  %v23440_v35 = vpack.c.bf16 %v20179_v24, %v20177_v38  ;;  %v23444_v24 = vand.u32 4294901760, %v21048_v15 }
 0x7a4   :  { %16778 = vmatpush3.bf16.msra.mxu1 %v20973_v61  ;;  %v21017_v59 = vpack.c.bf16 %v23424_v5, %v23029_v53  ;;  %v21033_v5 = vld [vmem:[%s22709_s5 + $0x350] sm:$0xff]  ;;  %v21038_v53 = vld [vmem:[%s22709_s5 + $0x358] sm:$0xff]  ;;  %v21053_v61 = vld [vmem:[%s22709_s5 + $0x3e8] sm:$0xff]  ;;  %23435 = vst [vmem:[#allocation126_spill] sm:$0xff] %v21067_v33  ;;  %v21114_v27 = vsub.f32 %v7808_v47, %v21067_v33 }
 0x7a5   :  { %16780 = vmatprep.subr.bf16.mxu1 %v20982_v10  ;;  %v23048_v10 = vand.u32 4294901760, %v21033_v5  ;;  %v21133_v47 = vld [vmem:[%s22709_s5 + $0x378] sm:$0xff]  ;;  %v23459_v33 = vld [vmem:[#allocation90_spill] sm:$0xff] }
 0x7a6   :  { %23425 = vst [vmem:[#allocation124_spill] sm:$0xff] %v21017_v59  ;;  %16270 = vmatpush3.bf16.msra.mxu0 %v23430_v34  ;;  %v21063_v34 = vpack.c.bf16 %v23433_v39, %v23432_v20  ;;  %v21081_v20 = vld [vmem:[%s22709_s5 + $0x360] sm:$0xff]  ;;  %v21086_v39 = vld [vmem:[%s22709_s5 + $0x368] sm:$0xff]  ;;  %23443 = vst [vmem:[#allocation129_spill] sm:$0xff] %v21114_v27 }
 0x7a7   :  { %16272 = vmatprep.subr.bf16.mxu0 %v23431_v18  ;;  %v23437_v18 = vand.u32 4294901760, %v21007_v42 }
 0x7a8   :  { %16782 = vmatpush3.bf16.msra.mxu1 %v21017_v59  ;;  %23434 = vst [vmem:[#allocation70_spill] sm:$0xff] %v21063_v34 }
 0x7a9   :  { %16784 = vmatprep.subr.bf16.mxu1 %v21026_v1  ;;  %v21074_v46 = vpack.c.bf16 %v23437_v18, %v23436_v43  ;;  %v21094_v43 = vld [vmem:[%s22709_s5 + $0x3f0] sm:$0xff]  ;;  %v21099_v18 = vld [vmem:[%s22709_s5 + $0x3f8] sm:$0xff]  ;;  %v23057_v1 = vand.u32 4294901760, %v21081_v20 }
 0x7aa   :  { %16274 = vmatpush3.bf16.msra.mxu0 %v23439_v7  ;;  %v23441_v7 = vand.u32 4294901760, %v21038_v53 }
 0x7ab   :  { %23438 = vst [vmem:[#allocation127_spill] sm:$0xff] %v21074_v46  ;;  %16276 = vmatprep.subr.bf16.mxu0 %v23440_v35  ;;  %v23445_v35 = vand.u32 4294901760, %v21053_v61 }
 0x7ac   :  { %16786 = vmatpush3.bf16.msra.mxu1 %v21063_v34  ;;  %v21109_v59 = vpack.c.bf16 %v23441_v7, %v23048_v10  ;;  %v21128_v10 = vld [vmem:[%s22709_s5 + $0x370] sm:$0xff]  ;;  %v23450_v7 = vand.u32 4294901760, %v21086_v39 }
 0x7ad   :  { %16788 = vmatprep.subr.bf16.mxu1 %v21074_v46  ;;  %v21121_v34 = vpack.c.bf16 %v23445_v35, %v23444_v24  ;;  %v23448_v24 = vld [vmem:[#allocation83_spill] sm:$0xff] }
 0x7ae   :  { %23442 = vst [vmem:[#allocation128_spill] sm:$0xff] %v21109_v59  ;;  %16278 = vmatpush3.bf16.msra.mxu0 %v23447_v12  ;;  %v23449_v35 = vpack.c.bf16 %v20344_v6, %v23448_v24  ;;  %v21146_v38 = vpack.c.bf16 %v23450_v7, %v23057_v1  ;;  %v23452_v12 = vand.u32 4294901760, %v20794_v13  ;;  %v23456_v7 = vand.u32 4294901760, %v21094_v43  ;;  %v23462_v24 = vld [vmem:[#allocation100_spill] sm:$0xff] }
 0x7af   :  { %23446 = vst [vmem:[#allocation130_spill] sm:$0xff] %v21121_v34  ;;  %v23457_v1 = vand.u32 4294901760, %v21099_v18  ;;  %v23461_v6 = vpack.c.bf16 %v23459_v33, %v23460_v55  ;;  %v23481_v33 = vand.u32 4294901760, %v20854_v54 }
 0x7b0   :  { %16280 = vmatprep.subr.bf16.mxu0 %v23449_v35  ;;  %16790 = vmatpush3.bf16.msra.mxu1 %v21109_v59  ;;  %23451 = vst [vmem:[#allocation131_spill] sm:$0xff] %v21146_v38  ;;  %v21154_v29 = vsub.f32 %v20794_v13, %v23452_v12  ;;  %v23454_v35 = vand.u32 4294901760, %v20799_v3  ;;  %v23463_v13 = vld [vmem:[#allocation97_spill] sm:$0xff] }
 0x7b1   :  { %16792 = vmatprep.subr.bf16.mxu1 %v21121_v34  ;;  %v21166_v46 = vpack.c.bf16 %v23457_v1, %v23456_v7  ;;  %v23464_v12 = vpack.c.bf16 %v23462_v24, %v23463_v13  ;;  %v23469_v1 = vand.u32 4294901760, %v21128_v10 }
 0x7b2   :  { %23453 = vst [vmem:[#allocation132_spill] sm:$0xff] %v21154_v29  ;;  %v21159_v59 = vsub.f32 %v20799_v3, %v23454_v35  ;;  %16282 = vmatpush3.bf16.msra.mxu0 %v23461_v6  ;;  %v21177_v3 = vsub.f32 %v20817_v11, %v23465_v60  ;;  %v23467_v35 = vand.u32 4294901760, %v20822_v17  ;;  %v23470_v6 = vand.u32 4294901760, %v21133_v47 }
 0x7b3   :  { %23458 = vst [vmem:[#allocation134_spill] sm:$0xff] %v21166_v46  ;;  %16284 = vmatprep.subr.bf16.mxu0 %v23464_v12  ;;  %v23472_v12 = vand.u32 4294901760, %v21114_v27  ;;  %v23473_v60 = vand.u32 4294901760, %v20829_v52 }
 0x7b4   :  { %23455 = vst [vmem:[#allocation133_spill] sm:$0xff] %v21159_v59  ;;  %23466 = vst [vmem:[#allocation88_spill] sm:$0xff] %v21177_v3  ;;  %v21182_v34 = vsub.f32 %v20822_v17, %v23467_v35  ;;  %16794 = vmatpush3.bf16.msra.mxu1 %v21146_v38  ;;  %v21189_v7 = vpack.c.bf16 %v23470_v6, %v23469_v1  ;;  %v23475_v17 = vand.u32 4294901760, %v20834_v40  ;;  %v23477_v6 = vld [vmem:[#allocation103_spill] sm:$0xff]  ;;  %v23478_v38 = vld [vmem:[#allocation102_spill] sm:$0xff] }
 0x7b5   :  { %v10636_v24 = vsub.f32 %v21114_v27, %v23472_v12  ;;  %v21197_v11 = vsub.f32 %v20829_v52, %v23473_v60  ;;  %16796 = vmatprep.subr.bf16.mxu1 %v21166_v46  ;;  %v16831_v1 = vpack.c.bf16 %v21159_v59, %v21154_v29  ;;  %v23479_v13 = vpack.c.bf16 %v23477_v6, %v23478_v38  ;;  %v23480_v12 = vld [vmem:[#allocation9_spill] sm:$0xff] }
 0x7b6   :  { %23468 = vst [vmem:[#allocation135_spill] sm:$0xff] %v21182_v34  ;;  %23471 = vst [vmem:[#allocation136_spill] sm:$0xff] %v21189_v7  ;;  %v21202_v35 = vsub.f32 %v20834_v40, %v23475_v17  ;;  %v21214_v52 = vsub.f32 %v20854_v54, %v23481_v33  ;;  %v23483_v60 = vand.u32 4294901760, %v20859_v32  ;;  %v16833_v17 = vpack.c.bf16 %v21182_v34, %v21177_v3  ;;  %v23489_v54 = vld [vmem:[#allocation113_spill] sm:$0xff] }
 0x7b7   :  { %23474 = vst [vmem:[#allocation137_spill] sm:$0xff] %v21197_v11  ;;  %16286 = vmatpush3.bf16.msra.mxu0 %v23479_v13  ;;  %v23485_v46 = vand.u32 4294901760, %v20868_v23  ;;  %v10637_v6 = vand.u32 4294901760, %v10636_v24 }
 0x7b8   :  { %23476 = vst [vmem:[#allocation138_spill] sm:$0xff] %v21202_v35  ;;  %16288 = vmatprep.subr.bf16.mxu0 %v23480_v12  ;;  %23482 = vst [vmem:[#allocation102_spill] sm:$0xff] %v21214_v52  ;;  %v21219_v40 = vsub.f32 %v20859_v32, %v23483_v60  ;;  %16798 = vmatpush3.bf16.msra.mxu1 %v21189_v7  ;;  %v23487_v12 = vand.u32 4294901760, %v20873_v49  ;;  %v16835_v32 = vpack.c.bf16 %v21202_v35, %v21197_v11  ;;  %v23490_v60 = vld [vmem:[#allocation10_spill] sm:$0xff] }
 0x7b9   :  { %v21227_v13 = vsub.f32 %v20868_v23, %v23485_v46  ;;  %16832 = vmatprep.subr.bf16.mxu1 %v16831_v1  ;;  %v23491_v7 = vand.u32 4294901760, %v20662_v2  ;;  %v23492_v46 = vld [vmem:[#allocation19_spill] sm:$0xff]  ;;  %v23493_v23 = vand.u32 4294901760, %v20899_v4 }
 0x7ba   :  { %23484 = vst [vmem:[#allocation139_spill] sm:$0xff] %v21219_v40  ;;  %v21232_v33 = vsub.f32 %v20873_v49, %v23487_v12  ;;  %8422 = vmatmul.mubr.f32.vlgmr.msra.gmra.mrb[10].mxu0 %v23489_v54  ;;  %v23495_v12 = vand.u32 4294901760, %v20904_v57  ;;  %v16837_v2 = vpack.c.bf16 %v21219_v40, %v21214_v52 }
 0x7bb   :  { %23486 = vst [vmem:[#allocation140_spill] sm:$0xff] %v21227_v13  ;;  %16290 = vmatpush3.bf16.msra.mxu0 %v23490_v60  ;;  %8526 = vmatprep.mubr.f32.mxu0 %v23491_v7  ;;  %v21244_v49 = vsub.f32 %v20899_v4, %v23493_v23  ;;  %v23497_v7 = vand.u32 4294901760, %v20913_v56  ;;  %v23502_v23 = vld [vmem:[#allocation29_spill] sm:$0xff] }
 0x7bc   :  { %23488 = vst [vmem:[#allocation141_spill] sm:$0xff] %v21232_v33  ;;  %10638 = vmatmul.mubr.f32.vlgmr.msra.gmra.mrb[8].mxu1 %v10637_v6  ;;  %16292 = vmatprep.subr.bf16.mxu0 %v23492_v46  ;;  %v21249_v24 = vsub.f32 %v20904_v57, %v23495_v12  ;;  %v23499_v6 = vand.u32 4294901760, %v20918_v0  ;;  %v16839_v57 = vpack.c.bf16 %v21232_v33, %v21227_v13  ;;  %v23503_v12 = vand.u32 4294901760, %v20945_v58 }
 0x7bd   :  { %23494 = vst [vmem:[#allocation113_spill] sm:$0xff] %v21244_v49  ;;  %16834 = vmatpush3.bf16.msra.mxu1 %v16833_v17  ;;  %11005 = vmatprep.mubr.f32.mxu1 %v20788_v31  ;;  %v21257_v1 = vsub.f32 %v20913_v56, %v23497_v7  ;;  %v23501_v17 = vld [vmem:[#allocation20_spill] sm:$0xff]  ;;  %v23505_v56 = vand.u32 4294901760, %v20950_v21  ;;  %v23554_v46 = vand.u32 4294901760, %v19910_v30  ;;  %v23560_v30 = vand.u32 4294901760, %v21202_v35 }
 0x7be   :  { %23496 = vst [vmem:[#allocation10_spill] sm:$0xff] %v21249_v24  ;;  %v21262_v4 = vsub.f32 %v20918_v0, %v23499_v6  ;;  %16836 = vmatprep.subr.bf16.mxu1 %v16835_v32  ;;  %v21271_v31 = vsub.f32 %v20945_v58, %v23503_v12  ;;  %v16841_v0 = vpack.c.bf16 %v21249_v24, %v21244_v49  ;;  %v23507_v32 = vand.u32 4294901760, %v20958_v41 }
 0x7bf   :  { %23498 = vst [vmem:[#allocation142_spill] sm:$0xff] %v21257_v1  ;;  %16294 = vmatpush3.bf16.msra.mxu0 %v23501_v17  ;;  %v21276_v7 = vsub.f32 %v20950_v21, %v23505_v56  ;;  %v23511_v21 = vld [vmem:[#allocation30_spill] sm:$0xff]  ;;  %v23513_v12 = vand.u32 4294901760, %v20989_v48 }
 0x7c0   :  { %23500 = vst [vmem:[#allocation143_spill] sm:$0xff] %v21262_v4  ;;  %16296 = vmatprep.subr.bf16.mxu0 %v23502_v23  ;;  %23504 = vst [vmem:[#allocation144_spill] sm:$0xff] %v21271_v31  ;;  %v21283_v6 = vsub.f32 %v20958_v41, %v23507_v32  ;;  %v23509_v23 = vand.u32 4294901760, %v20963_v36  ;;  %v16843_v58 = vpack.c.bf16 %v21262_v4, %v21257_v1  ;;  %v23515_v41 = vand.u32 4294901760, %v20994_v45 }
 0x7c1   :  { %23506 = vst [vmem:[#allocation145_spill] sm:$0xff] %v21276_v7  ;;  %16838 = vmatpush3.bf16.msra.mxu1 %v16837_v2  ;;  %v23512_v2 = vld [vmem:[#allocation39_spill] sm:$0xff]  ;;  %v21297_v56 = vsub.f32 %v20989_v48, %v23513_v12  ;;  %v23523_v12 = vand.u32 4294901760, %v21033_v5 }
 0x7c2   :  { %23508 = vst [vmem:[#allocation146_spill] sm:$0xff] %v21283_v6  ;;  %v21288_v17 = vsub.f32 %v20963_v36, %v23509_v23  ;;  %16840 = vmatprep.subr.bf16.mxu1 %v16839_v57  ;;  %v21302_v32 = vsub.f32 %v20994_v45, %v23515_v41  ;;  %v16845_v36 = vpack.c.bf16 %v21276_v7, %v21271_v31  ;;  %v23517_v57 = vand.u32 4294901760, %v21002_v16  ;;  %v23521_v45 = vld [vmem:[#allocation41_spill] sm:$0xff] }
 0x7c3   :  { %16298 = vmatpush3.bf16.msra.mxu0 %v23511_v21  ;;  %23514 = vst [vmem:[#allocation148_spill] sm:$0xff] %v21297_v56  ;;  %v21323_v41 = vsub.f32 %v21033_v5, %v23523_v12  ;;  %v23533_v12 = vand.u32 4294901760, %v21081_v20 }
 0x7c4   :  { %23510 = vst [vmem:[#allocation147_spill] sm:$0xff] %v21288_v17  ;;  %16300 = vmatprep.subr.bf16.mxu0 %v23512_v2  ;;  %23516 = vst [vmem:[#allocation149_spill] sm:$0xff] %v21302_v32  ;;  %v21309_v23 = vsub.f32 %v21002_v16, %v23517_v57  ;;  %v23519_v2 = vand.u32 4294901760, %v21007_v42  ;;  %v16847_v48 = vpack.c.bf16 %v21288_v17, %v21283_v6  ;;  %v23525_v16 = vand.u32 4294901760, %v21038_v53 }
 0x7c5   :  { %16842 = vmatpush3.bf16.msra.mxu1 %v16841_v0  ;;  %v23522_v0 = vld [vmem:[#allocation51_spill] sm:$0xff]  ;;  %23524 = vst [vmem:[#allocation152_spill] sm:$0xff] %v21323_v41 }
 0x7c6   :  { %23518 = vst [vmem:[#allocation150_spill] sm:$0xff] %v21309_v23  ;;  %v21314_v21 = vsub.f32 %v21007_v42, %v23519_v2  ;;  %16844 = vmatprep.subr.bf16.mxu1 %v16843_v58  ;;  %v21328_v57 = vsub.f32 %v21038_v53, %v23525_v16  ;;  %v16849_v42 = vpack.c.bf16 %v21302_v32, %v21297_v56  ;;  %v23527_v58 = vand.u32 4294901760, %v21048_v15  ;;  %v23531_v53 = vld [vmem:[#allocation55_spill] sm:$0xff] }
 0x7c7   :  { %16302 = vmatpush3.bf16.msra.mxu0 %v23521_v45  ;;  %v21349_v16 = vsub.f32 %v21081_v20, %v23533_v12  ;;  %v23543_v12 = vand.u32 4294901760, %v21128_v10 }
 0x7c8   :  { %23520 = vst [vmem:[#allocation151_spill] sm:$0xff] %v21314_v21  ;;  %16304 = vmatprep.subr.bf16.mxu0 %v23522_v0  ;;  %23526 = vst [vmem:[#allocation153_spill] sm:$0xff] %v21328_v57  ;;  %v21335_v2 = vsub.f32 %v21048_v15, %v23527_v58  ;;  %v23529_v0 = vand.u32 4294901760, %v21053_v61  ;;  %v16851_v5 = vpack.c.bf16 %v21314_v21, %v21309_v23  ;;  %v23535_v15 = vand.u32 4294901760, %v21086_v39 }
 0x7c9   :  { %16846 = vmatpush3.bf16.msra.mxu1 %v16845_v36  ;;  %v23532_v36 = vld [vmem:[#allocation62_spill] sm:$0xff]  ;;  %23534 = vst [vmem:[#allocation156_spill] sm:$0xff] %v21349_v16 }
 0x7ca   :  { %23528 = vst [vmem:[#allocation154_spill] sm:$0xff] %v21335_v2  ;;  %v21340_v45 = vsub.f32 %v21053_v61, %v23529_v0  ;;  %16848 = vmatprep.subr.bf16.mxu1 %v16847_v48  ;;  %v21354_v58 = vsub.f32 %v21086_v39, %v23535_v15  ;;  %v16853_v61 = vpack.c.bf16 %v21328_v57, %v21323_v41  ;;  %v23537_v48 = vand.u32 4294901760, %v21094_v43  ;;  %v23541_v39 = vld [vmem:[#allocation73_spill] sm:$0xff] }
 0x7cb   :  { %16306 = vmatpush3.bf16.msra.mxu0 %v23531_v53  ;;  %v21375_v15 = vsub.f32 %v21128_v10, %v23543_v12  ;;  %v23548_v10 = vld [vmem:[#allocation96_spill] sm:$0xff]  ;;  %v23549_v12 = vand.u32 4294901760, %v19842_v9  ;;  %v23098_v9 = vand.u32 4294901760, %v21214_v52 }
 0x7cc   :  { %23530 = vst [vmem:[#allocation155_spill] sm:$0xff] %v21340_v45  ;;  %16308 = vmatprep.subr.bf16.mxu0 %v23532_v36  ;;  %23536 = vst [vmem:[#allocation157_spill] sm:$0xff] %v21354_v58  ;;  %v21361_v0 = vsub.f32 %v21094_v43, %v23537_v48  ;;  %v23539_v36 = vand.u32 4294901760, %v21099_v18  ;;  %v16855_v20 = vpack.c.bf16 %v21340_v45, %v21335_v2  ;;  %v23545_v43 = vand.u32 4294901760, %v21133_v47 }
 0x7cd   :  { %16850 = vmatpush3.bf16.msra.mxu1 %v16849_v42  ;;  %v23542_v42 = vld [vmem:[#allocation85_spill] sm:$0xff]  ;;  %23544 = vst [vmem:[#allocation160_spill] sm:$0xff] %v21375_v15 }
 0x7ce   :  { %23538 = vst [vmem:[#allocation158_spill] sm:$0xff] %v21361_v0  ;;  %v21366_v53 = vsub.f32 %v21099_v18, %v23539_v36  ;;  %16852 = vmatprep.subr.bf16.mxu1 %v16851_v5  ;;  %v21380_v48 = vsub.f32 %v21133_v47, %v23545_v43  ;;  %v16857_v18 = vpack.c.bf16 %v21354_v58, %v21349_v16  ;;  %v23070_v36 = vand.u32 4294901760, %v21154_v29 }
 0x7cf   :  { %16310 = vmatpush3.bf16.msra.mxu0 %v23541_v39  ;;  %v23547_v39 = vld [vmem:[#allocation87_spill] sm:$0xff]  ;;  %v23550_v47 = vand.u32 4294901760, %v19844_v19  ;;  %v23551_v19 = vld [vmem:[#allocation101_spill] sm:$0xff] }
 0x7d0   :  { %23540 = vst [vmem:[#allocation159_spill] sm:$0xff] %v21366_v53  ;;  %16312 = vmatprep.subr.bf16.mxu0 %v23542_v42  ;;  %23546 = vst [vmem:[#allocation161_spill] sm:$0xff] %v21380_v48  ;;  %v16859_v5 = vpack.c.bf16 %v21366_v53, %v21361_v0  ;;  %v23069_v42 = vand.u32 4294901760, %v21159_v59  ;;  %v23097_v59 = vand.u32 4294901760, %v21219_v40 }
 0x7d1   :  { %16854 = vmatpush3.bf16.msra.mxu1 %v16853_v61  ;;  %v16319_v61 = vpack.c.bf16 %v23550_v47, %v23549_v12  ;;  %v23553_v12 = vand.u32 4294901760, %v19859_v50  ;;  %v23559_v50 = vand.u32 4294901760, %v21197_v11 }
 0x7d2   :  { %16856 = vmatprep.subr.bf16.mxu1 %v16855_v20  ;;  %v16861_v20 = vpack.c.bf16 %v21380_v48, %v21375_v15 }
 0x7d3   :  { %16314 = vmatpush3.bf16.msra.mxu0 %v23547_v39  ;;  %v16895_v39 = vpack.c.bf16 %v23069_v42, %v23070_v36  ;;  %v23556_v42 = vand.u32 4294901760, %v21177_v3  ;;  %v23557_v36 = vand.u32 4294901760, %v21182_v34 }
 0x7d4   :  { %16316 = vmatprep.subr.bf16.mxu0 %v23548_v10 }
 0x7d5   :  { %16858 = vmatpush3.bf16.msra.mxu1 %v16857_v18  ;;  %v23552_v18 = vand.u32 4294901760, %v19846_v22  ;;  %v16897_v10 = vpack.c.bf16 %v23557_v36, %v23556_v42  ;;  %v23558_v22 = vand.u32 4294901760, %v23489_v54  ;;  %v23561_v42 = vand.u32 4294901760, %v19925_v14 }
 0x7d6   :  { %16860 = vmatprep.subr.bf16.mxu1 %v16859_v5  ;;  %v23555_v5 = vand.u32 4294901760, %v19921_v26  ;;  %v16899_v26 = vpack.c.bf16 %v23560_v30, %v23559_v50  ;;  %v23562_v36 = vand.u32 4294901760, %v19927_v8  ;;  %v23563_v54 = vand.u32 4294901760, %v19982_v37  ;;  %v23568_v50 = vld [vmem:[#allocation40_spill] sm:$0xff] }
 0x7d7   :  { %16318 = vmatpush3.bf16.msra.mxu0 %v23551_v19  ;;  %v16321_v47 = vpack.c.bf16 %v23553_v12, %v23552_v18  ;;  %v16901_v12 = vpack.c.bf16 %v23097_v59, %v23098_v9  ;;  %v23094_v14 = vand.u32 4294901760, %v21244_v49  ;;  %v23093_v8 = vand.u32 4294901760, %v21249_v24  ;;  %v7868_v24 = vld [vmem:[%s22709_s5 + $0x1d0] sm:$0xff]  ;;  %v7869_v49 = vld [vmem:[%s22709_s5 + $0x1d8] sm:$0xff] }
 0x7d8   :  { %16320 = vmatprep.subr.bf16.mxu0 %v16319_v61  ;;  %v16323_v43 = vpack.c.bf16 %v23555_v5, %v23554_v46  ;;  %v23096_v46 = vand.u32 4294901760, %v21227_v13  ;;  %v23095_v61 = vand.u32 4294901760, %v21232_v33  ;;  %v23569_v30 = vand.u32 4294901760, %v23568_v50  ;;  %v23576_v50 = vld [vmem:[#allocation53_spill] sm:$0xff] }
 0x7d9   :  { %16862 = vmatpush3.bf16.msra.mxu1 %v16861_v20  ;;  %v16325_v20 = vpack.c.bf16 %v23562_v36, %v23561_v42  ;;  %v16905_v42 = vpack.c.bf16 %v23093_v8, %v23094_v14  ;;  %v23076_v36 = vand.u32 4294901760, %v21271_v31  ;;  %v7862_v8 = vld [vmem:[%s22709_s5 + $0x1a0] sm:$0xff]  ;;  %v7863_v14 = vld [vmem:[%s22709_s5 + $0x1a8] sm:$0xff] }
 0x7da   :  { %8530 = vmatmul.mubr.f32.vlgmr.msra.gmra.mrb[12].mxu0 %v23558_v22  ;;  %16896 = vmatprep.subr.bf16.mxu1 %v16895_v39  ;;  %v23564_v39 = vand.u32 4294901760, %v19984_v28  ;;  %v16903_v37 = vpack.c.bf16 %v23095_v61, %v23096_v46  ;;  %v23074_v28 = vand.u32 4294901760, %v21257_v1  ;;  %v23567_v22 = vand.u32 4294901760, %v20056_v63 }
 0x7db   :  { %16322 = vmatpush3.bf16.msra.mxu0 %v16321_v47  ;;  %8696 = vmatprep.mubr.f32.mxu0 %v20657_v51  ;;  %v23566_v47 = vand.u32 4294901760, %v20001_v25  ;;  %v23078_v63 = vand.u32 4294901760, %v21283_v6  ;;  %v23077_v25 = vand.u32 4294901760, %v21288_v17  ;;  %v8868_v9 = vand.u32 4294901760, %v7862_v8  ;;  %v7850_v17 = vld [vmem:[%s22709_s5 + $0x140] sm:$0xff] }
 0x7dc   :  { %11008 = vmatmul.mubr.f32.vlgmr.msra.gmra.mrb[10].mxu1 %v21114_v27  ;;  %16324 = vmatprep.subr.bf16.mxu0 %v16323_v43  ;;  %v16327_v18 = vpack.c.bf16 %v23564_v39, %v23563_v54  ;;  %v23565_v43 = vand.u32 4294901760, %v19999_v44  ;;  %v23570_v54 = vld [vmem:[#allocation42_spill] sm:$0xff]  ;;  %v7846_v27 = vld [vmem:[%s22709_s5 + $0x120] sm:$0xff] }
 0x7dd   :  { %16898 = vmatpush3.bf16.msra.mxu1 %v16897_v10  ;;  %11282 = vmatprep.mubr.f32.mxu1 %v20771_v62  ;;  %v23073_v10 = vand.u32 4294901760, %v21262_v4  ;;  %v23571_v39 = vand.u32 4294901760, %v23570_v54  ;;  %v23082_v54 = vand.u32 4294901760, %v21309_v23  ;;  %v21723_v52 = vsub.f32 %v7862_v8, %v8868_v9 }
 0x7de   :  { %16900 = vmatprep.subr.bf16.mxu1 %v16899_v26  ;;  %v16329_v5 = vpack.c.bf16 %v23566_v47, %v23565_v43  ;;  %v16331_v26 = vpack.c.bf16 %v23569_v30, %v23567_v22  ;;  %v23574_v47 = vld [vmem:[#allocation52_spill] sm:$0xff] }
 0x7df   :  { %16326 = vmatpush3.bf16.msra.mxu0 %v16325_v20  ;;  %v23075_v20 = vand.u32 4294901760, %v21276_v7  ;;  %v16907_v44 = vpack.c.bf16 %v23073_v10, %v23074_v28  ;;  %v23575_v22 = vand.u32 4294901760, %v23574_v47  ;;  %v23080_v28 = vand.u32 4294901760, %v21297_v56 }
 0x7e0   :  { %16328 = vmatprep.subr.bf16.mxu0 %v16327_v18  ;;  %v23572_v18 = vld [vmem:[#allocation43_spill] sm:$0xff] }
 0x7e1   :  { %16902 = vmatpush3.bf16.msra.mxu1 %v16901_v12  ;;  %v23573_v12 = vand.u32 4294901760, %v23572_v18  ;;  %v16909_v10 = vpack.c.bf16 %v23075_v20, %v23076_v36  ;;  %v23584_v20 = vld [vmem:[#allocation64_spill] sm:$0xff] }
 0x7e2   :  { %16904 = vmatprep.subr.bf16.mxu1 %v16903_v37  ;;  %v23577_v37 = vand.u32 4294901760, %v23576_v50  ;;  %v23582_v50 = vld [vmem:[#allocation63_spill] sm:$0xff] }
 0x7e3   :  { %16330 = vmatpush3.bf16.msra.mxu0 %v16329_v5  ;;  %v16333_v43 = vpack.c.bf16 %v23573_v12, %v23571_v39  ;;  %v23079_v5 = vand.u32 4294901760, %v21302_v32  ;;  %v23081_v39 = vand.u32 4294901760, %v21314_v21  ;;  %v23580_v12 = vld [vmem:[#allocation57_spill] sm:$0xff] }
 0x7e4   :  { %16332 = vmatprep.subr.bf16.mxu0 %v16331_v26  ;;  %v16335_v30 = vpack.c.bf16 %v23577_v37, %v23575_v22  ;;  %v16911_v26 = vpack.c.bf16 %v23077_v25, %v23078_v63  ;;  %v23581_v47 = vand.u32 4294901760, %v23580_v12  ;;  %v23583_v37 = vand.u32 4294901760, %v23582_v50  ;;  %v23588_v12 = vld [vmem:[#allocation75_spill] sm:$0xff]  ;;  %v7867_v21 = vld [vmem:[%s22709_s5 + $0x1c8] sm:$0xff] }
 0x7e5   :  { %16906 = vmatpush3.bf16.msra.mxu1 %v16905_v42  ;;  %v23578_v42 = vld [vmem:[#allocation56_spill] sm:$0xff]  ;;  %v16913_v25 = vpack.c.bf16 %v23079_v5, %v23080_v28  ;;  %v23092_v63 = vand.u32 4294901760, %v21323_v41  ;;  %v23592_v5 = vld [vmem:[#allocation86_spill] sm:$0xff]  ;;  %v8883_v31 = vand.u32 4294901760, %v7867_v21 }
 0x7e6   :  { %16908 = vmatprep.subr.bf16.mxu1 %v16907_v44  ;;  %v23579_v18 = vand.u32 4294901760, %v23578_v42  ;;  %v23585_v44 = vand.u32 4294901760, %v23584_v20  ;;  %v23085_v42 = vand.u32 4294901760, %v21335_v2  ;;  %v23084_v20 = vand.u32 4294901760, %v21340_v45  ;;  %v7848_v2 = vld [vmem:[%s22709_s5 + $0x130] sm:$0xff]  ;;  %v7866_v41 = vld [vmem:[%s22709_s5 + $0x1c0] sm:$0xff] }
 0x7e7   :  { %16334 = vmatpush3.bf16.msra.mxu0 %v16333_v43  ;;  %v23083_v43 = vand.u32 4294901760, %v21328_v57  ;;  %v8826_v32 = vand.u32 4294901760, %v7848_v2  ;;  %v8880_v7 = vand.u32 4294901760, %v7866_v41 }
 0x7e8   :  { %v16337_v22 = vpack.c.bf16 %v23581_v47, %v23579_v18  ;;  %16336 = vmatprep.subr.bf16.mxu0 %v16335_v30  ;;  %v16339_v36 = vpack.c.bf16 %v23585_v44, %v23583_v37  ;;  %v16915_v30 = vpack.c.bf16 %v23081_v39, %v23082_v54  ;;  %v23589_v47 = vand.u32 4294901760, %v23588_v12  ;;  %v23590_v37 = vld [vmem:[#allocation83_spill] sm:$0xff] }
 0x7e9   :  { %16910 = vmatpush3.bf16.msra.mxu1 %v16909_v10  ;;  %v23586_v10 = vld [vmem:[#allocation74_spill] sm:$0xff]  ;;  %v23591_v44 = vand.u32 4294901760, %v23590_v37  ;;  %v16917_v39 = vpack.c.bf16 %v23083_v43, %v23092_v63  ;;  %v23091_v54 = vand.u32 4294901760, %v21349_v16  ;;  %v23597_v37 = vld [vmem:[#allocation97_spill] sm:$0xff]  ;;  %v7845_v63 = vld [vmem:[%s22709_s5 + $0x118] sm:$0xff]  ;;  %v21754_v33 = vsub.f32 %v7848_v2, %v8826_v32 }
 0x7ea   :  { %16912 = vmatprep.subr.bf16.mxu1 %v16911_v26  ;;  %v23587_v18 = vand.u32 4294901760, %v23586_v10  ;;  %v23593_v26 = vand.u32 4294901760, %v23592_v5  ;;  %v23089_v10 = vand.u32 4294901760, %v21361_v0  ;;  %v23088_v5 = vand.u32 4294901760, %v21366_v53  ;;  %v7865_v53 = vld [vmem:[%s22709_s5 + $0x1b8] sm:$0xff]  ;;  %v21789_v2 = vld [vmem:[%s22709_s5 + $0x1f0] sm:$0xff] }
 0x7eb   :  { %16338 = vmatpush3.bf16.msra.mxu0 %v16337_v22  ;;  %v23090_v22 = vand.u32 4294901760, %v21354_v58  ;;  %v8817_v59 = vand.u32 4294901760, %v7845_v63  ;;  %v8820_v58 = vand.u32 4294901760, %v7846_v27  ;;  %v8877_v45 = vand.u32 4294901760, %v7865_v53 }
 0x7ec   :  { %v16341_v50 = vpack.c.bf16 %v23589_v47, %v23587_v18  ;;  %16340 = vmatprep.subr.bf16.mxu0 %v16339_v36  ;;  %v16343_v28 = vpack.c.bf16 %v23593_v26, %v23591_v44  ;;  %v16919_v36 = vpack.c.bf16 %v23084_v20, %v23085_v42  ;;  %v23595_v18 = vld [vmem:[#allocation90_spill] sm:$0xff]  ;;  %v23598_v44 = vand.u32 4294901760, %v23597_v37  ;;  %v23599_v26 = vld [vmem:[#allocation100_spill] sm:$0xff] }
 0x7ed   :  { %16914 = vmatpush3.bf16.msra.mxu1 %v16913_v25  ;;  %v23594_v25 = vand.u32 4294901760, %v23460_v55  ;;  %v23596_v12 = vand.u32 4294901760, %v23595_v18  ;;  %v16921_v20 = vpack.c.bf16 %v23090_v22, %v23091_v54  ;;  %v23087_v42 = vand.u32 4294901760, %v21375_v15  ;;  %v23605_v37 = vld [vmem:[#allocation112_spill] sm:$0xff]  ;;  %v7844_v54 = vld [vmem:[%s22709_s5 + $0x110] sm:$0xff] }
 0x7ee   :  { %16916 = vmatprep.subr.bf16.mxu1 %v16915_v30  ;;  %v23600_v30 = vand.u32 4294901760, %v23599_v26  ;;  %v16923_v55 = vpack.c.bf16 %v23088_v5, %v23089_v10  ;;  %v23611_v26 = vld [vmem:[#allocation39_spill] sm:$0xff]  ;;  %v8814_v46 = vand.u32 4294901760, %v7844_v54 }
 0x7ef   :  { %16342 = vmatpush3.bf16.msra.mxu0 %v16341_v50  ;;  %v16345_v47 = vpack.c.bf16 %v23596_v12, %v23594_v25  ;;  %v23086_v50 = vand.u32 4294901760, %v21380_v48  ;;  %v23602_v25 = vld [vmem:[#allocation103_spill] sm:$0xff] }
 0x7f0   :  { %16344 = vmatprep.subr.bf16.mxu0 %v16343_v28  ;;  %v16347_v43 = vpack.c.bf16 %v23600_v30, %v23598_v44  ;;  %v23601_v28 = vand.u32 4294901760, %v23478_v38  ;;  %v23606_v38 = vld [vmem:[#allocation126_spill] sm:$0xff]  ;;  %v21659_v0 = vpack.c.bf16 %v8817_v59, %v8814_v46 }
 0x7f1   :  { %16918 = vmatpush3.bf16.msra.mxu1 %v16917_v39  ;;  %v23603_v39 = vand.u32 4294901760, %v23602_v25  ;;  %v16925_v12 = vpack.c.bf16 %v23086_v50, %v23087_v42  ;;  %v23610_v44 = vld [vmem:[#allocation30_spill] sm:$0xff]  ;;  %v23614_v25 = vld [vmem:[#allocation41_spill] sm:$0xff]  ;;  %v23624_v42 = vld [vmem:[#allocation96_spill] sm:$0xff] }
 0x7f2   :  { %16920 = vmatprep.subr.bf16.mxu1 %v16919_v36  ;;  %v23604_v36 = vld [vmem:[#allocation9_spill] sm:$0xff]  ;;  %v23612_v30 = vld [vmem:[#allocation114_spill] sm:$0xff]  ;;  %23625 = vst [vmem:[#allocation40_spill] sm:$0xff] %v21659_v0 }
 0x7f3   :  { %16346 = vmatpush3.bf16.msra.mxu0 %v16345_v47  ;;  %v16349_v18 = vpack.c.bf16 %v23603_v39, %v23601_v28  ;;  %v23609_v47 = vld [vmem:[#allocation29_spill] sm:$0xff]  ;;  %v23617_v39 = vld [vmem:[#allocation55_spill] sm:$0xff] }
 0x7f4   :  { %16348 = vmatprep.subr.bf16.mxu0 %v16347_v43  ;;  %v23607_v43 = vld [vmem:[#allocation19_spill] sm:$0xff] }
 0x7f5   :  { %16922 = vmatpush3.bf16.msra.mxu1 %v16921_v20  ;;  %v23608_v20 = vld [vmem:[#allocation20_spill] sm:$0xff]  ;;  %v7864_v15 = vld [vmem:[%s22709_s5 + $0x1b0] sm:$0xff] }
 0x7f6   :  { %16924 = vmatprep.subr.bf16.mxu1 %v16923_v55  ;;  %v23613_v55 = vld [vmem:[#allocation65_spill] sm:$0xff] }
 0x7f7   :  { %16350 = vmatpush3.bf16.msra.mxu0 %v16349_v18  ;;  %v7805_v28 = vsel %vm7801_vm9, %v23613_v55, %v23612_v30  ;;  %v23618_v18 = vld [vmem:[#allocation62_spill] sm:$0xff]  ;;  %v23622_v30 = vld [vmem:[#allocation85_spill] sm:$0xff] }
 0x7f8   :  { %16352 = vmatprep.subr.bf16.mxu0 %v23604_v36  ;;  %v21581_v36 = vld [vmem:[%s22709_s5 + $0x180] sm:$0xff] }
 0x7f9   :  { %16926 = vmatpush3.bf16.msra.mxu1 %v16925_v12  ;;  %v8856_v55 = vand.u32 4294901760, %v21581_v36 }
 0x7fa   :  { %8698 = vmatmul.mubr.f32.vlgmr.msra.gmra.mrb[14].mxu0 %v23605_v37 }
 0x7fb   :  { %16354 = vmatpush3.bf16.msra.mxu0 %v23490_v60  ;;  %8800 = vmatprep.mubr.f32.mxu0 %v20657_v51  ;;  %v23615_v60 = vld [vmem:[#allocation51_spill] sm:$0xff]  ;;  %v21571_v51 = vand.u32 4294901760, %v7805_v28  ;;  %v21694_v62 = vsub.f32 %v21581_v36, %v8856_v55 }
 0x7fc   :  { %11284 = vmatmul.mubr.f32.vlgmr.msra.gmra.mrb[12].mxu1 %v23606_v38  ;;  %16356 = vmatprep.subr.bf16.mxu0 %v23607_v43  ;;  %v21586_v43 = vld [vmem:[%s22709_s5 + $0x188] sm:$0xff] }
 0x7fd   :  { %23616 = vst [vmem:[#allocation101_spill] sm:$0xff] %v21571_v51  ;;  %v21576_v12 = vsub.f32 %v7805_v28, %v21571_v51  ;;  %v8859_v28 = vand.u32 4294901760, %v21586_v43  ;;  %v7847_v38 = vld [vmem:[%s22709_s5 + $0x128] sm:$0xff] }
 0x7fe   :  { %v8823_v16 = vand.u32 4294901760, %v7847_v38 }
 0x7ff   :  { %16358 = vmatpush3.bf16.msra.mxu0 %v23608_v20  ;;  %v23619_v20 = vld [vmem:[#allocation115_spill] sm:$0xff]  ;;  %v21617_v5 = vpack.c.bf16 %v8859_v28, %v8856_v55  ;;  %v21697_v4 = vsub.f32 %v21586_v43, %v8859_v28  ;;  %v8832_v55 = vand.u32 4294901760, %v7850_v17 }
 0x800   :  { %16360 = vmatprep.subr.bf16.mxu0 %v23609_v47  ;;  %v23620_v47 = vld [vmem:[#allocation66_spill] sm:$0xff]  ;;  %v21682_v23 = vpack.c.bf16 %v8823_v16, %v8820_v58 }
 0x801   :  { %v23635_v34 = vand.u32 4294901760, %v21697_v4 }
 0x802   :  { %23628 = vst [vmem:[#allocation43_spill] sm:$0xff] %v21682_v23 }
 0x803   :  { %16362 = vmatpush3.bf16.msra.mxu0 %v23610_v44  ;;  %v7804_v44 = vsel %vm7801_vm9, %v23620_v47, %v23619_v20  ;;  %v7860_v20 = vld [vmem:[%s22709_s5 + $0x190] sm:$0xff]  ;;  %v21612_v47 = vld [vmem:[%s22709_s5 + $0x198] sm:$0xff]  ;;  %v9042_v3 = vsub.f32 %v21697_v4, %v23635_v34 }
 0x804   :  { %16364 = vmatprep.subr.bf16.mxu0 %v23611_v26  ;;  %v23621_v26 = vld [vmem:[#allocation73_spill] sm:$0xff]  ;;  %v8862_v10 = vand.u32 4294901760, %v7860_v20  ;;  %v8865_v22 = vand.u32 4294901760, %v21612_v47 }
 0x805   :  { %v9043_v34 = vand.u32 4294901760, %v9042_v3 }
 0x806   :  { %v21711_v36 = vsub.f32 %v7860_v20, %v8862_v10  ;;  %v21714_v28 = vsub.f32 %v21612_v47, %v8865_v22  ;;  %v21750_v20 = vld [vmem:[%s22709_s5 + $0x1e8] sm:$0xff]  ;;  %v21752_v47 = vsub.f32 %v7865_v53, %v8877_v45  ;;  %v21775_v53 = vsub.f32 %v7866_v41, %v8880_v7 }
 0x807   :  { %16366 = vmatpush3.bf16.msra.mxu0 %v23614_v25  ;;  %v7842_v25 = vld [vmem:[%s22709_s5 + $0x100] sm:$0xff] }
 0x808   :  { %16368 = vmatprep.subr.bf16.mxu0 %v23615_v60  ;;  %v21601_v60 = vld [vmem:[%s22709_s5 + $0x108] sm:$0xff]  ;;  %v23642_v29 = vand.u32 4294901760, %v21714_v28 }
 0x809   :  { %v8811_v50 = vand.u32 4294901760, %v21601_v60 }
 0x80b   :  { %16370 = vmatpush3.bf16.msra.mxu0 %v23617_v39  ;;  %v21603_v39 = vand.u32 4294901760, %v7804_v44  ;;  %v21709_v13 = vsub.f32 %v21601_v60, %v8811_v50  ;;  %v8889_v60 = vand.u32 4294901760, %v7869_v49 }
 0x80c   :  { %16372 = vmatprep.subr.bf16.mxu0 %v23618_v18  ;;  %v23099_v18 = vand.u32 4294901760, %v21576_v12 }
 0x80f   :  { %16374 = vmatpush3.bf16.msra.mxu0 %v23621_v26  ;;  %v23623_v26 = vld [vmem:[#allocation87_spill] sm:$0xff] }
 0x810   :  { %16376 = vmatprep.subr.bf16.mxu0 %v23622_v30  ;;  %v8808_v30 = vand.u32 4294901760, %v7842_v25 }
 0x812   :  { %v21639_v61 = vpack.c.bf16 %v8811_v50, %v8808_v30  ;;  %v21699_v1 = vsub.f32 %v7842_v25, %v8808_v30  ;;  %v21716_v25 = vsub.f32 %v7844_v54, %v8814_v46  ;;  %v21718_v30 = vsub.f32 %v7845_v63, %v8817_v59  ;;  %v21734_v59 = vld [vmem:[%s22709_s5 + $0x158] sm:$0xff]  ;;  %v7870_v54 = vld [vmem:[%s22709_s5 + $0x1e0] sm:$0xff] }
 0x813   :  { %16378 = vmatpush3.bf16.msra.mxu0 %v23623_v26  ;;  %v21627_v26 = vsub.f32 %v7804_v44, %v21603_v39  ;;  %v21642_v44 = vpack.c.bf16 %v8865_v22, %v8862_v10  ;;  %v21726_v50 = vpack.c.bf16 %v8883_v31, %v8880_v7  ;;  %v8886_v10 = vand.u32 4294901760, %v7868_v24  ;;  %v7852_v22 = vld [vmem:[%s22709_s5 + $0x150] sm:$0xff]  ;;  %v21794_v7 = vld [vmem:[%s22709_s5 + $0x1f8] sm:$0xff] }
 0x814   :  { %16380 = vmatprep.subr.bf16.mxu0 %v23624_v42  ;;  %v8906_v42 = vsub.f32 %v21576_v12, %v23099_v18  ;;  %v8871_v18 = vand.u32 4294901760, %v7863_v14  ;;  %v21738_v63 = vsub.f32 %v7846_v27, %v8820_v58  ;;  %v21768_v58 = vld [vmem:[%s22709_s5 + $0x168] sm:$0xff] }
 0x815   :  { %23631 = vst [vmem:[#allocation56_spill] sm:$0xff] %v21726_v50 }
 0x816   :  { %v8907_v48 = vand.u32 4294901760, %v8906_v42  ;;  %v21662_v42 = vpack.c.bf16 %v8871_v18, %v8868_v9  ;;  %v21736_v46 = vsub.f32 %v7863_v14, %v8871_v18  ;;  %v21740_v9 = vsub.f32 %v7847_v38, %v8823_v16  ;;  %v21763_v16 = vld [vmem:[%s22709_s5 + $0x160] sm:$0xff] }
 0x817   :  { %16382 = vmatpush3.bf16.msra.mxu0 %v23551_v19  ;;  %v8874_v19 = vand.u32 4294901760, %v7864_v15  ;;  %v8892_v38 = vand.u32 4294901760, %v7870_v54  ;;  %v8895_v18 = vand.u32 4294901760, %v21750_v20  ;;  %v8844_v35 = vand.u32 4294901760, %v21763_v16 }
 0x818   :  { %16384 = vmatprep.subr.bf16.mxu0 %v21617_v5  ;;  %23626 = vst [vmem:[#allocation42_spill] sm:$0xff] %v21662_v42 }
 0x819   :  { %v21691_v6 = vpack.c.bf16 %v8877_v45, %v8874_v19  ;;  %v21742_v8 = vsub.f32 %v7864_v15, %v8874_v19  ;;  %v8838_v45 = vand.u32 4294901760, %v7852_v22  ;;  %v21777_v15 = vpack.c.bf16 %v8889_v60, %v8886_v10 }
 0x81a   :  { %8802 = vmatmul.mubr.f32.vlgmr.msra.gmra.mrb[16].mxu0 %v23605_v37  ;;  %v7849_v37 = vld [vmem:[%s22709_s5 + $0x138] sm:$0xff]  ;;  %v21780_v19 = vsub.f32 %v7867_v21, %v8883_v31  ;;  %v21801_v31 = vld [vmem:[%s22709_s5 + $0x170] sm:$0xff]  ;;  %v21822_v21 = vsub.f32 %v7868_v24, %v8886_v10  ;;  %v23640_v10 = vand.u32 4294901760, %v21709_v13 }
 0x81b   :  { %16386 = vmatpush3.bf16.msra.mxu0 %v21639_v61  ;;  %8908 = vmatprep.mubr.f32.mxu0 %v8907_v48  ;;  %v23627_v48 = vand.u32 4294901760, %v21627_v26  ;;  %v8829_v56 = vand.u32 4294901760, %v7849_v37  ;;  %23629 = vst [vmem:[#allocation52_spill] sm:$0xff] %v21691_v6  ;;  %23633 = vst [vmem:[#allocation63_spill] sm:$0xff] %v21777_v15 }
 0x81c   :  { %16388 = vmatprep.subr.bf16.mxu0 %v21642_v44  ;;  %v8930_v11 = vsub.f32 %v21709_v13, %v23640_v10  ;;  %v23643_v10 = vand.u32 4294901760, %v21789_v2 }
 0x81d   :  { %v21673_v57 = vsub.f32 %v21627_v26, %v23627_v48  ;;  %v7851_v48 = vld [vmem:[%s22709_s5 + $0x148] sm:$0xff]  ;;  %v21721_v40 = vpack.c.bf16 %v8829_v56, %v8826_v32  ;;  %v21756_v14 = vsub.f32 %v7849_v37, %v8829_v56  ;;  %v8841_v32 = vand.u32 4294901760, %v21734_v59 }
 0x81e   :  { %v8835_v43 = vand.u32 4294901760, %v7851_v48  ;;  %v23169_v56 = vand.u32 4294901760, %v21694_v62  ;;  %v21782_v37 = vsub.f32 %v7850_v17, %v8832_v55  ;;  %v21806_v17 = vld [vmem:[%s22709_s5 + $0x178] sm:$0xff] }
 0x81f   :  { %16390 = vmatpush3.bf16.msra.mxu0 %v21659_v0  ;;  %23630 = vst [vmem:[#allocation53_spill] sm:$0xff] %v21721_v40  ;;  %v23653_v0 = vand.u32 4294901760, %v21742_v8 }
 0x820   :  { %16392 = vmatprep.subr.bf16.mxu0 %v21662_v42  ;;  %v21758_v27 = vpack.c.bf16 %v8835_v43, %v8832_v55  ;;  %v21796_v41 = vsub.f32 %v7851_v48, %v8835_v43  ;;  %v21812_v48 = vpack.c.bf16 %v8841_v32, %v8838_v45  ;;  %v9035_v43 = vsub.f32 %v21694_v62, %v23169_v56 }
 0x821   :  { %v21824_v55 = vpack.c.bf16 %v8895_v18, %v8892_v38  ;;  %v23637_v56 = vand.u32 4294901760, %v21768_v58 }
 0x822   :  { %23632 = vst [vmem:[#allocation57_spill] sm:$0xff] %v21758_v27  ;;  %23634 = vst [vmem:[#allocation64_spill] sm:$0xff] %v21812_v48 }
 0x823   :  { %16394 = vmatpush3.bf16.msra.mxu0 %v21682_v23  ;;  %23636 = vst [vmem:[#allocation74_spill] sm:$0xff] %v21824_v55  ;;  %v21851_v23 = vsub.f32 %v7852_v22, %v8838_v45  ;;  %v23186_v22 = vand.u32 4294901760, %v21738_v63 }
 0x824   :  { %16396 = vmatprep.subr.bf16.mxu0 %v21691_v6  ;;  %v9056_v6 = vsub.f32 %v21714_v28, %v23642_v29  ;;  %v21865_v29 = vsub.f32 %v7870_v54, %v8892_v38  ;;  %v23649_v38 = vand.u32 4294901760, %v21718_v30 }
 0x826   :  { %v8944_v45 = vsub.f32 %v21718_v30, %v23649_v38  ;;  %v23652_v38 = vand.u32 4294901760, %v21740_v9 }
 0x827   :  { %16398 = vmatpush3.bf16.msra.mxu0 %v21721_v40  ;;  %v21832_v40 = vpack.c.bf16 %v23637_v56, %v8844_v35  ;;  %v9036_v56 = vand.u32 4294901760, %v9035_v43  ;;  %v21863_v43 = vsub.f32 %v21734_v59, %v8841_v32  ;;  %v9057_v32 = vand.u32 4294901760, %v9056_v6 }
 0x828   :  { %16400 = vmatprep.subr.bf16.mxu0 %v21726_v50  ;;  %v21828_v50 = vsub.f32 %v7869_v49, %v8889_v60  ;;  %v23648_v60 = vand.u32 4294901760, %v21716_v25  ;;  %v21892_v6 = vsub.f32 %v21750_v20, %v8895_v18  ;;  %v8945_v18 = vand.u32 4294901760, %v8944_v45 }
 0x829   :  { %23638 = vst [vmem:[#allocation75_spill] sm:$0xff] %v21832_v40  ;;  %v16415_v59 = vpack.c.bf16 %v9043_v34, %v9036_v56  ;;  %v8951_v56 = vsub.f32 %v21738_v63, %v23186_v22  ;;  %v23194_v45 = vand.u32 4294901760, %v21796_v41 }
 0x82a   :  { %v8937_v3 = vsub.f32 %v21716_v25, %v23648_v60  ;;  %v23191_v60 = vand.u32 4294901760, %v21754_v33 }
 0x82b   :  { %16402 = vmatpush3.bf16.msra.mxu0 %v21758_v27  ;;  %v23641_v27 = vand.u32 4294901760, %v21711_v36 }
 0x82c   :  { %16404 = vmatprep.subr.bf16.mxu0 %v21777_v15  ;;  %v23639_v15 = vand.u32 4294901760, %v21699_v1 }
 0x82d   :  { %v9049_v49 = vsub.f32 %v21711_v36, %v23641_v27  ;;  %v23644_v27 = vand.u32 4294901760, %v21794_v7 }
 0x82e   :  { %v8923_v24 = vsub.f32 %v21699_v1, %v23639_v15  ;;  %v23646_v15 = vand.u32 4294901760, %v21801_v31 }
 0x82f   :  { %16406 = vmatpush3.bf16.msra.mxu0 %v21812_v48  ;;  %v21858_v42 = vpack.c.bf16 %v23644_v27, %v23643_v10  ;;  %v8931_v27 = vand.u32 4294901760, %v8930_v11  ;;  %v9050_v54 = vand.u32 4294901760, %v9049_v49  ;;  %v23651_v11 = vand.u32 4294901760, %v21736_v46 }
 0x830   :  { %16408 = vmatprep.subr.bf16.mxu0 %v21824_v55  ;;  %v23647_v55 = vand.u32 4294901760, %v21806_v17  ;;  %v8924_v10 = vand.u32 4294901760, %v8923_v24  ;;  %v21895_v49 = vsub.f32 %v21763_v16, %v8844_v35  ;;  %v23192_v35 = vand.u32 4294901760, %v21775_v53 }
 0x831   :  { %23645 = vst [vmem:[#allocation83_spill] sm:$0xff] %v21858_v42  ;;  %v16419_v20 = vpack.c.bf16 %v9057_v32, %v9050_v54  ;;  %v23193_v16 = vand.u32 4294901760, %v21780_v19  ;;  %v23195_v54 = vand.u32 4294901760, %v21782_v37  ;;  %v23655_v32 = vand.u32 4294901760, %v21673_v57 }
 0x832   :  { %v21873_v48 = vpack.c.bf16 %v23647_v55, %v23646_v15  ;;  %v23650_v55 = vand.u32 4294901760, %v21723_v52  ;;  %v9070_v15 = vsub.f32 %v21736_v46, %v23651_v11  ;;  %v8938_v11 = vand.u32 4294901760, %v8937_v3 }
 0x833   :  { %16410 = vmatpush3.bf16.msra.mxu0 %v21832_v40  ;;  %v23654_v3 = vand.u32 4294901760, %v21752_v47  ;;  %v9091_v57 = vsub.f32 %v21775_v53, %v23192_v35  ;;  %v8979_v35 = vsub.f32 %v21782_v37, %v23195_v54 }
 0x834   :  { %16412 = vmatprep.subr.bf16.mxu0 %v21858_v42  ;;  %v9063_v24 = vsub.f32 %v21723_v52, %v23650_v55  ;;  %v8958_v55 = vsub.f32 %v21740_v9, %v23652_v38  ;;  %v16417_v42 = vpack.c.bf16 %v8931_v27, %v8924_v10  ;;  %v9071_v40 = vand.u32 4294901760, %v9070_v15 }
 0x835   :  { %v9077_v10 = vsub.f32 %v21742_v8, %v23653_v0  ;;  %v9084_v27 = vsub.f32 %v21752_v47, %v23654_v3  ;;  %v8952_v38 = vand.u32 4294901760, %v8951_v56  ;;  %v9098_v3 = vsub.f32 %v21780_v19, %v23193_v16 }
 0x836   :  { %v9064_v22 = vand.u32 4294901760, %v9063_v24  ;;  %v8959_v34 = vand.u32 4294901760, %v8958_v55  ;;  %v23656_v24 = vand.u32 4294901760, %v21756_v14  ;;  %v16421_v55 = vpack.c.bf16 %v8945_v18, %v8938_v11 }
 0x837   :  { %16414 = vmatpush3.bf16.msra.mxu0 %v21873_v48  ;;  %v9078_v56 = vand.u32 4294901760, %v9077_v10  ;;  %v23658_v15 = vand.u32 4294901760, %v21789_v2  ;;  %v8986_v16 = vsub.f32 %v21796_v41, %v23194_v45  ;;  %v9099_v10 = vand.u32 4294901760, %v9098_v3 }
 0x838   :  { %16416 = vmatprep.subr.bf16.mxu0 %v16415_v59  ;;  %v8965_v59 = vsub.f32 %v21754_v33, %v23191_v60  ;;  %v8972_v0 = vsub.f32 %v21756_v14, %v23656_v24  ;;  %v16423_v60 = vpack.c.bf16 %v9071_v40, %v9064_v22  ;;  %v16425_v18 = vpack.c.bf16 %v8959_v34, %v8952_v38 }
 0x839   :  { %v21941_v11 = vsub.f32 %v21789_v2, %v23658_v15  ;;  %v23659_v40 = vand.u32 4294901760, %v21822_v21  ;;  %v9092_v34 = vand.u32 4294901760, %v9091_v57  ;;  %v23661_v15 = vand.u32 4294901760, %v21794_v7 }
 0x83a   :  { %8914 = vmatmul.mubr.f32.vlgmr.msra.gmra.mrb[18].mxu0 %v23655_v32  ;;  %v23657_v32 = vand.u32 4294901760, %v21768_v58  ;;  %v23663_v57 = vand.u32 4294901760, %v21806_v17  ;;  %v8980_v54 = vand.u32 4294901760, %v8979_v35  ;;  %v8987_v38 = vand.u32 4294901760, %v8986_v16 }
 0x83b   :  { %16418 = vmatpush3.bf16.msra.mxu0 %v16417_v42  ;;  %9144 = vmatprep.mubr.f32.mxu0 %v21571_v51  ;;  %v9085_v42 = vand.u32 4294901760, %v9084_v27  ;;  %v9105_v22 = vsub.f32 %v21822_v21, %v23659_v40  ;;  %v23197_v27 = vand.u32 4294901760, %v21851_v23  ;;  %v23196_v40 = vand.u32 4294901760, %v21865_v29 }
 0x83c   :  { %v21936_v24 = vsub.f32 %v21768_v58, %v23657_v32  ;;  %16420 = vmatprep.subr.bf16.mxu0 %v16419_v20  ;;  %v8966_v58 = vand.u32 4294901760, %v8965_v59  ;;  %v8973_v32 = vand.u32 4294901760, %v8972_v0  ;;  %v23660_v20 = vand.u32 4294901760, %v21828_v50 }
 0x83d   :  { %v21960_v59 = vsub.f32 %v21794_v7, %v23661_v15  ;;  %v16427_v0 = vpack.c.bf16 %v9085_v42, %v9078_v56  ;;  %v21972_v3 = vsub.f32 %v21806_v17, %v23663_v57  ;;  %v9106_v7 = vand.u32 4294901760, %v9105_v22 }
 0x83e   :  { %v9112_v2 = vsub.f32 %v21828_v50, %v23660_v20  ;;  %v23662_v20 = vand.u32 4294901760, %v21801_v31  ;;  %v23199_v56 = vand.u32 4294901760, %v21936_v24  ;;  %v16429_v42 = vpack.c.bf16 %v8973_v32, %v8966_v58 }
 0x83f   :  { %16422 = vmatpush3.bf16.msra.mxu0 %v16421_v55  ;;  %v16431_v45 = vpack.c.bf16 %v9099_v10, %v9092_v34  ;;  %v9119_v35 = vsub.f32 %v21865_v29, %v23196_v40  ;;  %v23665_v16 = vand.u32 4294901760, %v21892_v6  ;;  %v23201_v58 = vand.u32 4294901760, %v21960_v59 }
 0x840   :  { %16424 = vmatprep.subr.bf16.mxu0 %v16423_v60  ;;  %v21967_v55 = vsub.f32 %v21801_v31, %v23662_v20  ;;  %v9113_v15 = vand.u32 4294901760, %v9112_v2  ;;  %v23200_v60 = vand.u32 4294901760, %v21895_v49  ;;  %v8993_v31 = vsub.f32 %v21851_v23, %v23197_v27 }
 0x841   :  { %v23664_v20 = vand.u32 4294901760, %v21863_v43  ;;  %v9126_v22 = vsub.f32 %v21892_v6, %v23665_v16  ;;  %v16433_v32 = vpack.c.bf16 %v8987_v38, %v8980_v54  ;;  %v9014_v10 = vsub.f32 %v21936_v24, %v23199_v56 }
 0x842   :  { %v16435_v2 = vpack.c.bf16 %v9113_v15, %v9106_v7  ;;  %v9007_v34 = vsub.f32 %v21895_v49, %v23200_v60  ;;  %v23205_v16 = vand.u32 4294901760, %v21972_v3  ;;  %v9120_v40 = vand.u32 4294901760, %v9119_v35 }
 0x843   :  { %16426 = vmatpush3.bf16.msra.mxu0 %v16425_v18  ;;  %v9000_v17 = vsub.f32 %v21863_v43, %v23664_v20  ;;  %v23198_v18 = vand.u32 4294901760, %v21941_v11  ;;  %v23202_v20 = vand.u32 4294901760, %v21967_v55  ;;  %v9127_v27 = vand.u32 4294901760, %v9126_v22 }
 0x844   :  { %16428 = vmatprep.subr.bf16.mxu0 %v16427_v0  ;;  %v8994_v0 = vand.u32 4294901760, %v8993_v31  ;;  %v9140_v38 = vsub.f32 %v21960_v59, %v23201_v58  ;;  %v9008_v7 = vand.u32 4294901760, %v9007_v34 }
 0x845   :  { %v9001_v57 = vand.u32 4294901760, %v9000_v17  ;;  %v9133_v54 = vsub.f32 %v21941_v11, %v23198_v18  ;;  %v9021_v31 = vsub.f32 %v21967_v55, %v23202_v20  ;;  %v16439_v17 = vpack.c.bf16 %v9127_v27, %v9120_v40 }
 0x846   :  { %v9141_v22 = vand.u32 4294901760, %v9140_v38  ;;  %v16447_v27 = vpack.c.bf16 %v21697_v4, %v21694_v62  ;;  %v16449_v40 = vpack.c.bf16 %v21709_v13, %v21699_v1  ;;  %v16463_v38 = vpack.c.bf16 %v21780_v19, %v21775_v53 }
 0x847   :  { %16430 = vmatpush3.bf16.msra.mxu0 %v16429_v42  ;;  %v16437_v15 = vpack.c.bf16 %v9001_v57, %v8994_v0  ;;  %v9015_v42 = vand.u32 4294901760, %v9014_v10  ;;  %v9134_v35 = vand.u32 4294901760, %v9133_v54  ;;  %v9022_v0 = vand.u32 4294901760, %v9021_v31  ;;  %v12031_v31 = vld [vmem:[%s22710_s6] ss:$0 sm:$0xff] }
 0x848   :  { %16432 = vmatprep.subr.bf16.mxu0 %v16431_v45  ;;  %v9028_v45 = vsub.f32 %v21972_v3, %v23205_v16  ;;  %v16461_v54 = vpack.c.bf16 %v21756_v14, %v21754_v33 }
 0x849   :  { %v16443_v58 = vpack.c.bf16 %v9141_v22, %v9134_v35 }
 0x84a   :  { %v9029_v10 = vand.u32 4294901760, %v9028_v45  ;;  %v16471_v45 = vpack.c.bf16 %v21892_v6, %v21865_v29 }
 0x84b   :  { %16434 = vmatpush3.bf16.msra.mxu0 %v16433_v32  ;;  %v16441_v32 = vpack.c.bf16 %v9015_v42, %v9008_v7  ;;  %v16465_v7 = vpack.c.bf16 %v21796_v41, %v21782_v37  ;;  %v16469_v42 = vpack.c.bf16 %v21863_v43, %v21851_v23 }
 0x84c   :  { %16436 = vmatprep.subr.bf16.mxu0 %v16435_v2  ;;  %v12845_v18 = vpop.f32.mrb[6].mxu0  ;;  %v16445_v51 = vpack.c.bf16 %v9029_v10, %v9022_v0  ;;  %v16459_v2 = vpack.c.bf16 %v21752_v47, %v21742_v8  ;;  %v16473_v0 = vpack.c.bf16 %v21936_v24, %v21895_v49 }
 0x84d   :  { %v12846_v56 = vpop.f32.mrb[7].mxu0 }
 0x84e   :  { %v12847_v60 = vadd.f32 %v12846_v56, %v12845_v18  ;;  %v13335_v34 = vpop.f32.mrb[4].mxu1  ;;  %v16451_v56 = vpack.c.bf16 %v21714_v28, %v21711_v36  ;;  %v16453_v18 = vpack.c.bf16 %v21718_v30, %v21716_v25 }
 0x84f   :  { %16438 = vmatpush3.bf16.msra.mxu0 %v16437_v15  ;;  %v13336_v57 = vpop.f32.mrb[5].mxu1  ;;  %v16467_v15 = vpack.c.bf16 %v21828_v50, %v21822_v21 }
 0x850   :  { %16440 = vmatprep.subr.bf16.mxu0 %v16439_v17  ;;  %v22010_v20 = vadd.f32 %v13336_v57, %v13335_v34  ;;  %v8054_v22 = vadd.f32 %v12847_v60, %v12031_v31  ;;  %v16475_v57 = vpack.c.bf16 %v21960_v59, %v21941_v11  ;;  %v23666_v60 = vand.u32 4294901760, %v21576_v12 }
 0x853   :  { %16442 = vmatpush3.bf16.msra.mxu0 %v16441_v32 }
 0x854   :  { %16444 = vmatprep.subr.bf16.mxu0 %v16443_v58  ;;  %v16455_v58 = vpack.c.bf16 %v21736_v46, %v21723_v52 }
 0x857   :  { %16446 = vmatpush3.bf16.msra.mxu0 %v16445_v51  ;;  %v16457_v51 = vpack.c.bf16 %v21740_v9, %v21738_v63 }
 0x858   :  { %16448 = vmatprep.subr.bf16.mxu0 %v16447_v27 }
 0x85a   :  { %9146 = vmatmul.mubr.f32.vlgmr.msra.gmra.mrb[20].mxu0 %v21603_v39 }
 0x85b   :  { %16450 = vmatpush3.bf16.msra.mxu0 %v16449_v40  ;;  %9281 = vmatprep.mubr.f32.mxu0 %v21576_v12 }
 0x85c   :  { %16452 = vmatprep.subr.bf16.mxu0 %v16451_v56  ;;  %v16477_v56 = vpack.c.bf16 %v21972_v3, %v21967_v55 }
 0x85f   :  { %16454 = vmatpush3.bf16.msra.mxu0 %v16453_v18  ;;  %v23667_v18 = vld [vmem:[#allocation40_spill] sm:$0xff] }
 0x860   :  { %16456 = vmatprep.subr.bf16.mxu0 %v16455_v58  ;;  %v23668_v58 = vld [vmem:[#allocation42_spill] sm:$0xff] }
 0x863   :  { %16458 = vmatpush3.bf16.msra.mxu0 %v16457_v51  ;;  %v23669_v51 = vld [vmem:[#allocation43_spill] sm:$0xff] }
 0x864   :  { %16460 = vmatprep.subr.bf16.mxu0 %v16459_v2  ;;  %v23670_v2 = vld [vmem:[#allocation52_spill] sm:$0xff] }
 0x867   :  { %16462 = vmatpush3.bf16.msra.mxu0 %v16461_v54  ;;  %v23671_v54 = vld [vmem:[#allocation53_spill] sm:$0xff] }
 0x868   :  { %16464 = vmatprep.subr.bf16.mxu0 %v16463_v38  ;;  %v23672_v38 = vld [vmem:[#allocation56_spill] sm:$0xff] }
 0x86b   :  { %16466 = vmatpush3.bf16.msra.mxu0 %v16465_v7  ;;  %v23673_v7 = vld [vmem:[#allocation57_spill] sm:$0xff] }
 0x86c   :  { %16468 = vmatprep.subr.bf16.mxu0 %v16467_v15  ;;  %v12880_v17 = vpop.f32.mrb[8].mxu0  ;;  %v23674_v15 = vld [vmem:[#allocation63_spill] sm:$0xff] }
 0x86d   :  { %v12881_v35 = vpop.f32.mrb[9].mxu0 }
 0x86e   :  { %v12882_v34 = vadd.f32 %v12881_v35, %v12880_v17  ;;  %v13405_v32 = vpop.f32.mrb[6].mxu1 }
 0x86f   :  { %16470 = vmatpush3.bf16.msra.mxu0 %v16469_v42  ;;  %v13406_v10 = vpop.f32.mrb[7].mxu1 }
 0x870   :  { %16472 = vmatprep.subr.bf16.mxu0 %v16471_v45  ;;  %v8286_v27 = vadd.f32 %v12882_v34, %v8054_v22  ;;  %v22047_v40 = vadd.f32 %v13406_v10, %v13405_v32  ;;  %v23675_v45 = vld [vmem:[#allocation64_spill] sm:$0xff]  ;;  %v23676_v22 = vld [vmem:[#allocation74_spill] sm:$0xff]  ;;  %v23678_v10 = vld [vmem:[#allocation83_spill] sm:$0xff] }
 0x873   :  { %16474 = vmatpush3.bf16.msra.mxu0 %v16473_v0  ;;  %v23677_v0 = vld [vmem:[#allocation75_spill] sm:$0xff] }
 0x874   :  { %16476 = vmatprep.subr.bf16.mxu0 %v16475_v57  ;;  %v23679_v57 = vand.u32 4294901760, %v21694_v62  ;;  %v23686_v62 = vld [vmem:[#allocation101_spill] sm:$0xff] }
 0x877   :  { %16478 = vmatpush3.bf16.msra.mxu0 %v16477_v56  ;;  %v23680_v56 = vand.u32 4294901760, %v21697_v4  ;;  %v23687_v4 = vand.u32 4294901760, %v21716_v25  ;;  %v23694_v25 = vand.u32 4294901760, %v21752_v47  ;;  %v23701_v47 = vand.u32 4294901760, %v21822_v21 }
 0x878   :  { %16480 = vmatprep.subr.bf16.mxu0 %v21617_v5 }
 0x87a   :  { %9284 = vmatmul.mubr.f32.vlgmr.msra.gmra.mrb[22].mxu0 %v21627_v26 }
 0x87b   :  { %16482 = vmatpush3.bf16.msra.mxu0 %v21639_v61  ;;  %9388 = vmatprep.mubr.f32.mxu0 %v23666_v60  ;;  %v16511_v60 = vpack.c.bf16 %v23680_v56, %v23679_v57  ;;  %v23688_v57 = vand.u32 4294901760, %v21718_v30  ;;  %v23690_v56 = vand.u32 4294901760, %v21736_v46  ;;  %v23695_v30 = vand.u32 4294901760, %v21754_v33 }
 0x87c   :  { %16484 = vmatprep.subr.bf16.mxu0 %v21642_v44  ;;  %v23697_v46 = vand.u32 4294901760, %v21775_v53  ;;  %v23702_v33 = vand.u32 4294901760, %v21828_v50  ;;  %v23704_v53 = vand.u32 4294901760, %v21863_v43  ;;  %v23707_v50 = vand.u32 4294901760, %v21895_v49 }
 0x87d   :  { %v23709_v43 = vand.u32 4294901760, %v21941_v11 }
 0x87f   :  { %16486 = vmatpush3.bf16.msra.mxu0 %v23667_v18 }
 0x880   :  { %16488 = vmatprep.subr.bf16.mxu0 %v23668_v58 }
 0x883   :  { %16490 = vmatpush3.bf16.msra.mxu0 %v23669_v51 }
 0x884   :  { %16492 = vmatprep.subr.bf16.mxu0 %v23670_v2 }
 0x887   :  { %16494 = vmatpush3.bf16.msra.mxu0 %v23671_v54 }
 0x888   :  { %16496 = vmatprep.subr.bf16.mxu0 %v23672_v38 }
 0x88b   :  { %16498 = vmatpush3.bf16.msra.mxu0 %v23673_v7 }
 0x88c   :  { %16500 = vmatprep.subr.bf16.mxu0 %v23674_v15 }
 0x88d   :  { %v12915_v12 = vpop.f32.mrb[10].mxu0 }
 0x88e   :  { %v12916_v42 = vpop.f32.mrb[11].mxu0 }
 0x88f   :  { %v12917_v31 = vadd.f32 %v12916_v42, %v12915_v12  ;;  %16502 = vmatpush3.bf16.msra.mxu0 %v23675_v45  ;;  %v13475_v17 = vpop.f32.mrb[8].mxu1  ;;  %v23681_v12 = vand.u32 4294901760, %v21699_v1  ;;  %v23682_v42 = vand.u32 4294901760, %v21709_v13  ;;  %v16517_v1 = vpack.c.bf16 %v23688_v57, %v23687_v4 }
 0x890   :  { %v13476_v35 = vpop.f32.mrb[9].mxu1  ;;  %16504 = vmatprep.subr.bf16.mxu0 %v23676_v22  ;;  %v23689_v13 = vand.u32 4294901760, %v21723_v52  ;;  %v23696_v52 = vand.u32 4294901760, %v21756_v14  ;;  %v23703_v14 = vand.u32 4294901760, %v21851_v23 }
 0x891   :  { %v8424_v34 = vadd.f32 %v12917_v31, %v8286_v27  ;;  %v22067_v32 = vadd.f32 %v13476_v35, %v13475_v17  ;;  %v16513_v16 = vpack.c.bf16 %v23682_v42, %v23681_v12  ;;  %v23683_v27 = vand.u32 4294901760, %v21711_v36 }
 0x892   :  { %v23684_v31 = vand.u32 4294901760, %v21714_v28  ;;  %v23685_v35 = vand.u32 4294901760, %v21627_v26  ;;  %v16519_v36 = vpack.c.bf16 %v23690_v56, %v23689_v13  ;;  %v23691_v28 = vand.u32 4294901760, %v21738_v63 }
 0x893   :  { %16506 = vmatpush3.bf16.msra.mxu0 %v23677_v0  ;;  %v23692_v26 = vand.u32 4294901760, %v21740_v9  ;;  %v16525_v42 = vpack.c.bf16 %v23696_v52, %v23695_v30  ;;  %v23698_v63 = vand.u32 4294901760, %v21780_v19  ;;  %v23699_v9 = vand.u32 4294901760, %v21782_v37 }
 0x894   :  { %16508 = vmatprep.subr.bf16.mxu0 %v23678_v10  ;;  %v16515_v17 = vpack.c.bf16 %v23684_v31, %v23683_v27  ;;  %v23705_v19 = vand.u32 4294901760, %v21865_v29  ;;  %v23706_v37 = vand.u32 4294901760, %v21892_v6  ;;  %v23708_v13 = vand.u32 4294901760, %v21936_v24 }
 0x895   :  { %v16527_v27 = vpack.c.bf16 %v23698_v63, %v23697_v46 }
 0x896   :  { %v16535_v4 = vpack.c.bf16 %v23706_v37, %v23705_v19  ;;  %v16537_v56 = vpack.c.bf16 %v23708_v13, %v23707_v50  ;;  %v23740_v37 = vld [vmem:[#allocation35_spill] sm:$0xff] }
 0x897   :  { %16510 = vmatpush3.bf16.msra.mxu0 %v21873_v48 }
 0x898   :  { %16512 = vmatprep.subr.bf16.mxu0 %v16511_v60  ;;  %v16521_v60 = vpack.c.bf16 %v23692_v26, %v23691_v28  ;;  %v23711_v26 = vand.u32 4294901760, %v21967_v55  ;;  %v23713_v55 = vld [vmem:[#allocation118_spill] sm:$0xff] }
 0x89a   :  { %9392 = vmatmul.mubr.f32.vlgmr.msra.gmra.mrb[24].mxu0 %v23685_v35  ;;  %v16533_v35 = vpack.c.bf16 %v23704_v53, %v23703_v14 }
 0x89b   :  { %16514 = vmatpush3.bf16.msra.mxu0 %v16513_v16  ;;  %9558 = vmatprep.mubr.f32.mxu0 %v23686_v62  ;;  %v23693_v16 = vand.u32 4294901760, %v21742_v8  ;;  %v23700_v8 = vand.u32 4294901760, %v21796_v41 }
 0x89c   :  { %16516 = vmatprep.subr.bf16.mxu0 %v16515_v17  ;;  %v16531_v17 = vpack.c.bf16 %v23702_v33, %v23701_v47 }
 0x89d   :  { %v16523_v12 = vpack.c.bf16 %v23694_v25, %v23693_v16  ;;  %v16529_v31 = vpack.c.bf16 %v23700_v8, %v23699_v9  ;;  %v23732_v8 = vld [vmem:[#allocation25_spill] sm:$0xff] }
 0x89f   :  { %16518 = vmatpush3.bf16.msra.mxu0 %v16517_v1 }
 0x8a0   :  { %16520 = vmatprep.subr.bf16.mxu0 %v16519_v36  ;;  %v23710_v36 = vand.u32 4294901760, %v21960_v59 }
 0x8a2   :  { %v16539_v29 = vpack.c.bf16 %v23710_v36, %v23709_v43  ;;  %v23748_v43 = vld [vmem:[#allocation48_spill] sm:$0xff] }
 0x8a3   :  { %16522 = vmatpush3.bf16.msra.mxu0 %v16521_v60  ;;  %v23712_v60 = vand.u32 4294901760, %v21972_v3  ;;  %v9767_v3 = vand.u32 4294901760, %v23713_v55  ;;  %v23749_v36 = vand.u32 4294901760, %v23748_v43  ;;  %v23781_v43 = vld [vmem:[#allocation89_spill] sm:$0xff] }
 0x8a4   :  { %16524 = vmatprep.subr.bf16.mxu0 %v16523_v12 }
 0x8a5   :  { %v16541_v16 = vpack.c.bf16 %v23712_v60, %v23711_v26  ;;  %v23752_v60 = vld [vmem:[#allocation54_spill] sm:$0xff] }
 0x8a7   :  { %16526 = vmatpush3.bf16.msra.mxu0 %v16525_v42  ;;  %v23728_v42 = vld [vmem:[#allocation16_spill] sm:$0xff] }
 0x8a8   :  { %16528 = vmatprep.subr.bf16.mxu0 %v16527_v27  ;;  %v23729_v46 = vand.u32 4294901760, %v23728_v42  ;;  %v23730_v27 = vld [vmem:[#allocation21_spill] sm:$0xff] }
 0x8a9   :  { %v23731_v9 = vand.u32 4294901760, %v23730_v27  ;;  %v23770_v27 = vld [vmem:[#allocation119_spill] sm:$0xff] }
 0x8ab   :  { %16530 = vmatpush3.bf16.msra.mxu0 %v16529_v31  ;;  %v23733_v31 = vand.u32 4294901760, %v23732_v8 }
 0x8ac   :  { %16532 = vmatprep.subr.bf16.mxu0 %v16531_v17  ;;  %v23736_v17 = vld [vmem:[#allocation27_spill] sm:$0xff] }
 0x8ad   :  { %v12950_v41 = vpop.f32.mrb[12].mxu0  ;;  %v22197_v47 = vpack.c.bf16 %v23733_v31, %v23731_v9  ;;  %v23737_v14 = vand.u32 4294901760, %v23736_v17  ;;  %v9773_v9 = vand.u32 4294901760, %v23770_v27  ;;  %v23771_v31 = vld [vmem:[#allocation81_spill] sm:$0xff] }
 0x8ae   :  { %v12951_v57 = vpop.f32.mrb[13].mxu0 }
 0x8af   :  { %v12952_v1 = vadd.f32 %v12951_v57, %v12950_v41  ;;  %16534 = vmatpush3.bf16.msra.mxu0 %v16533_v35  ;;  %v13545_v21 = vpop.f32.mrb[10].mxu1  ;;  %v23738_v35 = vld [vmem:[#allocation31_spill] sm:$0xff]  ;;  %v23742_v57 = vld [vmem:[#allocation36_spill] sm:$0xff] }
 0x8b0   :  { %v13546_v23 = vpop.f32.mrb[11].mxu1  ;;  %16536 = vmatprep.subr.bf16.mxu0 %v16535_v4  ;;  %v23739_v19 = vand.u32 4294901760, %v23738_v35  ;;  %v23741_v4 = vand.u32 4294901760, %v23740_v37 }
 0x8b1   :  { %v8532_v28 = vadd.f32 %v12952_v1, %v8424_v34  ;;  %v22135_v6 = vadd.f32 %v13546_v23, %v13545_v21  ;;  %v23743_v1 = vand.u32 4294901760, %v23742_v57  ;;  %v23744_v21 = vld [vmem:[#allocation37_spill] sm:$0xff]  ;;  %v23777_v57 = vld [vmem:[#allocation18_spill] sm:$0xff] }
 0x8b2   :  { %v22211_v41 = vpack.c.bf16 %v23741_v4, %v23739_v19  ;;  %v23745_v50 = vand.u32 4294901760, %v23744_v21  ;;  %v23775_v19 = vld [vmem:[#allocation17_spill] sm:$0xff] }
 0x8b3   :  { %16538 = vmatpush3.bf16.msra.mxu0 %v16537_v56  ;;  %v23746_v56 = vld [vmem:[#allocation44_spill] sm:$0xff]  ;;  %v23776_v37 = vand.u32 4294901760, %v23775_v19 }
 0x8b4   :  { %16540 = vmatprep.subr.bf16.mxu0 %v16539_v29  ;;  %v22218_v13 = vpack.c.bf16 %v23745_v50, %v23743_v1  ;;  %v23747_v23 = vand.u32 4294901760, %v23746_v56  ;;  %v23778_v1 = vand.u32 4294901760, %v23777_v57  ;;  %v23779_v50 = vld [vmem:[#allocation22_spill] sm:$0xff] }
 0x8b5   :  { %v9785_v4 = vsub.f32 %v23775_v19, %v23776_v37  ;;  %v23780_v56 = vand.u32 4294901760, %v23779_v50 }
 0x8b6   :  { %v22225_v29 = vpack.c.bf16 %v23749_v36, %v23747_v23  ;;  %v9792_v21 = vsub.f32 %v23777_v57, %v23778_v1  ;;  %v23782_v36 = vand.u32 4294901760, %v23781_v43 }
 0x8b7   :  { %16542 = vmatpush3.bf16.msra.mxu0 %v16541_v16  ;;  %v23753_v16 = vand.u32 4294901760, %v23752_v60  ;;  %v9911_v23 = vsub.f32 %v23779_v50, %v23780_v56  ;;  %v23799_v50 = vld [vmem:[#allocation34_spill] sm:$0xff] }
 0x8b8   :  { %16544 = vmatprep.subr.bf16.mxu0 %v21617_v5  ;;  %v23800_v56 = vand.u32 4294901760, %v23799_v50 }
 0x8ba   :  { %9560 = vmatmul.mubr.f32.vlgmr.msra.gmra.mrb[26].mxu0 %v21603_v39 }
 0x8bb   :  { %16546 = vmatpush3.bf16.msra.mxu0 %v21639_v61  ;;  %9662 = vmatprep.mubr.f32.mxu0 %v23686_v62  ;;  %v23724_v62 = vld [vmem:[#allocation14_spill] sm:$0xff] }
 0x8bc   :  { %16548 = vmatprep.subr.bf16.mxu0 %v21642_v44  ;;  %v23725_v25 = vand.u32 4294901760, %v23724_v62  ;;  %v23766_v62 = vld [vmem:[#allocation11_spill] sm:$0xff] }
 0x8bf   :  { %16550 = vmatpush3.bf16.msra.mxu0 %v23667_v18  ;;  %v23714_v18 = vld [vmem:[#allocation5_spill] sm:$0xff] }
 0x8c0   :  { %16552 = vmatprep.subr.bf16.mxu0 %v23668_v58  ;;  %v23715_v58 = vand.u32 4294901760, %v23714_v18 }
 0x8c3   :  { %16554 = vmatpush3.bf16.msra.mxu0 %v23669_v51  ;;  %v23716_v51 = vld [vmem:[#allocation6_spill] sm:$0xff] }
 0x8c4   :  { %16556 = vmatprep.subr.bf16.mxu0 %v23670_v2  ;;  %v23717_v2 = vand.u32 4294901760, %v23716_v51 }
 0x8c7   :  { %16558 = vmatpush3.bf16.msra.mxu0 %v23671_v54  ;;  %v22165_v54 = vpack.c.bf16 %v23717_v2, %v23715_v58  ;;  %v23758_v58 = vld [vmem:[#allocation71_spill] sm:$0xff]  ;;  %v23760_v2 = vld [vmem:[#allocation72_spill] sm:$0xff] }
 0x8c8   :  { %16560 = vmatprep.subr.bf16.mxu0 %v23672_v38  ;;  %v9768_v38 = vsub.f32 %v23713_v55, %v9767_v3  ;;  %v23759_v51 = vand.u32 4294901760, %v23758_v58 }
 0x8ca   :  { %v9769_v30 = vand.u32 4294901760, %v9768_v38  ;;  %v23761_v38 = vand.u32 4294901760, %v23760_v2  ;;  %v23787_v2 = vld [vmem:[#allocation24_spill] sm:$0xff] }
 0x8cb   :  { %16562 = vmatpush3.bf16.msra.mxu0 %v23673_v7  ;;  %v23718_v7 = vld [vmem:[#allocation7_spill] sm:$0xff] }
 0x8cc   :  { %16564 = vmatprep.subr.bf16.mxu0 %v23674_v15  ;;  %v23719_v15 = vand.u32 4294901760, %v23718_v7  ;;  %v22246_v7 = vpack.c.bf16 %v23761_v38, %v23759_v51  ;;  %v9774_v51 = vsub.f32 %v23770_v27, %v9773_v9  ;;  %v23788_v38 = vand.u32 4294901760, %v23787_v2  ;;  %v23847_v27 = vld [vmem:[#allocation133_spill] sm:$0xff] }
 0x8cd   :  { %v12985_v61 = vpop.f32.mrb[14].mxu0 }
 0x8ce   :  { %v12986_v5 = vpop.f32.mrb[15].mxu0 }
 0x8cf   :  { %v12987_v49 = vadd.f32 %v12986_v5, %v12985_v61  ;;  %16566 = vmatpush3.bf16.msra.mxu0 %v23675_v45  ;;  %v13615_v44 = vpop.f32.mrb[12].mxu1  ;;  %v23720_v45 = vld [vmem:[#allocation8_spill] sm:$0xff]  ;;  %v23754_v5 = vld [vmem:[#allocation67_spill] sm:$0xff] }
 0x8d0   :  { %v13616_v24 = vpop.f32.mrb[13].mxu1  ;;  %16568 = vmatprep.subr.bf16.mxu0 %v23676_v22  ;;  %v23721_v22 = vand.u32 4294901760, %v23720_v45 }
 0x8d1   :  { %v8700_v11 = vadd.f32 %v12987_v49, %v8532_v28  ;;  %v22156_v59 = vadd.f32 %v13616_v24, %v13615_v44  ;;  %v23750_v28 = vld [vmem:[#allocation49_spill] sm:$0xff]  ;;  %v23755_v49 = vand.u32 4294901760, %v23754_v5  ;;  %v23756_v44 = vld [vmem:[#allocation68_spill] sm:$0xff] }
 0x8d2   :  { %v22175_v34 = vpack.c.bf16 %v23721_v22, %v23719_v15  ;;  %v23751_v26 = vand.u32 4294901760, %v23750_v28  ;;  %v23757_v24 = vand.u32 4294901760, %v23756_v44  ;;  %v23762_v15 = vld [vmem:[#allocation76_spill] sm:$0xff]  ;;  %v23783_v28 = vld [vmem:[#allocation93_spill] sm:$0xff] }
 0x8d3   :  { %16570 = vmatpush3.bf16.msra.mxu0 %v23677_v0  ;;  %v23722_v0 = vld [vmem:[#allocation13_spill] sm:$0xff]  ;;  %v23763_v45 = vand.u32 4294901760, %v23762_v15  ;;  %v23764_v22 = vld [vmem:[#allocation80_spill] sm:$0xff]  ;;  %v9799_v15 = vsub.f32 %v23787_v2, %v23788_v38 }
 0x8d4   :  { %16572 = vmatprep.subr.bf16.mxu0 %v23678_v10  ;;  %v23723_v10 = vand.u32 4294901760, %v23722_v0  ;;  %v22232_v61 = vpack.c.bf16 %v23753_v16, %v23751_v26  ;;  %v22239_v18 = vpack.c.bf16 %v23757_v24, %v23755_v49  ;;  %v23765_v0 = vand.u32 4294901760, %v23764_v22  ;;  %v23785_v49 = vld [vmem:[#allocation23_spill] sm:$0xff] }
 0x8d5   :  { %v23784_v26 = vand.u32 4294901760, %v23783_v28  ;;  %v23786_v44 = vand.u32 4294901760, %v23785_v49  ;;  %v9800_v57 = vand.u32 4294901760, %v9799_v15  ;;  %v23803_v28 = vld [vmem:[#allocation45_spill] sm:$0xff] }
 0x8d6   :  { %v22182_v12 = vpack.c.bf16 %v23725_v25, %v23723_v10  ;;  %v22253_v10 = vpack.c.bf16 %v23765_v0, %v23763_v45  ;;  %v23767_v25 = vand.u32 4294901760, %v23766_v62  ;;  %v23789_v45 = vld [vmem:[#allocation28_spill] sm:$0xff] }
 0x8d7   :  { %16574 = vmatpush3.bf16.msra.mxu0 %v21873_v48  ;;  %v23726_v48 = vld [vmem:[#allocation15_spill] sm:$0xff]  ;;  %v22283_v60 = vpack.c.bf16 %v23784_v26, %v23782_v36  ;;  %v9918_v24 = vsub.f32 %v23785_v49, %v23786_v44  ;;  %v23790_v22 = vand.u32 4294901760, %v23789_v45  ;;  %v23804_v26 = vand.u32 4294901760, %v23803_v28 }
 0x8d8   :  { %16576 = vmatprep.subr.bf16.mxu0 %v22165_v54  ;;  %v23727_v52 = vand.u32 4294901760, %v23726_v48  ;;  %v23768_v48 = vld [vmem:[#allocation12_spill] sm:$0xff] }
 0x8d9   :  { %v9806_v0 = vsub.f32 %v23789_v45, %v23790_v22 }
 0x8da   :  { %9664 = vmatmul.mubr.f32.vlgmr.msra.gmra.mrb[28].mxu0 %v21603_v39  ;;  %v22190_v63 = vpack.c.bf16 %v23729_v46, %v23727_v52  ;;  %v23734_v39 = vld [vmem:[#allocation26_spill] sm:$0xff]  ;;  %v23769_v52 = vand.u32 4294901760, %v23768_v48 }
 0x8db   :  { %16578 = vmatpush3.bf16.msra.mxu0 %v22175_v34  ;;  %9770 = vmatprep.mubr.f32.mxu0 %v9769_v30  ;;  %v23735_v33 = vand.u32 4294901760, %v23734_v39  ;;  %v9897_v30 = vsub.f32 %v23766_v62, %v23767_v25  ;;  %v23772_v39 = vand.u32 4294901760, %v23771_v31  ;;  %v23791_v62 = vld [vmem:[#allocation98_spill] sm:$0xff]  ;;  %v9919_v31 = vand.u32 4294901760, %v9918_v24 }
 0x8dc   :  { %16580 = vmatprep.subr.bf16.mxu0 %v22182_v12  ;;  %v9904_v42 = vsub.f32 %v23768_v48, %v23769_v52  ;;  %v23792_v25 = vand.u32 4294901760, %v23791_v62  ;;  %v9786_v52 = vand.u32 4294901760, %v9785_v4  ;;  %v9807_v1 = vand.u32 4294901760, %v9806_v0  ;;  %v23807_v62 = vld [vmem:[#allocation116_spill] sm:$0xff] }
 0x8dd   :  { %v22204_v53 = vpack.c.bf16 %v23737_v14, %v23735_v33  ;;  %v23773_v33 = vld [vmem:[#allocation84_spill] sm:$0xff]  ;;  %v9898_v16 = vand.u32 4294901760, %v9897_v30  ;;  %v23793_v30 = vld [vmem:[#allocation99_spill] sm:$0xff]  ;;  %v9813_v4 = vsub.f32 %v23799_v50, %v23800_v56  ;;  %v9775_v24 = vand.u32 4294901760, %v9774_v51  ;;  %v23818_v56 = vld [vmem:[#allocation61_spill] sm:$0xff] }
 0x8de   :  { %v23774_v17 = vand.u32 4294901760, %v23773_v33  ;;  %v9905_v5 = vand.u32 4294901760, %v9904_v42  ;;  %v23794_v48 = vand.u32 4294901760, %v23793_v30  ;;  %v9793_v42 = vand.u32 4294901760, %v9792_v21  ;;  %v23801_v21 = vld [vmem:[#allocation38_spill] sm:$0xff] }
 0x8df   :  { %16582 = vmatpush3.bf16.msra.mxu0 %v22190_v63  ;;  %v16613_v45 = vpack.c.bf16 %v9807_v1, %v9800_v57  ;;  %v9814_v22 = vand.u32 4294901760, %v9813_v4  ;;  %v23816_v57 = vld [vmem:[#allocation60_spill] sm:$0xff]  ;;  %v23819_v4 = vand.u32 4294901760, %v23818_v56 }
 0x8e0   :  { %16584 = vmatprep.subr.bf16.mxu0 %v22197_v47  ;;  %v22266_v14 = vpack.c.bf16 %v23774_v17, %v23772_v39  ;;  %v23795_v39 = vld [vmem:[#allocation32_spill] sm:$0xff]  ;;  %v16609_v36 = vpack.c.bf16 %v9793_v42, %v9786_v52  ;;  %v23817_v1 = vand.u32 4294901760, %v23816_v57 }
 0x8e1   :  { %v23796_v33 = vand.u32 4294901760, %v23795_v39 }
 0x8e2   :  { %v9841_v50 = vsub.f32 %v23816_v57, %v23817_v1  ;;  %v23832_v57 = vld [vmem:[#allocation94_spill] sm:$0xff] }
 0x8e3   :  { %16586 = vmatpush3.bf16.msra.mxu0 %v22204_v53  ;;  %v9925_v17 = vsub.f32 %v23795_v39, %v23796_v33  ;;  %v23810_v39 = vld [vmem:[#allocation50_spill] sm:$0xff]  ;;  %v23833_v1 = vand.u32 4294901760, %v23832_v57 }
 0x8e4   :  { %16588 = vmatprep.subr.bf16.mxu0 %v22211_v41  ;;  %v23811_v33 = vand.u32 4294901760, %v23810_v39 }
 0x8e5   :  { %v9926_v38 = vand.u32 4294901760, %v9925_v17 }
 0x8e6   :  { %v9834_v51 = vsub.f32 %v23810_v39, %v23811_v33  ;;  %v23828_v39 = vld [vmem:[#allocation91_spill] sm:$0xff] }
 0x8e7   :  { %16590 = vmatpush3.bf16.msra.mxu0 %v22218_v13  ;;  %v23829_v33 = vand.u32 4294901760, %v23828_v39 }
 0x8e8   :  { %16592 = vmatprep.subr.bf16.mxu0 %v22225_v29 }
 0x8eb   :  { %16594 = vmatpush3.bf16.msra.mxu0 %v22232_v61 }
 0x8ec   :  { %16596 = vmatprep.subr.bf16.mxu0 %v22239_v18 }
 0x8ed   :  { %v13020_v46 = vpop.f32.mrb[16].mxu0 }
 0x8ee   :  { %v13021_v8 = vpop.f32.mrb[17].mxu0 }
 0x8ef   :  { %v13022_v35 = vadd.f32 %v13021_v8, %v13020_v46  ;;  %16598 = vmatpush3.bf16.msra.mxu0 %v22246_v7  ;;  %v9912_v46 = vand.u32 4294901760, %v9911_v23  ;;  %v16607_v8 = vpack.c.bf16 %v9905_v5, %v9898_v16  ;;  %v23802_v23 = vand.u32 4294901760, %v23801_v21  ;;  %v23805_v5 = vld [vmem:[#allocation46_spill] sm:$0xff] }
 0x8f0   :  { %16600 = vmatprep.subr.bf16.mxu0 %v22253_v10  ;;  %v9939_v16 = vsub.f32 %v23803_v28, %v23804_v26  ;;  %v23806_v49 = vand.u32 4294901760, %v23805_v5  ;;  %v9835_v28 = vand.u32 4294901760, %v9834_v51  ;;  %v9981_v51 = vsub.f32 %v23828_v39, %v23829_v33 }
 0x8f1   :  { %v22288_v58 = vadd.f32 %v13022_v35, %v8700_v11  ;;  %v22304_v11 = vpack.c.bf16 %v23794_v48, %v23792_v25  ;;  %v23797_v35 = vld [vmem:[#allocation33_spill] sm:$0xff]  ;;  %v9820_v43 = vsub.f32 %v23801_v21, %v23802_v23  ;;  %v16611_v2 = vpack.c.bf16 %v9919_v31, %v9912_v46  ;;  %v23808_v48 = vld [vmem:[#allocation47_spill] sm:$0xff] }
 0x8f2   :  { %v23798_v19 = vand.u32 4294901760, %v23797_v35  ;;  %v9946_v44 = vsub.f32 %v23805_v5, %v23806_v49  ;;  %v9940_v25 = vand.u32 4294901760, %v9939_v16  ;;  %v23809_v52 = vand.u32 4294901760, %v23808_v48  ;;  %v23820_v5 = vld [vmem:[#allocation77_spill] sm:$0xff] }
 0x8f3   :  { %16602 = vmatpush3.bf16.msra.mxu0 %v22266_v14  ;;  %v9821_v0 = vand.u32 4294901760, %v9820_v43  ;;  %v9848_v21 = vsub.f32 %v23818_v56, %v23819_v4  ;;  %v23821_v49 = vand.u32 4294901760, %v23820_v5 }
 0x8f4   :  { %16604 = vmatprep.subr.bf16.mxu0 %v22283_v60  ;;  %v9932_v37 = vsub.f32 %v23797_v35, %v23798_v19  ;;  %v9947_v30 = vand.u32 4294901760, %v9946_v44  ;;  %v9827_v42 = vsub.f32 %v23808_v48, %v23809_v52  ;;  %v23814_v35 = vld [vmem:[#allocation59_spill] sm:$0xff] }
 0x8f5   :  { %v23815_v19 = vand.u32 4294901760, %v23814_v35  ;;  %v16617_v23 = vpack.c.bf16 %v9821_v0, %v9814_v22  ;;  %v9967_v44 = vsub.f32 %v23820_v5, %v23821_v49  ;;  %v9849_v48 = vand.u32 4294901760, %v9848_v21 }
 0x8f6   :  { %v9933_v15 = vand.u32 4294901760, %v9932_v37  ;;  %v16619_v43 = vpack.c.bf16 %v9947_v30, %v9940_v25  ;;  %v23826_v25 = vld [vmem:[#allocation82_spill] sm:$0xff]  ;;  %v9982_v21 = vand.u32 4294901760, %v9981_v51 }
 0x8f7   :  { %16606 = vmatpush3.bf16.msra.mxu0 %v22304_v11  ;;  %v9960_v37 = vsub.f32 %v23814_v35, %v23815_v19  ;;  %v23827_v30 = vand.u32 4294901760, %v23826_v25 }
 0x8f8   :  { %16608 = vmatprep.subr.bf16.mxu0 %v16607_v8  ;;  %v16615_v46 = vpack.c.bf16 %v9933_v15, %v9926_v38  ;;  %v23812_v8 = vld [vmem:[#allocation58_spill] sm:$0xff]  ;;  %v9842_v15 = vand.u32 4294901760, %v9841_v50  ;;  %v9869_v50 = vsub.f32 %v23832_v57, %v23833_v1  ;;  %v23844_v1 = vld [vmem:[#allocation117_spill] sm:$0xff] }
 0x8f9   :  { %v23813_v31 = vand.u32 4294901760, %v23812_v8  ;;  %v9961_v16 = vand.u32 4294901760, %v9960_v37 }
 0x8fa   :  { %9776 = vmatmul.mubr.f32.vlgmr.msra.gmra.mrb[30].mxu0 %v9775_v24  ;;  %v23822_v24 = vld [vmem:[#allocation78_spill] sm:$0xff]  ;;  %v16625_v37 = vpack.c.bf16 %v9849_v48, %v9842_v15 }
 0x8fb   :  { %16610 = vmatpush3.bf16.msra.mxu0 %v16609_v36  ;;  %10006 = vmatprep.mubr.f32.mxu0 %v23807_v62  ;;  %v9953_v17 = vsub.f32 %v23812_v8, %v23813_v31  ;;  %v9828_v36 = vand.u32 4294901760, %v9827_v42  ;;  %v9862_v42 = vsub.f32 %v23826_v25, %v23827_v30  ;;  %v9968_v8 = vand.u32 4294901760, %v9967_v44  ;;  %v23838_v44 = vld [vmem:[#allocation105_spill] sm:$0xff] }
 0x8fc   :  { %16612 = vmatprep.subr.bf16.mxu0 %v16611_v2  ;;  %v23823_v2 = vand.u32 4294901760, %v23822_v24 }
 0x8fd   :  { %v9954_v26 = vand.u32 4294901760, %v9953_v17  ;;  %v16621_v52 = vpack.c.bf16 %v9835_v28, %v9828_v36  ;;  %v23830_v17 = vld [vmem:[#allocation92_spill] sm:$0xff]  ;;  %v9863_v4 = vand.u32 4294901760, %v9862_v42 }
 0x8fe   :  { %v9974_v38 = vsub.f32 %v23822_v24, %v23823_v2  ;;  %v23831_v35 = vand.u32 4294901760, %v23830_v17  ;;  %v23839_v24 = vand.u32 4294901760, %v23838_v44 }
 0x8ff   :  { %16614 = vmatpush3.bf16.msra.mxu0 %v16613_v45  ;;  %v23824_v45 = vld [vmem:[#allocation79_spill] sm:$0xff] }
 0x900   :  { %16616 = vmatprep.subr.bf16.mxu0 %v16615_v46  ;;  %v23825_v22 = vand.u32 4294901760, %v23824_v45  ;;  %v16623_v46 = vpack.c.bf16 %v9961_v16, %v9954_v26  ;;  %v9975_v31 = vand.u32 4294901760, %v9974_v38  ;;  %v9988_v19 = vsub.f32 %v23830_v17, %v23831_v35  ;;  %v23836_v16 = vld [vmem:[#allocation104_spill] sm:$0xff] }
 0x901   :  { %v23837_v5 = vand.u32 4294901760, %v23836_v16  ;;  %v10002_v2 = vsub.f32 %v23838_v44, %v23839_v24  ;;  %v9870_v38 = vand.u32 4294901760, %v9869_v50  ;;  %v23859_v24 = vld [vmem:[#allocation139_spill] sm:$0xff] }
 0x902   :  { %v9855_v0 = vsub.f32 %v23824_v45, %v23825_v22  ;;  %v16627_v28 = vpack.c.bf16 %v9975_v31, %v9968_v8  ;;  %v9989_v26 = vand.u32 4294901760, %v9988_v19 }
 0x903   :  { %16618 = vmatpush3.bf16.msra.mxu0 %v16617_v23  ;;  %v23834_v23 = vld [vmem:[#allocation95_spill] sm:$0xff]  ;;  %v9995_v49 = vsub.f32 %v23836_v16, %v23837_v5  ;;  %v10003_v33 = vand.u32 4294901760, %v10002_v2  ;;  %v23857_v5 = vld [vmem:[#allocation102_spill] sm:$0xff]  ;;  %v23860_v2 = vand.u32 4294901760, %v23859_v24 }
 0x904   :  { %16620 = vmatprep.subr.bf16.mxu0 %v16619_v43  ;;  %v9856_v56 = vand.u32 4294901760, %v9855_v0  ;;  %v23835_v36 = vand.u32 4294901760, %v23834_v23  ;;  %v23842_v0 = vld [vmem:[#allocation107_spill] sm:$0xff]  ;;  %v16631_v42 = vpack.c.bf16 %v9989_v26, %v9982_v21 }
 0x905   :  { %v23843_v25 = vand.u32 4294901760, %v23842_v0  ;;  %v9996_v39 = vand.u32 4294901760, %v9995_v49  ;;  %v23858_v49 = vand.u32 4294901760, %v23857_v5 }
 0x906   :  { %v9876_v43 = vsub.f32 %v23834_v23, %v23835_v36  ;;  %v16629_v15 = vpack.c.bf16 %v9863_v4, %v9856_v56  ;;  %v23853_v4 = vld [vmem:[#allocation137_spill] sm:$0xff] }
 0x907   :  { %16622 = vmatpush3.bf16.msra.mxu0 %v16621_v52  ;;  %v23840_v52 = vld [vmem:[#allocation106_spill] sm:$0xff]  ;;  %v9890_v30 = vsub.f32 %v23842_v0, %v23843_v25  ;;  %v16635_v19 = vpack.c.bf16 %v10003_v33, %v9996_v39  ;;  %v23854_v21 = vand.u32 4294901760, %v23853_v4  ;;  %v10661_v44 = vsub.f32 %v23857_v5, %v23858_v49 }
 0x908   :  { %16624 = vmatprep.subr.bf16.mxu0 %v16623_v46  ;;  %v9877_v48 = vand.u32 4294901760, %v9876_v43  ;;  %v23841_v45 = vand.u32 4294901760, %v23840_v52 }
 0x909   :  { %v9891_v35 = vand.u32 4294901760, %v9890_v30  ;;  %v10773_v23 = vsub.f32 %v23853_v4, %v23854_v21  ;;  %v23863_v30 = vld [vmem:[#allocation141_spill] sm:$0xff]  ;;  %v10662_v33 = vand.u32 4294901760, %v10661_v44  ;;  %v23880_v21 = vld [vmem:[#allocation147_spill] sm:$0xff] }
 0x90a   :  { %v9883_v22 = vsub.f32 %v23840_v52, %v23841_v45  ;;  %v16633_v31 = vpack.c.bf16 %v9877_v48, %v9870_v38  ;;  %v10668_v38 = vsub.f32 %v23859_v24, %v23860_v2 }
 0x90b   :  { %16626 = vmatpush3.bf16.msra.mxu0 %v16625_v37  ;;  %v10774_v48 = vand.u32 4294901760, %v10773_v23  ;;  %v23881_v23 = vand.u32 4294901760, %v23880_v21 }
 0x90c   :  { %16628 = vmatprep.subr.bf16.mxu0 %v16627_v28  ;;  %v9884_v17 = vand.u32 4294901760, %v9883_v22  ;;  %v23855_v28 = vld [vmem:[#allocation138_spill] sm:$0xff]  ;;  %v23861_v22 = vld [vmem:[#allocation140_spill] sm:$0xff] }
 0x90d   :  { %v13055_v51 = vpop.f32.mrb[18].mxu0  ;;  %v23856_v26 = vand.u32 4294901760, %v23855_v28  ;;  %v23862_v0 = vand.u32 4294901760, %v23861_v22 }
 0x90e   :  { %v13056_v46 = vpop.f32.mrb[19].mxu0  ;;  %v16637_v57 = vpack.c.bf16 %v9891_v35, %v9884_v17 }
 0x90f   :  { %v13057_v8 = vadd.f32 %v13056_v46, %v13055_v51  ;;  %16630 = vmatpush3.bf16.msra.mxu0 %v16629_v15  ;;  %v10787_v25 = vsub.f32 %v23861_v22, %v23862_v0  ;;  %v10669_v51 = vand.u32 4294901760, %v10668_v38  ;;  %v23865_v46 = vld [vmem:[#allocation113_spill] sm:$0xff]  ;;  %v23888_v22 = vld [vmem:[#allocation151_spill] sm:$0xff] }
 0x910   :  { %16632 = vmatprep.subr.bf16.mxu0 %v16631_v42  ;;  %v23864_v42 = vand.u32 4294901760, %v23863_v30  ;;  %v23889_v0 = vand.u32 4294901760, %v23888_v22 }
 0x911   :  { %v8916_v37 = vadd.f32 %v13057_v8, %v22288_v58  ;;  %v23866_v8 = vand.u32 4294901760, %v23865_v46 }
 0x912   :  { %v10794_v39 = vsub.f32 %v23863_v30, %v23864_v42 }
 0x913   :  { %16634 = vmatpush3.bf16.msra.mxu0 %v16633_v31  ;;  %v23867_v31 = vld [vmem:[#allocation10_spill] sm:$0xff] }
 0x914   :  { %16636 = vmatprep.subr.bf16.mxu0 %v16635_v19  ;;  %v23868_v17 = vand.u32 4294901760, %v23867_v31  ;;  %v23869_v19 = vld [vmem:[#allocation142_spill] sm:$0xff] }
 0x917   :  { %16638 = vmatpush3.bf16.msra.mxu0 %v16637_v57 }
 0x918   :  { %16672 = vmatprep.subr.bf16.mxu0 %v22165_v54 }
 0x91a   :  { %10008 = vmatmul.mubr.f32.vlgmr.msra.gmra.mrb[32].mxu0 %v23844_v1 }
 0x91b   :  { %16674 = vmatpush3.bf16.msra.mxu0 %v22175_v34  ;;  %10250 = vmatprep.mubr.f32.mxu0 %v9767_v3 }
 0x91c   :  { %16676 = vmatprep.subr.bf16.mxu0 %v22182_v12 }
 0x91f   :  { %16678 = vmatpush3.bf16.msra.mxu0 %v22190_v63 }
 0x920   :  { %16680 = vmatprep.subr.bf16.mxu0 %v22197_v47 }
 0x923   :  { %16682 = vmatpush3.bf16.msra.mxu0 %v22204_v53 }
 0x924   :  { %16684 = vmatprep.subr.bf16.mxu0 %v22211_v41 }
 0x927   :  { %16686 = vmatpush3.bf16.msra.mxu0 %v22218_v13 }
 0x928   :  { %16688 = vmatprep.subr.bf16.mxu0 %v22225_v29 }
 0x92b   :  { %16690 = vmatpush3.bf16.msra.mxu0 %v22232_v61 }
 0x92c   :  { %16692 = vmatprep.subr.bf16.mxu0 %v22239_v18 }
 0x92d   :  { %v13090_v55 = vpop.f32.mrb[20].mxu0 }
 0x92e   :  { %v13091_v3 = vpop.f32.mrb[21].mxu0 }
 0x92f   :  { %v13092_v58 = vadd.f32 %v13091_v3, %v13090_v55  ;;  %16694 = vmatpush3.bf16.msra.mxu0 %v22246_v7  ;;  %v23871_v55 = vld [vmem:[#allocation143_spill] sm:$0xff] }
 0x930   :  { %16696 = vmatprep.subr.bf16.mxu0 %v22253_v10  ;;  %v23872_v3 = vand.u32 4294901760, %v23871_v55 }
 0x931   :  { %v9148_v50 = vadd.f32 %v13092_v58, %v8916_v37  ;;  %v23870_v37 = vand.u32 4294901760, %v23869_v19 }
 0x932   :  { %v10808_v58 = vsub.f32 %v23871_v55, %v23872_v3  ;;  %v23896_v55 = vld [vmem:[#allocation155_spill] sm:$0xff] }
 0x933   :  { %16698 = vmatpush3.bf16.msra.mxu0 %v22266_v14  ;;  %v10801_v57 = vsub.f32 %v23869_v19, %v23870_v37  ;;  %v23897_v3 = vand.u32 4294901760, %v23896_v55 }
 0x934   :  { %16700 = vmatprep.subr.bf16.mxu0 %v22283_v60 }
 0x937   :  { %16702 = vmatpush3.bf16.msra.mxu0 %v22304_v11 }
 0x938   :  { %16736 = vmatprep.subr.bf16.mxu0 %v22165_v54  ;;  %v23845_v54 = vld [vmem:[#allocation132_spill] sm:$0xff] }
 0x93a   :  { %10254 = vmatmul.mubr.f32.vlgmr.msra.gmra.mrb[34].mxu0 %v9773_v9 }
 0x93b   :  { %16738 = vmatpush3.bf16.msra.mxu0 %v22175_v34  ;;  %10524 = vmatprep.mubr.f32.mxu0 %v23807_v62  ;;  %v23846_v34 = vand.u32 4294901760, %v23845_v54 }
 0x93c   :  { %16740 = vmatprep.subr.bf16.mxu0 %v22182_v12 }
 0x93d   :  { %v10759_v12 = vsub.f32 %v23845_v54, %v23846_v34  ;;  %v10788_v54 = vand.u32 4294901760, %v10787_v25  ;;  %v10795_v34 = vand.u32 4294901760, %v10794_v39  ;;  %v10836_v25 = vsub.f32 %v23888_v22, %v23889_v0 }
 0x93f   :  { %16742 = vmatpush3.bf16.msra.mxu0 %v22190_v63  ;;  %v23848_v63 = vand.u32 4294901760, %v23847_v27  ;;  %v10760_v36 = vand.u32 4294901760, %v10759_v12  ;;  %v16805_v12 = vpack.c.bf16 %v10669_v51, %v10662_v33  ;;  %v23890_v33 = vld [vmem:[#allocation152_spill] sm:$0xff] }
 0x940   :  { %16744 = vmatprep.subr.bf16.mxu0 %v22197_v47  ;;  %v23891_v51 = vand.u32 4294901760, %v23890_v33 }
 0x941   :  { %v10766_v47 = vsub.f32 %v23847_v27, %v23848_v63 }
 0x943   :  { %16746 = vmatpush3.bf16.msra.mxu0 %v22204_v53  ;;  %v10767_v43 = vand.u32 4294901760, %v10766_v47  ;;  %v10802_v47 = vand.u32 4294901760, %v10801_v57  ;;  %v10837_v57 = vand.u32 4294901760, %v10836_v25 }
 0x944   :  { %16748 = vmatprep.subr.bf16.mxu0 %v22211_v41  ;;  %v23849_v41 = vld [vmem:[#allocation88_spill] sm:$0xff] }
 0x945   :  { %v16799_v52 = vpack.c.bf16 %v10767_v43, %v10760_v36  ;;  %v10822_v36 = vsub.f32 %v23880_v21, %v23881_v23  ;;  %v23882_v43 = vld [vmem:[#allocation148_spill] sm:$0xff] }
 0x947   :  { %16750 = vmatpush3.bf16.msra.mxu0 %v22218_v13  ;;  %v23850_v13 = vand.u32 4294901760, %v23849_v41 }
 0x948   :  { %16752 = vmatprep.subr.bf16.mxu0 %v22225_v29 }
 0x949   :  { %v10647_v29 = vsub.f32 %v23849_v41, %v23850_v13  ;;  %v23876_v13 = vld [vmem:[#allocation145_spill] sm:$0xff] }
 0x94b   :  { %16754 = vmatpush3.bf16.msra.mxu0 %v22232_v61  ;;  %v23851_v61 = vld [vmem:[#allocation135_spill] sm:$0xff]  ;;  %v10648_v15 = vand.u32 4294901760, %v10647_v29  ;;  %v23877_v29 = vand.u32 4294901760, %v23876_v13 }
 0x94c   :  { %16756 = vmatprep.subr.bf16.mxu0 %v22239_v18  ;;  %v23852_v56 = vand.u32 4294901760, %v23851_v61 }
 0x94d   :  { %v13125_v9 = vpop.f32.mrb[22].mxu0 }
 0x94e   :  { %v13126_v53 = vpop.f32.mrb[23].mxu0  ;;  %v10654_v18 = vsub.f32 %v23851_v61, %v23852_v56  ;;  %v10696_v61 = vsub.f32 %v23876_v13, %v23877_v29  ;;  %v16807_v56 = vpack.c.bf16 %v10795_v34, %v10788_v54  ;;  %v23898_v54 = vld [vmem:[#allocation156_spill] sm:$0xff]  ;;  %v23902_v29 = vld [vmem:[#allocation158_spill] sm:$0xff] }
 0x94f   :  { %v13127_v62 = vadd.f32 %v13126_v53, %v13125_v9  ;;  %16758 = vmatpush3.bf16.msra.mxu0 %v22246_v7  ;;  %v10780_v7 = vsub.f32 %v23855_v28, %v23856_v26  ;;  %v10809_v9 = vand.u32 4294901760, %v10808_v58  ;;  %v23874_v53 = vld [vmem:[#allocation144_spill] sm:$0xff]  ;;  %v23883_v28 = vand.u32 4294901760, %v23882_v43 }
 0x950   :  { %16760 = vmatprep.subr.bf16.mxu0 %v22253_v10  ;;  %v10655_v10 = vand.u32 4294901760, %v10654_v18  ;;  %v23878_v18 = vld [vmem:[#allocation146_spill] sm:$0xff]  ;;  %v10697_v38 = vand.u32 4294901760, %v10696_v61  ;;  %v10850_v58 = vsub.f32 %v23896_v55, %v23897_v3  ;;  %v23899_v34 = vand.u32 4294901760, %v23898_v54  ;;  %v23924_v3 = vld [vmem:[#allocation128_spill] sm:$0xff] }
 0x951   :  { %v22435_v16 = vadd.f32 %v13127_v62, %v9148_v50  ;;  %v10781_v45 = vand.u32 4294901760, %v10780_v7  ;;  %v23875_v62 = vand.u32 4294901760, %v23874_v53  ;;  %v10703_v26 = vsub.f32 %v23882_v43, %v23883_v28  ;;  %v23884_v7 = vld [vmem:[#allocation149_spill] sm:$0xff]  ;;  %v23906_v43 = vld [vmem:[#allocation160_spill] sm:$0xff] }
 0x952   :  { %v16801_v35 = vpack.c.bf16 %v10655_v10, %v10648_v15  ;;  %v23885_v5 = vand.u32 4294901760, %v23884_v7  ;;  %v16811_v24 = vpack.c.bf16 %v10809_v9, %v10802_v47  ;;  %v10823_v10 = vand.u32 4294901760, %v10822_v36  ;;  %v23900_v9 = vld [vmem:[#allocation157_spill] sm:$0xff] }
 0x953   :  { %16762 = vmatpush3.bf16.msra.mxu0 %v22266_v14  ;;  %v10675_v14 = vsub.f32 %v23865_v46, %v23866_v8  ;;  %v16803_v50 = vpack.c.bf16 %v10781_v45, %v10774_v48  ;;  %v10689_v41 = vsub.f32 %v23874_v53, %v23875_v62  ;;  %v23886_v48 = vld [vmem:[#allocation150_spill] sm:$0xff]  ;;  %v10704_v30 = vand.u32 4294901760, %v10703_v26  ;;  %v23892_v8 = vld [vmem:[#allocation153_spill] sm:$0xff] }
 0x954   :  { %16764 = vmatprep.subr.bf16.mxu0 %v22283_v60  ;;  %v10682_v60 = vsub.f32 %v23867_v31, %v23868_v17  ;;  %v10710_v49 = vsub.f32 %v23884_v7, %v23885_v5  ;;  %v10717_v46 = vsub.f32 %v23890_v33, %v23891_v51  ;;  %v23894_v17 = vld [vmem:[#allocation154_spill] sm:$0xff]  ;;  %v23901_v53 = vand.u32 4294901760, %v23900_v9  ;;  %v23908_v7 = vld [vmem:[#allocation161_spill] sm:$0xff]  ;;  %v23913_v33 = vld [vmem:[#allocation108_spill] sm:$0xff] }
 0x955   :  { %v10676_v27 = vand.u32 4294901760, %v10675_v14  ;;  %v10690_v2 = vand.u32 4294901760, %v10689_v41  ;;  %v23893_v14 = vand.u32 4294901760, %v23892_v8  ;;  %v10851_v13 = vand.u32 4294901760, %v10850_v58  ;;  %v23925_v58 = vld [vmem:[#allocation130_spill] sm:$0xff] }
 0x956   :  { %v10683_v63 = vand.u32 4294901760, %v10682_v60  ;;  %v10711_v42 = vand.u32 4294901760, %v10710_v49  ;;  %v23895_v60 = vand.u32 4294901760, %v23894_v17  ;;  %v10738_v62 = vsub.f32 %v23900_v9, %v23901_v53 }
 0x957   :  { %16766 = vmatpush3.bf16.msra.mxu0 %v22304_v11  ;;  %v23873_v11 = vld [vmem:[#allocation69_spill] sm:$0xff]  ;;  %v16813_v39 = vpack.c.bf16 %v10697_v38, %v10690_v2  ;;  %v10724_v31 = vsub.f32 %v23892_v8, %v23893_v14  ;;  %v23903_v61 = vand.u32 4294901760, %v23902_v29  ;;  %v23907_v28 = vand.u32 4294901760, %v23906_v43  ;;  %v23916_v8 = vld [vmem:[#allocation120_spill] sm:$0xff] }
 0x958   :  { %16800 = vmatprep.subr.bf16.mxu0 %v16799_v52  ;;  %v16809_v44 = vpack.c.bf16 %v10683_v63, %v10676_v27  ;;  %v23887_v52 = vand.u32 4294901760, %v23886_v48  ;;  %v10718_v27 = vand.u32 4294901760, %v10717_v46  ;;  %v10739_v36 = vand.u32 4294901760, %v10738_v62  ;;  %v23915_v46 = vld [vmem:[#allocation111_spill] sm:$0xff]  ;;  %v23917_v14 = vld [vmem:[#allocation121_spill] sm:$0xff] }
 0x959   :  { %v10725_v63 = vand.u32 4294901760, %v10724_v31  ;;  %v10745_v26 = vsub.f32 %v23906_v43, %v23907_v28  ;;  %v23909_v5 = vand.u32 4294901760, %v23908_v7  ;;  %v23914_v51 = vand.u32 4294901760, %v23913_v33  ;;  %v23919_v31 = vld [vmem:[#allocation123_spill] sm:$0xff] }
 0x95a   :  { %10526 = vmatmul.mubr.f32.vlgmr.msra.gmra.mrb[36].mxu0 %v23844_v1  ;;  %v23879_v1 = vand.u32 4294901760, %v23878_v18  ;;  %v10829_v45 = vsub.f32 %v23886_v48, %v23887_v52 }
 0x95b   :  { %16802 = vmatpush3.bf16.msra.mxu0 %v16801_v35  ;;  %10868 = vmatprep.mubr.f32.mxu0 %v23873_v11  ;;  %v10843_v35 = vsub.f32 %v23894_v17, %v23895_v60  ;;  %v16821_v23 = vpack.c.bf16 %v10725_v63, %v10718_v27  ;;  %v10752_v49 = vsub.f32 %v23908_v7, %v23909_v5  ;;  %v10746_v52 = vand.u32 4294901760, %v10745_v26  ;;  %v23920_v17 = vld [vmem:[#allocation124_spill] sm:$0xff]  ;;  %v23921_v60 = vld [vmem:[#allocation125_spill] sm:$0xff]  ;;  %v11396_v5 = vld [vmem:[%s22711_s7 + $0x10] sm:$0xff] }
 0x95c   :  { %16804 = vmatprep.subr.bf16.mxu0 %v16803_v50  ;;  %v10815_v4 = vsub.f32 %v23878_v18, %v23879_v1  ;;  %v10830_v37 = vand.u32 4294901760, %v10829_v45  ;;  %v16817_v50 = vpack.c.bf16 %v10711_v42, %v10704_v30  ;;  %v23904_v18 = vld [vmem:[#allocation159_spill] sm:$0xff]  ;;  %v23910_v30 = vld [vmem:[#allocation109_spill] sm:$0xff]  ;;  %v23911_v42 = vld [vmem:[#allocation126_spill] sm:$0xff] }
 0x95d   :  { %v10844_v47 = vand.u32 4294901760, %v10843_v35  ;;  %v23905_v1 = vand.u32 4294901760, %v23904_v18  ;;  %v10753_v45 = vand.u32 4294901760, %v10752_v49  ;;  %v23922_v35 = vld [vmem:[#allocation70_spill] sm:$0xff]  ;;  %v23929_v27 = vld [vmem:[#allocation129_spill] sm:$0xff] }
 0x95e   :  { %v10816_v15 = vand.u32 4294901760, %v10815_v4  ;;  %v16819_v41 = vpack.c.bf16 %v10837_v57, %v10830_v37  ;;  %v23930_v63 = vand.u32 4294901760, %v23929_v27  ;;  %v11394_v26 = vld [vmem:[%s22711_s7] sm:$0xff]  ;;  %v11395_v7 = vld [vmem:[%s22711_s7 + $0x8] sm:$0xff] }
 0x95f   :  { %16806 = vmatpush3.bf16.msra.mxu0 %v16805_v12  ;;  %v10731_v12 = vsub.f32 %v23898_v54, %v23899_v34  ;;  %v10864_v4 = vsub.f32 %v23904_v18, %v23905_v1  ;;  %v16829_v25 = vpack.c.bf16 %v10753_v45, %v10746_v52  ;;  %v23926_v54 = vld [vmem:[#allocation131_spill] sm:$0xff]  ;;  %v23927_v34 = vld [vmem:[#allocation134_spill] sm:$0xff]  ;;  %v11413_v49 = vand.u32 4294901760, %v11394_v26 }
 0x960   :  { %16808 = vmatprep.subr.bf16.mxu0 %v16807_v56  ;;  %v16815_v19 = vpack.c.bf16 %v10823_v10, %v10816_v15  ;;  %v10857_v56 = vsub.f32 %v23902_v29, %v23903_v61  ;;  %v11400_v45 = vld [vmem:[%s22711_s7 + $0x30] sm:$0xff] }
 0x961   :  { %v10732_v21 = vand.u32 4294901760, %v10731_v12  ;;  %v10865_v2 = vand.u32 4294901760, %v10864_v4  ;;  %v23928_v12 = vld [vmem:[#allocation136_spill] sm:$0xff] }
 0x963   :  { %16810 = vmatpush3.bf16.msra.mxu0 %v16809_v44  ;;  %v16823_v44 = vpack.c.bf16 %v10851_v13, %v10844_v47  ;;  %v16825_v48 = vpack.c.bf16 %v10739_v36, %v10732_v21 }
 0x964   :  { %16812 = vmatprep.subr.bf16.mxu0 %v16811_v24  ;;  %v10858_v24 = vand.u32 4294901760, %v10857_v56 }
 0x966   :  { %v16827_v22 = vpack.c.bf16 %v10865_v2, %v10858_v24  ;;  %v11419_v24 = vand.u32 4294901760, %v11396_v5  ;;  %v11398_v2 = vld [vmem:[%s22711_s7 + $0x20] sm:$0xff] }
 0x967   :  { %16814 = vmatpush3.bf16.msra.mxu0 %v16813_v39  ;;  %v23912_v39 = vld [vmem:[#allocation110_spill] sm:$0xff] }
 0x968   :  { %16816 = vmatprep.subr.bf16.mxu0 %v16815_v19  ;;  %v23923_v19 = vld [vmem:[#allocation127_spill] sm:$0xff] }
 0x96b   :  { %16818 = vmatpush3.bf16.msra.mxu0 %v16817_v50 }
 0x96c   :  { %16820 = vmatprep.subr.bf16.mxu0 %v16819_v41 }
 0x96d   :  { %v13160_v38 = vpop.f32.mrb[24].mxu0 }
 0x96e   :  { %v13161_v15 = vpop.f32.mrb[25].mxu0 }
 0x96f   :  { %v13162_v10 = vadd.f32 %v13161_v15, %v13160_v38  ;;  %16822 = vmatpush3.bf16.msra.mxu0 %v16821_v23  ;;  %v11399_v38 = vld [vmem:[%s22711_s7 + $0x28] sm:$0xff]  ;;  %v23931_v15 = vmov 0.0  }
 0x970   :  { %16824 = vmatprep.subr.bf16.mxu0 %v16823_v44  ;;  %v11416_v44 = vand.u32 4294901760, %v11395_v7  ;;  %15133 = vmatprep.mubr.msk.f32.mxu1 %vm17384_vm10, %v23931_v15  ;;  %v11428_v52 = vand.u32 4294901760, %v11399_v38 }
 0x971   :  { %v9394_v0 = vadd.f32 %v13162_v10, %v22435_v16  ;;  %v23918_v16 = vld [vmem:[#allocation122_spill] sm:$0xff] }
 0x973   :  { %16826 = vmatpush3.bf16.msra.mxu0 %v16825_v48  ;;  %v11425_v48 = vand.u32 4294901760, %v11398_v2 }
 0x974   :  { %16828 = vmatprep.subr.bf16.mxu0 %v16827_v22  ;;  %v11401_v22 = vld [vmem:[%s22711_s7 + $0x38] sm:$0xff] }
 0x975   :  { %v22601_v33 = vsub.f32 %v11398_v2, %v11425_v48 }
 0x977   :  { %16830 = vmatpush3.bf16.msra.mxu0 %v16829_v25  ;;  %v22593_v25 = vsub.f32 %v11394_v26, %v11413_v49 }
 0x978   :  { %16864 = vmatprep.subr.bf16.mxu0 %v23910_v30 }
 0x97a   :  { %10870 = vmatmul.mubr.f32.vlgmr.msra.gmra.mrb[38].mxu0 %v23911_v42 }
 0x97b   :  { %16866 = vmatpush3.bf16.msra.mxu0 %v23912_v39  ;;  %11112 = vmatprep.mubr.f32.mxu0 %v23914_v51 }
 0x97c   :  { %16868 = vmatprep.subr.bf16.mxu0 %v23915_v46 }
 0x97f   :  { %16870 = vmatpush3.bf16.msra.mxu0 %v23916_v8 }
 0x980   :  { %16872 = vmatprep.subr.bf16.mxu0 %v23917_v14 }
 0x983   :  { %16874 = vmatpush3.bf16.msra.mxu0 %v23918_v16 }
 0x984   :  { %16876 = vmatprep.subr.bf16.mxu0 %v23919_v31 }
 0x987   :  { %16878 = vmatpush3.bf16.msra.mxu0 %v23920_v17 }
 0x988   :  { %16880 = vmatprep.subr.bf16.mxu0 %v23921_v60 }
 0x98b   :  { %16882 = vmatpush3.bf16.msra.mxu0 %v23922_v35 }
 0x98c   :  { %16884 = vmatprep.subr.bf16.mxu0 %v23923_v19 }
 0x98d   :  { %v13195_v37 = vpop.f32.mrb[26].mxu0 }
 0x98e   :  { %v13196_v57 = vpop.f32.mrb[27].mxu0 }
 0x98f   :  { %v13197_v55 = vadd.f32 %v13196_v57, %v13195_v37  ;;  %16886 = vmatpush3.bf16.msra.mxu0 %v23924_v3 }
 0x990   :  { %16888 = vmatprep.subr.bf16.mxu0 %v23925_v58 }
 0x991   :  { %v9562_v50 = vadd.f32 %v13197_v55, %v9394_v0  ;;  %v22591_v0 = vpack.c.bf16 %v11416_v44, %v11413_v49 }
 0x993   :  { %16890 = vmatpush3.bf16.msra.mxu0 %v23926_v54 }
 0x994   :  { %16892 = vmatprep.subr.bf16.mxu0 %v23927_v34 }
 0x997   :  { %16894 = vmatpush3.bf16.msra.mxu0 %v23928_v12 }
 0x998   :  { %16928 = vmatprep.subr.bf16.mxu0 %v23910_v30  ;;  %v22595_v30 = vsub.f32 %v11395_v7, %v11416_v44 }
 0x99a   :  { %11116 = vmatmul.mubr.f32.vlgmr.msra.gmra.mrb[40].mxu0 %v23930_v63  ;;  %v16984_v7 = vpack.c.bf16 %v22595_v30, %v22593_v25 }
 0x99b   :  { %16930 = vmatpush3.bf16.msra.mxu0 %v23912_v39  ;;  %11386 = vmatprep.mubr.f32.mxu0 %v23873_v11 }
 0x99c   :  { %16932 = vmatprep.subr.bf16.mxu0 %v23915_v46  ;;  %v22606_v46 = vsub.f32 %v11399_v38, %v11428_v52 }
 0x99f   :  { %16934 = vmatpush3.bf16.msra.mxu0 %v23916_v8  ;;  %v11431_v8 = vand.u32 4294901760, %v11400_v45 }
 0x9a0   :  { %16936 = vmatprep.subr.bf16.mxu0 %v23917_v14  ;;  %v11434_v14 = vand.u32 4294901760, %v11401_v22 }
 0x9a3   :  { %16938 = vmatpush3.bf16.msra.mxu0 %v23918_v16  ;;  %v22609_v16 = vsub.f32 %v11400_v45, %v11431_v8 }
 0x9a4   :  { %16940 = vmatprep.subr.bf16.mxu0 %v23919_v31  ;;  %v22611_v31 = vsub.f32 %v11401_v22, %v11434_v14 }
 0x9a7   :  { %16942 = vmatpush3.bf16.msra.mxu0 %v23920_v17  ;;  %v11498_v17 = vand.u32 4294901760, %v22593_v25 }
 0x9a8   :  { %16944 = vmatprep.subr.bf16.mxu0 %v23921_v60  ;;  %v11505_v60 = vand.u32 4294901760, %v22595_v30 }
 0x9aa   :  { %v11506_v37 = vsub.f32 %v22595_v30, %v11505_v60 }
 0x9ab   :  { %16946 = vmatpush3.bf16.msra.mxu0 %v23922_v35  ;;  %v22616_v35 = vpack.c.bf16 %v11428_v52, %v11425_v48  ;;  %v17008_v48 = vpack.c.bf16 %v11505_v60, %v11498_v17 }
 0x9ac   :  { %16948 = vmatprep.subr.bf16.mxu0 %v23923_v19  ;;  %v11499_v19 = vsub.f32 %v22593_v25, %v11498_v17 }
 0x9ad   :  { %v13230_v47 = vpop.f32.mrb[28].mxu0 }
 0x9ae   :  { %v13231_v11 = vpop.f32.mrb[29].mxu0 }
 0x9af   :  { %v13232_v9 = vadd.f32 %v13231_v11, %v13230_v47  ;;  %16950 = vmatpush3.bf16.msra.mxu0 %v23924_v3  ;;  %v11500_v3 = vand.u32 4294901760, %v11499_v19  ;;  %v11526_v47 = vand.u32 4294901760, %v22601_v33  ;;  %v11533_v11 = vand.u32 4294901760, %v22606_v46 }
 0x9b0   :  { %16952 = vmatprep.subr.bf16.mxu0 %v23925_v58  ;;  %v11507_v58 = vand.u32 4294901760, %v11506_v37 }
 0x9b1   :  { %v9666_v53 = vadd.f32 %v13232_v9, %v9562_v50 }
 0x9b3   :  { %16954 = vmatpush3.bf16.msra.mxu0 %v23926_v54 }
 0x9b4   :  { %16956 = vmatprep.subr.bf16.mxu0 %v23927_v34  ;;  %v22626_v34 = vpack.c.bf16 %v11434_v14, %v11431_v8 }
 0x9b7   :  { %16958 = vmatpush3.bf16.msra.mxu0 %v23928_v12  ;;  %v16972_v12 = vpack.c.bf16 %v11507_v58, %v11500_v3 }
 0x9ba   :  { %11388 = vmatmul.mubr.f32.vlgmr.msra.gmra.mrb[42].mxu0 %v23911_v42  ;;  %v22597_v42 = vsub.f32 %v11396_v5, %v11419_v24 }
 0x9bc   :  { %v11512_v57 = vand.u32 4294901760, %v22597_v42 }
 0x9be   :  { %v11513_v50 = vsub.f32 %v22597_v42, %v11512_v57 }
 0x9c0   :  { %v11514_v27 = vand.u32 4294901760, %v11513_v50 }
 0x9cd   :  { %v13265_v62 = vpop.f32.mrb[30].mxu0 }
 0x9ce   :  { %v13266_v41 = vpop.f32.mrb[31].mxu0 }
 0x9cf   :  { %v13267_v13 = vadd.f32 %v13266_v41, %v13265_v62  ;;  %v11534_v62 = vsub.f32 %v22606_v46, %v11533_v11 }
 0x9d1   :  { %v9778_v29 = vadd.f32 %v13267_v13, %v9666_v53  ;;  %v11527_v53 = vsub.f32 %v22601_v33, %v11526_v47  ;;  %v11540_v13 = vand.u32 4294901760, %v22609_v16 }
 0x9d3   :  { %v11528_v41 = vand.u32 4294901760, %v11527_v53 }
 0x9ed   :  { %v13300_v61 = vpop.f32.mrb[32].mxu0 }
 0x9ee   :  { %v13301_v56 = vpop.f32.mrb[33].mxu0 }
 0x9ef   :  { %v13302_v18 = vadd.f32 %v13301_v56, %v13300_v61  ;;  %v11535_v61 = vand.u32 4294901760, %v11534_v62  ;;  %v11541_v56 = vsub.f32 %v22609_v16, %v11540_v13 }
 0x9f1   :  { %v10010_v1 = vadd.f32 %v13302_v18, %v9778_v29  ;;  %v11547_v29 = vand.u32 4294901760, %v22611_v31 }
 0x9f3   :  { %v10148_v4 = vadd.f32 %v22010_v20, %v10010_v1  ;;  %v17383_v20 = vmov 0.0|0.0   ;;  %v11548_v18 = vsub.f32 %v22611_v31, %v11547_v29  ;;  %v17017_v25 = vpack.c.bf16 %v11547_v29, %v11540_v13 }
 0x9f4   :  { %16959 = vmatprep.subr.bf16.mxu1 %v17383_v20 }
 0x9f5   :  { %16961 = vmatpush3.bf16.msra.mxu1 %v22591_v0 }
 0x9f6   :  { %16962 = vmatprep.subr.bf16.mxu1 %v17383_v20 }
 0xa0d   :  { %v13370_v21 = vpop.f32.mrb[34].mxu0 }
 0xa0e   :  { %v13371_v23 = vpop.f32.mrb[35].mxu0 }
 0xa0f   :  { %v13372_v36 = vadd.f32 %v13371_v23, %v13370_v21  ;;  %v11542_v23 = vand.u32 4294901760, %v11541_v56 }
 0xa11   :  { %v10256_v43 = vadd.f32 %v13372_v36, %v10148_v4  ;;  %v16978_v4 = vpack.c.bf16 %v11535_v61, %v11528_v41  ;;  %v11549_v36 = vand.u32 4294901760, %v11548_v18 }
 0xa13   :  { %v22562_v28 = vadd.f32 %v22047_v40, %v10256_v43  ;;  %v11397_v40 = vld [vmem:[%s22711_s7 + $0x18] sm:$0xff]  ;;  %v16981_v26 = vpack.c.bf16 %v11549_v36, %v11542_v23 }
 0xa14   :  { %v11422_v10 = vand.u32 4294901760, %v11397_v40 }
 0xa16   :  { %v22599_v39 = vsub.f32 %v11397_v40, %v11422_v10  ;;  %v22604_v51 = vpack.c.bf16 %v11422_v10, %v11419_v24  ;;  %v16990_v40 = vpack.c.bf16 %v22606_v46, %v22601_v33  ;;  %v16993_v24 = vpack.c.bf16 %v22611_v31, %v22609_v16 }
 0xa18   :  { %16964 = vmatpush3.bf16.msra.mxu1 %v22604_v51  ;;  %v11519_v55 = vand.u32 4294901760, %v22599_v39  ;;  %v16987_v49 = vpack.c.bf16 %v22599_v39, %v22597_v42 }
 0xa19   :  { %16965 = vmatprep.subr.bf16.mxu1 %v17383_v20 }
 0xa1a   :  { %v11520_v54 = vsub.f32 %v22599_v39, %v11519_v55  ;;  %v17011_v45 = vpack.c.bf16 %v11519_v55, %v11512_v57 }
 0xa1c   :  { %16967 = vmatpush3.bf16.msra.mxu1 %v22616_v35  ;;  %v11521_v63 = vand.u32 4294901760, %v11520_v54 }
 0xa1d   :  { %16968 = vmatprep.subr.bf16.mxu1 %v17383_v20 }
 0xa1e   :  { %v16975_v9 = vpack.c.bf16 %v11521_v63, %v11514_v27 }
 0xa20   :  { %16970 = vmatpush3.bf16.msra.mxu1 %v22626_v34 }
 0xa21   :  { %16971 = vmatprep.subr.bf16.mxu1 %v17383_v20 }
 0xa2d   :  { %v13440_v1 = vpop.f32.mrb[36].mxu0 }
 0xa2e   :  { %v13441_v21 = vpop.f32.mrb[37].mxu0 }
 0xa2f   :  { %v13442_v43 = vadd.f32 %v13441_v21, %v13440_v1 }
 0xa31   :  { %v10528_v5 = vadd.f32 %v13442_v43, %v22562_v28  ;;  %v17014_v28 = vpack.c.bf16 %v11533_v11, %v11526_v47 }
 0xa33   :  { %v10640_v44 = vadd.f32 %v22067_v32, %v10528_v5 }
 0xa4d   :  { %v13510_v2 = vpop.f32.mrb[38].mxu0 }
 0xa4e   :  { %v13511_v38 = vpop.f32.mrb[39].mxu0 }
 0xa4f   :  { %v13512_v10 = vadd.f32 %v13511_v38, %v13510_v2 }
 0xa51   :  { %v10872_v52 = vadd.f32 %v13512_v10, %v10640_v44 }
 0xa53   :  { %v11010_v22 = vadd.f32 %v22135_v6, %v10872_v52 }
 0xa6d   :  { %v13580_v30 = vpop.f32.mrb[40].mxu0 }
 0xa6e   :  { %v13581_v42 = vpop.f32.mrb[41].mxu0 }
 0xa6f   :  { %v13582_v39 = vadd.f32 %v13581_v42, %v13580_v30 }
 0xa71   :  { %v11118_v32 = vadd.f32 %v13582_v39, %v11010_v22 }
 0xa73   :  { %v11286_v8 = vadd.f32 %v22156_v59, %v11118_v32  ;;  %v12032_v59 = vld [vmem:[%s22712_s8] ss:$0 sm:$0xff] }
 0xa8d   :  { %v13650_v33 = vpop.f32.mrb[42].mxu0 }
 0xa8e   :  { %v13651_v46 = vpop.f32.mrb[43].mxu0 }
 0xa8f   :  { %v13652_v14 = vadd.f32 %v13651_v46, %v13650_v33 }
 0xa91   :  { %v11390_v16 = vadd.f32 %v13652_v14, %v11286_v8 }
 0xa93   :  { %v11393_v31 = vmax.f32 %v11390_v16, 0.0 }
 0xa95   :  { %v11410_v19 = vsel %vm7801_vm9, %v11393_v31, 0 }
 0xa96   :  { %v11485_v17 = vand.u32 4294901760, %v11410_v19 }
 0xa98   :  { %v11486_v60 = vsub.f32 %v11410_v19, %v11485_v17 }
 0xa9a   :  { %v11487_v37 = vand.u32 4294901760, %v11486_v60 }
 0xa9c   :  { %v11488_v57 = vsub.f32 %v11486_v60, %v11487_v37 }
 0xa9e   :  { %v11489_v6 = vand.u32 4294901760, %v11488_v57 }
 0xaa0   :  { %15134 = vmatmul.mubr.f32.vlgmr.msra.gmra.mrb[14].mxu1 %v11489_v6 }
 0xaa1   :  { %16973 = vmatpush3.bf16.msra.mxu1 %v16972_v12  ;;  %15152 = vmatprep.mubr.msk.f32.mxu1 %vm17384_vm10, %v23931_v15 }
 0xaa2   :  { %16974 = vmatprep.subr.bf16.mxu1 %v17383_v20 }
 0xaa5   :  { %16976 = vmatpush3.bf16.msra.mxu1 %v16975_v9 }
 0xaa6   :  { %16977 = vmatprep.subr.bf16.mxu1 %v17383_v20 }
 0xaa9   :  { %16979 = vmatpush3.bf16.msra.mxu1 %v16978_v4 }
 0xaaa   :  { %16980 = vmatprep.subr.bf16.mxu1 %v17383_v20 }
 0xaad   :  { %16982 = vmatpush3.bf16.msra.mxu1 %v16981_v26 }
 0xaae   :  { %16983 = vmatprep.subr.bf16.mxu1 %v17383_v20 }
 0xab0   :  { %15153 = vmatmul.mubr.f32.vlgmr.msra.gmra.mrb[14].mxu1 %v11485_v17 }
 0xab1   :  { %16985 = vmatpush3.bf16.msra.mxu1 %v16984_v7  ;;  %15171 = vmatprep.mubr.msk.f32.mxu1 %vm17384_vm10, %v23931_v15 }
 0xab2   :  { %16986 = vmatprep.subr.bf16.mxu1 %v17383_v20 }
 0xab5   :  { %16988 = vmatpush3.bf16.msra.mxu1 %v16987_v49 }
 0xab6   :  { %16989 = vmatprep.subr.bf16.mxu1 %v17383_v20 }
 0xab9   :  { %16991 = vmatpush3.bf16.msra.mxu1 %v16990_v40 }
 0xaba   :  { %16992 = vmatprep.subr.bf16.mxu1 %v17383_v20 }
 0xabd   :  { %16994 = vmatpush3.bf16.msra.mxu1 %v16993_v24 }
 0xabe   :  { %16995 = vmatprep.subr.bf16.mxu1 %v17383_v20 }
 0xac0   :  { %15172 = vmatmul.mubr.f32.vlgmr.msra.gmra.mrb[14].mxu1 %v11486_v60 }
 0xac1   :  { %16997 = vmatpush3.bf16.msra.mxu1 %v22591_v0  ;;  %15190 = vmatprep.mubr.msk.f32.mxu1 %vm17384_vm10, %v23931_v15 }
 0xac2   :  { %16998 = vmatprep.subr.bf16.mxu1 %v17383_v20 }
 0xac5   :  { %17000 = vmatpush3.bf16.msra.mxu1 %v22604_v51 }
 0xac6   :  { %17001 = vmatprep.subr.bf16.mxu1 %v17383_v20 }
 0xac9   :  { %17003 = vmatpush3.bf16.msra.mxu1 %v22616_v35 }
 0xaca   :  { %17004 = vmatprep.subr.bf16.mxu1 %v17383_v20 }
 0xacd   :  { %17006 = vmatpush3.bf16.msra.mxu1 %v22626_v34 }
 0xace   :  { %17007 = vmatprep.subr.bf16.mxu1 %v17383_v20 }
 0xad0   :  { %15191 = vmatmul.mubr.f32.vlgmr.msra.gmra.mrb[14].mxu1 %v11487_v37 }
 0xad1   :  { %17009 = vmatpush3.bf16.msra.mxu1 %v17008_v48  ;;  %15209 = vmatprep.mubr.msk.f32.mxu1 %vm17384_vm10, %v23931_v15 }
 0xad2   :  { %17010 = vmatprep.subr.bf16.mxu1 %v17383_v20 }
 0xad5   :  { %17012 = vmatpush3.bf16.msra.mxu1 %v17011_v45 }
 0xad6   :  { %17013 = vmatprep.subr.bf16.mxu1 %v17383_v20 }
 0xad9   :  { %17015 = vmatpush3.bf16.msra.mxu1 %v17014_v28 }
 0xada   :  { %17016 = vmatprep.subr.bf16.mxu1 %v17383_v20 }
 0xadd   :  { %17018 = vmatpush3.bf16.msra.mxu1 %v17017_v25 }
 0xade   :  { %17019 = vmatprep.subr.bf16.mxu1 %v17383_v20 }
 0xae0   :  { %15210 = vmatmul.mubr.f32.vlgmr.msra.gmra.mrb[14].mxu1 %v11485_v17 }
 0xae1   :  { %17021 = vmatpush3.bf16.msra.mxu1 %v22591_v0  ;;  %15228 = vmatprep.mubr.msk.f32.mxu1 %vm17384_vm10, %v23931_v15 }
 0xae2   :  { %17022 = vmatprep.subr.bf16.mxu1 %v17383_v20 }
 0xae5   :  { %17024 = vmatpush3.bf16.msra.mxu1 %v22604_v51 }
 0xae6   :  { %17025 = vmatprep.subr.bf16.mxu1 %v17383_v20 }
 0xae9   :  { %17027 = vmatpush3.bf16.msra.mxu1 %v22616_v35 }
 0xaea   :  { %17028 = vmatprep.subr.bf16.mxu1 %v17383_v20 }
 0xaed   :  { %17030 = vmatpush3.bf16.msra.mxu1 %v22626_v34 }
 0xaf0   :  { %15229 = vmatmul.mubr.f32.vlgmr.msra.gmra.mrb[14].mxu1 %v11485_v17 }
 0xbc3   :  { %v11945_v15 = vpop.f32.mrb[14].mxu1 }
 0xbc4   :  { %v17031_v0 = vadd.f32 %v12032_v59, %v11945_v15  ;;  %v15230_v55 = vpop.f32.mrb[15].mxu1 }
 0xbc6   :  { %11950 = vst.msk [vmem:[#allocation2] sm:$0x3] %vm11949_vm11, %v17031_v0 }
 0xbc7   :  { %17362 = shalt.err (!%p17359_p4)
}
 0xbc8   :  { %s17363_s18 = scalar_lea.hbm %s22713_s9, 32 }
 0xbc9   :  { %p17364_p5 = scmp.ne.s32.totalorder %s22713_s9, %s17363_s18  ;;  %p17367_p6 = scmp.lt.u32.totalorder %s17363_s18, %s22713_s9 }
 0xbcb   :  { %p17369_p7 = pnand %p17367_p6, %p17364_p5 }
 0xbcd   :  { %17372 = shalt.err (!%p17369_p7)
}
 0xbce   :  { %11960 = dma.vmem_to_hbm [thread:$0]  %s11958_s15, 32, %s22713_s9, [#allocation3]  }
 0xbcf   :  { %17373 = dma.done.wait [#allocation3], 32  }
 0xbd0   :  { %17374 = vsyncadd [#allocation3], 4294967264 }
 0xbd1   :  { %11964 = vsyncpa [#allocation3], 1 }

</bundles_post_ra>
